<compile_context>
chip_gen: v5e
topology: v5e:2x2
jax: 0.10.0
libtpu: 0.0.40
codegen_flags: <defaults>
</compile_context>

<pallas_src>
import functools

import jax
import jax.numpy as jnp
from jax import lax
from jax.experimental import pallas as pl
from jax.experimental.pallas import tpu as pltpu


def _round_up(x, m):
    return (x + m - 1) // m * m


# ----------------------------------------------------------------------------
# Fused Pallas kernel (grid = one step per batch element, "parallel")
# ----------------------------------------------------------------------------
def _decoder_block_kernel(*refs, H, Wp, Nflat, Cout, has_skip):
    # Layouts (all channel-major, flat padded spatial on the lane axis):
    #   xf_ref : (Cx, Nflat)  bf16   zero-padded upsampled x
    #   sf_ref : (Cs, Nflat)  bf16   zero-padded skip           (only if has_skip)
    #   mask   : (1, H*Wp)    f32    1.0 on real columns, 0.0 on Wp-W junk columns
    #   w1x/w1s: (9, Cout, C) bf16   per-tap conv1 weights (BN scale folded)
    #   w2     : (9, Cout, Cout) bf16
    #   b1/b2  : (Cout, 1)    f32    folded-BN biases
    #   o_ref  : (Cout, H*Wp) f32    NCHW-flat output (junk columns stripped later)
    #   mid    : (Cout, Nflat) bf16  conv1 output re-padded as conv2's input
    if has_skip:
        (xf_ref, sf_ref, mask_ref, w1x_ref, w1s_ref, b1_ref,
         w2_ref, b2_ref, o_ref, mid_ref) = refs
    else:
        (xf_ref, mask_ref, w1x_ref, b1_ref,
         w2_ref, b2_ref, o_ref, mid_ref) = refs
        sf_ref = w1s_ref = None

    Nout = H * Wp
    taps = [(kh, kw) for kh in range(3) for kw in range(3)]

    # ---- conv1: 9 per-tap MXU matmuls; the tap offset is a lane-axis shift ----
    acc1 = jnp.zeros((Cout, Nout), jnp.float32)
    for t, (kh, kw) in enumerate(taps):
        off = kh * Wp + kw
        acc1 = acc1 + jnp.dot(w1x_ref[t], xf_ref[:, off:off + Nout],
                              preferred_element_type=jnp.float32)
        if has_skip:
            acc1 = acc1 + jnp.dot(w1s_ref[t], sf_ref[:, off:off + Nout],
                                  preferred_element_type=jnp.float32)
    # bias + ReLU; zero the junk pad columns so they double as conv2's padding.
    y1 = jnp.maximum(acc1 + b1_ref[...], 0.0) * mask_ref[...]

    # ---- re-pad conv1's output in VMEM: zero ONLY the border of `mid` ---------
    # (the interior [Wp+1 : Wp+1+Nout] is fully overwritten right below)
    mid_ref[:, :Wp + 1] = jnp.zeros((Cout, Wp + 1), jnp.bfloat16)
    mid_ref[:, Wp + 1 + Nout:] = jnp.zeros((Cout, Nflat - Nout - Wp - 1),
                                           jnp.bfloat16)
    mid_ref[:, Wp + 1:Wp + 1 + Nout] = y1.astype(jnp.bfloat16)

    # ---- conv2: 9 per-tap matmuls, K = Cout (not 128-padded) ------------------
    acc2 = jnp.zeros((Cout, Nout), jnp.float32)
    for t, (kh, kw) in enumerate(taps):
        off = kh * Wp + kw
        acc2 = acc2 + jnp.dot(w2_ref[t], mid_ref[:, off:off + Nout],
                              preferred_element_type=jnp.float32)
    y2 = jnp.maximum(acc2 + b2_ref[...], 0.0)
    o_ref[...] = y2.astype(o_ref.dtype)       # lane-dense (Cout, H*Wp) store


def _decoder_block_pallas(xf, sf, mask, w1x, w1s, b1, w2, b2,
                          *, H, Wp, Nflat, Cout):
    B = xf.shape[0]
    Nout = H * Wp
    has_skip = sf is not None
    kernel = functools.partial(_decoder_block_kernel, H=H, Wp=Wp,
                               Nflat=Nflat, Cout=Cout, has_skip=has_skip)

    in_specs = [pl.BlockSpec((None, xf.shape[1], Nflat), lambda b: (b, 0, 0))]
    args = [xf]
    if has_skip:
        in_specs.append(pl.BlockSpec((None, sf.shape[1], Nflat),
                                     lambda b: (b, 0, 0)))
        args.append(sf)
    in_specs.append(pl.BlockSpec((1, Nout), lambda b: (0, 0)))
    args.append(mask)
    in_specs.append(pl.BlockSpec(w1x.shape, lambda b: (0, 0, 0)))
    args.append(w1x)
    if has_skip:
        in_specs.append(pl.BlockSpec(w1s.shape, lambda b: (0, 0, 0)))
        args.append(w1s)
    in_specs += [
        pl.BlockSpec((Cout, 1), lambda b: (0, 0)),
        pl.BlockSpec(w2.shape, lambda b: (0, 0, 0)),
        pl.BlockSpec((Cout, 1), lambda b: (0, 0)),
    ]
    args += [b1, w2, b2]

    return pl.pallas_call(
        kernel,
        out_shape=jax.ShapeDtypeStruct((B, Cout, Nout), jnp.float32),
        grid=(B,),
        in_specs=in_specs,
        out_specs=pl.BlockSpec((None, Cout, Nout), lambda b: (b, 0, 0)),
        scratch_shapes=[pltpu.VMEM((Cout, Nflat), jnp.bfloat16)],
        compiler_params=pltpu.CompilerParams(
            dimension_semantics=("parallel",),     # batch across TCs (v7x megacore)
            vmem_limit_bytes=32 * 1024 * 1024,     # actual use is ~2 MiB per step
        ),
    )(*args)


# ----------------------------------------------------------------------------
# Parameter construction (BN folded in inference mode, per-tap weight layout)
# ----------------------------------------------------------------------------
def _make_conv_bn(key, cin, cout, eps=1e-5):
    k_w, k_g, k_b, k_m, k_v = jax.random.split(key, 5)
    w = jax.random.normal(k_w, (cout, cin, 3, 3), jnp.float32) * jnp.sqrt(
        2.0 / (9 * cin))
    gamma = 1.0 + 0.1 * jax.random.normal(k_g, (cout,), jnp.float32)
    beta = 0.1 * jax.random.normal(k_b, (cout,), jnp.float32)
    mean = 0.1 * jax.random.normal(k_m, (cout,), jnp.float32)
    var = 1.0 + 0.1 * jax.random.uniform(k_v, (cout,), jnp.float32)
    scale = gamma / jnp.sqrt(var + eps)
    w_folded = w * scale[:, None, None, None]      # BN scale folded into weights
    bias = beta - mean * scale
    return w_folded, bias


def init_decoder_block_params(key, in_channels, skip_channels, out_channels,
                              upscale=True):
    k1, k2 = jax.random.split(key)
    w1, b1 = _make_conv_bn(k1, in_channels + skip_channels, out_channels)
    w2, b2 = _make_conv_bn(k2, out_channels, out_channels)

    def to_taps(w_oihw):   # (Co, Ci, 3, 3) -> (9, Co, Ci) bf16, tap-major
        co, ci = w_oihw.shape[0], w_oihw.shape[1]
        return jnp.transpose(w_oihw, (2, 3, 0, 1)).reshape(9, co, ci).astype(
            jnp.bfloat16)

    params = {
        "w1x": to_taps(w1[:, :in_channels]),
        "b1": b1.reshape(out_channels, 1),
        "w2": to_taps(w2),
        "b2": b2.reshape(out_channels, 1),
        "in_channels": in_channels, "skip_channels": skip_channels,
        "out_channels": out_channels, "upscale": upscale,
        # reference-layout weights (same folded values, same bf16 rounding)
        "ref_w1": w1.astype(jnp.bfloat16), "ref_b1": b1,
        "ref_w2": w2.astype(jnp.bfloat16), "ref_b2": b2,
    }
    if skip_channels > 0:
        params["w1s"] = to_taps(w1[:, in_channels:])
    return params


# ----------------------------------------------------------------------------
# DecoderBlock.forward (Pallas-backed).  NCHW in / NCHW out, like PyTorch.
# ----------------------------------------------------------------------------
def decoder_block_forward(params, x_nchw, skip_nchw=None, upscale=True):
    assert (skip_nchw is None) == (params["skip_channels"] == 0)
    Cout = params["out_channels"]
    x = x_nchw
    if params["upscale"] and upscale:
        # TODO(synk): use_pixel_shuffle=True (PixelShuffle_ICNR) path not implemented.
        # TODO(synk): fold this nearest-2x upsample into the kernel (index h//2, w//2)
        # to remove the HBM round trip of the upsampled activation.
        x = jnp.repeat(jnp.repeat(x, 2, axis=2), 2, axis=3)   # F.interpolate nearest
    B, _, H, W = x.shape

    Wp = _round_up(W + 2, 4)                  # padded row width (H*Wp lane-dense)
    Npix = (H + 2) * Wp
    Nflat = _round_up(Npix + 2, 128)          # + tail so all 9 tap slices stay in-bounds
    Nout = H * Wp

    def to_flat(a):                           # NCHW -> (B, C, Nflat) bf16, zero-padded
        a = jnp.pad(a, ((0, 0), (0, 0), (1, 1), (1, Wp - W - 1)))
        a = a.reshape(a.shape[0], a.shape[1], Npix)
        a = jnp.pad(a, ((0, 0), (0, 0), (0, Nflat - Npix)))
        return a.astype(jnp.bfloat16)

    xf = to_flat(x)
    sf = None
    if skip_nchw is not None:
        # attention1 = Identity (attention_type=None); channel concat is folded
        # into the kernel via the two conv1 weight groups.
        sf = to_flat(skip_nchw)

    # 1.0 on real output columns, 0.0 on the Wp-W junk pad columns of each row.
    mask = (jnp.arange(Nout) % Wp < W).astype(jnp.float32)[None, :]

    out_flat = _decoder_block_pallas(
        xf, sf, mask, params["w1x"], params.get("w1s"),
        params["b1"], params["w2"], params["b2"],
        H=H, Wp=Wp, Nflat=Nflat, Cout=Cout)

    # attention2 = Identity.  Output is already NCHW; just drop the pad columns.
    return out_flat.reshape(B, Cout, H, Wp)[:, :, :, :W]


# ----------------------------------------------------------------------------
# Pure-JAX reference mirroring the kernel numerics
# (BN folded, bf16 operands, f32 accumulation, bf16 intermediate)
# ----------------------------------------------------------------------------
def _ref_conv_bn_relu(x_nchw, w_oihw_bf16, bias):
    y = lax.conv_general_dilated(
        x_nchw.astype(jnp.bfloat16), w_oihw_bf16,
        window_strides=(1, 1), padding=((1, 1), (1, 1)),
        dimension_numbers=("NCHW", "OIHW", "NCHW"),
        preferred_element_type=jnp.float32)
    return jnp.maximum(y + bias.reshape(1, -1, 1, 1), 0.0)


def decoder_block_reference(params, x_nchw, skip_nchw=None, upscale=True):
    x = x_nchw
    if params["upscale"] and upscale:
        x = jnp.repeat(jnp.repeat(x, 2, axis=2), 2, axis=3)
    if skip_nchw is not None:
        x = jnp.concatenate([x, skip_nchw], axis=1)
    y1 = _ref_conv_bn_relu(x, params["ref_w1"], params["ref_b1"])
    y1 = y1.astype(jnp.bfloat16)              # kernel keeps the intermediate in bf16
    y2 = _ref_conv_bn_relu(y1, params["ref_w2"], params["ref_b2"])
    return y2


# ----------------------------------------------------------------------------
if __name__ == "__main__":
    key = jax.random.PRNGKey(0)
    kx, ks, kp = jax.random.split(key, 3)

    B = 2
    in_channels, skip_channels, out_channels = 32, 16, 32
    h = w = 16                                       # pre-upsample spatial size

    x = jax.random.normal(kx, (B, in_channels, h, w), jnp.float32)
    skip = jax.random.normal(ks, (B, skip_channels, 2 * h, 2 * w), jnp.float32)
    params = init_decoder_block_params(kp, in_channels, skip_channels, out_channels)

    fwd = jax.jit(lambda xx, ss: decoder_block_forward(params, xx, ss))
    out = jax.block_until_ready(fwd(x, skip))

    ref = jax.block_until_ready(decoder_block_reference(params, x, skip))

    assert out.shape == (B, out_channels, 2 * h, 2 * w), out.shape
    max_err = float(jnp.max(jnp.abs(out - ref)))
    assert max_err < 2e-2, max_err
    print("KERNEL_OK")
</pallas_src>

<mosaic_0001>
module attributes {stable_mosaic.version = 11 : i64} {
  func.func @_decoder_block_kernel(%arg0: i32, %arg1: memref<1x32x1280xbf16, #tpu.memory_space<vmem>>, %arg2: memref<1x16x1280xbf16, #tpu.memory_space<vmem>>, %arg3: memref<1x1152xf32, #tpu.memory_space<vmem>>, %arg4: memref<9x32x32xbf16, #tpu.memory_space<vmem>>, %arg5: memref<9x32x16xbf16, #tpu.memory_space<vmem>>, %arg6: memref<32x1xf32, #tpu.memory_space<vmem>>, %arg7: memref<9x32x32xbf16, #tpu.memory_space<vmem>>, %arg8: memref<32x1xf32, #tpu.memory_space<vmem>>, %arg9: memref<1x32x1152xf32, #tpu.memory_space<vmem>>, %arg10: memref<32x1280xbf16, #tpu.memory_space<vmem>>) attributes {dimension_semantics = [#tpu.dimension_semantics<parallel>], iteration_bounds = array<i64: 2>, scalar_prefetch = 0 : i64, scratch_operands = 1 : i64, tpu.core_type = #tpu.core_type<tc>, window_params = [{transform_indices = @transform_0, window_bounds = array<i64: 1, 32, 1280>}, {transform_indices = @transform_1, window_bounds = array<i64: 1, 16, 1280>}, {pipeline_mode = #tpu.pipeline_mode<synchronous>, transform_indices = @transform_2, window_bounds = array<i64: 1, 1152>}, {pipeline_mode = #tpu.pipeline_mode<synchronous>, transform_indices = @transform_3, window_bounds = array<i64: 9, 32, 32>}, {pipeline_mode = #tpu.pipeline_mode<synchronous>, transform_indices = @transform_4, window_bounds = array<i64: 9, 32, 16>}, {pipeline_mode = #tpu.pipeline_mode<synchronous>, transform_indices = @transform_5, window_bounds = array<i64: 32, 1>}, {pipeline_mode = #tpu.pipeline_mode<synchronous>, transform_indices = @transform_6, window_bounds = array<i64: 9, 32, 32>}, {pipeline_mode = #tpu.pipeline_mode<synchronous>, transform_indices = @transform_7, window_bounds = array<i64: 32, 1>}, {transform_indices = @transform_8, window_bounds = array<i64: 1, 32, 1152>}]} {
    %cst = arith.constant 0.000000e+00 : f32
    %0 = vector.broadcast %cst : f32 to vector<32x1152xf32>
    %c0 = arith.constant 0 : index
    %c0_0 = arith.constant 0 : index
    %c0_1 = arith.constant 0 : index
    %1 = vector.load %arg4[%c0, %c0_0, %c0_1] : memref<9x32x32xbf16, #tpu.memory_space<vmem>>, vector<1x32x32xbf16>
    %2 = vector.shape_cast %1 : vector<1x32x32xbf16> to vector<32x32xbf16>
    %c0_2 = arith.constant 0 : index
    %c0_3 = arith.constant 0 : index
    %c0_4 = arith.constant 0 : index
    %3 = vector.load %arg1[%c0_2, %c0_3, %c0_4] : memref<1x32x1280xbf16, #tpu.memory_space<vmem>>, vector<1x32x1152xbf16>
    %4 = vector.shape_cast %3 : vector<1x32x1152xbf16> to vector<32x1152xbf16>
    %cst_5 = arith.constant dense<0.000000e+00> : vector<32x1152xf32>
    %5 = tpu.matmul %2, %4, %cst_5 {dimension_numbers = #tpu.dot_dimension_numbers<[1], [0], [0], [1], [0, 0, 1, 1], [], []>} : vector<32x32xbf16>, vector<32x1152xbf16>, vector<32x1152xf32> -> vector<32x1152xf32>
    %6 = arith.addf %0, %5 : vector<32x1152xf32>
    %c0_6 = arith.constant 0 : index
    %c0_7 = arith.constant 0 : index
    %c0_8 = arith.constant 0 : index
    %7 = vector.load %arg5[%c0_6, %c0_7, %c0_8] : memref<9x32x16xbf16, #tpu.memory_space<vmem>>, vector<1x32x16xbf16>
    %8 = vector.shape_cast %7 : vector<1x32x16xbf16> to vector<32x16xbf16>
    %c0_9 = arith.constant 0 : index
    %c0_10 = arith.constant 0 : index
    %c0_11 = arith.constant 0 : index
    %9 = vector.load %arg2[%c0_9, %c0_10, %c0_11] : memref<1x16x1280xbf16, #tpu.memory_space<vmem>>, vector<1x16x1152xbf16>
    %10 = vector.shape_cast %9 : vector<1x16x1152xbf16> to vector<16x1152xbf16>
    %cst_12 = arith.constant dense<0.000000e+00> : vector<32x1152xf32>
    %11 = tpu.matmul %8, %10, %cst_12 {dimension_numbers = #tpu.dot_dimension_numbers<[1], [0], [0], [1], [0, 0, 1, 1], [], []>} : vector<32x16xbf16>, vector<16x1152xbf16>, vector<32x1152xf32> -> vector<32x1152xf32>
    %12 = arith.addf %6, %11 : vector<32x1152xf32>
    %c1 = arith.constant 1 : index
    %c0_13 = arith.constant 0 : index
    %c0_14 = arith.constant 0 : index
    %13 = vector.load %arg4[%c1, %c0_13, %c0_14] : memref<9x32x32xbf16, #tpu.memory_space<vmem>>, vector<1x32x32xbf16>
    %14 = vector.shape_cast %13 : vector<1x32x32xbf16> to vector<32x32xbf16>
    %c0_15 = arith.constant 0 : index
    %c0_16 = arith.constant 0 : index
    %c1_17 = arith.constant 1 : index
    %15 = vector.load %arg1[%c0_15, %c0_16, %c1_17] : memref<1x32x1280xbf16, #tpu.memory_space<vmem>>, vector<1x32x1152xbf16>
    %16 = vector.shape_cast %15 : vector<1x32x1152xbf16> to vector<32x1152xbf16>
    %cst_18 = arith.constant dense<0.000000e+00> : vector<32x1152xf32>
    %17 = tpu.matmul %14, %16, %cst_18 {dimension_numbers = #tpu.dot_dimension_numbers<[1], [0], [0], [1], [0, 0, 1, 1], [], []>} : vector<32x32xbf16>, vector<32x1152xbf16>, vector<32x1152xf32> -> vector<32x1152xf32>
    %18 = arith.addf %12, %17 : vector<32x1152xf32>
    %c1_19 = arith.constant 1 : index
    %c0_20 = arith.constant 0 : index
    %c0_21 = arith.constant 0 : index
    %19 = vector.load %arg5[%c1_19, %c0_20, %c0_21] : memref<9x32x16xbf16, #tpu.memory_space<vmem>>, vector<1x32x16xbf16>
    %20 = vector.shape_cast %19 : vector<1x32x16xbf16> to vector<32x16xbf16>
    %c0_22 = arith.constant 0 : index
    %c0_23 = arith.constant 0 : index
    %c1_24 = arith.constant 1 : index
    %21 = vector.load %arg2[%c0_22, %c0_23, %c1_24] : memref<1x16x1280xbf16, #tpu.memory_space<vmem>>, vector<1x16x1152xbf16>
    %22 = vector.shape_cast %21 : vector<1x16x1152xbf16> to vector<16x1152xbf16>
    %cst_25 = arith.constant dense<0.000000e+00> : vector<32x1152xf32>
    %23 = tpu.matmul %20, %22, %cst_25 {dimension_numbers = #tpu.dot_dimension_numbers<[1], [0], [0], [1], [0, 0, 1, 1], [], []>} : vector<32x16xbf16>, vector<16x1152xbf16>, vector<32x1152xf32> -> vector<32x1152xf32>
    %24 = arith.addf %18, %23 : vector<32x1152xf32>
    %c2 = arith.constant 2 : index
    %c0_26 = arith.constant 0 : index
    %c0_27 = arith.constant 0 : index
    %25 = vector.load %arg4[%c2, %c0_26, %c0_27] : memref<9x32x32xbf16, #tpu.memory_space<vmem>>, vector<1x32x32xbf16>
    %26 = vector.shape_cast %25 : vector<1x32x32xbf16> to vector<32x32xbf16>
    %c0_28 = arith.constant 0 : index
    %c0_29 = arith.constant 0 : index
    %c2_30 = arith.constant 2 : index
    %27 = vector.load %arg1[%c0_28, %c0_29, %c2_30] : memref<1x32x1280xbf16, #tpu.memory_space<vmem>>, vector<1x32x1152xbf16>
    %28 = vector.shape_cast %27 : vector<1x32x1152xbf16> to vector<32x1152xbf16>
    %cst_31 = arith.constant dense<0.000000e+00> : vector<32x1152xf32>
    %29 = tpu.matmul %26, %28, %cst_31 {dimension_numbers = #tpu.dot_dimension_numbers<[1], [0], [0], [1], [0, 0, 1, 1], [], []>} : vector<32x32xbf16>, vector<32x1152xbf16>, vector<32x1152xf32> -> vector<32x1152xf32>
    %30 = arith.addf %24, %29 : vector<32x1152xf32>
    %c2_32 = arith.constant 2 : index
    %c0_33 = arith.constant 0 : index
    %c0_34 = arith.constant 0 : index
    %31 = vector.load %arg5[%c2_32, %c0_33, %c0_34] : memref<9x32x16xbf16, #tpu.memory_space<vmem>>, vector<1x32x16xbf16>
    %32 = vector.shape_cast %31 : vector<1x32x16xbf16> to vector<32x16xbf16>
    %c0_35 = arith.constant 0 : index
    %c0_36 = arith.constant 0 : index
    %c2_37 = arith.constant 2 : index
    %33 = vector.load %arg2[%c0_35, %c0_36, %c2_37] : memref<1x16x1280xbf16, #tpu.memory_space<vmem>>, vector<1x16x1152xbf16>
    %34 = vector.shape_cast %33 : vector<1x16x1152xbf16> to vector<16x1152xbf16>
    %cst_38 = arith.constant dense<0.000000e+00> : vector<32x1152xf32>
    %35 = tpu.matmul %32, %34, %cst_38 {dimension_numbers = #tpu.dot_dimension_numbers<[1], [0], [0], [1], [0, 0, 1, 1], [], []>} : vector<32x16xbf16>, vector<16x1152xbf16>, vector<32x1152xf32> -> vector<32x1152xf32>
    %36 = arith.addf %30, %35 : vector<32x1152xf32>
    %c3 = arith.constant 3 : index
    %c0_39 = arith.constant 0 : index
    %c0_40 = arith.constant 0 : index
    %37 = vector.load %arg4[%c3, %c0_39, %c0_40] : memref<9x32x32xbf16, #tpu.memory_space<vmem>>, vector<1x32x32xbf16>
    %38 = vector.shape_cast %37 : vector<1x32x32xbf16> to vector<32x32xbf16>
    %c0_41 = arith.constant 0 : index
    %c0_42 = arith.constant 0 : index
    %c36 = arith.constant 36 : index
    %39 = vector.load %arg1[%c0_41, %c0_42, %c36] : memref<1x32x1280xbf16, #tpu.memory_space<vmem>>, vector<1x32x1152xbf16>
    %40 = vector.shape_cast %39 : vector<1x32x1152xbf16> to vector<32x1152xbf16>
    %cst_43 = arith.constant dense<0.000000e+00> : vector<32x1152xf32>
    %41 = tpu.matmul %38, %40, %cst_43 {dimension_numbers = #tpu.dot_dimension_numbers<[1], [0], [0], [1], [0, 0, 1, 1], [], []>} : vector<32x32xbf16>, vector<32x1152xbf16>, vector<32x1152xf32> -> vector<32x1152xf32>
    %42 = arith.addf %36, %41 : vector<32x1152xf32>
    %c3_44 = arith.constant 3 : index
    %c0_45 = arith.constant 0 : index
    %c0_46 = arith.constant 0 : index
    %43 = vector.load %arg5[%c3_44, %c0_45, %c0_46] : memref<9x32x16xbf16, #tpu.memory_space<vmem>>, vector<1x32x16xbf16>
    %44 = vector.shape_cast %43 : vector<1x32x16xbf16> to vector<32x16xbf16>
    %c0_47 = arith.constant 0 : index
    %c0_48 = arith.constant 0 : index
    %c36_49 = arith.constant 36 : index
    %45 = vector.load %arg2[%c0_47, %c0_48, %c36_49] : memref<1x16x1280xbf16, #tpu.memory_space<vmem>>, vector<1x16x1152xbf16>
    %46 = vector.shape_cast %45 : vector<1x16x1152xbf16> to vector<16x1152xbf16>
    %cst_50 = arith.constant dense<0.000000e+00> : vector<32x1152xf32>
    %47 = tpu.matmul %44, %46, %cst_50 {dimension_numbers = #tpu.dot_dimension_numbers<[1], [0], [0], [1], [0, 0, 1, 1], [], []>} : vector<32x16xbf16>, vector<16x1152xbf16>, vector<32x1152xf32> -> vector<32x1152xf32>
    %48 = arith.addf %42, %47 : vector<32x1152xf32>
    %c4 = arith.constant 4 : index
    %c0_51 = arith.constant 0 : index
    %c0_52 = arith.constant 0 : index
    %49 = vector.load %arg4[%c4, %c0_51, %c0_52] : memref<9x32x32xbf16, #tpu.memory_space<vmem>>, vector<1x32x32xbf16>
    %50 = vector.shape_cast %49 : vector<1x32x32xbf16> to vector<32x32xbf16>
    %c0_53 = arith.constant 0 : index
    %c0_54 = arith.constant 0 : index
    %c37 = arith.constant 37 : index
    %51 = vector.load %arg1[%c0_53, %c0_54, %c37] : memref<1x32x1280xbf16, #tpu.memory_space<vmem>>, vector<1x32x1152xbf16>
    %52 = vector.shape_cast %51 : vector<1x32x1152xbf16> to vector<32x1152xbf16>
    %cst_55 = arith.constant dense<0.000000e+00> : vector<32x1152xf32>
    %53 = tpu.matmul %50, %52, %cst_55 {dimension_numbers = #tpu.dot_dimension_numbers<[1], [0], [0], [1], [0, 0, 1, 1], [], []>} : vector<32x32xbf16>, vector<32x1152xbf16>, vector<32x1152xf32> -> vector<32x1152xf32>
    %54 = arith.addf %48, %53 : vector<32x1152xf32>
    %c4_56 = arith.constant 4 : index
    %c0_57 = arith.constant 0 : index
    %c0_58 = arith.constant 0 : index
    %55 = vector.load %arg5[%c4_56, %c0_57, %c0_58] : memref<9x32x16xbf16, #tpu.memory_space<vmem>>, vector<1x32x16xbf16>
    %56 = vector.shape_cast %55 : vector<1x32x16xbf16> to vector<32x16xbf16>
    %c0_59 = arith.constant 0 : index
    %c0_60 = arith.constant 0 : index
    %c37_61 = arith.constant 37 : index
    %57 = vector.load %arg2[%c0_59, %c0_60, %c37_61] : memref<1x16x1280xbf16, #tpu.memory_space<vmem>>, vector<1x16x1152xbf16>
    %58 = vector.shape_cast %57 : vector<1x16x1152xbf16> to vector<16x1152xbf16>
    %cst_62 = arith.constant dense<0.000000e+00> : vector<32x1152xf32>
    %59 = tpu.matmul %56, %58, %cst_62 {dimension_numbers = #tpu.dot_dimension_numbers<[1], [0], [0], [1], [0, 0, 1, 1], [], []>} : vector<32x16xbf16>, vector<16x1152xbf16>, vector<32x1152xf32> -> vector<32x1152xf32>
    %60 = arith.addf %54, %59 : vector<32x1152xf32>
    %c5 = arith.constant 5 : index
    %c0_63 = arith.constant 0 : index
    %c0_64 = arith.constant 0 : index
    %61 = vector.load %arg4[%c5, %c0_63, %c0_64] : memref<9x32x32xbf16, #tpu.memory_space<vmem>>, vector<1x32x32xbf16>
    %62 = vector.shape_cast %61 : vector<1x32x32xbf16> to vector<32x32xbf16>
    %c0_65 = arith.constant 0 : index
    %c0_66 = arith.constant 0 : index
    %c38 = arith.constant 38 : index
    %63 = vector.load %arg1[%c0_65, %c0_66, %c38] : memref<1x32x1280xbf16, #tpu.memory_space<vmem>>, vector<1x32x1152xbf16>
    %64 = vector.shape_cast %63 : vector<1x32x1152xbf16> to vector<32x1152xbf16>
    %cst_67 = arith.constant dense<0.000000e+00> : vector<32x1152xf32>
    %65 = tpu.matmul %62, %64, %cst_67 {dimension_numbers = #tpu.dot_dimension_numbers<[1], [0], [0], [1], [0, 0, 1, 1], [], []>} : vector<32x32xbf16>, vector<32x1152xbf16>, vector<32x1152xf32> -> vector<32x1152xf32>
    %66 = arith.addf %60, %65 : vector<32x1152xf32>
    %c5_68 = arith.constant 5 : index
    %c0_69 = arith.constant 0 : index
    %c0_70 = arith.constant 0 : index
    %67 = vector.load %arg5[%c5_68, %c0_69, %c0_70] : memref<9x32x16xbf16, #tpu.memory_space<vmem>>, vector<1x32x16xbf16>
    %68 = vector.shape_cast %67 : vector<1x32x16xbf16> to vector<32x16xbf16>
    %c0_71 = arith.constant 0 : index
    %c0_72 = arith.constant 0 : index
    %c38_73 = arith.constant 38 : index
    %69 = vector.load %arg2[%c0_71, %c0_72, %c38_73] : memref<1x16x1280xbf16, #tpu.memory_space<vmem>>, vector<1x16x1152xbf16>
    %70 = vector.shape_cast %69 : vector<1x16x1152xbf16> to vector<16x1152xbf16>
    %cst_74 = arith.constant dense<0.000000e+00> : vector<32x1152xf32>
    %71 = tpu.matmul %68, %70, %cst_74 {dimension_numbers = #tpu.dot_dimension_numbers<[1], [0], [0], [1], [0, 0, 1, 1], [], []>} : vector<32x16xbf16>, vector<16x1152xbf16>, vector<32x1152xf32> -> vector<32x1152xf32>
    %72 = arith.addf %66, %71 : vector<32x1152xf32>
    %c6 = arith.constant 6 : index
    %c0_75 = arith.constant 0 : index
    %c0_76 = arith.constant 0 : index
    %73 = vector.load %arg4[%c6, %c0_75, %c0_76] : memref<9x32x32xbf16, #tpu.memory_space<vmem>>, vector<1x32x32xbf16>
    %74 = vector.shape_cast %73 : vector<1x32x32xbf16> to vector<32x32xbf16>
    %c0_77 = arith.constant 0 : index
    %c0_78 = arith.constant 0 : index
    %c72 = arith.constant 72 : index
    %75 = vector.load %arg1[%c0_77, %c0_78, %c72] : memref<1x32x1280xbf16, #tpu.memory_space<vmem>>, vector<1x32x1152xbf16>
    %76 = vector.shape_cast %75 : vector<1x32x1152xbf16> to vector<32x1152xbf16>
    %cst_79 = arith.constant dense<0.000000e+00> : vector<32x1152xf32>
    %77 = tpu.matmul %74, %76, %cst_79 {dimension_numbers = #tpu.dot_dimension_numbers<[1], [0], [0], [1], [0, 0, 1, 1], [], []>} : vector<32x32xbf16>, vector<32x1152xbf16>, vector<32x1152xf32> -> vector<32x1152xf32>
    %78 = arith.addf %72, %77 : vector<32x1152xf32>
    %c6_80 = arith.constant 6 : index
    %c0_81 = arith.constant 0 : index
    %c0_82 = arith.constant 0 : index
    %79 = vector.load %arg5[%c6_80, %c0_81, %c0_82] : memref<9x32x16xbf16, #tpu.memory_space<vmem>>, vector<1x32x16xbf16>
    %80 = vector.shape_cast %79 : vector<1x32x16xbf16> to vector<32x16xbf16>
    %c0_83 = arith.constant 0 : index
    %c0_84 = arith.constant 0 : index
    %c72_85 = arith.constant 72 : index
    %81 = vector.load %arg2[%c0_83, %c0_84, %c72_85] : memref<1x16x1280xbf16, #tpu.memory_space<vmem>>, vector<1x16x1152xbf16>
    %82 = vector.shape_cast %81 : vector<1x16x1152xbf16> to vector<16x1152xbf16>
    %cst_86 = arith.constant dense<0.000000e+00> : vector<32x1152xf32>
    %83 = tpu.matmul %80, %82, %cst_86 {dimension_numbers = #tpu.dot_dimension_numbers<[1], [0], [0], [1], [0, 0, 1, 1], [], []>} : vector<32x16xbf16>, vector<16x1152xbf16>, vector<32x1152xf32> -> vector<32x1152xf32>
    %84 = arith.addf %78, %83 : vector<32x1152xf32>
    %c7 = arith.constant 7 : index
    %c0_87 = arith.constant 0 : index
    %c0_88 = arith.constant 0 : index
    %85 = vector.load %arg4[%c7, %c0_87, %c0_88] : memref<9x32x32xbf16, #tpu.memory_space<vmem>>, vector<1x32x32xbf16>
    %86 = vector.shape_cast %85 : vector<1x32x32xbf16> to vector<32x32xbf16>
    %c0_89 = arith.constant 0 : index
    %c0_90 = arith.constant 0 : index
    %c73 = arith.constant 73 : index
    %87 = vector.load %arg1[%c0_89, %c0_90, %c73] : memref<1x32x1280xbf16, #tpu.memory_space<vmem>>, vector<1x32x1152xbf16>
    %88 = vector.shape_cast %87 : vector<1x32x1152xbf16> to vector<32x1152xbf16>
    %cst_91 = arith.constant dense<0.000000e+00> : vector<32x1152xf32>
    %89 = tpu.matmul %86, %88, %cst_91 {dimension_numbers = #tpu.dot_dimension_numbers<[1], [0], [0], [1], [0, 0, 1, 1], [], []>} : vector<32x32xbf16>, vector<32x1152xbf16>, vector<32x1152xf32> -> vector<32x1152xf32>
    %90 = arith.addf %84, %89 : vector<32x1152xf32>
    %c7_92 = arith.constant 7 : index
    %c0_93 = arith.constant 0 : index
    %c0_94 = arith.constant 0 : index
    %91 = vector.load %arg5[%c7_92, %c0_93, %c0_94] : memref<9x32x16xbf16, #tpu.memory_space<vmem>>, vector<1x32x16xbf16>
    %92 = vector.shape_cast %91 : vector<1x32x16xbf16> to vector<32x16xbf16>
    %c0_95 = arith.constant 0 : index
    %c0_96 = arith.constant 0 : index
    %c73_97 = arith.constant 73 : index
    %93 = vector.load %arg2[%c0_95, %c0_96, %c73_97] : memref<1x16x1280xbf16, #tpu.memory_space<vmem>>, vector<1x16x1152xbf16>
    %94 = vector.shape_cast %93 : vector<1x16x1152xbf16> to vector<16x1152xbf16>
    %cst_98 = arith.constant dense<0.000000e+00> : vector<32x1152xf32>
    %95 = tpu.matmul %92, %94, %cst_98 {dimension_numbers = #tpu.dot_dimension_numbers<[1], [0], [0], [1], [0, 0, 1, 1], [], []>} : vector<32x16xbf16>, vector<16x1152xbf16>, vector<32x1152xf32> -> vector<32x1152xf32>
    %96 = arith.addf %90, %95 : vector<32x1152xf32>
    %c8 = arith.constant 8 : index
    %c0_99 = arith.constant 0 : index
    %c0_100 = arith.constant 0 : index
    %97 = vector.load %arg4[%c8, %c0_99, %c0_100] : memref<9x32x32xbf16, #tpu.memory_space<vmem>>, vector<1x32x32xbf16>
    %98 = vector.shape_cast %97 : vector<1x32x32xbf16> to vector<32x32xbf16>
    %c0_101 = arith.constant 0 : index
    %c0_102 = arith.constant 0 : index
    %c74 = arith.constant 74 : index
    %99 = vector.load %arg1[%c0_101, %c0_102, %c74] : memref<1x32x1280xbf16, #tpu.memory_space<vmem>>, vector<1x32x1152xbf16>
    %100 = vector.shape_cast %99 : vector<1x32x1152xbf16> to vector<32x1152xbf16>
    %cst_103 = arith.constant dense<0.000000e+00> : vector<32x1152xf32>
    %101 = tpu.matmul %98, %100, %cst_103 {dimension_numbers = #tpu.dot_dimension_numbers<[1], [0], [0], [1], [0, 0, 1, 1], [], []>} : vector<32x32xbf16>, vector<32x1152xbf16>, vector<32x1152xf32> -> vector<32x1152xf32>
    %102 = arith.addf %96, %101 : vector<32x1152xf32>
    %c8_104 = arith.constant 8 : index
    %c0_105 = arith.constant 0 : index
    %c0_106 = arith.constant 0 : index
    %103 = vector.load %arg5[%c8_104, %c0_105, %c0_106] : memref<9x32x16xbf16, #tpu.memory_space<vmem>>, vector<1x32x16xbf16>
    %104 = vector.shape_cast %103 : vector<1x32x16xbf16> to vector<32x16xbf16>
    %c0_107 = arith.constant 0 : index
    %c0_108 = arith.constant 0 : index
    %c74_109 = arith.constant 74 : index
    %105 = vector.load %arg2[%c0_107, %c0_108, %c74_109] : memref<1x16x1280xbf16, #tpu.memory_space<vmem>>, vector<1x16x1152xbf16>
    %106 = vector.shape_cast %105 : vector<1x16x1152xbf16> to vector<16x1152xbf16>
    %cst_110 = arith.constant dense<0.000000e+00> : vector<32x1152xf32>
    %107 = tpu.matmul %104, %106, %cst_110 {dimension_numbers = #tpu.dot_dimension_numbers<[1], [0], [0], [1], [0, 0, 1, 1], [], []>} : vector<32x16xbf16>, vector<16x1152xbf16>, vector<32x1152xf32> -> vector<32x1152xf32>
    %108 = arith.addf %102, %107 : vector<32x1152xf32>
    %c0_111 = arith.constant 0 : index
    %c0_112 = arith.constant 0 : index
    %109 = vector.load %arg6[%c0_111, %c0_112] : memref<32x1xf32, #tpu.memory_space<vmem>>, vector<32x1xf32>
    %110 = vector.broadcast %109 : vector<32x1xf32> to vector<32x1152xf32>
    %111 = arith.addf %108, %110 : vector<32x1152xf32>
    %cst_113 = arith.constant 0.000000e+00 : f32
    %112 = vector.broadcast %cst_113 : f32 to vector<32x1152xf32>
    %113 = arith.maximumf %111, %112 : vector<32x1152xf32>
    %c0_114 = arith.constant 0 : index
    %c0_115 = arith.constant 0 : index
    %114 = vector.load %arg3[%c0_114, %c0_115] : memref<1x1152xf32, #tpu.memory_space<vmem>>, vector<1x1152xf32>
    %115 = vector.broadcast %114 : vector<1x1152xf32> to vector<32x1152xf32>
    %116 = arith.mulf %113, %115 : vector<32x1152xf32>
    %cst_116 = arith.constant 0.000000e+00 : bf16
    %117 = vector.broadcast %cst_116 : bf16 to vector<32x37xbf16>
    %c0_117 = arith.constant 0 : index
    %c0_118 = arith.constant 0 : index
    %118 = vector.load %arg10[%c0_117, %c0_118] : memref<32x1280xbf16, #tpu.memory_space<vmem>>, vector<32x37xbf16>
    tpu.vector_store %arg10[%c0_117, %c0_118], %117 {strides = array<i32>} : memref<32x1280xbf16, #tpu.memory_space<vmem>>, vector<32x37xbf16>,
    %cst_119 = arith.constant 0.000000e+00 : bf16
    %119 = vector.broadcast %cst_119 : bf16 to vector<32x91xbf16>
    %c0_120 = arith.constant 0 : index
    %c1189 = arith.constant 1189 : index
    %120 = vector.load %arg10[%c0_120, %c1189] : memref<32x1280xbf16, #tpu.memory_space<vmem>>, vector<32x91xbf16>
    tpu.vector_store %arg10[%c0_120, %c1189], %119 {strides = array<i32>} : memref<32x1280xbf16, #tpu.memory_space<vmem>>, vector<32x91xbf16>,
    %121 = arith.truncf %116 : vector<32x1152xf32> to vector<32x1152xbf16>
    %c0_121 = arith.constant 0 : index
    %c37_122 = arith.constant 37 : index
    %122 = vector.load %arg10[%c0_121, %c37_122] : memref<32x1280xbf16, #tpu.memory_space<vmem>>, vector<32x1152xbf16>
    tpu.vector_store %arg10[%c0_121, %c37_122], %121 {strides = array<i32>} : memref<32x1280xbf16, #tpu.memory_space<vmem>>, vector<32x1152xbf16>,
    %cst_123 = arith.constant 0.000000e+00 : f32
    %123 = vector.broadcast %cst_123 : f32 to vector<32x1152xf32>
    %c0_124 = arith.constant 0 : index
    %c0_125 = arith.constant 0 : index
    %c0_126 = arith.constant 0 : index
    %124 = vector.load %arg7[%c0_124, %c0_125, %c0_126] : memref<9x32x32xbf16, #tpu.memory_space<vmem>>, vector<1x32x32xbf16>
    %125 = vector.shape_cast %124 : vector<1x32x32xbf16> to vector<32x32xbf16>
    %c0_127 = arith.constant 0 : index
    %c0_128 = arith.constant 0 : index
    %126 = vector.load %arg10[%c0_127, %c0_128] : memref<32x1280xbf16, #tpu.memory_space<vmem>>, vector<32x1152xbf16>
    %cst_129 = arith.constant dense<0.000000e+00> : vector<32x1152xf32>
    %127 = tpu.matmul %125, %126, %cst_129 {dimension_numbers = #tpu.dot_dimension_numbers<[1], [0], [0], [1], [0, 0, 1, 1], [], []>} : vector<32x32xbf16>, vector<32x1152xbf16>, vector<32x1152xf32> -> vector<32x1152xf32>
    %128 = arith.addf %123, %127 : vector<32x1152xf32>
    %c1_130 = arith.constant 1 : index
    %c0_131 = arith.constant 0 : index
    %c0_132 = arith.constant 0 : index
    %129 = vector.load %arg7[%c1_130, %c0_131, %c0_132] : memref<9x32x32xbf16, #tpu.memory_space<vmem>>, vector<1x32x32xbf16>
    %130 = vector.shape_cast %129 : vector<1x32x32xbf16> to vector<32x32xbf16>
    %c0_133 = arith.constant 0 : index
    %c1_134 = arith.constant 1 : index
    %131 = vector.load %arg10[%c0_133, %c1_134] : memref<32x1280xbf16, #tpu.memory_space<vmem>>, vector<32x1152xbf16>
    %cst_135 = arith.constant dense<0.000000e+00> : vector<32x1152xf32>
    %132 = tpu.matmul %130, %131, %cst_135 {dimension_numbers = #tpu.dot_dimension_numbers<[1], [0], [0], [1], [0, 0, 1, 1], [], []>} : vector<32x32xbf16>, vector<32x1152xbf16>, vector<32x1152xf32> -> vector<32x1152xf32>
    %133 = arith.addf %128, %132 : vector<32x1152xf32>
    %c2_136 = arith.constant 2 : index
    %c0_137 = arith.constant 0 : index
    %c0_138 = arith.constant 0 : index
    %134 = vector.load %arg7[%c2_136, %c0_137, %c0_138] : memref<9x32x32xbf16, #tpu.memory_space<vmem>>, vector<1x32x32xbf16>
    %135 = vector.shape_cast %134 : vector<1x32x32xbf16> to vector<32x32xbf16>
    %c0_139 = arith.constant 0 : index
    %c2_140 = arith.constant 2 : index
    %136 = vector.load %arg10[%c0_139, %c2_140] : memref<32x1280xbf16, #tpu.memory_space<vmem>>, vector<32x1152xbf16>
    %cst_141 = arith.constant dense<0.000000e+00> : vector<32x1152xf32>
    %137 = tpu.matmul %135, %136, %cst_141 {dimension_numbers = #tpu.dot_dimension_numbers<[1], [0], [0], [1], [0, 0, 1, 1], [], []>} : vector<32x32xbf16>, vector<32x1152xbf16>, vector<32x1152xf32> -> vector<32x1152xf32>
    %138 = arith.addf %133, %137 : vector<32x1152xf32>
    %c3_142 = arith.constant 3 : index
    %c0_143 = arith.constant 0 : index
    %c0_144 = arith.constant 0 : index
    %139 = vector.load %arg7[%c3_142, %c0_143, %c0_144] : memref<9x32x32xbf16, #tpu.memory_space<vmem>>, vector<1x32x32xbf16>
    %140 = vector.shape_cast %139 : vector<1x32x32xbf16> to vector<32x32xbf16>
    %c0_145 = arith.constant 0 : index
    %c36_146 = arith.constant 36 : index
    %141 = vector.load %arg10[%c0_145, %c36_146] : memref<32x1280xbf16, #tpu.memory_space<vmem>>, vector<32x1152xbf16>
    %cst_147 = arith.constant dense<0.000000e+00> : vector<32x1152xf32>
    %142 = tpu.matmul %140, %141, %cst_147 {dimension_numbers = #tpu.dot_dimension_numbers<[1], [0], [0], [1], [0, 0, 1, 1], [], []>} : vector<32x32xbf16>, vector<32x1152xbf16>, vector<32x1152xf32> -> vector<32x1152xf32>
    %143 = arith.addf %138, %142 : vector<32x1152xf32>
    %c4_148 = arith.constant 4 : index
    %c0_149 = arith.constant 0 : index
    %c0_150 = arith.constant 0 : index
    %144 = vector.load %arg7[%c4_148, %c0_149, %c0_150] : memref<9x32x32xbf16, #tpu.memory_space<vmem>>, vector<1x32x32xbf16>
    %145 = vector.shape_cast %144 : vector<1x32x32xbf16> to vector<32x32xbf16>
    %c0_151 = arith.constant 0 : index
    %c37_152 = arith.constant 37 : index
    %146 = vector.load %arg10[%c0_151, %c37_152] : memref<32x1280xbf16, #tpu.memory_space<vmem>>, vector<32x1152xbf16>
    %cst_153 = arith.constant dense<0.000000e+00> : vector<32x1152xf32>
    %147 = tpu.matmul %145, %146, %cst_153 {dimension_numbers = #tpu.dot_dimension_numbers<[1], [0], [0], [1], [0, 0, 1, 1], [], []>} : vector<32x32xbf16>, vector<32x1152xbf16>, vector<32x1152xf32> -> vector<32x1152xf32>
    %148 = arith.addf %143, %147 : vector<32x1152xf32>
    %c5_154 = arith.constant 5 : index
    %c0_155 = arith.constant 0 : index
    %c0_156 = arith.constant 0 : index
    %149 = vector.load %arg7[%c5_154, %c0_155, %c0_156] : memref<9x32x32xbf16, #tpu.memory_space<vmem>>, vector<1x32x32xbf16>
    %150 = vector.shape_cast %149 : vector<1x32x32xbf16> to vector<32x32xbf16>
    %c0_157 = arith.constant 0 : index
    %c38_158 = arith.constant 38 : index
    %151 = vector.load %arg10[%c0_157, %c38_158] : memref<32x1280xbf16, #tpu.memory_space<vmem>>, vector<32x1152xbf16>
    %cst_159 = arith.constant dense<0.000000e+00> : vector<32x1152xf32>
    %152 = tpu.matmul %150, %151, %cst_159 {dimension_numbers = #tpu.dot_dimension_numbers<[1], [0], [0], [1], [0, 0, 1, 1], [], []>} : vector<32x32xbf16>, vector<32x1152xbf16>, vector<32x1152xf32> -> vector<32x1152xf32>
    %153 = arith.addf %148, %152 : vector<32x1152xf32>
    %c6_160 = arith.constant 6 : index
    %c0_161 = arith.constant 0 : index
    %c0_162 = arith.constant 0 : index
    %154 = vector.load %arg7[%c6_160, %c0_161, %c0_162] : memref<9x32x32xbf16, #tpu.memory_space<vmem>>, vector<1x32x32xbf16>
    %155 = vector.shape_cast %154 : vector<1x32x32xbf16> to vector<32x32xbf16>
    %c0_163 = arith.constant 0 : index
    %c72_164 = arith.constant 72 : index
    %156 = vector.load %arg10[%c0_163, %c72_164] : memref<32x1280xbf16, #tpu.memory_space<vmem>>, vector<32x1152xbf16>
    %cst_165 = arith.constant dense<0.000000e+00> : vector<32x1152xf32>
    %157 = tpu.matmul %155, %156, %cst_165 {dimension_numbers = #tpu.dot_dimension_numbers<[1], [0], [0], [1], [0, 0, 1, 1], [], []>} : vector<32x32xbf16>, vector<32x1152xbf16>, vector<32x1152xf32> -> vector<32x1152xf32>
    %158 = arith.addf %153, %157 : vector<32x1152xf32>
    %c7_166 = arith.constant 7 : index
    %c0_167 = arith.constant 0 : index
    %c0_168 = arith.constant 0 : index
    %159 = vector.load %arg7[%c7_166, %c0_167, %c0_168] : memref<9x32x32xbf16, #tpu.memory_space<vmem>>, vector<1x32x32xbf16>
    %160 = vector.shape_cast %159 : vector<1x32x32xbf16> to vector<32x32xbf16>
    %c0_169 = arith.constant 0 : index
    %c73_170 = arith.constant 73 : index
    %161 = vector.load %arg10[%c0_169, %c73_170] : memref<32x1280xbf16, #tpu.memory_space<vmem>>, vector<32x1152xbf16>
    %cst_171 = arith.constant dense<0.000000e+00> : vector<32x1152xf32>
    %162 = tpu.matmul %160, %161, %cst_171 {dimension_numbers = #tpu.dot_dimension_numbers<[1], [0], [0], [1], [0, 0, 1, 1], [], []>} : vector<32x32xbf16>, vector<32x1152xbf16>, vector<32x1152xf32> -> vector<32x1152xf32>
    %163 = arith.addf %158, %162 : vector<32x1152xf32>
    %c8_172 = arith.constant 8 : index
    %c0_173 = arith.constant 0 : index
    %c0_174 = arith.constant 0 : index
    %164 = vector.load %arg7[%c8_172, %c0_173, %c0_174] : memref<9x32x32xbf16, #tpu.memory_space<vmem>>, vector<1x32x32xbf16>
    %165 = vector.shape_cast %164 : vector<1x32x32xbf16> to vector<32x32xbf16>
    %c0_175 = arith.constant 0 : index
    %c74_176 = arith.constant 74 : index
    %166 = vector.load %arg10[%c0_175, %c74_176] : memref<32x1280xbf16, #tpu.memory_space<vmem>>, vector<32x1152xbf16>
    %cst_177 = arith.constant dense<0.000000e+00> : vector<32x1152xf32>
    %167 = tpu.matmul %165, %166, %cst_177 {dimension_numbers = #tpu.dot_dimension_numbers<[1], [0], [0], [1], [0, 0, 1, 1], [], []>} : vector<32x32xbf16>, vector<32x1152xbf16>, vector<32x1152xf32> -> vector<32x1152xf32>
    %168 = arith.addf %163, %167 : vector<32x1152xf32>
    %c0_178 = arith.constant 0 : index
    %c0_179 = arith.constant 0 : index
    %169 = vector.load %arg8[%c0_178, %c0_179] : memref<32x1xf32, #tpu.memory_space<vmem>>, vector<32x1xf32>
    %170 = vector.broadcast %169 : vector<32x1xf32> to vector<32x1152xf32>
    %171 = arith.addf %168, %170 : vector<32x1152xf32>
    %cst_180 = arith.constant 0.000000e+00 : f32
    %172 = vector.broadcast %cst_180 : f32 to vector<32x1152xf32>
    %173 = arith.maximumf %171, %172 : vector<32x1152xf32>
    %c0_181 = arith.constant 0 : index
    %c0_182 = arith.constant 0 : index
    %c0_183 = arith.constant 0 : index
    %174 = vector.load %arg9[%c0_181, %c0_182, %c0_183] : memref<1x32x1152xf32, #tpu.memory_space<vmem>>, vector<1x32x1152xf32>
    %175 = vector.shape_cast %174 : vector<1x32x1152xf32> to vector<32x1152xf32>
    %176 = vector.shape_cast %173 : vector<32x1152xf32> to vector<1x32x1152xf32>
    tpu.vector_store %arg9[%c0_181, %c0_182, %c0_183], %176 {strides = array<i32>} : memref<1x32x1152xf32, #tpu.memory_space<vmem>>, vector<1x32x1152xf32>,
    return
  }
  func.func @transform_0(%arg0: i32) -> (i32, i32, i32) {
    %c0_i32 = arith.constant 0 : i32
    %c0_i32_0 = arith.constant 0 : i32
    %c0_i32_1 = arith.constant 0 : i32
    return %arg0, %c0_i32, %c0_i32_0 : i32, i32, i32
  }
  func.func @transform_1(%arg0: i32) -> (i32, i32, i32) {
    %c0_i32 = arith.constant 0 : i32
    %c0_i32_0 = arith.constant 0 : i32
    %c0_i32_1 = arith.constant 0 : i32
    return %arg0, %c0_i32, %c0_i32_0 : i32, i32, i32
  }
  func.func @transform_2(%arg0: i32) -> (i32, i32) {
    %c0_i32 = arith.constant 0 : i32
    %c0_i32_0 = arith.constant 0 : i32
    %c0_i32_1 = arith.constant 0 : i32
    return %c0_i32, %c0_i32_0 : i32, i32
  }
  func.func @transform_3(%arg0: i32) -> (i32, i32, i32) {
    %c0_i32 = arith.constant 0 : i32
    %c0_i32_0 = arith.constant 0 : i32
    %c0_i32_1 = arith.constant 0 : i32
    %c0_i32_2 = arith.constant 0 : i32
    return %c0_i32, %c0_i32_0, %c0_i32_1 : i32, i32, i32
  }
  func.func @transform_4(%arg0: i32) -> (i32, i32, i32) {
    %c0_i32 = arith.constant 0 : i32
    %c0_i32_0 = arith.constant 0 : i32
    %c0_i32_1 = arith.constant 0 : i32
    %c0_i32_2 = arith.constant 0 : i32
    return %c0_i32, %c0_i32_0, %c0_i32_1 : i32, i32, i32
  }
  func.func @transform_5(%arg0: i32) -> (i32, i32) {
    %c0_i32 = arith.constant 0 : i32
    %c0_i32_0 = arith.constant 0 : i32
    %c0_i32_1 = arith.constant 0 : i32
    return %c0_i32, %c0_i32_0 : i32, i32
  }
  func.func @transform_6(%arg0: i32) -> (i32, i32, i32) {
    %c0_i32 = arith.constant 0 : i32
    %c0_i32_0 = arith.constant 0 : i32
    %c0_i32_1 = arith.constant 0 : i32
    %c0_i32_2 = arith.constant 0 : i32
    return %c0_i32, %c0_i32_0, %c0_i32_1 : i32, i32, i32
  }
  func.func @transform_7(%arg0: i32) -> (i32, i32) {
    %c0_i32 = arith.constant 0 : i32
    %c0_i32_0 = arith.constant 0 : i32
    %c0_i32_1 = arith.constant 0 : i32
    return %c0_i32, %c0_i32_0 : i32, i32
  }
  func.func @transform_8(%arg0: i32) -> (i32, i32, i32) {
    %c0_i32 = arith.constant 0 : i32
    %c0_i32_0 = arith.constant 0 : i32
    %c0_i32_1 = arith.constant 0 : i32
    return %arg0, %c0_i32, %c0_i32_0 : i32, i32, i32
  }
}

</mosaic_0001>

<bundles_post_ra>
// kernel: _lambda_.1
= control target key start
LH: loop header
LB: loop body
LE: loop exit
PB: predicated region body
PF: predicated region fallthrough
CT: control target
= control target key end

     0   :  { %s10368_s27 = smov 0   ;;  %s16259_s0 = inlined_call_operand.vmem [shape: bf16[2,32,1280], index: 0, kind: input, shape index: {}]   ;;  %s16260_s1 = inlined_call_operand.vmem [shape: bf16[2,16,1280], index: 1, kind: input, shape index: {}]   ;;  %s16261_s2 = inlined_call_operand.vmem [shape: f32[1,1152], index: 2, kind: input, shape index: {}]   ;;  %s16262_s3 = inlined_call_operand.vmem [shape: bf16[9,32,32], index: 3, kind: input, shape index: {}]   ;;  %s16263_s4 = inlined_call_operand.vmem [shape: bf16[9,32,16], index: 4, kind: input, shape index: {}]   ;;  %s16264_s5 = inlined_call_operand.vmem [shape: f32[32,1], index: 5, kind: input, shape index: {}]   ;;  %s16265_s6 = inlined_call_operand.vmem [shape: bf16[9,32,32], index: 6, kind: input, shape index: {}]   ;;  %s16266_s7 = inlined_call_operand.vmem [shape: f32[32,1], index: 7, kind: input, shape index: {}]   ;;  %s16267_s8 = inlined_call_operand.vmem [shape: f32[2,32,1152], index: 8, kind: output, shape index: {}]  }
   0x1 LB: > { %s8942_s28 = sadd.s32 4294967295, %s10311_s27   ;;  %p8946_p0 = scmp.ge.s32.totalorder %s10311_s27, 1  ;;  %s10311_s27 = sphi %s10368_s27, %s18_s27  }
   0x2   : > { %p272_p1 = scmp.lt.s32.totalorder %s10311_s27, 3 }
   0x4   : > { %p273_p2 = pnand %p8946_p0, %p272_p1 }
   0x6   : > { %276 = sbr.rel (%p273_p2) target bundleno = 2555 (0x9fb), region = 52 }
   0xb   : > { %p311_p3 = scmp.lt.s32.totalorder %s8942_s28, 1  ;;  %s10313_s15 = smov 127   ;;  %v10407_v14 = vld [vmem:[%s16263_s4] sm:$0xff]  ;;  %vm421_vm0 = vcmask 130048   ;;  %v10412_v15 = vld [vmem:[%s16263_s4 + $0x8] sm:$0xff]  ;;  %vm701_vm1 = vcmask 261120  }
   0xc   : > { %s10314_s24 = smov 126   ;;  %vm1034_vm2 = vcmask 1039360   ;;  %s10315_s9 = smov 92   ;;  %vm1655_vm3 = vcmask 1031168   ;;  %vm2226_vm4 = vcmask 752640   ;;  %vm2797_vm5 = vcmask 744448  }
   0xd   : > { %s16599_s28 = smov (!%p311_p3, %s8942_s28), 1  ;;  %s10316_s19 = smov 91   ;;  %vm3368_vm6 = vcmask 736256   ;;  %vm3939_vm7 = vcmask 457728   ;;  %vm4510_vm8 = vcmask 449536   ;;  %vm5081_vm9 = vcmask 441344  }
   0xe   : > { %s10280_s29 = smul.u32 160, %s16599_s28  ;;  %s10317_s10 = smov 90   ;;  %vm5751_vm10 = vcmask 297984   ;;  %vm5756_vm11 = vcmask 1043752   ;;  %vm5919_vm12 = vcmask 1047556   ;;  %vm5861_vm13 = vcmask 302080  }
   0xf   : > { %s10281_s30 = smul.u32 80, %s16599_s28  ;;  %s10318_s21 = smov 56   ;;  %vm14115_vm14 = vmor %vm5919_vm12, %vm5756_vm11  ;;  %vm5863_vm15 = vcmask 1043456  }
  0x10   : > { %s10383_s11 = scalar_lea.vmem %s16259_s0, %s10280_s29  ;;  %s10319_s13 = smov 55  }
  0x11   : > { %s10388_s14 = scalar_lea.vmem %s16260_s1, %s10281_s30  ;;  %v9164_v0 = vld [vmem:[%s10383_s11 + $0x50] sm:$0xf]  ;;  %v10178_v1 = vld [vmem:[%s10383_s11 + $0x74] sm:$0xf0]  ;;  %v9124_v2 = vld [vmem:[%s10383_s11] sm:$0xf] }
  0x12   : > { %v8960_v3 = vld [vmem:[%s10388_s14] sm:$0xf]  ;;  %v10156_v4 = vld [vmem:[%s10388_s14 + $0x24] sm:$0xf0]  ;;  %v10152_v5 = vld [vmem:[%s10388_s14 + $0x4] sm:$0xf]  ;;  %v10396_v6 = vor.u32 %v10178_v1, %v9164_v0 }
  0x13   : > { %v8961_v7 = vor.u32 %v10156_v4, %v8960_v3  ;;  %v8962_v8 = vld [vmem:[%s10388_s14 + $0x28] sm:$0xf0]  ;;  %v8968_v9 = vld [vmem:[%s10388_s14 + $0x8] sm:$0xf]  ;;  %v10157_v10 = vld [vmem:[%s10388_s14 + $0x2c] sm:$0xf0] }
  0x14   : > { %v8965_v11 = vor.u32 %v10152_v5, %v8962_v8  ;;  %v8969_v12 = vor.u32 %v10157_v10, %v8968_v9  ;;  %1014 = vrot.lane.b32.xlu0 %v10396_v6, %s10313_s15  ;;  %v10168_v13 = vld [vmem:[%s10383_s11 + $0x24] sm:$0xf0]  ;;  %v10173_v17 = vld [vmem:[%s10383_s11 + $0x54] sm:$0xf]  ;;  %v9166_v18 = vld [vmem:[%s10383_s11 + $0x78] sm:$0xf0] }
  0x15   : > { %435 = vmatpush.bf16.msra.mxu0 %v8961_v7  ;;  %10279 = vmatpush.bf16.msra.mxu3 %v8961_v7  ;;  %v10414_v16 = vor.u32 %v10168_v13, %v9124_v2  ;;  %v10153_v19 = vld [vmem:[%s10388_s14 + $0xc] sm:$0xf]  ;;  %v8970_v20 = vld [vmem:[%s10388_s14 + $0x30] sm:$0xf0]  ;;  %v8976_v21 = vld [vmem:[%s10388_s14 + $0x10] sm:$0xf]  ;;  %v10428_v25 = vor.u32 %v10173_v17, %v9166_v18 }
  0x16   : > { %454 = vmatpush.bf16.msra.mxu1 %v8965_v11  ;;  %473 = vmatpush.bf16.msra.mxu2 %v8969_v12  ;;  %v10158_v22 = vld [vmem:[%s10388_s14 + $0x34] sm:$0xf0]  ;;  %v8973_v23 = vor.u32 %v10153_v19, %v8970_v20  ;;  %v10163_v26 = vld [vmem:[%s10383_s11 + $0x4] sm:$0xf]  ;;  %v9126_v27 = vld [vmem:[%s10383_s11 + $0x28] sm:$0xf0] }
  0x17   : > { %16336 = vst [vmem:[#allocation3_spill] sm:$0xff] %v10414_v16  ;;  %994 = vrot.lane.b32.xlu1 %v10414_v16, %s10313_s15  ;;  %v8977_v24 = vor.u32 %v10158_v22, %v8976_v21  ;;  %v8984_v28 = vld [vmem:[%s10388_s14 + $0x18] sm:$0xf]  ;;  %v10159_v29 = vld [vmem:[%s10388_s14 + $0x3c] sm:$0xf0]  ;;  %v10440_v33 = vor.u32 %v10163_v26, %v9126_v27  ;;  %s10320_s26 = smov 54  }
  0x18   : > { %8994 = vmatmul.msk.bf16.vlgmr.msra.gmra.mxu0 %vm421_vm0, %v10407_v14  ;;  %8995 = vmatmul.msk.bf16.vlgmr.msra.gmra.mxu3 %vm421_vm0, %v10412_v15  ;;  %16337 = vst [vmem:[#allocation4_spill] sm:$0xff] %v10428_v25  ;;  %v9172_v30 = vld [vmem:[%s10383_s11 + $0x58] sm:$0xf]  ;;  %v8985_v31 = vor.u32 %v10159_v29, %v8984_v28  ;;  %v10179_v32 = vld [vmem:[%s10383_s11 + $0x7c] sm:$0xf0]  ;;  %s10322_s17 = smov 37  }
  0x19   : > { %8996 = vmatmul.msk.bf16.vlgmr.msra.gmra.mxu1 %vm421_vm0, %v10407_v14  ;;  %8998 = vmatmul.msk.bf16.vlgmr.msra.gmra.mxu2 %vm421_vm0, %v10407_v14  ;;  %16338 = vst [vmem:[#allocation5_spill] sm:$0xff] %v10440_v33  ;;  %v10442_v34 = vor.u32 %v10179_v32, %v9172_v30  ;;  %v10154_v35 = vld [vmem:[%s10388_s14 + $0x14] sm:$0xf]  ;;  %v8978_v36 = vld [vmem:[%s10388_s14 + $0x38] sm:$0xf0] }
  0x1a   : > { %492 = vmatpush.bf16.msrb.mxu3 %v8973_v23  ;;  %511 = vmatpush.bf16.msrb.mxu0 %v8977_v24  ;;  %v8981_v37 = vor.u32 %v10154_v35, %v8978_v36  ;;  %v10175_v38 = vld [vmem:[%s10383_s11 + $0x64] sm:$0xf]  ;;  %v9182_v39 = vld [vmem:[%s10383_s11 + $0x88] sm:$0xf0]  ;;  %v9180_v40 = vld [vmem:[%s10383_s11 + $0x60] sm:$0xf] }
  0x1b   : > { %16339 = vst [vmem:[#allocation6_spill] sm:$0xff] %v10442_v34  ;;  %549 = vmatpush.bf16.msrb.mxu2 %v8985_v31  ;;  %1018 = vrot.lane.b32.xlu2 %v10442_v34, %s10313_s15  ;;  %v10180_v41 = vld [vmem:[%s10383_s11 + $0x84] sm:$0xf0]  ;;  %v10155_v42 = vld [vmem:[%s10388_s14 + $0x1c] sm:$0xf]  ;;  %v10461_v47 = vor.u32 %v10175_v38, %v9182_v39 }
  0x1c   : > { %1016 = vrot.lane.b32.xlu0 %v10428_v25, %s10313_s15  ;;  %530 = vmatpush.bf16.msrb.mxu1 %v8981_v37  ;;  %v8986_v43 = vld [vmem:[%s10388_s14 + $0x40] sm:$0xf0]  ;;  %v8992_v44 = vld [vmem:[%s10388_s14 + $0x20] sm:$0xf]  ;;  %v9132_v45 = vld [vmem:[%s10383_s11 + $0x8] sm:$0xf]  ;;  %v10464_v50 = vor.u32 %v10180_v41, %v9180_v40 }
  0x1d   : > { %v10169_v46 = vld [vmem:[%s10383_s11 + $0x2c] sm:$0xf0]  ;;  %16340 = vst [vmem:[#allocation7_spill] sm:$0xff] %v10461_v47  ;;  %v8989_v48 = vor.u32 %v10155_v42, %v8986_v43  ;;  %v10160_v49 = vld [vmem:[%s10388_s14 + $0x44] sm:$0xf0] }
  0x1e   : > { %16341 = vst [vmem:[#allocation8_spill] sm:$0xff] %v10464_v50  ;;  %v8993_v51 = vor.u32 %v10160_v49, %v8992_v44  ;;  %v10466_v52 = vor.u32 %v10169_v46, %v9132_v45  ;;  %v10165_v53 = vld [vmem:[%s10383_s11 + $0x14] sm:$0xf]  ;;  %v9142_v54 = vld [vmem:[%s10383_s11 + $0x38] sm:$0xf0] }
  0x1f   : > { %996 = vrot.lane.b32.xlu1 %v10440_v33, %s10313_s15  ;;  %568 = vmatpush.bf16.msra.mxu3 %v8989_v48  ;;  %v9140_v55 = vld [vmem:[%s10383_s11 + $0x10] sm:$0xf]  ;;  %v10170_v56 = vld [vmem:[%s10383_s11 + $0x34] sm:$0xf0]  ;;  %v10174_v57 = vld [vmem:[%s10383_s11 + $0x5c] sm:$0xf]  ;;  %v10484_v59 = vor.u32 %v10165_v53, %v9142_v54 }
  0x20   : > { %16342 = vst [vmem:[#allocation9_spill] sm:$0xff] %v10466_v52  ;;  %587 = vmatpush.bf16.msra.mxu0 %v8993_v51  ;;  %v9174_v58 = vld [vmem:[%s10383_s11 + $0x80] sm:$0xf0]  ;;  %v10490_v60 = vor.u32 %v10170_v56, %v9140_v55  ;;  %v9058_v61 = vld [vmem:[%s10383_s11 + $0x50] sm:$0xf] }
  0x21   : > { %16343 = vst [vmem:[#allocation10_spill] sm:$0xff] %v10484_v59  ;;  %v10493_v62 = vor.u32 %v10174_v57, %v9174_v58  ;;  %v10145_v63 = vld [vmem:[%s10383_s11 + $0x74] sm:$0xf0]  ;;  %v10141_v0 = vld [vmem:[%s10383_s11 + $0x54] sm:$0xf] }
  0x22   : > { %16344 = vst [vmem:[#allocation11_spill] sm:$0xff] %v10490_v60  ;;  %v9060_v1 = vld [vmem:[%s10383_s11 + $0x78] sm:$0xf0]  ;;  %v9059_v2 = vor.u32 %v10145_v63, %v9058_v61  ;;  %v9022_v4 = vld [vmem:[%s10383_s11] sm:$0xf] }
  0x23   : > { %1022 = vrot.lane.b32.xlu2 %v10464_v50, %s10313_s15  ;;  %16345 = vst [vmem:[#allocation12_spill] sm:$0xff] %v10493_v62  ;;  %v9063_v3 = vor.u32 %v10141_v0, %v9060_v1  ;;  %v10136_v5 = vld [vmem:[%s10383_s11 + $0x24] sm:$0xf0]  ;;  %v10132_v7 = vld [vmem:[%s10383_s11 + $0x4] sm:$0xf] }
  0x24   : > { %1024 = vrot.lane.b32.xlu0 %v10461_v47, %s10313_s15  ;;  %v9188_v8 = vld [vmem:[%s10383_s11 + $0x68] sm:$0xf]  ;;  %v10181_v9 = vld [vmem:[%s10383_s11 + $0x8c] sm:$0xf0]  ;;  %v9024_v10 = vld [vmem:[%s10383_s11 + $0x28] sm:$0xf0]  ;;  %714 = vmatpush.bf16.msra.mxu1 %v9059_v2  ;;  %v9023_v13 = vor.u32 %v10136_v5, %v9022_v4 }
  0x25   : > { %v10164_v11 = vld [vmem:[%s10383_s11 + $0xc] sm:$0xf]  ;;  %v9134_v12 = vld [vmem:[%s10383_s11 + $0x30] sm:$0xf0]  ;;  %733 = vmatpush.bf16.msra.mxu2 %v9063_v3  ;;  %v9027_v17 = vor.u32 %v10132_v7, %v9024_v10  ;;  %v10512_v18 = vor.u32 %v10181_v9, %v9188_v8  ;;  %v9196_v19 = vld [vmem:[%s10383_s11 + $0x70] sm:$0xf] }
  0x26   : > { %v10182_v20 = vld [vmem:[%s10383_s11 + $0x94] sm:$0xf0]  ;;  %v10516_v21 = vor.u32 %v10164_v11, %v9134_v12  ;;  %v10171_v24 = vld [vmem:[%s10383_s11 + $0x3c] sm:$0xf0]  ;;  %v10172_v28 = vld [vmem:[%s10383_s11 + $0x44] sm:$0xf0] }
  0x27   : > { %998 = vrot.lane.b32.xlu1 %v10466_v52, %s10313_s15  ;;  %16346 = vst [vmem:[#allocation13_spill] sm:$0xff] %v10512_v18  ;;  %v10518_v22 = vor.u32 %v10182_v20, %v9196_v19  ;;  %v9148_v23 = vld [vmem:[%s10383_s11 + $0x18] sm:$0xf]  ;;  %v9156_v27 = vld [vmem:[%s10383_s11 + $0x20] sm:$0xf] }
  0x28   : > { %9000 = vmatmul.msk.bf16.vlgmr.msrb.gmra.mxu3 %vm421_vm0, %v10407_v14  ;;  %9002 = vmatmul.msk.bf16.vlgmr.msrb.gmra.mxu0 %vm421_vm0, %v10407_v14  ;;  %v10532_v26 = vor.u32 %v10171_v24, %v9148_v23  ;;  %v9066_v29 = vld [vmem:[%s10383_s11 + $0x58] sm:$0xf]  ;;  %v10146_v30 = vld [vmem:[%s10383_s11 + $0x7c] sm:$0xf0]  ;;  %v10142_v31 = vld [vmem:[%s10383_s11 + $0x5c] sm:$0xf]  ;;  %v10546_v38 = vor.u32 %v10172_v28, %v9156_v27 }
  0x29   : > { %8997 = vmatmul.msk.bf16.gmra.mxu1 %vm421_vm0, %v10412_v15  ;;  %8999 = vmatmul.msk.bf16.gmra.mxu2 %vm421_vm0, %v10412_v15  ;;  %16347 = vst [vmem:[#allocation14_spill] sm:$0xff] %v10518_v22  ;;  %v9067_v32 = vor.u32 %v10146_v30, %v9066_v29  ;;  %v9068_v35 = vld [vmem:[%s10383_s11 + $0x80] sm:$0xf0]  ;;  %v9030_v36 = vld [vmem:[%s10383_s11 + $0x8] sm:$0xf] }
  0x2a   : > { %715 = vmatpush.bf16.msra.mxu1 %v9023_v13  ;;  %734 = vmatpush.bf16.msra.mxu2 %v9027_v17  ;;  %16348 = vst [vmem:[#allocation15_spill] sm:$0xff] %v10532_v26  ;;  %v10137_v37 = vld [vmem:[%s10383_s11 + $0x2c] sm:$0xf0]  ;;  %v9071_v39 = vor.u32 %v10142_v31, %v9068_v35  ;;  %v10133_v40 = vld [vmem:[%s10383_s11 + $0xc] sm:$0xf]  ;;  %v10615_v27 = vld [vmem:[%s16262_s3] sm:$0xff] }
  0x2b   : > { %1002 = vrot.lane.b32.xlu2 %v10490_v60, %s10313_s15  ;;  %16349 = vst [vmem:[#allocation16_spill] sm:$0xff] %v10546_v38  ;;  %v9032_v41 = vld [vmem:[%s10383_s11 + $0x30] sm:$0xf0]  ;;  %752 = vmatpush.bf16.msrb.mxu3 %v9067_v32  ;;  %v9031_v42 = vor.u32 %v10137_v37, %v9030_v36  ;;  %v10176_v43 = vld [vmem:[%s10383_s11 + $0x6c] sm:$0xf] }
  0x2c   : > { %1004 = vrot.lane.b32.xlu0 %v10484_v59, %s10313_s15  ;;  %v9190_v44 = vld [vmem:[%s10383_s11 + $0x90] sm:$0xf0]  ;;  %771 = vmatpush.bf16.msrb.mxu0 %v9071_v39  ;;  %v9035_v45 = vor.u32 %v10133_v40, %v9032_v41  ;;  %v10166_v48 = vld [vmem:[%s10383_s11 + $0x1c] sm:$0xf]  ;;  %v9150_v49 = vld [vmem:[%s10383_s11 + $0x40] sm:$0xf0] }
  0x2d   : > { %v10556_v46 = vor.u32 %v10176_v43, %v9190_v44  ;;  %v10560_v51 = vor.u32 %v10166_v48, %v9150_v49  ;;  %v10185_v53 = vld [vmem:[%s10388_s14 + $0x4] sm:$0xf]  ;;  %v9236_v54 = vld [vmem:[%s10388_s14 + $0x28] sm:$0xf0]  ;;  %v10177_v56 = vld [vmem:[%s10383_s11 + $0x74] sm:$0xf] }
  0x2e   : > { %v10576_v55 = vor.u32 %v10185_v53, %v9236_v54  ;;  %v9198_v57 = vld [vmem:[%s10383_s11 + $0x98] sm:$0xf0]  ;;  %v9074_v61 = vld [vmem:[%s10383_s11 + $0x60] sm:$0xf]  ;;  %v9242_v63 = vld [vmem:[%s10388_s14 + $0x8] sm:$0xf] }
  0x2f   : > { %1020 = vrot.lane.b32.xlu1 %v10493_v62, %s10313_s15  ;;  %16350 = vst [vmem:[#allocation17_spill] sm:$0xff] %v10556_v46  ;;  %753 = vmatpush.bf16.msrb.mxu3 %v9031_v42  ;;  %v10580_v58 = vor.u32 %v10177_v56, %v9198_v57  ;;  %v10191_v0 = vld [vmem:[%s10388_s14 + $0x2c] sm:$0xf0]  ;;  %v10143_v2 = vld [vmem:[%s10383_s11 + $0x64] sm:$0xf] }
  0x30   : > { %772 = vmatpush.bf16.msrb.mxu0 %v9035_v45  ;;  %16351 = vst [vmem:[#allocation18_spill] sm:$0xff] %v10560_v51  ;;  %v9076_v3 = vld [vmem:[%s10383_s11 + $0x88] sm:$0xf0]  ;;  %v9244_v7 = vld [vmem:[%s10388_s14 + $0x30] sm:$0xf0]  ;;  %v10604_v23 = vor.u32 %v10191_v0, %v9242_v63 }
  0x31   : > { %16352 = vst [vmem:[#allocation19_spill] sm:$0xff] %v10576_v55  ;;  %v10186_v4 = vld [vmem:[%s10388_s14 + $0xc] sm:$0xf]  ;;  %v9079_v5 = vor.u32 %v10143_v2, %v9076_v3  ;;  %v9038_v8 = vld [vmem:[%s10383_s11 + $0x10] sm:$0xf] }
  0x32   : > { %16353 = vst [vmem:[#allocation20_spill] sm:$0xff] %v10580_v58  ;;  %v10595_v9 = vor.u32 %v10186_v4, %v9244_v7  ;;  %v10138_v10 = vld [vmem:[%s10383_s11 + $0x34] sm:$0xf0]  ;;  %v10134_v11 = vld [vmem:[%s10383_s11 + $0x14] sm:$0xf]  ;;  %v10642_v45 = vld [vmem:[%s16262_s3 + $0x8] sm:$0xff] }
  0x33   : > { %1000 = vrot.lane.b32.xlu2 %v10516_v21, %s10313_s15  ;;  %v9040_v12 = vld [vmem:[%s10383_s11 + $0x38] sm:$0xf0]  ;;  %v9039_v13 = vor.u32 %v10138_v10, %v9038_v8  ;;  %v10167_v19 = vld [vmem:[%s10383_s11 + $0x24] sm:$0xf]  ;;  %v9158_v20 = vld [vmem:[%s10383_s11 + $0x48] sm:$0xf0] }
  0x34   : > { %1026 = vrot.lane.b32.xlu0 %v10512_v18, %s10313_s15  ;;  %16354 = vst [vmem:[#allocation21_spill] sm:$0xff] %v10595_v9  ;;  %v9043_v17 = vor.u32 %v10134_v11, %v9040_v12  ;;  %v10606_v24 = vor.u32 %v10167_v19, %v9158_v20  ;;  %v10187_v28 = vld [vmem:[%s10388_s14 + $0x14] sm:$0xf]  ;;  %v9252_v29 = vld [vmem:[%s10388_s14 + $0x38] sm:$0xf0] }
  0x35   : > { %16355 = vst [vmem:[#allocation22_spill] sm:$0xff] %v10604_v23  ;;  %v9082_v30 = vld [vmem:[%s10383_s11 + $0x68] sm:$0xf]  ;;  %v10628_v31 = vor.u32 %v10187_v28, %v9252_v29  ;;  %v10148_v32 = vld [vmem:[%s10383_s11 + $0x8c] sm:$0xf0] }
  0x36   : > { %16356 = vst [vmem:[#allocation23_spill] sm:$0xff] %v10606_v24  ;;  %v10144_v35 = vld [vmem:[%s10383_s11 + $0x6c] sm:$0xf]  ;;  %v9084_v36 = vld [vmem:[%s10383_s11 + $0x90] sm:$0xf0]  ;;  %v9083_v37 = vor.u32 %v10148_v32, %v9082_v30 }
  0x37   : > { %1030 = vrot.lane.b32.xlu1 %v10518_v22, %s10313_s15  ;;  %16357 = vst [vmem:[#allocation24_spill] sm:$0xff] %v10628_v31  ;;  %v9087_v39 = vor.u32 %v10144_v35, %v9084_v36  ;;  %v10139_v40 = vld [vmem:[%s10383_s11 + $0x3c] sm:$0xf0]  ;;  %v10135_v41 = vld [vmem:[%s10383_s11 + $0x1c] sm:$0xf] }
  0x38   : > { %9001 = vmatmul.msk.bf16.gmra.mxu3 %vm421_vm0, %v10412_v15  ;;  %9003 = vmatmul.msk.bf16.gmra.mxu0 %vm421_vm0, %v10412_v15  ;;  %v9048_v42 = vld [vmem:[%s10383_s11 + $0x40] sm:$0xf0]  ;;  %v9234_v48 = vld [vmem:[%s10388_s14] sm:$0xf]  ;;  %v10190_v49 = vld [vmem:[%s10388_s14 + $0x24] sm:$0xf0] }
  0x39   : > { %9004 = vmatmul.msk.bf16.vlgmr.msrb.gmra.mxu1 %vm421_vm0, %v10407_v14  ;;  %9006 = vmatmul.msk.bf16.vlgmr.msrb.gmra.mxu2 %vm421_vm0, %v10407_v14  ;;  %v9051_v44 = vor.u32 %v10135_v41, %v9048_v42  ;;  %v10654_v53 = vor.u32 %v10190_v49, %v9234_v48  ;;  %v9258_v54 = vld [vmem:[%s10388_s14 + $0x18] sm:$0xf]  ;;  %v10193_v56 = vld [vmem:[%s10388_s14 + $0x3c] sm:$0xf0]  ;;  %v9090_v57 = vld [vmem:[%s10383_s11 + $0x70] sm:$0xf] }
  0x3a   : > { %809 = vmatpush.bf16.msrb.mxu2 %v9079_v5  ;;  %v9054_v0 = vld [vmem:[%s10383_s11 + $0x20] sm:$0xf]  ;;  %v9250_v2 = vld [vmem:[%s10388_s14 + $0x10] sm:$0xf]  ;;  %v10192_v3 = vld [vmem:[%s10388_s14 + $0x34] sm:$0xf0] }
  0x3b   : > { %1032 = vrot.lane.b32.xlu2 %v10580_v58, %s10313_s15  ;;  %16358 = vst [vmem:[#allocation25_spill] sm:$0xff] %v10654_v53  ;;  %v10670_v5 = vor.u32 %v10192_v3, %v9250_v2  ;;  %v9266_v7 = vld [vmem:[%s10388_s14 + $0x20] sm:$0xf]  ;;  %v10194_v8 = vld [vmem:[%s10388_s14 + $0x44] sm:$0xf0]  ;;  %v10726_v41 = vld [vmem:[%s16262_s3 + $0x10] sm:$0xff] }
  0x3c   : > { %1006 = vrot.lane.b32.xlu0 %v10532_v26, %s10313_s15  ;;  %v10682_v10 = vor.u32 %v10194_v8, %v9266_v7  ;;  %v10189_v11 = vld [vmem:[%s10388_s14 + $0x24] sm:$0xf]  ;;  %v9268_v12 = vld [vmem:[%s10388_s14 + $0x48] sm:$0xf0]  ;;  %v10188_v28 = vld [vmem:[%s10388_s14 + $0x1c] sm:$0xf] }
  0x3d   : > { %16360 = vst [vmem:[#allocation27_spill] sm:$0xff] %v10670_v5  ;;  %v9260_v29 = vld [vmem:[%s10388_s14 + $0x40] sm:$0xf0] }
  0x3e   : > { %810 = vmatpush.bf16.msrb.mxu2 %v9043_v17  ;;  %16361 = vst [vmem:[#allocation28_spill] sm:$0xff] %v10682_v10  ;;  %v10710_v32 = vor.u32 %v10188_v28, %v9260_v29 }
  0x3f   : > { %1010 = vrot.lane.b32.xlu1 %v10546_v38, %s10313_s15 }
  0x40   : > { %16363 = vst [vmem:[#allocation30_spill] sm:$0xff] %v10710_v32 }
  0x43   : > { %1012 = vrot.lane.b32.xlu2 %v10606_v24, %s10313_s15 }
  0x44   : > { %1028 = vrot.lane.b32.xlu0 %v10556_v46, %s10313_s15 }
  0x47   : > { %1008 = vrot.lane.b32.xlu1 %v10560_v51, %s10313_s15 }
  0x48   : > { %9008 = vmatmul.msk.bf16.vlgmr.msra.gmra.mxu3 %vm421_vm0, %v10407_v14  ;;  %9010 = vmatmul.msk.bf16.vlgmr.msra.gmra.mxu0 %vm421_vm0, %v10407_v14  ;;  %v10147_v14 = vld [vmem:[%s10383_s11 + $0x84] sm:$0xf0] }
  0x49   : > { %9005 = vmatmul.msk.bf16.gmra.mxu1 %vm421_vm0, %v10412_v15  ;;  %9007 = vmatmul.msk.bf16.gmra.mxu2 %vm421_vm0, %v10412_v15  ;;  %v9075_v1 = vor.u32 %v10147_v14, %v9074_v61  ;;  %v10661_v61 = vor.u32 %v10193_v56, %v9258_v54  ;;  %v10149_v14 = vld [vmem:[%s10383_s11 + $0x94] sm:$0xf0] }
  0x4a   : > { %828 = vmatpush.bf16.msra.mxu3 %v9083_v37  ;;  %847 = vmatpush.bf16.msra.mxu0 %v9087_v39  ;;  %v9091_v63 = vor.u32 %v10149_v14, %v9090_v57 }
  0x4b   : > { %790 = vmatpush.bf16.msrb.mxu1 %v9075_v1  ;;  %1349 = vrot.lane.b32.xlu2 %v10654_v53, %s10313_s15  ;;  %16359 = vst [vmem:[#allocation26_spill] sm:$0xff] %v10661_v61  ;;  %v10140_v1 = vld [vmem:[%s10383_s11 + $0x44] sm:$0xf0] }
  0x4c   : > { %1351 = vrot.lane.b32.xlu0 %v10576_v55, %s10313_s15  ;;  %v9055_v4 = vor.u32 %v10140_v1, %v9054_v0 }
  0x4e   : > { %848 = vmatpush.bf16.msra.mxu0 %v9051_v44 }
  0x4f   : > { %1355 = vrot.lane.b32.xlu1 %v10595_v9, %s10313_s15  ;;  %791 = vmatpush.bf16.msrb.mxu1 %v9039_v13  ;;  %v10690_v13 = vor.u32 %v10189_v11, %v9268_v12 }
  0x51   : > { %16362 = vst [vmem:[#allocation29_spill] sm:$0xff] %v10690_v13 }
  0x53   : > { %1357 = vrot.lane.b32.xlu2 %v10670_v5, %s10313_s15 }
  0x54   : > { %1353 = vrot.lane.b32.xlu0 %v10604_v23, %s10313_s15 }
  0x57   : > { %1359 = vrot.lane.b32.xlu1 %v10628_v31, %s10313_s15 }
  0x58   : > { %9009 = vmatmul.msk.bf16.gmra.mxu3 %vm421_vm0, %v10412_v15  ;;  %9011 = vmatmul.msk.bf16.gmra.mxu0 %vm421_vm0, %v10412_v15  ;;  %v9046_v15 = vld [vmem:[%s10383_s11 + $0x18] sm:$0xf] }
  0x59   : > { %9092 = vmatmul.msk.bf16.vlgmr.msra.gmra.mxu1 %vm701_vm1, %v10615_v27  ;;  %9094 = vmatmul.msk.bf16.vlgmr.msra.gmra.mxu2 %vm701_vm1, %v10615_v27  ;;  %v9047_v43 = vor.u32 %v10139_v40, %v9046_v15 }
  0x5a   : > { %866 = vmatpush.bf16.msra.mxu1 %v9091_v63 }
  0x5b   : > { %829 = vmatpush.bf16.msra.mxu3 %v9047_v43  ;;  %1363 = vrot.lane.b32.xlu2 %v10710_v32, %s10313_s15 }
  0x5c   : > { %1365 = vrot.lane.b32.xlu0 %v10682_v10, %s10313_s15 }
  0x5e   : > { %867 = vmatpush.bf16.msra.mxu1 %v9055_v4 }
  0x5f   : > { %1361 = vrot.lane.b32.xlu1 %v10661_v61, %s10313_s15 }
  0x63   : > { %1639 = vrot.lane.b32.xlu2 %v10442_v34, %s10314_s24 }
  0x64   : > { %1641 = vrot.lane.b32.xlu0 %v10493_v62, %s10314_s24 }
  0x67   : > { %1367 = vrot.lane.b32.xlu1 %v10690_v13, %s10313_s15 }
  0x68   : > { %9096 = vmatmul.msk.bf16.vlgmr.msrb.gmra.mxu3 %vm701_vm1, %v10615_v27  ;;  %9098 = vmatmul.msk.bf16.vlgmr.msrb.gmra.mxu0 %vm701_vm1, %v10615_v27 }
  0x69   : > { %9093 = vmatmul.msk.bf16.gmra.mxu1 %vm701_vm1, %v10642_v45  ;;  %9095 = vmatmul.msk.bf16.gmra.mxu2 %vm701_vm1, %v10642_v45 }
  0x6b   : > { %1619 = vrot.lane.b32.xlu2 %v10466_v52, %s10314_s24 }
  0x6c   : > { %1621 = vrot.lane.b32.xlu0 %v10516_v21, %s10314_s24 }
  0x6f   : > { %1635 = vrot.lane.b32.xlu1 %v10396_v6, %s10314_s24 }
  0x73   : > { %1637 = vrot.lane.b32.xlu2 %v10428_v25, %s10314_s24 }
  0x74   : > { %1615 = vrot.lane.b32.xlu0 %v10414_v16, %s10314_s24 }
  0x75   : > { %v1019_v17 = vpop.permute.xlu2 %1018 }
  0x77   : > { %1617 = vrot.lane.b32.xlu1 %v10440_v33, %s10314_s24 }
  0x78   : > { %9097 = vmatmul.msk.bf16.gmra.mxu3 %vm701_vm1, %v10642_v45  ;;  %9099 = vmatmul.msk.bf16.gmra.mxu0 %vm701_vm1, %v10642_v45 }
  0x79   : > { %9100 = vmatmul.msk.bf16.vlgmr.msrb.gmra.mxu1 %vm701_vm1, %v10615_v27  ;;  %9102 = vmatmul.msk.bf16.vlgmr.msrb.gmra.mxu2 %vm701_vm1, %v10615_v27 }
  0x7b   : > { %1643 = vrot.lane.b32.xlu2 %v10464_v50, %s10314_s24 }
  0x7c   : > { %1647 = vrot.lane.b32.xlu0 %v10512_v18, %s10314_s24 }
  0x7d   : > { %v1023_v30 = vpop.permute.xlu2 %1022 }
  0x7f   : > { %1649 = vrot.lane.b32.xlu1 %v10556_v46, %s10314_s24 }
  0x83   : > { %1623 = vrot.lane.b32.xlu2 %v10490_v60, %s10314_s24 }
  0x84   : > { %1627 = vrot.lane.b32.xlu0 %v10532_v26, %s10314_s24 }
  0x85   : > { %v1003_v44 = vpop.permute.xlu2 %1002 }
  0x86   : > { %v1015_v19 = vpop.permute.xlu0 %1014 }
  0x87   : > { %1629 = vrot.lane.b32.xlu1 %v10560_v51, %s10314_s24 }
  0x88   : > { %9104 = vmatmul.msk.bf16.vlgmr.msra.gmra.mxu3 %vm701_vm1, %v10615_v27  ;;  %9106 = vmatmul.msk.bf16.vlgmr.msra.gmra.mxu0 %vm701_vm1, %v10615_v27 }
  0x89   : > { %v995_v20 = vpop.permute.xlu1 %994  ;;  %9101 = vmatmul.msk.bf16.gmra.mxu1 %vm701_vm1, %v10642_v45  ;;  %9103 = vmatmul.msk.bf16.gmra.mxu2 %vm701_vm1, %v10642_v45 }
  0x8b   : > { %1645 = vrot.lane.b32.xlu2 %v10461_v47, %s10314_s24 }
  0x8c   : > { %1625 = vrot.lane.b32.xlu0 %v10484_v59, %s10314_s24 }
  0x8d   : > { %v1001_v2 = vpop.permute.xlu2 %1000 }
  0x8e   : > { %v1017_v35 = vpop.permute.xlu0 %1016  ;;  %v1038_v12 = vsel %vm1034_vm2, %v1001_v2, %v1003_v44 }
  0x8f   : > { %v1044_v36 = vsel %vm1034_vm2, %v1015_v19, %v1017_v35  ;;  %v1045_v37 = vsel %vm1034_vm2, %v1017_v35, %v1019_v17  ;;  %1651 = vrot.lane.b32.xlu1 %v10518_v22, %s10314_s24 }
  0x90   : > { %1083 = vmatpush.bf16.msra.mxu2 %v1044_v36  ;;  %1102 = vmatpush.bf16.msrb.mxu3 %v1045_v37 }
  0x91   : > { %v997_v39 = vpop.permute.xlu1 %996 }
  0x92   : > { %v1035_v15 = vsel %vm1034_vm2, %v995_v20, %v997_v39 }
  0x93   : > { %1631 = vrot.lane.b32.xlu2 %v10546_v38, %s10314_s24 }
  0x94   : > { %1084 = vmatpush.bf16.msra.mxu2 %v1035_v15  ;;  %1922 = vrot.lane.b32.xlu0 %v10576_v55, %s10314_s24 }
  0x95   : > { %v10721_v40 = vpop.f32.mrf.mxu0  ;;  %v1033_v35 = vpop.permute.xlu2 %1032 }
  0x96   : > { %v10728_v42 = vpop.f32.mrf.mxu1  ;;  %v1025_v43 = vpop.permute.xlu0 %1024 }
  0x97   : > { %v1048_v48 = vsel %vm1034_vm2, %v1023_v30, %v1025_v43  ;;  %1924 = vrot.lane.b32.xlu1 %v10604_v23, %s10314_s24 }
  0x98   : > { %9105 = vmatmul.msk.bf16.gmra.mxu3 %vm701_vm1, %v10642_v45  ;;  %9107 = vmatmul.msk.bf16.gmra.mxu0 %vm701_vm1, %v10642_v45 }
  0x99   : > { %v999_v49 = vpop.permute.xlu1 %998  ;;  %9108 = vmatmul.msk.bf16.vlgmr.msra.gmra.mxu1 %vm701_vm1, %v10615_v27  ;;  %9202 = vmatmul.msk.bf16.vlgmr.msra.gmra.mxu2 %vm701_vm1, %v10726_v41 }
  0x9a   : > { %v1036_v54 = vsel %vm1034_vm2, %v997_v39, %v999_v49  ;;  %1159 = vmatpush.bf16.msrb.mxu2 %v1048_v48  ;;  %v1037_v11 = vsel %vm1034_vm2, %v999_v49, %v1001_v2 }
  0x9b   : > { %1103 = vmatpush.bf16.msrb.mxu3 %v1036_v54  ;;  %v10744_v56 = vpop.f32.mrf.mxu3  ;;  %1653 = vrot.lane.b32.xlu2 %v10580_v58, %s10314_s24 }
  0x9c   : > { %v10748_v57 = vpop.f32.mrf.mxu2  ;;  %1633 = vrot.lane.b32.xlu0 %v10606_v24, %s10314_s24 }
  0x9d   : > { %v10750_v14 = vpop.f32.mrf.mxu0  ;;  %v1013_v49 = vpop.permute.xlu2 %1012 }
  0x9e   : > { %v10752_v27 = vpop.f32.mrf.mxu1  ;;  %v1005_v63 = vpop.permute.xlu0 %1004 }
  0x9f   : > { %v1039_v0 = vsel %vm1034_vm2, %v1003_v44, %v1005_v63  ;;  %1920 = vrot.lane.b32.xlu1 %v10654_v53, %s10314_s24 }
  0xa0   : > { %1160 = vmatpush.bf16.msrb.mxu2 %v1039_v0 }
  0xa1   : > { %v1021_v1 = vpop.permute.xlu1 %1020 }
  0xa2   : > { %v1046_v3 = vsel %vm1034_vm2, %v1019_v17, %v1021_v1  ;;  %v1047_v4 = vsel %vm1034_vm2, %v1021_v1, %v1023_v30  ;;  %v10774_v17 = vld [vmem:[%s16262_s3 + $0x18] sm:$0xff] }
  0xa3   : > { %1121 = vmatpush.bf16.msrb.mxu0 %v1046_v3  ;;  %v10761_v7 = vpop.f32.mrf.mxu3  ;;  %1140 = vmatpush.bf16.msrb.mxu1 %v1047_v4 }
  0xa4   : > { %v10763_v8 = vpop.f32.mrf.mxu2  ;;  %1930 = vrot.lane.b32.xlu0 %v10628_v31, %s10314_s24  ;;  %1926 = vrot.lane.b32.xlu2 %v10595_v9, %s10314_s24 }
  0xa5   : > { %v10769_v19 = vpop.f32.mrf.mxu0 }
  0xa6   : > { %v10776_v20 = vpop.f32.mrf.mxu1  ;;  %v1027_v28 = vpop.permute.xlu0 %1026 }
  0xa7   : > { %1122 = vmatpush.bf16.msrb.mxu0 %v1037_v11  ;;  %v1049_v29 = vsel %vm1034_vm2, %v1025_v43, %v1027_v28  ;;  %1141 = vmatpush.bf16.msrb.mxu1 %v1038_v12 }
  0xa8   : > { %9204 = vmatmul.msk.bf16.vlgmr.msrb.gmra.mxu3 %vm701_vm1, %v10726_v41  ;;  %1932 = vrot.lane.b32.xlu1 %v10661_v61, %s10314_s24 }
  0xa9   : > { %9109 = vmatmul.msk.bf16.gmra.mxu1 %vm701_vm1, %v10642_v45  ;;  %9203 = vmatmul.msk.bf16.gmra.mxu2 %vm701_vm1, %v10774_v17  ;;  %v1031_v30 = vpop.permute.xlu1 %1030 }
  0xaa   : > { %9206 = vmatmul.msk.bf16.vlgmr.msrb.gmra.mxu0 %vm701_vm1, %v10726_v41  ;;  %1178 = vmatpush.bf16.msra.mxu3 %v1049_v29  ;;  %v1052_v37 = vsel %vm1034_vm2, %v1031_v30, %v1033_v35 }
  0xab   : > { %v10789_v36 = vpop.f32.mrf.mxu3  ;;  %1235 = vmatpush.bf16.msra.mxu2 %v1052_v37 }
  0xac   : > { %v10794_v39 = vpop.f32.mrf.mxu2  ;;  %2206 = vrot.lane.b32.xlu0 %v10396_v6, %s10315_s9  ;;  %1928 = vrot.lane.b32.xlu2 %v10670_v5, %s10314_s24 }
  0xad   : > { %v10798_v45 = vpop.f32.mrf.mxu0 }
  0xae   : > { %16364 = vst [vmem:[#allocation31_spill] sm:$0xff] %v10798_v45  ;;  %v10800_v15 = vpop.f32.mrf.mxu1  ;;  %v1007_v43 = vpop.permute.xlu0 %1006 }
  0xaf   : > { %v1040_v44 = vsel %vm1034_vm2, %v1005_v63, %v1007_v43 }
  0xb0   : > { %1179 = vmatpush.bf16.msra.mxu3 %v1040_v44  ;;  %2208 = vrot.lane.b32.xlu1 %v10428_v25, %s10315_s9 }
  0xb1   : > { %v1011_v48 = vpop.permute.xlu1 %1010 }
  0xb2   : > { %v1043_v1 = vsel %vm1034_vm2, %v1011_v48, %v1013_v49 }
  0xb3   : > { %v10805_v54 = vpop.f32.mrf.mxu3  ;;  %1236 = vmatpush.bf16.msra.mxu2 %v1043_v1 }
  0xb4   : > { %v10809_v0 = vpop.f32.mrf.mxu2  ;;  %2186 = vrot.lane.b32.xlu0 %v10414_v16, %s10315_s9  ;;  %1934 = vrot.lane.b32.xlu2 %v10710_v32, %s10314_s24 }
  0xb5   : > { %v10814_v2 = vpop.f32.mrf.mxu0 }
  0xb6   : > { %16365 = vst [vmem:[#allocation32_spill] sm:$0xff] %v10814_v2  ;;  %v10816_v63 = vpop.f32.mrf.mxu1  ;;  %v1029_v3 = vpop.permute.xlu0 %1028 }
  0xb7   : > { %v1050_v4 = vsel %vm1034_vm2, %v1027_v28, %v1029_v3  ;;  %v1051_v11 = vsel %vm1034_vm2, %v1029_v3, %v1031_v30  ;;  %v1350_v3 = vpop.permute.xlu2 %1349 }
  0xb8   : > { %9205 = vmatmul.msk.bf16.gmra.mxu3 %vm701_vm1, %v10774_v17  ;;  %1197 = vmatpush.bf16.msra.mxu0 %v1050_v4 }
  0xb9   : > { %9208 = vmatmul.msk.bf16.vlgmr.msrb.gmra.mxu1 %vm701_vm1, %v10726_v41  ;;  %9210 = vmatmul.msk.bf16.vlgmr.msrb.gmra.mxu2 %vm701_vm1, %v10726_v41  ;;  %v1009_v12 = vpop.permute.xlu1 %1008 }
  0xba   : > { %9207 = vmatmul.msk.bf16.gmra.mxu0 %vm701_vm1, %v10774_v17  ;;  %v1041_v29 = vsel %vm1034_vm2, %v1007_v43, %v1009_v12  ;;  %1216 = vmatpush.bf16.msra.mxu1 %v1051_v11  ;;  %v1042_v30 = vsel %vm1034_vm2, %v1009_v12, %v1011_v48 }
  0xbb   : > { %v10829_v28 = vpop.f32.mrf.mxu3  ;;  %2188 = vrot.lane.b32.xlu1 %v10440_v33, %s10315_s9 }
  0xbc   : > { %v10836_v35 = vpop.f32.mrf.mxu2  ;;  %1198 = vmatpush.bf16.msra.mxu0 %v1041_v29  ;;  %1938 = vrot.lane.b32.xlu0 %v10690_v13, %s10314_s24 }
  0xbd   : > { %16366 = vst [vmem:[#allocation33_spill] sm:$0xff] %v10836_v35  ;;  %v10840_v37 = vpop.f32.mrf.mxu0  ;;  %1936 = vrot.lane.b32.xlu2 %v10682_v10, %s10314_s24 }
  0xbe   : > { %16367 = vst [vmem:[#allocation34_spill] sm:$0xff] %v10840_v37  ;;  %v10842_v43 = vpop.f32.mrf.mxu1  ;;  %1217 = vmatpush.bf16.msra.mxu1 %v1042_v30  ;;  %v1352_v44 = vpop.permute.xlu0 %1351 }
  0xbf   : > { %v1369_v12 = vsel %vm1034_vm2, %v1350_v3, %v1352_v44  ;;  %v1358_v25 = vpop.permute.xlu2 %1357 }
  0xc0   : > { %1400 = vmatpush.bf16.msrb.mxu3 %v1369_v12 }
  0xc1   : > { %v1356_v30 = vpop.permute.xlu1 %1355 }
  0xc3   : > { %v10844_v49 = vpop.f32.mrf.mxu3  ;;  %2210 = vrot.lane.b32.xlu1 %v10442_v34, %s10315_s9 }
  0xc4   : > { %v10850_v48 = vpop.f32.mrf.mxu2  ;;  %2216 = vrot.lane.b32.xlu0 %v10461_v47, %s10315_s9 }
  0xc5   : > { %16368 = vst [vmem:[#allocation35_spill] sm:$0xff] %v10850_v48  ;;  %v10854_v1 = vpop.f32.mrf.mxu0  ;;  %2214 = vrot.lane.b32.xlu2 %v10464_v50, %s10315_s9 }
  0xc6   : > { %16369 = vst [vmem:[#allocation36_spill] sm:$0xff] %v10854_v1  ;;  %v10856_v4 = vpop.f32.mrf.mxu1  ;;  %v1354_v11 = vpop.permute.xlu0 %1353 }
  0xc7   : > { %v1370_v29 = vsel %vm1034_vm2, %v1352_v44, %v1354_v11 }
  0xc8   : > { %9212 = vmatmul.msk.bf16.vlgmr.msra.gmra.mxu3 %vm701_vm1, %v10726_v41  ;;  %1419 = vmatpush.bf16.msrb.mxu0 %v1370_v29  ;;  %v1371_v29 = vsel %vm1034_vm2, %v1354_v11, %v1356_v30  ;;  %v1372_v11 = vsel %vm1034_vm2, %v1356_v30, %v1358_v25 }
  0xc9   : > { %9209 = vmatmul.msk.bf16.gmra.mxu1 %vm701_vm1, %v10774_v17  ;;  %9211 = vmatmul.msk.bf16.gmra.mxu2 %vm701_vm1, %v10774_v17  ;;  %v1360_v37 = vpop.permute.xlu1 %1359 }
  0xca   : > { %9214 = vmatmul.msk.bf16.vlgmr.msra.gmra.mxu0 %vm701_vm1, %v10726_v41  ;;  %1438 = vmatpush.bf16.msrb.mxu1 %v1371_v29  ;;  %v1373_v29 = vsel %vm1034_vm2, %v1358_v25, %v1360_v37 }
  0xcb   : > { %v10868_v1 = vpop.f32.mrf.mxu3  ;;  %1457 = vmatpush.bf16.msrb.mxu2 %v1372_v11  ;;  %1476 = vmatpush.bf16.msra.mxu3 %v1373_v29 }
  0xcc   : > { %v10874_v44 = vpop.f32.mrf.mxu2  ;;  %2190 = vrot.lane.b32.xlu1 %v10466_v52, %s10315_s9  ;;  %2196 = vrot.lane.b32.xlu0 %v10484_v59, %s10315_s9 }
  0xcd   : > { %16370 = vst [vmem:[#allocation37_spill] sm:$0xff] %v10874_v44  ;;  %v10878_v3 = vpop.f32.mrf.mxu0  ;;  %2194 = vrot.lane.b32.xlu2 %v10490_v60, %s10315_s9 }
  0xce   : > { %16371 = vst [vmem:[#allocation38_spill] sm:$0xff] %v10878_v3  ;;  %v10880_v12 = vpop.f32.mrf.mxu1 }
  0xd3   : > { %v10883_v48 = vpop.f32.mrf.mxu3 }
  0xd4   : > { %v10889_v44 = vpop.f32.mrf.mxu2  ;;  %2212 = vrot.lane.b32.xlu1 %v10493_v62, %s10315_s9  ;;  %2218 = vrot.lane.b32.xlu0 %v10512_v18, %s10315_s9 }
  0xd5   : > { %16372 = vst [vmem:[#allocation39_spill] sm:$0xff] %v10889_v44  ;;  %v10893_v3 = vpop.f32.mrf.mxu0  ;;  %2192 = vrot.lane.b32.xlu2 %v10516_v21, %s10315_s9 }
  0xd6   : > { %16373 = vst [vmem:[#allocation40_spill] sm:$0xff] %v10893_v3  ;;  %v717_v2 = vpop.f32.mrf.mxu1 }
  0xd7   : > { %v10898_v35 = vadd.f32 %v717_v2, %v10721_v40 }
  0xd8   : > { %9213 = vmatmul.msk.bf16.gmra.mxu3 %vm701_vm1, %v10774_v17 }
  0xd9   : > { %9216 = vmatmul.msk.bf16.vlgmr.msra.gmra.mxu1 %vm701_vm1, %v10726_v41  ;;  %9218 = vmatmul.msk.bf16.vlgmr.msra.gmra.mxu2 %vm701_vm1, %v10726_v41 }
  0xda   : > { %9215 = vmatmul.msk.bf16.gmra.mxu0 %vm701_vm1, %v10774_v17 }
  0xdb   : > { %v10908_v30 = vpop.f32.mrf.mxu3 }
  0xdc   : > { %v736_v25 = vpop.f32.mrf.mxu2  ;;  %2222 = vrot.lane.b32.xlu1 %v10518_v22, %s10315_s9  ;;  %2198 = vrot.lane.b32.xlu0 %v10532_v26, %s10315_s9 }
  0xdd   : > { %v10917_v40 = vadd.f32 %v736_v25, %v10728_v42  ;;  %v10919_v2 = vpop.f32.mrf.mxu0  ;;  %v10933_v42 = vld [vmem:[%s16263_s4 + $0x10] sm:$0xff]  ;;  %2224 = vrot.lane.b32.xlu2 %v10580_v58, %s10315_s9 }
  0xde   : > { %16374 = vst [vmem:[#allocation41_spill] sm:$0xff] %v10919_v2  ;;  %v719_v41 = vpop.f32.mrf.mxu1 }
  0xdf   : > { %v10922_v11 = vadd.f32 %v719_v41, %v10750_v14  ;;  %v1362_v41 = vpop.permute.xlu1 %1361 }
  0xe0   : > { %v1374_v16 = vsel %vm1034_vm2, %v1360_v37, %v1362_v41  ;;  %v1366_v37 = vpop.permute.xlu0 %1365 }
  0xe1   : > { %1495 = vmatpush.bf16.msra.mxu0 %v1374_v16 }
  0xe3   : > { %v10924_v29 = vpop.f32.mrf.mxu3 }
  0xe4   : > { %v738_v3 = vpop.f32.mrf.mxu2  ;;  %2202 = vrot.lane.b32.xlu1 %v10546_v38, %s10315_s9  ;;  %2220 = vrot.lane.b32.xlu0 %v10556_v46, %s10315_s9 }
  0xe5   : > { %v10938_v14 = vadd.f32 %v738_v3, %v10752_v27  ;;  %v774_v25 = vpop.f32.mrf.mxu0  ;;  %v1364_v27 = vpop.permute.xlu2 %1363  ;;  %2204 = vrot.lane.b32.xlu2 %v10606_v24, %s10315_s9 }
  0xe6   : > { %v10940_v2 = vpop.f32.mrf.mxu1  ;;  %v10943_v44 = vadd.f32 %v774_v25, %v10789_v36  ;;  %v1375_v52 = vsel %vm1034_vm2, %v1362_v41, %v1364_v27  ;;  %v1376_v33 = vsel %vm1034_vm2, %v1364_v27, %v1366_v37 }
  0xe7   : > { %1514 = vmatpush.bf16.msra.mxu1 %v1375_v52  ;;  %1533 = vmatpush.bf16.msra.mxu2 %v1376_v33  ;;  %v1368_v59 = vpop.permute.xlu1 %1367 }
  0xe8   : > { %9272 = vmatmul.msk.bf16.vlgmr.msrb.gmra.mxu3 %vm421_vm0, %v10933_v42  ;;  %v1377_v41 = vsel %vm1034_vm2, %v1366_v37, %v1368_v59  ;;  %v1642_v27 = vpop.permute.xlu0 %1641 }
  0xe9   : > { %9217 = vmatmul.msk.bf16.gmra.mxu1 %vm701_vm1, %v10774_v17  ;;  %9219 = vmatmul.msk.bf16.gmra.mxu2 %vm701_vm1, %v10774_v17 }
  0xea   : > { %9274 = vmatmul.msk.bf16.vlgmr.msrb.gmra.mxu0 %vm421_vm0, %v10933_v42  ;;  %1552 = vmatpush.bf16.msrb.mxu3 %v1377_v41 }
  0xeb   : > { %v10954_v3 = vpop.f32.mrf.mxu3 }
  0xec   : > { %v741_v16 = vpop.f32.mrf.mxu2  ;;  %2200 = vrot.lane.b32.xlu1 %v10560_v51, %s10315_s9  ;;  %2493 = vrot.lane.b32.xlu0 %v10576_v55, %s10315_s9 }
  0xed   : > { %v10963_v36 = vadd.f32 %v741_v16, %v10776_v20  ;;  %v776_v17 = vpop.f32.mrf.mxu0  ;;  %v1640_v45 = vpop.permute.xlu2 %1639  ;;  %2491 = vrot.lane.b32.xlu2 %v10654_v53, %s10315_s9 }
  0xee   : > { %v10965_v25 = vpop.f32.mrf.mxu1  ;;  %v10968_v47 = vadd.f32 %v776_v17, %v10805_v54  ;;  %v10981_v54 = vld [vmem:[%s16263_s4 + $0x18] sm:$0xff]  ;;  %v1667_v51 = vsel %vm1655_vm3, %v1640_v45, %v1642_v27 }
  0xef   : > { %v1636_v37 = vpop.permute.xlu1 %1635 }
  0xf3   : > { %v10972_v34 = vpop.f32.mrf.mxu3 }
  0xf4   : > { %v743_v20 = vpop.f32.mrf.mxu2  ;;  %2497 = vrot.lane.b32.xlu1 %v10595_v9, %s10315_s9  ;;  %2495 = vrot.lane.b32.xlu0 %v10604_v23, %s10315_s9 }
  0xf5   : > { %v10987_v33 = vadd.f32 %v743_v20, %v10800_v15  ;;  %v779_v52 = vpop.f32.mrf.mxu0  ;;  %v1620_v59 = vpop.permute.xlu2 %1619  ;;  %2499 = vrot.lane.b32.xlu2 %v10670_v5, %s10315_s9 }
  0xf6   : > { %v10990_v16 = vadd.f32 %v779_v52, %v10829_v28  ;;  %v10992_v17 = vpop.f32.mrf.mxu1  ;;  %v1622_v52 = vpop.permute.xlu0 %1621 }
  0xf8   : > { %16375 = vst [vmem:[#allocation42_spill] sm:$0xff] %v10990_v16  ;;  %9273 = vmatmul.msk.bf16.gmra.mxu3 %vm421_vm0, %v10981_v54 }
  0xf9   : > { %9276 = vmatmul.msk.bf16.vlgmr.msrb.gmra.mxu1 %vm421_vm0, %v10933_v42  ;;  %9278 = vmatmul.msk.bf16.vlgmr.msrb.gmra.mxu2 %vm421_vm0, %v10933_v42 }
  0xfa   : > { %9275 = vmatmul.msk.bf16.gmra.mxu0 %vm421_vm0, %v10981_v54  ;;  %1742 = vmatpush.bf16.msrb.mxu2 %v1667_v51 }
  0xfb   : > { %v11002_v15 = vpop.f32.mrf.mxu3 }
  0xfc   : > { %v812_v28 = vpop.f32.mrf.mxu2  ;;  %2501 = vrot.lane.b32.xlu1 %v10628_v31, %s10315_s9  ;;  %2507 = vrot.lane.b32.xlu0 %v10682_v10, %s10315_s9 }
  0xfd   : > { %v11011_v20 = vadd.f32 %v812_v28, %v10816_v63  ;;  %v781_v41 = vpop.f32.mrf.mxu0  ;;  %v1638_v50 = vpop.permute.xlu2 %1637  ;;  %2505 = vrot.lane.b32.xlu2 %v10710_v32, %s10315_s9 }
  0xfe   : > { %v11014_v22 = vadd.f32 %v781_v41, %v10844_v49  ;;  %v11016_v18 = vpop.f32.mrf.mxu1  ;;  %v1665_v38 = vsel %vm1655_vm3, %v1636_v37, %v1638_v50  ;;  %v1618_v28 = vpop.permute.xlu1 %1617 }
  0xff   : > { %1704 = vmatpush.bf16.msrb.mxu0 %v1665_v38  ;;  %v1616_v26 = vpop.permute.xlu0 %1615  ;;  %v1666_v38 = vsel %vm1655_vm3, %v1638_v50, %v1640_v45 }
 0x100   : > { %16376 = vst [vmem:[#allocation43_spill] sm:$0xff] %v11014_v22  ;;  %v1656_v60 = vsel %vm1655_vm3, %v1616_v26, %v1618_v28  ;;  %1723 = vmatpush.bf16.msrb.mxu1 %v1666_v38  ;;  %v1658_v38 = vsel %vm1655_vm3, %v1620_v59, %v1622_v52 }
 0x101   : > { %1743 = vmatpush.bf16.msrb.mxu2 %v1658_v38 }
 0x103   : > { %v11018_v16 = vpop.f32.mrf.mxu3  ;;  %1705 = vmatpush.bf16.msrb.mxu0 %v1656_v60 }
 0x104   : > { %v814_v63 = vpop.f32.mrf.mxu2  ;;  %2503 = vrot.lane.b32.xlu1 %v10661_v61, %s10315_s9  ;;  %2783 = vrot.lane.b32.xlu0 %v10493_v62, %s10316_s19 }
 0x105   : > { %v11028_v49 = vadd.f32 %v814_v63, %v10842_v43  ;;  %v850_v41 = vpop.f32.mrf.mxu0  ;;  %v1644_v26 = vpop.permute.xlu2 %1643 }
 0x106   : > { %v11030_v22 = vpop.f32.mrf.mxu1  ;;  %v11033_v37 = vadd.f32 %v850_v41, %v10868_v1  ;;  %v1668_v51 = vsel %vm1655_vm3, %v1642_v27, %v1644_v26  ;;  %v1657_v41 = vsel %vm1655_vm3, %v1618_v28, %v1620_v59 }
 0x107   : > { %v1648_v55 = vpop.permute.xlu0 %1647  ;;  %1724 = vmatpush.bf16.msrb.mxu1 %v1657_v41 }
 0x108   : > { %9280 = vmatmul.msk.bf16.vlgmr.msra.gmra.mxu3 %vm421_vm0, %v10933_v42 }
 0x109   : > { %9277 = vmatmul.msk.bf16.gmra.mxu1 %vm421_vm0, %v10981_v54  ;;  %9279 = vmatmul.msk.bf16.gmra.mxu2 %vm421_vm0, %v10981_v54 }
 0x10a   : > { %9282 = vmatmul.msk.bf16.vlgmr.msra.gmra.mxu0 %vm421_vm0, %v10933_v42  ;;  %1761 = vmatpush.bf16.msra.mxu3 %v1668_v51 }
 0x10b   : > { %v11046_v43 = vpop.f32.mrf.mxu3 }
 0x10c   : > { %v817_v50 = vpop.f32.mrf.mxu2  ;;  %2509 = vrot.lane.b32.xlu1 %v10690_v13, %s10315_s9  ;;  %2763 = vrot.lane.b32.xlu0 %v10516_v21, %s10316_s19 }
 0x10d   : > { %v11055_v60 = vadd.f32 %v817_v50, %v10856_v4  ;;  %v852_v45 = vpop.f32.mrf.mxu0  ;;  %v1624_v59 = vpop.permute.xlu2 %1623 }
 0x10e   : > { %v11057_v1 = vpop.f32.mrf.mxu1  ;;  %v11060_v63 = vadd.f32 %v852_v45, %v10883_v48  ;;  %v1659_v45 = vsel %vm1655_vm3, %v1622_v52, %v1624_v59 }
 0x10f   : > { %1762 = vmatpush.bf16.msra.mxu3 %v1659_v45 }
 0x113   : > { %v11065_v9 = vpop.f32.mrf.mxu3 }
 0x114   : > { %v819_v4 = vpop.f32.mrf.mxu2  ;;  %2777 = vrot.lane.b32.xlu1 %v10396_v6, %s10316_s19 }
 0x115   : > { %v11074_v48 = vadd.f32 %v819_v4, %v10880_v12  ;;  %v855_v27 = vpop.f32.mrf.mxu0  ;;  %v1628_v12 = vpop.permute.xlu0 %1627 }
 0x116   : > { %v11077_v28 = vadd.f32 %v855_v27, %v10908_v30  ;;  %v11079_v50 = vpop.f32.mrf.mxu1  ;;  %v1650_v30 = vpop.permute.xlu1 %1649 }
 0x117   : > { %v1646_v45 = vpop.permute.xlu2 %1645 }
 0x118   : > { %9281 = vmatmul.msk.bf16.gmra.mxu3 %vm421_vm0, %v10981_v54  ;;  %v1669_v31 = vsel %vm1655_vm3, %v1644_v26, %v1646_v45 }
 0x119   : > { %9284 = vmatmul.msk.bf16.vlgmr.msra.gmra.mxu1 %vm421_vm0, %v10933_v42  ;;  %9286 = vmatmul.msk.bf16.vlgmr.msra.gmra.mxu2 %vm421_vm0, %v10933_v42 }
 0x11a   : > { %9283 = vmatmul.msk.bf16.gmra.mxu0 %vm421_vm0, %v10981_v54 }
 0x11b   : > { %v11090_v51 = vpop.f32.mrf.mxu3  ;;  %1780 = vmatpush.bf16.msra.mxu0 %v1669_v31  ;;  %v11123_v31 = vld [vmem:[%s16262_s3 + $0x20] sm:$0xff] }
 0x11c   : > { %v1086_v52 = vpop.f32.mrf.mxu2 }
 0x11d   : > { %v11099_v41 = vadd.f32 %v1086_v52, %v10898_v35  ;;  %v857_v38 = vpop.f32.mrf.mxu0  ;;  %v1626_v61 = vpop.permute.xlu0 %1625 }
 0x11e   : > { %v11102_v4 = vadd.f32 %v857_v38, %v10924_v29  ;;  %v11104_v27 = vpop.f32.mrf.mxu1  ;;  %v1630_v58 = vpop.permute.xlu1 %1629  ;;  %v756_v29 = vadd.f32 %v10954_v3, %v10748_v57  ;;  %v1660_v26 = vsel %vm1655_vm3, %v1624_v59, %v1626_v61  ;;  %v1670_v59 = vsel %vm1655_vm3, %v1646_v45, %v1648_v55 }
 0x11f   : > { %1781 = vmatpush.bf16.msra.mxu0 %v1660_v26  ;;  %1799 = vmatpush.bf16.msra.mxu1 %v1670_v59 }
 0x123   : > { %v11107_v24 = vpop.f32.mrf.mxu3 }
 0x124   : > { %v1088_v10 = vpop.f32.mrf.mxu2 }
 0x125   : > { %v11114_v35 = vadd.f32 %v1088_v10, %v10922_v11  ;;  %v723_v10 = vadd.f32 %v10940_v2, %v10744_v56  ;;  %v758_v56 = vadd.f32 %v10972_v34, %v10763_v8  ;;  %v1661_v34 = vsel %vm1655_vm3, %v1626_v61, %v1628_v12 }
 0x126   : > { %v11118_v52 = vpop.f32.mrf.mxu1  ;;  %v1652_v11 = vpop.permute.xlu1 %1651  ;;  %v1662_v8 = vsel %vm1655_vm3, %v1628_v12, %v1630_v58  ;;  %1800 = vmatpush.bf16.msra.mxu1 %v1661_v34 }
 0x127   : > { %v1124_v38 = vpop.f32.mrf.mxu0 }
 0x128   : > { %v11126_v53 = vadd.f32 %v1124_v38, %v756_v29  ;;  %9288 = vmatmul.msk.bf16.vlgmr.msrb.gmra.mxu3 %vm421_vm0, %v10933_v42  ;;  %v1671_v29 = vsel %vm1655_vm3, %v1648_v55, %v1650_v30  ;;  %v1672_v38 = vsel %vm1655_vm3, %v1650_v30, %v1652_v11  ;;  %v1632_v55 = vpop.permute.xlu2 %1631 }
 0x129   : > { %9285 = vmatmul.msk.bf16.gmra.mxu1 %vm421_vm0, %v10981_v54  ;;  %9287 = vmatmul.msk.bf16.gmra.mxu2 %vm421_vm0, %v10981_v54 }
 0x12a   : > { %9302 = vmatmul.msk.bf16.vlgmr.msrb.gmra.mxu0 %vm701_vm1, %v11123_v31  ;;  %1818 = vmatpush.bf16.msra.mxu2 %v1671_v29 }
 0x12b   : > { %v1105_v57 = vpop.f32.mrf.mxu3  ;;  %1837 = vmatpush.bf16.msrb.mxu3 %v1672_v38 }
 0x12c   : > { %v1091_v3 = vpop.f32.mrf.mxu2  ;;  %v11141_v42 = vadd.f32 %v1105_v57, %v10917_v40  ;;  %v725_v40 = vadd.f32 %v10965_v25, %v10761_v7  ;;  %v11170_v25 = vld [vmem:[%s16262_s3 + $0x28] sm:$0xff] }
 0x12d   : > { %v11145_v26 = vadd.f32 %v1091_v3, %v723_v10 }
 0x12e   : > { %v11149_v2 = vpop.f32.mrf.mxu1  ;;  %1819 = vmatpush.bf16.msra.mxu2 %v1662_v8 }
 0x12f   : > { %v1126_v13 = vpop.f32.mrf.mxu0 }
 0x130   : > { %v11152_v5 = vadd.f32 %v1126_v13, %v758_v56  ;;  %v761_v13 = vadd.f32 %v11002_v15, %v10794_v39  ;;  %v794_v39 = vadd.f32 %v10992_v17, %v10769_v19 }
 0x133   : > { %v1107_v45 = vpop.f32.mrf.mxu3 }
 0x134   : > { %v1093_v10 = vpop.f32.mrf.mxu2  ;;  %v11159_v57 = vadd.f32 %v1107_v45, %v10938_v14  ;;  %v1663_v14 = vsel %vm1655_vm3, %v1630_v58, %v1632_v55  ;;  %v1923_v58 = vpop.permute.xlu0 %1922 }
 0x135   : > { %v11163_v30 = vadd.f32 %v1093_v10, %v725_v40  ;;  %1838 = vmatpush.bf16.msrb.mxu3 %v1663_v14  ;;  %v1654_v10 = vpop.permute.xlu2 %1653 }
 0x136   : > { %v1143_v7 = vpop.f32.mrf.mxu1  ;;  %v1673_v19 = vsel %vm1655_vm3, %v1652_v11, %v1654_v10 }
 0x137   : > { %v1129_v3 = vpop.f32.mrf.mxu0  ;;  %v11174_v61 = vadd.f32 %v1143_v7, %v10943_v44  ;;  %1856 = vmatpush.bf16.msrb.mxu0 %v1673_v19 }
 0x138   : > { %v11176_v12 = vadd.f32 %v1129_v3, %v761_v13  ;;  %9289 = vmatmul.msk.bf16.gmra.mxu3 %vm421_vm0, %v10981_v54  ;;  %v763_v54 = vadd.f32 %v11018_v16, %v10809_v0  ;;  %v16377_v0 = vld [vmem:[#allocation6_spill] sm:$0xff]  ;;  %v16379_v13 = vld [vmem:[#allocation33_spill] sm:$0xff] }
 0x139   : > { %9304 = vmatmul.msk.bf16.vlgmr.msrb.gmra.mxu1 %vm701_vm1, %v11123_v31  ;;  %9306 = vmatmul.msk.bf16.vlgmr.msrb.gmra.mxu2 %vm701_vm1, %v11123_v31  ;;  %v832_v7 = vadd.f32 %v11046_v43, %v16379_v13  ;;  %v16381_v43 = vld [vmem:[#allocation32_spill] sm:$0xff]  ;;  %v16385_v13 = vld [vmem:[#allocation43_spill] sm:$0xff] }
 0x13a   : > { %9303 = vmatmul.msk.bf16.gmra.mxu0 %vm701_vm1, %v11170_v25  ;;  %2781 = vrot.lane.b32.xlu2 %v16377_v0, %s10316_s19 }
 0x13b   : > { %v1110_v44 = vpop.f32.mrf.mxu3 }
 0x13c   : > { %v11189_v15 = vadd.f32 %v1110_v44, %v10963_v36  ;;  %v1162_v59 = vpop.f32.mrf.mxu2  ;;  %v16378_v36 = vld [vmem:[#allocation31_spill] sm:$0xff]  ;;  %v1634_v17 = vpop.permute.xlu0 %1633 }
 0x13d   : > { %v11191_v29 = vadd.f32 %v1162_v59, %v794_v39  ;;  %v1664_v3 = vsel %vm1655_vm3, %v1632_v55, %v1634_v17  ;;  %v16380_v39 = vld [vmem:[#allocation42_spill] sm:$0xff]  ;;  %v799_v55 = vadd.f32 %v11030_v22, %v16381_v43  ;;  %v16386_v43 = vld [vmem:[#allocation3_spill] sm:$0xff] }
 0x13e   : > { %v1145_v56 = vpop.f32.mrf.mxu1  ;;  %1857 = vmatpush.bf16.msrb.mxu0 %v1664_v3  ;;  %2757 = vrot.lane.b32.xlu0 %v16386_v43, %s10316_s19 }
 0x13f   : > { %v1131_v38 = vpop.f32.mrf.mxu0  ;;  %v11196_v40 = vadd.f32 %v1145_v56, %v10968_v47  ;;  %v796_v47 = vadd.f32 %v11016_v18, %v16378_v36  ;;  %v16382_v56 = vld [vmem:[#allocation5_spill] sm:$0xff] }
 0x140   : > { %v11198_v45 = vadd.f32 %v1131_v38, %v763_v54  ;;  %2759 = vrot.lane.b32.xlu1 %v16382_v56, %s10316_s19  ;;  %v16383_v38 = vld [vmem:[#allocation9_spill] sm:$0xff] }
 0x142   : > { %2761 = vrot.lane.b32.xlu2 %v16383_v38, %s10316_s19 }
 0x143   : > { %v1112_v16 = vpop.f32.mrf.mxu3 }
 0x144   : > { %v11210_v34 = vadd.f32 %v1112_v16, %v10987_v33  ;;  %v1164_v11 = vpop.f32.mrf.mxu2  ;;  %v1925_v33 = vpop.permute.xlu1 %1924  ;;  %v16384_v16 = vld [vmem:[#allocation35_spill] sm:$0xff] }
 0x145   : > { %v11212_v8 = vadd.f32 %v1164_v11, %v796_v47  ;;  %v1927_v47 = vpop.permute.xlu2 %1926  ;;  %v834_v17 = vadd.f32 %v11065_v9, %v16384_v16  ;;  %v16387_v9 = vld [vmem:[#allocation34_spill] sm:$0xff] }
 0x146   : > { %v1148_v14 = vpop.f32.mrf.mxu1 }
 0x147   : > { %v11218_v44 = vadd.f32 %v1148_v14, %v16380_v39  ;;  %v1200_v59 = vpop.f32.mrf.mxu0  ;;  %v1941_v39 = vsel %vm1655_vm3, %v1923_v58, %v1925_v33 }
 0x148   : > { %v11220_v18 = vadd.f32 %v1200_v59, %v832_v7  ;;  %9308 = vmatmul.msk.bf16.vlgmr.msra.gmra.mxu3 %vm701_vm1, %v11123_v31  ;;  %v1942_v59 = vsel %vm1655_vm3, %v1925_v33, %v1927_v47  ;;  %1990 = vmatpush.bf16.msrb.mxu2 %v1941_v39 }
 0x149   : > { %9305 = vmatmul.msk.bf16.gmra.mxu1 %vm701_vm1, %v11170_v25  ;;  %9307 = vmatmul.msk.bf16.gmra.mxu2 %vm701_vm1, %v11170_v25 }
 0x14a   : > { %9310 = vmatmul.msk.bf16.vlgmr.msra.gmra.mxu0 %vm701_vm1, %v11123_v31  ;;  %2009 = vmatpush.bf16.msra.mxu3 %v1942_v59  ;;  %v16392_v59 = vld [vmem:[#allocation8_spill] sm:$0xff] }
 0x14b   : > { %v1181_v54 = vpop.f32.mrf.mxu3  ;;  %2791 = vrot.lane.b32.xlu1 %v10556_v46, %s10316_s19 }
 0x14c   : > { %v1167_v10 = vpop.f32.mrf.mxu2  ;;  %v11239_v19 = vadd.f32 %v1181_v54, %v11011_v20  ;;  %v1921_v3 = vpop.permute.xlu1 %1920 }
 0x14d   : > { %v11241_v36 = vadd.f32 %v1167_v10, %v799_v55  ;;  %v1940_v20 = vsel %vm1655_vm3, %v1921_v3, %v1923_v58  ;;  %v801_v55 = vadd.f32 %v11057_v1, %v16387_v9  ;;  %v16388_v10 = vld [vmem:[#allocation4_spill] sm:$0xff]  ;;  %v1929_v46 = vpop.permute.xlu2 %1928 }
 0x14e   : > { %v1150_v11 = vpop.f32.mrf.mxu1  ;;  %1971 = vmatpush.bf16.msrb.mxu1 %v1940_v20  ;;  %2779 = vrot.lane.b32.xlu2 %v16388_v10, %s10316_s19  ;;  %v16393_v20 = vld [vmem:[#allocation18_spill] sm:$0xff] }
 0x14f   : > { %v11246_v22 = vadd.f32 %v1150_v11, %v16385_v13  ;;  %v1202_v7 = vpop.f32.mrf.mxu0 }
 0x150   : > { %v11248_v14 = vadd.f32 %v1202_v7, %v834_v17  ;;  %v16389_v17 = vld [vmem:[#allocation37_spill] sm:$0xff] }
 0x151   : > { %v837_v11 = vadd.f32 %v11090_v51, %v16389_v17  ;;  %v16391_v51 = vld [vmem:[#allocation36_spill] sm:$0xff] }
 0x153   : > { %v1183_v54 = vpop.f32.mrf.mxu3  ;;  %2771 = vrot.lane.b32.xlu1 %v16393_v20, %s10316_s19  ;;  %v16396_v20 = vld [vmem:[#allocation38_spill] sm:$0xff] }
 0x154   : > { %v1169_v16 = vpop.f32.mrf.mxu2  ;;  %v11262_v33 = vadd.f32 %v1183_v54, %v11028_v49  ;;  %v16390_v49 = vld [vmem:[#allocation13_spill] sm:$0xff] }
 0x155   : > { %v11264_v58 = vadd.f32 %v1169_v16, %v801_v55  ;;  %2789 = vrot.lane.b32.xlu0 %v16390_v49, %s10316_s19  ;;  %v16394_v16 = vld [vmem:[#allocation39_spill] sm:$0xff] }
 0x156   : > { %v1219_v13 = vpop.f32.mrf.mxu1  ;;  %2785 = vrot.lane.b32.xlu2 %v16392_v59, %s10316_s19  ;;  %v839_v17 = vadd.f32 %v11107_v24, %v16394_v16  ;;  %v16398_v24 = vld [vmem:[#allocation14_spill] sm:$0xff] }
 0x157   : > { %v1205_v7 = vpop.f32.mrf.mxu0  ;;  %v11269_v1 = vadd.f32 %v1219_v13, %v11033_v37  ;;  %v870_v37 = vadd.f32 %v11079_v50, %v16391_v51  ;;  %v16395_v51 = vld [vmem:[#allocation15_spill] sm:$0xff] }
 0x158   : > { %v11271_v3 = vadd.f32 %v1205_v7, %v837_v11  ;;  %9309 = vmatmul.msk.bf16.gmra.mxu3 %vm701_vm1, %v11170_v25 }
 0x159   : > { %9312 = vmatmul.msk.bf16.vlgmr.msra.gmra.mxu1 %vm701_vm1, %v11123_v31  ;;  %9314 = vmatmul.msk.bf16.vlgmr.msra.gmra.mxu2 %vm701_vm1, %v11123_v31 }
 0x15a   : > { %9311 = vmatmul.msk.bf16.gmra.mxu0 %vm701_vm1, %v11170_v25 }
 0x15b   : > { %v1186_v39 = vpop.f32.mrf.mxu3  ;;  %2793 = vrot.lane.b32.xlu1 %v16398_v24, %s10316_s19  ;;  %v1933_v24 = vpop.permute.xlu1 %1932 }
 0x15c   : > { %v11290_v9 = vadd.f32 %v1186_v39, %v11055_v60  ;;  %v1238_v55 = vpop.f32.mrf.mxu2  ;;  %v872_v60 = vadd.f32 %v11104_v27, %v16396_v20 }
 0x15d   : > { %v11292_v54 = vadd.f32 %v1238_v55, %v870_v37  ;;  %2769 = vrot.lane.b32.xlu0 %v16395_v51, %s10316_s19  ;;  %v16397_v37 = vld [vmem:[#allocation11_spill] sm:$0xff]  ;;  %v1931_v51 = vpop.permute.xlu0 %1930 }
 0x15e   : > { %v1221_v11 = vpop.f32.mrf.mxu1  ;;  %2765 = vrot.lane.b32.xlu2 %v16397_v37, %s10316_s19  ;;  %v1944_v49 = vsel %vm1655_vm3, %v1929_v46, %v1931_v51 }
 0x15f   : > { %v1207_v13 = vpop.f32.mrf.mxu0  ;;  %v11297_v50 = vadd.f32 %v1221_v11, %v11060_v63  ;;  %v1943_v11 = vsel %vm1655_vm3, %v1927_v47, %v1929_v46  ;;  %2047 = vmatpush.bf16.msra.mxu1 %v1944_v49  ;;  %v16404_v46 = vld [vmem:[#allocation16_spill] sm:$0xff]  ;;  %v16405_v49 = vld [vmem:[#allocation25_spill] sm:$0xff] }
 0x160   : > { %v11299_v7 = vadd.f32 %v1207_v13, %v839_v17  ;;  %2028 = vmatpush.bf16.msra.mxu0 %v1943_v11 }
 0x163   : > { %v1188_v39 = vpop.f32.mrf.mxu3  ;;  %3066 = vrot.lane.b32.xlu1 %v10604_v23, %s10316_s19  ;;  %v1945_v23 = vsel %vm1655_vm3, %v1931_v51, %v1933_v24 }
 0x164   : > { %v11310_v55 = vadd.f32 %v1188_v39, %v11074_v48  ;;  %v1240_v63 = vpop.f32.mrf.mxu2  ;;  %v16399_v48 = vld [vmem:[#allocation10_spill] sm:$0xff]  ;;  %2066 = vmatpush.bf16.msra.mxu2 %v1945_v23 }
 0x165   : > { %v11312_v16 = vadd.f32 %v1240_v63, %v872_v60  ;;  %2767 = vrot.lane.b32.xlu0 %v16399_v48, %s10316_s19  ;;  %v16401_v60 = vld [vmem:[#allocation7_spill] sm:$0xff] }
 0x166   : > { %v1224_v17 = vpop.f32.mrf.mxu1  ;;  %2787 = vrot.lane.b32.xlu2 %v16401_v60, %s10316_s19 }
 0x167   : > { %v11316_v13 = vadd.f32 %v1224_v17, %v11077_v28  ;;  %v1421_v27 = vpop.f32.mrf.mxu0  ;;  %v16400_v28 = vld [vmem:[#allocation40_spill] sm:$0xff] }
 0x168   : > { %v11319_v20 = vadd.f32 %v1421_v27, %v11141_v42  ;;  %9316 = vmatmul.msk.bf16.vlgmr.msrb.gmra.mxu3 %vm701_vm1, %v11123_v31  ;;  %v875_v47 = vadd.f32 %v11118_v52, %v16400_v28  ;;  %v1935_v28 = vpop.permute.xlu2 %1934 }
 0x169   : > { %9313 = vmatmul.msk.bf16.gmra.mxu1 %vm701_vm1, %v11170_v25  ;;  %9315 = vmatmul.msk.bf16.gmra.mxu2 %vm701_vm1, %v11170_v25 }
 0x16a   : > { %9318 = vmatmul.msk.bf16.vlgmr.msrb.gmra.mxu0 %vm701_vm1, %v11123_v31 }
 0x16b   : > { %v1402_v42 = vpop.f32.mrf.mxu3  ;;  %3062 = vrot.lane.b32.xlu1 %v16405_v49, %s10316_s19 }
 0x16c   : > { %v1243_v39 = vpop.f32.mrf.mxu2  ;;  %v11338_v63 = vadd.f32 %v1402_v42, %v11099_v41  ;;  %v1946_v41 = vsel %vm1655_vm3, %v1933_v24, %v1935_v28  ;;  %v16403_v42 = vld [vmem:[#allocation41_spill] sm:$0xff]  ;;  %v11367_v24 = vld [vmem:[%s16263_s4 + $0x20] sm:$0xff] }
 0x16d   : > { %v11340_v17 = vadd.f32 %v1243_v39, %v875_v47  ;;  %v16402_v47 = vld [vmem:[#allocation19_spill] sm:$0xff]  ;;  %2085 = vmatpush.bf16.msrb.mxu3 %v1946_v41  ;;  %v2209_v41 = vpop.permute.xlu1 %2208 }
 0x16e   : > { %v1226_v31 = vpop.f32.mrf.mxu1  ;;  %3064 = vrot.lane.b32.xlu0 %v16402_v47, %s10316_s19  ;;  %2773 = vrot.lane.b32.xlu2 %v16404_v46, %s10316_s19 }
 0x16f   : > { %v11343_v11 = vadd.f32 %v1226_v31, %v11102_v4  ;;  %v1423_v27 = vpop.f32.mrf.mxu0  ;;  %v877_v4 = vadd.f32 %v11149_v2, %v16403_v42  ;;  %v16406_v42 = vld [vmem:[#allocation23_spill] sm:$0xff] }
 0x170   : > { %v11346_v52 = vadd.f32 %v1423_v27, %v11159_v57 }
 0x173   : > { %v1404_v39 = vpop.f32.mrf.mxu3 }
 0x174   : > { %v1245_v57 = vpop.f32.mrf.mxu2  ;;  %v11356_v31 = vadd.f32 %v1404_v39, %v11114_v35  ;;  %v16407_v39 = vld [vmem:[#allocation20_spill] sm:$0xff] }
 0x175   : > { %v11362_v51 = vadd.f32 %v1245_v57, %v877_v4  ;;  %v16408_v57 = vld [vmem:[#allocation26_spill] sm:$0xff]  ;;  %v2189_v49 = vpop.permute.xlu1 %2188 }
 0x176   : > { %v1440_v2 = vpop.f32.mrf.mxu1  ;;  %2775 = vrot.lane.b32.xlu0 %v16406_v42, %s10316_s19  ;;  %2795 = vrot.lane.b32.xlu2 %v16407_v39, %s10316_s19  ;;  %v16409_v42 = vld [vmem:[#allocation24_spill] sm:$0xff] }
 0x177   : > { %v1426_v23 = vpop.f32.mrf.mxu0  ;;  %v11370_v27 = vadd.f32 %v1440_v2, %v11126_v53  ;;  %3074 = vrot.lane.b32.xlu1 %v16408_v57, %s10316_s19 }
 0x178   : > { %v11373_v35 = vadd.f32 %v1426_v23, %v11189_v15  ;;  %9317 = vmatmul.msk.bf16.gmra.mxu3 %vm701_vm1, %v11170_v25 }
 0x179   : > { %9332 = vmatmul.msk.bf16.vlgmr.msrb.gmra.mxu1 %vm421_vm0, %v11367_v24  ;;  %9334 = vmatmul.msk.bf16.vlgmr.msrb.gmra.mxu2 %vm421_vm0, %v11367_v24 }
 0x17a   : > { %9319 = vmatmul.msk.bf16.gmra.mxu0 %vm701_vm1, %v11170_v25 }
 0x17b   : > { %v1407_v53 = vpop.f32.mrf.mxu3 }
 0x17c   : > { %v11386_v15 = vadd.f32 %v1407_v53, %v11145_v26  ;;  %v1459_v4 = vpop.f32.mrf.mxu2  ;;  %v2207_v26 = vpop.permute.xlu0 %2206 }
 0x17d   : > { %v11393_v2 = vadd.f32 %v1459_v4, %v11174_v61  ;;  %v2236_v53 = vsel %vm2226_vm4, %v2207_v26, %v2209_v41  ;;  %v1937_v61 = vpop.permute.xlu2 %1936 }
 0x17e   : > { %v1442_v23 = vpop.f32.mrf.mxu1  ;;  %2275 = vmatpush.bf16.msrb.mxu2 %v2236_v53  ;;  %3072 = vrot.lane.b32.xlu0 %v16409_v42, %s10316_s19  ;;  %v1947_v26 = vsel %vm1655_vm3, %v1935_v28, %v1937_v61 }
 0x17f   : > { %v1428_v25 = vpop.f32.mrf.mxu0  ;;  %v11396_v47 = vadd.f32 %v1442_v23, %v11152_v5  ;;  %v16410_v5 = vld [vmem:[#allocation21_spill] sm:$0xff]  ;;  %v11415_v23 = vld [vmem:[%s16263_s4 + $0x28] sm:$0xff]  ;;  %2104 = vmatpush.bf16.msrb.mxu0 %v1947_v26  ;;  %3350 = vrot.lane.b32.xlu1 %v16388_v10, %s10317_s10 }
 0x180   : > { %v11399_v46 = vadd.f32 %v1428_v25, %v11210_v34  ;;  %3068 = vrot.lane.b32.xlu2 %v16410_v5, %s10316_s19 }
 0x183   : > { %v1409_v57 = vpop.f32.mrf.mxu3 }
 0x184   : > { %v11405_v4 = vadd.f32 %v1409_v57, %v11163_v30  ;;  %v1461_v48 = vpop.f32.mrf.mxu2 }
 0x185   : > { %v11410_v34 = vadd.f32 %v1461_v48, %v11196_v40  ;;  %v2187_v40 = vpop.permute.xlu0 %2186 }
 0x186   : > { %v1445_v25 = vpop.f32.mrf.mxu1  ;;  %3348 = vrot.lane.b32.xlu0 %v10396_v6, %s10317_s10 }
 0x187   : > { %v11419_v53 = vadd.f32 %v1445_v25, %v11176_v12  ;;  %v1497_v30 = vpop.f32.mrf.mxu0  ;;  %v2211_v12 = vpop.permute.xlu1 %2210  ;;  %3330 = vrot.lane.b32.xlu1 %v16382_v56, %s10317_s10 }
 0x188   : > { %v11422_v57 = vadd.f32 %v1497_v30, %v11239_v19  ;;  %9336 = vmatmul.msk.bf16.vlgmr.msra.gmra.mxu3 %vm421_vm0, %v11367_v24  ;;  %v16411_v19 = vld [vmem:[#allocation27_spill] sm:$0xff]  ;;  %v2237_v42 = vsel %vm2226_vm4, %v2209_v41, %v2211_v12 }
 0x189   : > { %9333 = vmatmul.msk.bf16.gmra.mxu1 %vm421_vm0, %v11415_v23  ;;  %9335 = vmatmul.msk.bf16.gmra.mxu2 %vm421_vm0, %v11415_v23 }
 0x18a   : > { %9338 = vmatmul.msk.bf16.vlgmr.msra.gmra.mxu0 %vm421_vm0, %v11367_v24  ;;  %3070 = vrot.lane.b32.xlu2 %v16411_v19, %s10316_s19 }
 0x18b   : > { %v1478_v48 = vpop.f32.mrf.mxu3  ;;  %2294 = vmatpush.bf16.msra.mxu3 %v2237_v42 }
 0x18c   : > { %v1464_v28 = vpop.f32.mrf.mxu2  ;;  %v11433_v25 = vadd.f32 %v1478_v48, %v11191_v29  ;;  %v2227_v29 = vsel %vm2226_vm4, %v2187_v40, %v2189_v49  ;;  %v2215_v48 = vpop.permute.xlu2 %2214 }
 0x18d   : > { %v11438_v26 = vadd.f32 %v1464_v28, %v11218_v44  ;;  %2276 = vmatpush.bf16.msrb.mxu2 %v2227_v29  ;;  %v1939_v60 = vpop.permute.xlu0 %1938 }
 0x18e   : > { %v1447_v30 = vpop.f32.mrf.mxu1  ;;  %v1948_v44 = vsel %vm1655_vm3, %v1937_v61, %v1939_v60  ;;  %3328 = vrot.lane.b32.xlu0 %v16386_v43, %s10317_s10 }
 0x18f   : > { %v11442_v5 = vadd.f32 %v1447_v30, %v11198_v45  ;;  %v1499_v62 = vpop.f32.mrf.mxu0  ;;  %v2191_v28 = vpop.permute.xlu1 %2190  ;;  %2123 = vmatpush.bf16.msrb.mxu1 %v1948_v44  ;;  %3352 = vrot.lane.b32.xlu1 %v16377_v0, %s10317_s10 }
 0x190   : > { %v11445_v39 = vadd.f32 %v1499_v62, %v11262_v33  ;;  %v2228_v33 = vsel %vm2226_vm4, %v2189_v49, %v2191_v28  ;;  %v16412_v49 = vld [vmem:[#allocation28_spill] sm:$0xff] }
 0x191   : > { %2295 = vmatpush.bf16.msra.mxu3 %v2228_v33 }
 0x192   : > { %3076 = vrot.lane.b32.xlu2 %v10710_v32, %s10316_s19 }
 0x193   : > { %v1480_v19 = vpop.f32.mrf.mxu3 }
 0x194   : > { %v1466_v38 = vpop.f32.mrf.mxu2  ;;  %v11450_v41 = vadd.f32 %v1480_v19, %v11212_v8  ;;  %v2195_v8 = vpop.permute.xlu2 %2194 }
 0x195   : > { %v11455_v62 = vadd.f32 %v1466_v38, %v11246_v22  ;;  %v2217_v38 = vpop.permute.xlu0 %2216 }
 0x196   : > { %v1516_v45 = vpop.f32.mrf.mxu1 }
 0x197   : > { %v1502_v42 = vpop.f32.mrf.mxu0  ;;  %v11459_v40 = vadd.f32 %v1516_v45, %v11220_v18  ;;  %v2213_v45 = vpop.permute.xlu1 %2212 }
 0x198   : > { %v11462_v60 = vadd.f32 %v1502_v42, %v11290_v9  ;;  %9337 = vmatmul.msk.bf16.gmra.mxu3 %vm421_vm0, %v11415_v23  ;;  %v2238_v33 = vsel %vm2226_vm4, %v2211_v12, %v2213_v45 }
 0x199   : > { %9340 = vmatmul.msk.bf16.vlgmr.msra.gmra.mxu1 %vm421_vm0, %v11367_v24  ;;  %9342 = vmatmul.msk.bf16.vlgmr.msra.gmra.mxu2 %vm421_vm0, %v11367_v24 }
 0x19a   : > { %9339 = vmatmul.msk.bf16.gmra.mxu0 %vm421_vm0, %v11415_v23  ;;  %3078 = vrot.lane.b32.xlu2 %v16412_v49, %s10316_s19 }
 0x19b   : > { %v1483_v18 = vpop.f32.mrf.mxu3  ;;  %2313 = vmatpush.bf16.msra.mxu0 %v2238_v33 }
 0x19c   : > { %v11473_v22 = vadd.f32 %v1483_v18, %v11241_v36  ;;  %v1535_v9 = vpop.f32.mrf.mxu2  ;;  %v2193_v18 = vpop.permute.xlu2 %2192 }
 0x19d   : > { %v11478_v61 = vadd.f32 %v1535_v9, %v11269_v1  ;;  %v2197_v36 = vpop.permute.xlu0 %2196 }
 0x19e   : > { %v1518_v19 = vpop.f32.mrf.mxu1 }
 0x19f   : > { %v1504_v30 = vpop.f32.mrf.mxu0  ;;  %v11481_v29 = vadd.f32 %v1518_v19, %v11248_v14  ;;  %v2229_v14 = vsel %vm2226_vm4, %v2191_v28, %v2193_v18  ;;  %v2240_v28 = vsel %vm2226_vm4, %v2215_v48, %v2217_v38 }
 0x1a0   : > { %v11484_v44 = vadd.f32 %v1504_v30, %v11310_v55  ;;  %2314 = vmatpush.bf16.msra.mxu0 %v2229_v14  ;;  %2351 = vmatpush.bf16.msra.mxu2 %v2240_v28 }
 0x1a2   : > { %3356 = vrot.lane.b32.xlu2 %v16392_v59, %s10317_s10 }
 0x1a3   : > { %v1485_v42 = vpop.f32.mrf.mxu3 }
 0x1a4   : > { %v11488_v49 = vadd.f32 %v1485_v42, %v11264_v58  ;;  %v1537_v1 = vpop.f32.mrf.mxu2 }
 0x1a5   : > { %v11491_v9 = vadd.f32 %v1537_v1, %v11297_v50  ;;  %v2219_v58 = vpop.permute.xlu0 %2218 }
 0x1a6   : > { %v1521_v32 = vpop.f32.mrf.mxu1  ;;  %v2241_v42 = vsel %vm2226_vm4, %v2217_v38, %v2219_v58 }
 0x1a7   : > { %v11495_v55 = vadd.f32 %v1521_v32, %v11271_v3  ;;  %v1707_v19 = vpop.f32.mrf.mxu0 }
 0x1a8   : > { %v11498_v12 = vadd.f32 %v1707_v19, %v11338_v63  ;;  %9344 = vmatmul.msk.bf16.vlgmr.msrb.gmra.mxu3 %vm421_vm0, %v11367_v24  ;;  %v2239_v63 = vsel %vm2226_vm4, %v2213_v45, %v2215_v48  ;;  %v2223_v19 = vpop.permute.xlu1 %2222 }
 0x1a9   : > { %9341 = vmatmul.msk.bf16.gmra.mxu1 %vm421_vm0, %v11415_v23  ;;  %9343 = vmatmul.msk.bf16.gmra.mxu2 %vm421_vm0, %v11415_v23 }
 0x1aa   : > { %9346 = vmatmul.msk.bf16.vlgmr.msrb.gmra.mxu0 %vm421_vm0, %v11367_v24  ;;  %2332 = vmatpush.bf16.msra.mxu1 %v2239_v63  ;;  %v2231_v63 = vsel %vm2226_vm4, %v2195_v8, %v2197_v36 }
 0x1ab   : > { %v1554_v32 = vpop.f32.mrf.mxu3  ;;  %2370 = vmatpush.bf16.msrb.mxu3 %v2241_v42  ;;  %2352 = vmatpush.bf16.msra.mxu2 %v2231_v63 }
 0x1ac   : > { %v1540_v3 = vpop.f32.mrf.mxu2  ;;  %v11509_v50 = vadd.f32 %v1554_v32, %v11292_v54  ;;  %3336 = vrot.lane.b32.xlu2 %v16397_v37, %s10317_s10 }
 0x1ad   : > { %v11514_v30 = vadd.f32 %v1540_v3, %v11316_v13  ;;  %v2199_v32 = vpop.permute.xlu0 %2198  ;;  %v2230_v3 = vsel %vm2226_vm4, %v2193_v18, %v2195_v8 }
 0x1ae   : > { %v1523_v33 = vpop.f32.mrf.mxu1  ;;  %2333 = vmatpush.bf16.msra.mxu1 %v2230_v3  ;;  %v2232_v28 = vsel %vm2226_vm4, %v2197_v36, %v2199_v32 }
 0x1af   : > { %v11518_v1 = vadd.f32 %v1523_v33, %v11299_v7  ;;  %v1709_v14 = vpop.f32.mrf.mxu0  ;;  %v11534_v7 = vld [vmem:[%s16262_s3 + $0x30] sm:$0xff]  ;;  %2371 = vmatpush.bf16.msrb.mxu3 %v2232_v28 }
 0x1b0   : > { %v11521_v54 = vadd.f32 %v1709_v14, %v11356_v31 }
 0x1b3   : > { %v1556_v45 = vpop.f32.mrf.mxu3 }
 0x1b4   : > { %v1542_v48 = vpop.f32.mrf.mxu2  ;;  %v11524_v13 = vadd.f32 %v1556_v45, %v11312_v16  ;;  %3334 = vrot.lane.b32.xlu2 %v10516_v21, %s10317_s10 }
 0x1b5   : > { %v11529_v38 = vadd.f32 %v1542_v48, %v11343_v11  ;;  %v2203_v11 = vpop.permute.xlu1 %2202  ;;  %v2221_v48 = vpop.permute.xlu0 %2220 }
 0x1b6   : > { %v1726_v31 = vpop.f32.mrf.mxu1  ;;  %v2242_v3 = vsel %vm2226_vm4, %v2219_v58, %v2221_v48 }
 0x1b7   : > { %v1712_v33 = vpop.f32.mrf.mxu0  ;;  %v11538_v16 = vadd.f32 %v1726_v31, %v11319_v20  ;;  %2389 = vmatpush.bf16.msrb.mxu0 %v2242_v3 }
 0x1b8   : > { %v11541_v8 = vadd.f32 %v1712_v33, %v11386_v15  ;;  %9345 = vmatmul.msk.bf16.gmra.mxu3 %vm421_vm0, %v11415_v23 }
 0x1b9   : > { %9348 = vmatmul.msk.bf16.vlgmr.msrb.gmra.mxu1 %vm421_vm0, %v11367_v24  ;;  %9362 = vmatmul.msk.bf16.vlgmr.msrb.gmra.mxu2 %vm701_vm1, %v11534_v7 }
 0x1ba   : > { %9347 = vmatmul.msk.bf16.gmra.mxu0 %vm421_vm0, %v11415_v23 }
 0x1bb   : > { %v1559_v36 = vpop.f32.mrf.mxu3 }
 0x1bc   : > { %v11552_v20 = vadd.f32 %v1559_v36, %v11340_v17  ;;  %v1745_v18 = vpop.f32.mrf.mxu2 }
 0x1bd   : > { %v11555_v15 = vadd.f32 %v1745_v18, %v11370_v27  ;;  %v2201_v31 = vpop.permute.xlu1 %2200  ;;  %v2243_v18 = vsel %vm2226_vm4, %v2221_v48, %v2223_v19 }
 0x1be   : > { %v1728_v42 = vpop.f32.mrf.mxu1  ;;  %v2233_v33 = vsel %vm2226_vm4, %v2199_v32, %v2201_v31  ;;  %2408 = vmatpush.bf16.msrb.mxu1 %v2243_v18  ;;  %v2234_v48 = vsel %vm2226_vm4, %v2201_v31, %v2203_v11 }
 0x1bf   : > { %v1714_v14 = vpop.f32.mrf.mxu0  ;;  %v11558_v45 = vadd.f32 %v1728_v42, %v11346_v52  ;;  %v11573_v52 = vld [vmem:[%s16262_s3 + $0x38] sm:$0xff]  ;;  %2390 = vmatpush.bf16.msrb.mxu0 %v2233_v33 }
 0x1c0   : > { %v11561_v24 = vadd.f32 %v1714_v14, %v11405_v4 }
 0x1c2   : > { %2409 = vmatpush.bf16.msrb.mxu1 %v2234_v48 }
 0x1c3   : > { %v1561_v63 = vpop.f32.mrf.mxu3 }
 0x1c4   : > { %v11565_v17 = vadd.f32 %v1561_v63, %v11362_v51  ;;  %v1747_v28 = vpop.f32.mrf.mxu2 }
 0x1c5   : > { %v11568_v27 = vadd.f32 %v1747_v28, %v11396_v47  ;;  %v2225_v47 = vpop.permute.xlu2 %2224 }
 0x1c6   : > { %v1731_v4 = vpop.f32.mrf.mxu1  ;;  %v2244_v32 = vsel %vm2226_vm4, %v2223_v19, %v2225_v47 }
 0x1c7   : > { %v11577_v58 = vadd.f32 %v1731_v4, %v11373_v35  ;;  %v1783_v36 = vpop.f32.mrf.mxu0  ;;  %2427 = vmatpush.bf16.msrb.mxu2 %v2244_v32 }
 0x1c8   : > { %v11580_v51 = vadd.f32 %v1783_v36, %v11433_v25  ;;  %9364 = vmatmul.msk.bf16.vlgmr.msra.gmra.mxu3 %vm701_vm1, %v11534_v7 }
 0x1c9   : > { %9349 = vmatmul.msk.bf16.gmra.mxu1 %vm421_vm0, %v11415_v23  ;;  %9363 = vmatmul.msk.bf16.gmra.mxu2 %vm701_vm1, %v11573_v52 }
 0x1ca   : > { %9366 = vmatmul.msk.bf16.vlgmr.msra.gmra.mxu0 %vm701_vm1, %v11534_v7 }
 0x1cb   : > { %v1764_v35 = vpop.f32.mrf.mxu3 }
 0x1cc   : > { %v1750_v25 = vpop.f32.mrf.mxu2  ;;  %v11596_v23 = vadd.f32 %v1764_v35, %v11393_v2 }
 0x1cd   : > { %v11602_v42 = vadd.f32 %v1750_v25, %v11419_v53  ;;  %v2205_v2 = vpop.permute.xlu2 %2204 }
 0x1ce   : > { %v1733_v14 = vpop.f32.mrf.mxu1 }
 0x1cf   : > { %v11605_v3 = vadd.f32 %v1733_v14, %v11399_v46  ;;  %v1785_v63 = vpop.f32.mrf.mxu0  ;;  %v2235_v46 = vsel %vm2226_vm4, %v2203_v11, %v2205_v2 }
 0x1d0   : > { %v11608_v28 = vadd.f32 %v1785_v63, %v11450_v41  ;;  %2428 = vmatpush.bf16.msrb.mxu2 %v2235_v46  ;;  %v16416_v46 = vld [vmem:[#allocation20_spill] sm:$0xff] }
 0x1d1   : > { %3366 = vrot.lane.b32.xlu2 %v16416_v46, %s10317_s10 }
 0x1d3   : > { %v1766_v4 = vpop.f32.mrf.mxu3 }
 0x1d4   : > { %v1752_v19 = vpop.f32.mrf.mxu2  ;;  %v11615_v53 = vadd.f32 %v1766_v4, %v11410_v34 }
 0x1d5   : > { %v11622_v41 = vadd.f32 %v1752_v19, %v11442_v5  ;;  %v2494_v5 = vpop.permute.xlu0 %2493  ;;  %v2492_v63 = vpop.permute.xlu2 %2491  ;;  %v16414_v19 = vld [vmem:[#allocation9_spill] sm:$0xff] }
 0x1d6   : > { %v1802_v33 = vpop.f32.mrf.mxu1  ;;  %v2511_v2 = vsel %vm2226_vm4, %v2492_v63, %v2494_v5  ;;  %3332 = vrot.lane.b32.xlu1 %v16414_v19, %s10317_s10  ;;  %v16419_v63 = vld [vmem:[#allocation23_spill] sm:$0xff] }
 0x1d7   : > { %v1788_v36 = vpop.f32.mrf.mxu0  ;;  %v11625_v47 = vadd.f32 %v1802_v33, %v11422_v57  ;;  %v16413_v57 = vld [vmem:[#allocation29_spill] sm:$0xff]  ;;  %2542 = vmatpush.bf16.msra.mxu3 %v2511_v2 }
 0x1d8   : > { %v11628_v34 = vadd.f32 %v1788_v36, %v11473_v22  ;;  %9365 = vmatmul.msk.bf16.gmra.mxu3 %vm701_vm1, %v11573_v52  ;;  %3080 = vrot.lane.b32.xlu0 %v16413_v57, %s10316_s19 }
 0x1d9   : > { %9368 = vmatmul.msk.bf16.vlgmr.msra.gmra.mxu1 %vm701_vm1, %v11534_v7  ;;  %9370 = vmatmul.msk.bf16.vlgmr.msra.gmra.mxu2 %vm701_vm1, %v11534_v7 }
 0x1da   : > { %9367 = vmatmul.msk.bf16.gmra.mxu0 %vm701_vm1, %v11573_v52  ;;  %3346 = vrot.lane.b32.xlu2 %v16419_v63, %s10317_s10 }
 0x1db   : > { %v1769_v11 = vpop.f32.mrf.mxu3 }
 0x1dc   : > { %v11643_v22 = vadd.f32 %v1769_v11, %v11438_v26  ;;  %v1821_v31 = vpop.f32.mrf.mxu2 }
 0x1dd   : > { %v11648_v35 = vadd.f32 %v1821_v31, %v11459_v40  ;;  %v2496_v4 = vpop.permute.xlu0 %2495  ;;  %v16415_v40 = vld [vmem:[#allocation7_spill] sm:$0xff] }
 0x1de   : > { %v1804_v32 = vpop.f32.mrf.mxu1  ;;  %v2512_v36 = vsel %vm2226_vm4, %v2494_v5, %v2496_v4 }
 0x1df   : > { %v1790_v25 = vpop.f32.mrf.mxu0  ;;  %v11651_v18 = vadd.f32 %v1804_v32, %v11445_v39  ;;  %2561 = vmatpush.bf16.msra.mxu0 %v2512_v36 }
 0x1e0   : > { %v11654_v14 = vadd.f32 %v1790_v25, %v11488_v49  ;;  %3358 = vrot.lane.b32.xlu0 %v16415_v40, %s10317_s10 }
 0x1e3   : > { %v1771_v26 = vpop.f32.mrf.mxu3 }
 0x1e4   : > { %v11662_v48 = vadd.f32 %v1771_v26, %v11455_v62  ;;  %v1823_v39 = vpop.f32.mrf.mxu2  ;;  %v2498_v62 = vpop.permute.xlu1 %2497 }
 0x1e5   : > { %v11667_v49 = vadd.f32 %v1823_v39, %v11481_v29  ;;  %v16417_v29 = vld [vmem:[#allocation12_spill] sm:$0xff]  ;;  %v2513_v40 = vsel %vm2226_vm4, %v2496_v4, %v2498_v62  ;;  %v16422_v4 = vld [vmem:[#allocation25_spill] sm:$0xff] }
 0x1e6   : > { %v1807_v33 = vpop.f32.mrf.mxu1  ;;  %3354 = vrot.lane.b32.xlu1 %v16417_v29, %s10317_s10  ;;  %2580 = vmatpush.bf16.msra.mxu1 %v2513_v40 }
 0x1e7   : > { %v11671_v11 = vadd.f32 %v1807_v33, %v11462_v60  ;;  %v1859_v31 = vpop.f32.mrf.mxu0  ;;  %3633 = vrot.lane.b32.xlu2 %v16422_v4, %s10317_s10 }
 0x1e8   : > { %v11674_v32 = vadd.f32 %v1859_v31, %v11509_v50  ;;  %9372 = vmatmul.msk.bf16.vlgmr.msrb.gmra.mxu3 %vm701_vm1, %v11534_v7  ;;  %v16418_v50 = vld [vmem:[#allocation10_spill] sm:$0xff]  ;;  %v2500_v31 = vpop.permute.xlu2 %2499 }
 0x1e9   : > { %9369 = vmatmul.msk.bf16.gmra.mxu1 %vm701_vm1, %v11573_v52  ;;  %9371 = vmatmul.msk.bf16.gmra.mxu2 %vm701_vm1, %v11573_v52 }
 0x1ea   : > { %9374 = vmatmul.msk.bf16.vlgmr.msrb.gmra.mxu0 %vm701_vm1, %v11534_v7  ;;  %3338 = vrot.lane.b32.xlu0 %v16418_v50, %s10317_s10 }
 0x1eb   : > { %v1840_v60 = vpop.f32.mrf.mxu3 }
 0x1ec   : > { %v1826_v5 = vpop.f32.mrf.mxu2  ;;  %v11689_v25 = vadd.f32 %v1840_v60, %v11478_v61  ;;  %v2502_v46 = vpop.permute.xlu1 %2501  ;;  %v2514_v61 = vsel %vm2226_vm4, %v2498_v62, %v2500_v31 }
 0x1ed   : > { %v11694_v2 = vadd.f32 %v1826_v5, %v11495_v55  ;;  %v2515_v60 = vsel %vm2226_vm4, %v2500_v31, %v2502_v46  ;;  %2599 = vmatpush.bf16.msra.mxu2 %v2514_v61  ;;  %v16420_v5 = vld [vmem:[#allocation13_spill] sm:$0xff] }
 0x1ee   : > { %v1809_v26 = vpop.f32.mrf.mxu1  ;;  %2618 = vmatpush.bf16.msrb.mxu3 %v2515_v60 }
 0x1ef   : > { %v11697_v39 = vadd.f32 %v1809_v26, %v11484_v44  ;;  %v1861_v33 = vpop.f32.mrf.mxu0  ;;  %v16421_v44 = vld [vmem:[#allocation14_spill] sm:$0xff] }
 0x1f0   : > { %v11700_v36 = vadd.f32 %v1861_v33, %v11524_v13  ;;  %3364 = vrot.lane.b32.xlu1 %v16421_v44, %s10317_s10  ;;  %v2506_v44 = vpop.permute.xlu2 %2505 }
 0x1f2   : > { %3360 = vrot.lane.b32.xlu0 %v16420_v5, %s10317_s10 }
 0x1f3   : > { %v1842_v55 = vpop.f32.mrf.mxu3 }
 0x1f4   : > { %v1828_v13 = vpop.f32.mrf.mxu2  ;;  %v11710_v26 = vadd.f32 %v1842_v55, %v11491_v9  ;;  %v16425_v55 = vld [vmem:[#allocation27_spill] sm:$0xff] }
 0x1f5   : > { %v11715_v40 = vadd.f32 %v1828_v13, %v11518_v1  ;;  %v16423_v1 = vld [vmem:[#allocation15_spill] sm:$0xff]  ;;  %3641 = vrot.lane.b32.xlu2 %v16425_v55, %s10317_s10 }
 0x1f6   : > { %v1973_v62 = vpop.f32.mrf.mxu1 }
 0x1f7   : > { %v1864_v33 = vpop.f32.mrf.mxu0  ;;  %v11718_v31 = vadd.f32 %v1973_v62, %v11498_v12  ;;  %v16424_v12 = vld [vmem:[#allocation16_spill] sm:$0xff] }
 0x1f8   : > { %v11721_v61 = vadd.f32 %v1864_v33, %v11552_v20  ;;  %9373 = vmatmul.msk.bf16.gmra.mxu3 %vm701_vm1, %v11573_v52  ;;  %3344 = vrot.lane.b32.xlu1 %v16424_v12, %s10317_s10  ;;  %v2504_v12 = vpop.permute.xlu1 %2503 }
 0x1f9   : > { %9376 = vmatmul.msk.bf16.vlgmr.msrb.gmra.mxu1 %vm701_vm1, %v11534_v7  ;;  %9378 = vmatmul.msk.bf16.vlgmr.msrb.gmra.mxu2 %vm701_vm1, %v11534_v7 }
 0x1fa   : > { %9375 = vmatmul.msk.bf16.gmra.mxu0 %vm701_vm1, %v11573_v52  ;;  %3340 = vrot.lane.b32.xlu0 %v16423_v1, %s10317_s10  ;;  %v2782_v1 = vpop.permute.xlu2 %2781 }
 0x1fb   : > { %v1845_v9 = vpop.f32.mrf.mxu3 }
 0x1fc   : > { %v11736_v20 = vadd.f32 %v1845_v9, %v11514_v30  ;;  %v1992_v60 = vpop.f32.mrf.mxu2  ;;  %v16426_v30 = vld [vmem:[#allocation17_spill] sm:$0xff]  ;;  %v16427_v9 = vld [vmem:[#allocation18_spill] sm:$0xff] }
 0x1fd   : > { %v11741_v13 = vadd.f32 %v1992_v60, %v11538_v16 }
 0x1fe   : > { %v1975_v7 = vpop.f32.mrf.mxu1 }
 0x1ff   : > { %v1866_v62 = vpop.f32.mrf.mxu0  ;;  %v11744_v33 = vadd.f32 %v1975_v7, %v11521_v54  ;;  %v11759_v54 = vld [vmem:[%s16263_s4 + $0x30] sm:$0xff] }
 0x200   : > { %v11747_v63 = vadd.f32 %v1866_v62, %v11565_v17  ;;  %3342 = vrot.lane.b32.xlu1 %v16427_v9, %s10317_s10  ;;  %v16428_v17 = vld [vmem:[#allocation30_spill] sm:$0xff]  ;;  %v2516_v62 = vsel %vm2226_vm4, %v2502_v46, %v2504_v12  ;;  %v16429_v46 = vld [vmem:[#allocation19_spill] sm:$0xff]  ;;  %v2517_v9 = vsel %vm2226_vm4, %v2504_v12, %v2506_v44 }
 0x201   : > { %3647 = vrot.lane.b32.xlu2 %v16428_v17, %s10317_s10  ;;  %2637 = vmatpush.bf16.msrb.mxu0 %v2516_v62 }
 0x202   : > { %3362 = vrot.lane.b32.xlu0 %v16426_v30, %s10317_s10  ;;  %2656 = vmatpush.bf16.msrb.mxu1 %v2517_v9 }
 0x203   : > { %v1847_v4 = vpop.f32.mrf.mxu3 }
 0x204   : > { %v11754_v55 = vadd.f32 %v1847_v4, %v11529_v38  ;;  %v1994_v16 = vpop.f32.mrf.mxu2 }
 0x205   : > { %v11764_v60 = vadd.f32 %v1994_v16, %v11558_v45 }
 0x206   : > { %v1978_v7 = vpop.f32.mrf.mxu1 }
 0x207   : > { %v11768_v50 = vadd.f32 %v1978_v7, %v11541_v8  ;;  %v2030_v38 = vpop.f32.mrf.mxu0  ;;  %v2508_v8 = vpop.permute.xlu0 %2507 }
 0x208   : > { %v11771_v4 = vadd.f32 %v2030_v38, %v11596_v23  ;;  %9392 = vmatmul.msk.bf16.vlgmr.msra.gmra.mxu3 %vm421_vm0, %v11759_v54  ;;  %v16430_v23 = vld [vmem:[#allocation21_spill] sm:$0xff] }
 0x209   : > { %9377 = vmatmul.msk.bf16.gmra.mxu1 %vm701_vm1, %v11573_v52  ;;  %9379 = vmatmul.msk.bf16.gmra.mxu2 %vm701_vm1, %v11573_v52 }
 0x20a   : > { %9394 = vmatmul.msk.bf16.vlgmr.msra.gmra.mxu0 %vm421_vm0, %v11759_v54  ;;  %3635 = vrot.lane.b32.xlu0 %v16429_v46, %s10317_s10  ;;  %v2510_v46 = vpop.permute.xlu1 %2509 }
 0x20b   : > { %v2011_v45 = vpop.f32.mrf.mxu3  ;;  %3639 = vrot.lane.b32.xlu1 %v16430_v23, %s10317_s10  ;;  %v2518_v23 = vsel %vm2226_vm4, %v2506_v44, %v2508_v8  ;;  %v11810_v44 = vld [vmem:[%s16263_s4 + $0x38] sm:$0xff]  ;;  %3923 = vrot.lane.b32.xlu2 %v16377_v0, %s10318_s21 }
 0x20c   : > { %v1997_v16 = vpop.f32.mrf.mxu2  ;;  %v11786_v7 = vadd.f32 %v2011_v45, %v11555_v15  ;;  %v2519_v15 = vsel %vm2226_vm4, %v2508_v8, %v2510_v46  ;;  %2675 = vmatpush.bf16.msrb.mxu2 %v2518_v23 }
 0x20d   : > { %v11789_v62 = vadd.f32 %v1997_v16, %v11577_v58  ;;  %2694 = vmatpush.bf16.msra.mxu3 %v2519_v15  ;;  %v16432_v16 = vld [vmem:[#allocation24_spill] sm:$0xff]  ;;  %v16433_v15 = vld [vmem:[#allocation26_spill] sm:$0xff] }
 0x20e   : > { %v1980_v38 = vpop.f32.mrf.mxu1 }
 0x20f   : > { %v11792_v52 = vadd.f32 %v1980_v38, %v11561_v24  ;;  %v2032_v17 = vpop.f32.mrf.mxu0  ;;  %v2784_v58 = vpop.permute.xlu0 %2783  ;;  %v16431_v24 = vld [vmem:[#allocation22_spill] sm:$0xff] }
 0x210   : > { %v11795_v37 = vadd.f32 %v2032_v17, %v11615_v53 }
 0x212   : > { %3637 = vrot.lane.b32.xlu0 %v16431_v24, %s10317_s10  ;;  %v2778_v38 = vpop.permute.xlu1 %2777 }
 0x213   : > { %v2013_v45 = vpop.f32.mrf.mxu3  ;;  %3643 = vrot.lane.b32.xlu1 %v16432_v16, %s10317_s10  ;;  %3903 = vrot.lane.b32.xlu2 %v16414_v19, %s10318_s21 }
 0x214   : > { %v1999_v53 = vpop.f32.mrf.mxu2  ;;  %v11805_v17 = vadd.f32 %v2013_v45, %v11568_v27  ;;  %v2762_v27 = vpop.permute.xlu2 %2761 }
 0x215   : > { %v11813_v12 = vadd.f32 %v1999_v53, %v11605_v3 }
 0x216   : > { %v2049_v9 = vpop.f32.mrf.mxu1 }
 0x217   : > { %v2035_v8 = vpop.f32.mrf.mxu0  ;;  %v11816_v46 = vadd.f32 %v2049_v9, %v11580_v51  ;;  %v2764_v3 = vpop.permute.xlu0 %2763 }
 0x218   : > { %v11819_v23 = vadd.f32 %v2035_v8, %v11643_v22  ;;  %9393 = vmatmul.msk.bf16.gmra.mxu3 %vm421_vm0, %v11810_v44  ;;  %v16434_v22 = vld [vmem:[#allocation28_spill] sm:$0xff] }
 0x219   : > { %9396 = vmatmul.msk.bf16.vlgmr.msra.gmra.mxu1 %vm421_vm0, %v11759_v54  ;;  %9398 = vmatmul.msk.bf16.vlgmr.msra.gmra.mxu2 %vm421_vm0, %v11759_v54 }
 0x21a   : > { %9395 = vmatmul.msk.bf16.gmra.mxu0 %vm421_vm0, %v11810_v44  ;;  %3649 = vrot.lane.b32.xlu0 %v16434_v22, %s10317_s10 }
 0x21b   : > { %v2016_v51 = vpop.f32.mrf.mxu3  ;;  %3645 = vrot.lane.b32.xlu1 %v16433_v15, %s10317_s10  ;;  %3921 = vrot.lane.b32.xlu2 %v16388_v10, %s10318_s21 }
 0x21c   : > { %v11834_v45 = vadd.f32 %v2016_v51, %v11602_v42  ;;  %v2068_v53 = vpop.f32.mrf.mxu2  ;;  %v2780_v5 = vpop.permute.xlu2 %2779 }
 0x21d   : > { %v11837_v9 = vadd.f32 %v2068_v53, %v11625_v47  ;;  %v2807_v15 = vsel %vm2797_vm5, %v2778_v38, %v2780_v5  ;;  %v2760_v51 = vpop.permute.xlu1 %2759 }
 0x21e   : > { %v2051_v8 = vpop.f32.mrf.mxu1  ;;  %2846 = vmatpush.bf16.msra.mxu0 %v2807_v15 }
 0x21f   : > { %v2037_v16 = vpop.f32.mrf.mxu0  ;;  %v11840_v24 = vadd.f32 %v2051_v8, %v11608_v28  ;;  %v2758_v22 = vpop.permute.xlu0 %2757 }
 0x220   : > { %v11843_v59 = vadd.f32 %v2037_v16, %v11662_v48  ;;  %v2798_v16 = vsel %vm2797_vm5, %v2758_v22, %v2760_v51 }
 0x222   : > { %2847 = vmatpush.bf16.msra.mxu0 %v2798_v16  ;;  %3925 = vrot.lane.b32.xlu0 %v16417_v29, %s10318_s21 }
 0x223   : > { %v2018_v42 = vpop.f32.mrf.mxu3  ;;  %3651 = vrot.lane.b32.xlu1 %v16413_v57, %s10317_s10 }
 0x224   : > { %v11849_v47 = vadd.f32 %v2018_v42, %v11622_v41  ;;  %v2070_v53 = vpop.f32.mrf.mxu2  ;;  %v2808_v41 = vsel %vm2797_vm5, %v2780_v5, %v2782_v1  ;;  %v2809_v42 = vsel %vm2797_vm5, %v2782_v1, %v2784_v58 }
 0x225   : > { %v11852_v28 = vadd.f32 %v2070_v53, %v11651_v18  ;;  %2865 = vmatpush.bf16.msra.mxu1 %v2808_v41  ;;  %2884 = vmatpush.bf16.msra.mxu2 %v2809_v42  ;;  %v2799_v41 = vsel %vm2797_vm5, %v2760_v51, %v2762_v27  ;;  %v2800_v42 = vsel %vm2797_vm5, %v2762_v27, %v2764_v3 }
 0x226   : > { %v2054_v48 = vpop.f32.mrf.mxu1 }
 0x227   : > { %v11856_v8 = vadd.f32 %v2054_v48, %v11628_v34  ;;  %v2106_v38 = vpop.f32.mrf.mxu0  ;;  %v2786_v34 = vpop.permute.xlu2 %2785 }
 0x228   : > { %v11859_v15 = vadd.f32 %v2106_v38, %v11689_v25  ;;  %9400 = vmatmul.msk.bf16.vlgmr.msrb.gmra.mxu3 %vm421_vm0, %v11759_v54  ;;  %v2810_v53 = vsel %vm2797_vm5, %v2784_v58, %v2786_v34 }
 0x229   : > { %9397 = vmatmul.msk.bf16.gmra.mxu1 %vm421_vm0, %v11810_v44  ;;  %9399 = vmatmul.msk.bf16.gmra.mxu2 %vm421_vm0, %v11810_v44 }
 0x22a   : > { %9402 = vmatmul.msk.bf16.vlgmr.msrb.gmra.mxu0 %vm421_vm0, %v11759_v54  ;;  %2903 = vmatpush.bf16.msrb.mxu3 %v2810_v53 }
 0x22b   : > { %v2087_v18 = vpop.f32.mrf.mxu3  ;;  %2866 = vmatpush.bf16.msra.mxu1 %v2799_v41  ;;  %2885 = vmatpush.bf16.msra.mxu2 %v2800_v42 }
 0x22c   : > { %v2073_v25 = vpop.f32.mrf.mxu2  ;;  %v11872_v22 = vadd.f32 %v2087_v18, %v11648_v35  ;;  %v2790_v35 = vpop.permute.xlu0 %2789  ;;  %3919 = vrot.lane.b32.xlu1 %v10396_v6, %s10318_s21  ;;  %3905 = vrot.lane.b32.xlu0 %v10516_v21, %s10318_s21 }
 0x22d   : > { %v11875_v5 = vadd.f32 %v2073_v25, %v11671_v11 }
 0x22e   : > { %v2056_v1 = vpop.f32.mrf.mxu1 }
 0x22f   : > { %v11879_v48 = vadd.f32 %v2056_v1, %v11654_v14  ;;  %v2108_v16 = vpop.f32.mrf.mxu0  ;;  %v2766_v18 = vpop.permute.xlu2 %2765 }
 0x230   : > { %v11882_v38 = vadd.f32 %v2108_v16, %v11710_v26  ;;  %v2801_v26 = vsel %vm2797_vm5, %v2764_v3, %v2766_v18 }
 0x231   : > { %2904 = vmatpush.bf16.msrb.mxu3 %v2801_v26 }
 0x233   : > { %v2089_v11 = vpop.f32.mrf.mxu3 }
 0x234   : > { %v2075_v25 = vpop.f32.mrf.mxu2  ;;  %v11887_v58 = vadd.f32 %v2089_v11, %v11667_v49  ;;  %v2770_v49 = vpop.permute.xlu0 %2769  ;;  %3901 = vrot.lane.b32.xlu1 %v16382_v56, %s10318_s21  ;;  %3899 = vrot.lane.b32.xlu0 %v16386_v43, %s10318_s21 }
 0x235   : > { %v11890_v14 = vadd.f32 %v2075_v25, %v11697_v39  ;;  %v2792_v39 = vpop.permute.xlu1 %2791 }
 0x236   : > { %v2125_v1 = vpop.f32.mrf.mxu1 }
 0x237   : > { %v2111_v53 = vpop.f32.mrf.mxu0  ;;  %v11894_v51 = vadd.f32 %v2125_v1, %v11674_v32  ;;  %v2788_v1 = vpop.permute.xlu2 %2787 }
 0x238   : > { %v11897_v27 = vadd.f32 %v2111_v53, %v11736_v20  ;;  %9401 = vmatmul.msk.bf16.gmra.mxu3 %vm421_vm0, %v11810_v44  ;;  %v2811_v26 = vsel %vm2797_vm5, %v2786_v34, %v2788_v1 }
 0x239   : > { %9404 = vmatmul.msk.bf16.vlgmr.msrb.gmra.mxu1 %vm421_vm0, %v11759_v54  ;;  %9406 = vmatmul.msk.bf16.vlgmr.msrb.gmra.mxu2 %vm421_vm0, %v11759_v54 }
 0x23a   : > { %9403 = vmatmul.msk.bf16.gmra.mxu0 %vm421_vm0, %v11810_v44 }
 0x23b   : > { %v2092_v32 = vpop.f32.mrf.mxu3  ;;  %2922 = vmatpush.bf16.msrb.mxu0 %v2811_v26 }
 0x23c   : > { %v11908_v3 = vadd.f32 %v2092_v32, %v11694_v2  ;;  %v2278_v20 = vpop.f32.mrf.mxu2  ;;  %v2768_v2 = vpop.permute.xlu0 %2767  ;;  %3933 = vrot.lane.b32.xlu1 %v16426_v30, %s10318_s21 }
 0x23d   : > { %v11911_v16 = vadd.f32 %v2278_v20, %v11718_v31  ;;  %v2772_v53 = vpop.permute.xlu1 %2771 }
 0x23e   : > { %v2127_v41 = vpop.f32.mrf.mxu1 }
 0x23f   : > { %16435 = vst [vmem:[#allocation6_spill] sm:$0xff] %v11911_v16  ;;  %v2113_v42 = vpop.f32.mrf.mxu0  ;;  %v11914_v11 = vadd.f32 %v2127_v41, %v11700_v36  ;;  %v11929_v36 = vld [vmem:[%s16262_s3 + $0x40] sm:$0xff] }
 0x240   : > { %v11917_v25 = vadd.f32 %v2113_v42, %v11754_v55  ;;  %v2802_v55 = vsel %vm2797_vm5, %v2766_v18, %v2768_v2 }
 0x241   : > { %2923 = vmatpush.bf16.msrb.mxu0 %v2802_v55 }
 0x243   : > { %v2094_v57 = vpop.f32.mrf.mxu3 }
 0x244   : > { %v11921_v32 = vadd.f32 %v2094_v57, %v11715_v40  ;;  %v2280_v31 = vpop.f32.mrf.mxu2 }
 0x245   : > { %v11924_v20 = vadd.f32 %v2280_v31, %v11744_v33 }
 0x246   : > { %v2130_v16 = vpop.f32.mrf.mxu1 }
 0x247   : > { %v11933_v34 = vadd.f32 %v2130_v16, %v11721_v61  ;;  %v2316_v41 = vpop.f32.mrf.mxu0  ;;  %v2794_v61 = vpop.permute.xlu1 %2793  ;;  %v2813_v16 = vsel %vm2797_vm5, %v2790_v35, %v2792_v39 }
 0x248   : > { %v11936_v57 = vadd.f32 %v2316_v41, %v11786_v7  ;;  %9408 = vmatmul.msk.bf16.vlgmr.msra.gmra.mxu3 %vm421_vm0, %v11759_v54  ;;  %v2812_v7 = vsel %vm2797_vm5, %v2788_v1, %v2790_v35  ;;  %2960 = vmatpush.bf16.msrb.mxu2 %v2813_v16  ;;  %v2814_v26 = vsel %vm2797_vm5, %v2792_v39, %v2794_v61  ;;  %v2774_v1 = vpop.permute.xlu2 %2773 }
 0x249   : > { %9405 = vmatmul.msk.bf16.gmra.mxu1 %vm421_vm0, %v11810_v44  ;;  %9407 = vmatmul.msk.bf16.gmra.mxu2 %vm421_vm0, %v11810_v44 }
 0x24a   : > { %9422 = vmatmul.msk.bf16.vlgmr.msra.gmra.mxu0 %vm701_vm1, %v11929_v36  ;;  %2941 = vmatpush.bf16.msrb.mxu1 %v2812_v7  ;;  %v2805_v7 = vsel %vm2797_vm5, %v2772_v53, %v2774_v1 }
 0x24b   : > { %v2297_v40 = vpop.f32.mrf.mxu3  ;;  %2979 = vmatpush.bf16.msra.mxu3 %v2814_v26 }
 0x24c   : > { %v2283_v33 = vpop.f32.mrf.mxu2  ;;  %v11947_v18 = vadd.f32 %v2297_v40, %v11741_v13 }
 0x24d   : > { %v11952_v54 = vadd.f32 %v2283_v33, %v11768_v50  ;;  %v2803_v50 = vsel %vm2797_vm5, %v2768_v2, %v2770_v49  ;;  %v2804_v33 = vsel %vm2797_vm5, %v2770_v49, %v2772_v53 }
 0x24e   : > { %v2132_v42 = vpop.f32.mrf.mxu1  ;;  %2942 = vmatpush.bf16.msrb.mxu1 %v2803_v50  ;;  %2961 = vmatpush.bf16.msrb.mxu2 %v2804_v33 }
 0x24f   : > { %v11956_v31 = vadd.f32 %v2132_v42, %v11747_v63  ;;  %v2318_v55 = vpop.f32.mrf.mxu0  ;;  %2980 = vmatpush.bf16.msra.mxu3 %v2805_v7 }
 0x250   : > { %v11959_v13 = vadd.f32 %v2318_v55, %v11805_v17  ;;  %v11972_v17 = vld [vmem:[%s16262_s3 + $0x48] sm:$0xff] }
 0x253   : > { %v2299_v41 = vpop.f32.mrf.mxu3 }
 0x254   : > { %v2285_v40 = vpop.f32.mrf.mxu2  ;;  %v11962_v35 = vadd.f32 %v2299_v41, %v11764_v60  ;;  %v2796_v41 = vpop.permute.xlu2 %2795 }
 0x255   : > { %v11967_v39 = vadd.f32 %v2285_v40, %v11792_v52  ;;  %v3065_v52 = vpop.permute.xlu0 %3064  ;;  %v2815_v40 = vsel %vm2797_vm5, %v2794_v61, %v2796_v41 }
 0x256   : > { %v2335_v63 = vpop.f32.mrf.mxu1  ;;  %2998 = vmatpush.bf16.msra.mxu0 %v2815_v40 }
 0x257   : > { %v2321_v16 = vpop.f32.mrf.mxu0  ;;  %v11976_v60 = vadd.f32 %v2335_v63, %v11771_v4 }
 0x258   : > { %v11979_v49 = vadd.f32 %v2321_v16, %v11834_v45  ;;  %9409 = vmatmul.msk.bf16.gmra.mxu3 %vm421_vm0, %v11810_v44 }
 0x259   : > { %9424 = vmatmul.msk.bf16.vlgmr.msra.gmra.mxu1 %vm701_vm1, %v11929_v36  ;;  %9426 = vmatmul.msk.bf16.vlgmr.msra.gmra.mxu2 %vm701_vm1, %v11929_v36 }
 0x25a   : > { %9423 = vmatmul.msk.bf16.gmra.mxu0 %vm701_vm1, %v11972_v17 }
 0x25b   : > { %v2302_v53 = vpop.f32.mrf.mxu3 }
 0x25c   : > { %v11990_v4 = vadd.f32 %v2302_v53, %v11789_v62  ;;  %v2354_v2 = vpop.f32.mrf.mxu2  ;;  %v3069_v53 = vpop.permute.xlu2 %3068 }
 0x25d   : > { %v11993_v45 = vadd.f32 %v2354_v2, %v11816_v46 }
 0x25e   : > { %v2337_v42 = vpop.f32.mrf.mxu1 }
 0x25f   : > { %v2323_v44 = vpop.f32.mrf.mxu0  ;;  %v11996_v26 = vadd.f32 %v2337_v42, %v11795_v37  ;;  %v2776_v37 = vpop.permute.xlu0 %2775 }
 0x260   : > { %v11999_v55 = vadd.f32 %v2323_v44, %v11849_v47  ;;  %v2806_v33 = vsel %vm2797_vm5, %v2774_v1, %v2776_v37 }
 0x261   : > { %2999 = vmatpush.bf16.msra.mxu0 %v2806_v33 }
 0x263   : > { %v2304_v62 = vpop.f32.mrf.mxu3 }
 0x264   : > { %v12009_v46 = vadd.f32 %v2304_v62, %v11813_v12  ;;  %v2356_v47 = vpop.f32.mrf.mxu2  ;;  %v3067_v12 = vpop.permute.xlu1 %3066 }
 0x265   : > { %v12012_v50 = vadd.f32 %v2356_v47, %v11840_v24  ;;  %v3083_v62 = vsel %vm2797_vm5, %v3065_v52, %v3067_v12  ;;  %v3084_v37 = vsel %vm2797_vm5, %v3067_v12, %v3069_v53 }
 0x266   : > { %v2340_v61 = vpop.f32.mrf.mxu1  ;;  %3132 = vmatpush.bf16.msra.mxu2 %v3083_v62 }
 0x267   : > { %v12016_v63 = vadd.f32 %v2340_v61, %v11819_v23  ;;  %v2392_v7 = vpop.f32.mrf.mxu0  ;;  %v3073_v30 = vpop.permute.xlu0 %3072 }
 0x268   : > { %v12019_v16 = vadd.f32 %v2392_v7, %v11872_v22  ;;  %9428 = vmatmul.msk.bf16.vlgmr.msrb.gmra.mxu3 %vm701_vm1, %v11929_v36 }
 0x269   : > { %9425 = vmatmul.msk.bf16.gmra.mxu1 %vm701_vm1, %v11972_v17  ;;  %9427 = vmatmul.msk.bf16.gmra.mxu2 %vm701_vm1, %v11972_v17 }
 0x26a   : > { %9430 = vmatmul.msk.bf16.vlgmr.msrb.gmra.mxu0 %vm701_vm1, %v11929_v36  ;;  %3151 = vmatpush.bf16.msrb.mxu3 %v3084_v37  ;;  %v16439_v37 = vld [vmem:[#allocation15_spill] sm:$0xff] }
 0x26b   : > { %v2373_v24 = vpop.f32.mrf.mxu3 }
 0x26c   : > { %v2359_v23 = vpop.f32.mrf.mxu2  ;;  %v12036_v22 = vadd.f32 %v2373_v24, %v11837_v9  ;;  %v3063_v40 = vpop.permute.xlu1 %3062 }
 0x26d   : > { %v12039_v1 = vadd.f32 %v2359_v23, %v11856_v8  ;;  %v3082_v9 = vsel %vm2797_vm5, %v3063_v40, %v3065_v52 }
 0x26e   : > { %v2342_v2 = vpop.f32.mrf.mxu1  ;;  %3113 = vmatpush.bf16.msra.mxu1 %v3082_v9 }
 0x26f   : > { %v12042_v42 = vadd.f32 %v2342_v2, %v11843_v59  ;;  %v2394_v44 = vpop.f32.mrf.mxu0 }
 0x270   : > { %v12045_v41 = vadd.f32 %v2394_v44, %v11887_v58 }
 0x273   : > { %v2375_v8 = vpop.f32.mrf.mxu3 }
 0x274   : > { %v2361_v59 = vpop.f32.mrf.mxu2  ;;  %v12057_v58 = vadd.f32 %v2375_v8, %v11852_v28  ;;  %v16436_v28 = vld [vmem:[#allocation13_spill] sm:$0xff]  ;;  %v3071_v8 = vpop.permute.xlu2 %3070 }
 0x275   : > { %v12060_v47 = vadd.f32 %v2361_v59, %v11879_v48  ;;  %3931 = vrot.lane.b32.xlu0 %v16436_v28, %s10318_s21  ;;  %v16437_v48 = vld [vmem:[#allocation8_spill] sm:$0xff]  ;;  %v16441_v59 = vld [vmem:[#allocation14_spill] sm:$0xff] }
 0x276   : > { %v2411_v52 = vpop.f32.mrf.mxu1  ;;  %3927 = vrot.lane.b32.xlu2 %v16437_v48, %s10318_s21  ;;  %v16452_v28 = vld [vmem:[#allocation24_spill] sm:$0xff] }
 0x277   : > { %v2397_v61 = vpop.f32.mrf.mxu0  ;;  %v12063_v33 = vadd.f32 %v2411_v52, %v11859_v15 }
 0x278   : > { %v12066_v7 = vadd.f32 %v2397_v61, %v11908_v3  ;;  %9429 = vmatmul.msk.bf16.gmra.mxu3 %vm701_vm1, %v11972_v17  ;;  %v16438_v3 = vld [vmem:[#allocation18_spill] sm:$0xff]  ;;  %v3085_v61 = vsel %vm2797_vm5, %v3069_v53, %v3071_v8 }
 0x279   : > { %9432 = vmatmul.msk.bf16.vlgmr.msrb.gmra.mxu1 %vm701_vm1, %v11929_v36  ;;  %9434 = vmatmul.msk.bf16.vlgmr.msrb.gmra.mxu2 %vm701_vm1, %v11929_v36 }
 0x27a   : > { %9431 = vmatmul.msk.bf16.gmra.mxu0 %vm701_vm1, %v11972_v17  ;;  %3913 = vrot.lane.b32.xlu1 %v16438_v3, %s10318_s21 }
 0x27b   : > { %v2378_v15 = vpop.f32.mrf.mxu3  ;;  %3170 = vmatpush.bf16.msrb.mxu0 %v3085_v61 }
 0x27c   : > { %v12083_v12 = vadd.f32 %v2378_v15, %v11875_v5  ;;  %v2430_v24 = vpop.f32.mrf.mxu2  ;;  %v16440_v5 = vld [vmem:[#allocation11_spill] sm:$0xff]  ;;  %v3077_v3 = vpop.permute.xlu2 %3076 }
 0x27d   : > { %v12086_v23 = vadd.f32 %v2430_v24, %v11894_v51  ;;  %3911 = vrot.lane.b32.xlu0 %v16439_v37, %s10318_s21  ;;  %v3075_v37 = vpop.permute.xlu1 %3074 }
 0x27e   : > { %v2413_v2 = vpop.f32.mrf.mxu1  ;;  %3907 = vrot.lane.b32.xlu2 %v16440_v5, %s10318_s21 }
 0x27f   : > { %v2399_v44 = vpop.f32.mrf.mxu0  ;;  %v12089_v40 = vadd.f32 %v2413_v2, %v11882_v38 }
 0x280   : > { %v12092_v62 = vadd.f32 %v2399_v44, %v11921_v32  ;;  %v16445_v44 = vld [vmem:[#allocation6_spill] sm:$0xff] }
 0x282   : > { %3935 = vrot.lane.b32.xlu1 %v16441_v59, %s10318_s21 }
 0x283   : > { %v2380_v9 = vpop.f32.mrf.mxu3 }
 0x284   : > { %v12101_v51 = vadd.f32 %v2380_v9, %v11890_v14  ;;  %v2432_v52 = vpop.f32.mrf.mxu2  ;;  %v16442_v14 = vld [vmem:[#allocation10_spill] sm:$0xff] }
 0x285   : > { %v12104_v38 = vadd.f32 %v2432_v52, %v11914_v11  ;;  %3909 = vrot.lane.b32.xlu0 %v16442_v14, %s10318_s21  ;;  %v16443_v11 = vld [vmem:[#allocation7_spill] sm:$0xff] }
 0x286   : > { %v2416_v32 = vpop.f32.mrf.mxu1  ;;  %3929 = vrot.lane.b32.xlu2 %v16443_v11, %s10318_s21 }
 0x287   : > { %v12108_v15 = vadd.f32 %v2416_v32, %v11897_v27  ;;  %v2563_v24 = vpop.f32.mrf.mxu0 }
 0x288   : > { %v12111_v2 = vadd.f32 %v2563_v24, %v11947_v18  ;;  %9436 = vmatmul.msk.bf16.vlgmr.msra.gmra.mxu3 %vm701_vm1, %v11929_v36  ;;  %v16444_v18 = vld [vmem:[#allocation22_spill] sm:$0xff] }
 0x289   : > { %9433 = vmatmul.msk.bf16.gmra.mxu1 %vm701_vm1, %v11972_v17  ;;  %9435 = vmatmul.msk.bf16.gmra.mxu2 %vm701_vm1, %v11972_v17 }
 0x28a   : > { %9438 = vmatmul.msk.bf16.vlgmr.msra.gmra.mxu0 %vm701_vm1, %v11929_v36  ;;  %4208 = vrot.lane.b32.xlu1 %v16444_v18, %s10318_s21  ;;  %v3086_v18 = vsel %vm2797_vm5, %v3071_v8, %v3073_v30  ;;  %v16448_v8 = vld [vmem:[#allocation25_spill] sm:$0xff] }
 0x28b   : > { %v2544_v27 = vpop.f32.mrf.mxu3  ;;  %3189 = vmatpush.bf16.msrb.mxu1 %v3086_v18 }
 0x28c   : > { %v2435_v53 = vpop.f32.mrf.mxu2  ;;  %v12128_v9 = vadd.f32 %v2544_v27, %v16445_v44  ;;  %v3087_v27 = vsel %vm2797_vm5, %v3073_v30, %v3075_v37  ;;  %v3088_v44 = vsel %vm2797_vm5, %v3075_v37, %v3077_v3  ;;  %v12157_v37 = vld [vmem:[%s16263_s4 + $0x40] sm:$0xff] }
 0x28d   : > { %v12131_v52 = vadd.f32 %v2435_v53, %v11933_v34  ;;  %v16446_v34 = vld [vmem:[#allocation19_spill] sm:$0xff]  ;;  %3208 = vmatpush.bf16.msrb.mxu2 %v3087_v27  ;;  %3227 = vmatpush.bf16.msra.mxu3 %v3088_v44 }
 0x28e   : > { %v2418_v32 = vpop.f32.mrf.mxu1  ;;  %4206 = vrot.lane.b32.xlu0 %v16446_v34, %s10318_s21  ;;  %v16449_v44 = vld [vmem:[#allocation23_spill] sm:$0xff] }
 0x28f   : > { %v12134_v36 = vadd.f32 %v2418_v32, %v11917_v25  ;;  %v2565_v61 = vpop.f32.mrf.mxu0  ;;  %v16447_v32 = vld [vmem:[#allocation16_spill] sm:$0xff] }
 0x290   : > { %v12137_v24 = vadd.f32 %v2565_v61, %v11962_v35  ;;  %3915 = vrot.lane.b32.xlu2 %v16447_v32, %s10318_s21 }
 0x292   : > { %4204 = vrot.lane.b32.xlu1 %v16448_v8, %s10318_s21 }
 0x293   : > { %v2546_v53 = vpop.f32.mrf.mxu3 }
 0x294   : > { %v2437_v25 = vpop.f32.mrf.mxu2  ;;  %v12145_v35 = vadd.f32 %v2546_v53, %v11924_v20 }
 0x295   : > { %v12152_v30 = vadd.f32 %v2437_v25, %v11956_v31  ;;  %v3351_v31 = vpop.permute.xlu1 %3350  ;;  %v16450_v25 = vld [vmem:[#allocation20_spill] sm:$0xff] }
 0x296   : > { %v2582_v18 = vpop.f32.mrf.mxu1  ;;  %3917 = vrot.lane.b32.xlu0 %v16449_v44, %s10318_s21 }
 0x297   : > { %v2568_v61 = vpop.f32.mrf.mxu0  ;;  %v12160_v27 = vadd.f32 %v2582_v18, %v11936_v57  ;;  %v16451_v18 = vld [vmem:[#allocation26_spill] sm:$0xff] }
 0x298   : > { %v12163_v20 = vadd.f32 %v2568_v61, %v11990_v4  ;;  %9437 = vmatmul.msk.bf16.gmra.mxu3 %vm701_vm1, %v11972_v17  ;;  %3937 = vrot.lane.b32.xlu2 %v16450_v25, %s10318_s21 }
 0x299   : > { %9452 = vmatmul.msk.bf16.vlgmr.msra.gmra.mxu1 %vm421_vm0, %v12157_v37  ;;  %9454 = vmatmul.msk.bf16.vlgmr.msra.gmra.mxu2 %vm421_vm0, %v12157_v37 }
 0x29a   : > { %9439 = vmatmul.msk.bf16.gmra.mxu0 %vm701_vm1, %v11972_v17  ;;  %4216 = vrot.lane.b32.xlu1 %v16451_v18, %s10318_s21 }
 0x29b   : > { %v2549_v57 = vpop.f32.mrf.mxu3 }
 0x29c   : > { %v12176_v4 = vadd.f32 %v2549_v57, %v11952_v54  ;;  %v2601_v53 = vpop.f32.mrf.mxu2  ;;  %v3349_v54 = vpop.permute.xlu0 %3348 }
 0x29d   : > { %v12183_v61 = vadd.f32 %v2601_v53, %v11976_v60  ;;  %v3378_v57 = vsel %vm3368_vm6, %v3349_v54, %v3351_v31  ;;  %v3331_v59 = vpop.permute.xlu1 %3330  ;;  %v3079_v60 = vpop.permute.xlu2 %3078 }
 0x29e   : > { %v2584_v34 = vpop.f32.mrf.mxu1  ;;  %3417 = vmatpush.bf16.msra.mxu2 %v3378_v57  ;;  %4214 = vrot.lane.b32.xlu0 %v16452_v28, %s10318_s21  ;;  %v3089_v54 = vsel %vm2797_vm5, %v3077_v3, %v3079_v60 }
 0x29f   : > { %v2570_v17 = vpop.f32.mrf.mxu0  ;;  %v12186_v32 = vadd.f32 %v2584_v34, %v11959_v13  ;;  %v16453_v13 = vld [vmem:[#allocation21_spill] sm:$0xff]  ;;  %v12205_v34 = vld [vmem:[%s16263_s4 + $0x48] sm:$0xff]  ;;  %3246 = vmatpush.bf16.msra.mxu0 %v3089_v54 }
 0x2a0   : > { %v12189_v8 = vadd.f32 %v2570_v17, %v12009_v46  ;;  %4210 = vrot.lane.b32.xlu2 %v16453_v13, %s10318_s21 }
 0x2a2   : > { %4492 = vrot.lane.b32.xlu1 %v16388_v10, %s10319_s13 }
 0x2a3   : > { %v2551_v18 = vpop.f32.mrf.mxu3 }
 0x2a4   : > { %v12195_v53 = vadd.f32 %v2551_v18, %v11967_v39  ;;  %v2603_v44 = vpop.f32.mrf.mxu2 }
 0x2a5   : > { %v12200_v46 = vadd.f32 %v2603_v44, %v11996_v26  ;;  %v3329_v26 = vpop.permute.xlu0 %3328 }
 0x2a6   : > { %v2587_v17 = vpop.f32.mrf.mxu1  ;;  %4490 = vrot.lane.b32.xlu0 %v10396_v6, %s10319_s13 }
 0x2a7   : > { %v12209_v57 = vadd.f32 %v2587_v17, %v11979_v49  ;;  %v2639_v39 = vpop.f32.mrf.mxu0  ;;  %v3353_v49 = vpop.permute.xlu1 %3352 }
 0x2a8   : > { %v12212_v18 = vadd.f32 %v2639_v39, %v12036_v22  ;;  %9456 = vmatmul.msk.bf16.vlgmr.msrb.gmra.mxu3 %vm421_vm0, %v12157_v37  ;;  %v16454_v22 = vld [vmem:[#allocation27_spill] sm:$0xff]  ;;  %v3379_v28 = vsel %vm3368_vm6, %v3351_v31, %v3353_v49 }
 0x2a9   : > { %9453 = vmatmul.msk.bf16.gmra.mxu1 %vm421_vm0, %v12205_v34  ;;  %9455 = vmatmul.msk.bf16.gmra.mxu2 %vm421_vm0, %v12205_v34 }
 0x2aa   : > { %9458 = vmatmul.msk.bf16.vlgmr.msrb.gmra.mxu0 %vm421_vm0, %v12157_v37  ;;  %4212 = vrot.lane.b32.xlu2 %v16454_v22, %s10318_s21 }
 0x2ab   : > { %v2620_v3 = vpop.f32.mrf.mxu3  ;;  %3436 = vmatpush.bf16.msrb.mxu3 %v3379_v28  ;;  %4472 = vrot.lane.b32.xlu1 %v16382_v56, %s10319_s13 }
 0x2ac   : > { %v2606_v44 = vpop.f32.mrf.mxu2  ;;  %v12223_v17 = vadd.f32 %v2620_v3, %v11993_v45  ;;  %v3369_v45 = vsel %vm3368_vm6, %v3329_v26, %v3331_v59  ;;  %v3357_v3 = vpop.permute.xlu2 %3356 }
 0x2ad   : > { %v12228_v54 = vadd.f32 %v2606_v44, %v12016_v63  ;;  %3418 = vmatpush.bf16.msra.mxu2 %v3369_v45  ;;  %v3081_v25 = vpop.permute.xlu0 %3080 }
 0x2ae   : > { %v2589_v39 = vpop.f32.mrf.mxu1  ;;  %v3090_v63 = vsel %vm2797_vm5, %v3079_v60, %v3081_v25  ;;  %4470 = vrot.lane.b32.xlu0 %v16386_v43, %s10319_s13 }
 0x2af   : > { %v12232_v13 = vadd.f32 %v2589_v39, %v11999_v55  ;;  %v2641_v14 = vpop.f32.mrf.mxu0  ;;  %v3333_v44 = vpop.permute.xlu1 %3332  ;;  %3265 = vmatpush.bf16.msra.mxu1 %v3090_v63  ;;  %v16455_v55 = vld [vmem:[#allocation30_spill] sm:$0xff] }
 0x2b0   : > { %v12235_v29 = vadd.f32 %v2641_v14, %v12057_v58  ;;  %v3370_v14 = vsel %vm3368_vm6, %v3331_v59, %v3333_v44 }
 0x2b1   : > { %3437 = vmatpush.bf16.msrb.mxu3 %v3370_v14 }
 0x2b2   : > { %4218 = vrot.lane.b32.xlu2 %v16455_v55, %s10318_s21 }
 0x2b3   : > { %v2622_v22 = vpop.f32.mrf.mxu3  ;;  %4494 = vrot.lane.b32.xlu1 %v16377_v0, %s10319_s13 }
 0x2b4   : > { %v2608_v11 = vpop.f32.mrf.mxu2  ;;  %v12240_v31 = vadd.f32 %v2622_v22, %v12012_v50  ;;  %v3337_v50 = vpop.permute.xlu2 %3336 }
 0x2b5   : > { %v12245_v58 = vadd.f32 %v2608_v11, %v12042_v42  ;;  %v3359_v42 = vpop.permute.xlu0 %3358  ;;  %v16456_v11 = vld [vmem:[#allocation28_spill] sm:$0xff] }
 0x2b6   : > { %v2658_v28 = vpop.f32.mrf.mxu1 }
 0x2b7   : > { %v2644_v26 = vpop.f32.mrf.mxu0  ;;  %v12249_v39 = vadd.f32 %v2658_v28, %v12019_v16  ;;  %v3355_v14 = vpop.permute.xlu1 %3354 }
 0x2b8   : > { %v12252_v25 = vadd.f32 %v2644_v26, %v12083_v12  ;;  %9457 = vmatmul.msk.bf16.gmra.mxu3 %vm421_vm0, %v12205_v34  ;;  %v3380_v26 = vsel %vm3368_vm6, %v3353_v49, %v3355_v14 }
 0x2b9   : > { %9460 = vmatmul.msk.bf16.vlgmr.msrb.gmra.mxu1 %vm421_vm0, %v12157_v37  ;;  %9462 = vmatmul.msk.bf16.vlgmr.msrb.gmra.mxu2 %vm421_vm0, %v12157_v37 }
 0x2ba   : > { %9459 = vmatmul.msk.bf16.gmra.mxu0 %vm421_vm0, %v12205_v34  ;;  %4220 = vrot.lane.b32.xlu2 %v16456_v11, %s10318_s21 }
 0x2bb   : > { %v2625_v16 = vpop.f32.mrf.mxu3  ;;  %3455 = vmatpush.bf16.msrb.mxu0 %v3380_v26  ;;  %4474 = vrot.lane.b32.xlu1 %v16414_v19, %s10319_s13 }
 0x2bc   : > { %v12263_v59 = vadd.f32 %v2625_v16, %v12039_v1  ;;  %v2677_v12 = vpop.f32.mrf.mxu2  ;;  %v3335_v55 = vpop.permute.xlu2 %3334 }
 0x2bd   : > { %v12268_v60 = vadd.f32 %v2677_v12, %v12063_v33  ;;  %v3339_v1 = vpop.permute.xlu0 %3338 }
 0x2be   : > { %v2660_v22 = vpop.f32.mrf.mxu1 }
 0x2bf   : > { %16457 = vst [vmem:[#allocation31_spill] sm:$0xff] %v12268_v60  ;;  %v2646_v45 = vpop.f32.mrf.mxu0  ;;  %v12271_v63 = vadd.f32 %v2660_v22, %v12045_v41  ;;  %v3371_v41 = vsel %vm3368_vm6, %v3333_v44, %v3335_v55 }
 0x2c0   : > { %v12274_v28 = vadd.f32 %v2646_v45, %v12101_v51  ;;  %3456 = vmatpush.bf16.msrb.mxu0 %v3371_v41 }
 0x2c2   : > { %4498 = vrot.lane.b32.xlu2 %v16437_v48, %s10319_s13 }
 0x2c3   : > { %v2627_v16 = vpop.f32.mrf.mxu3 }
 0x2c4   : > { %v12278_v11 = vadd.f32 %v2627_v16, %v12060_v47  ;;  %v2679_v33 = vpop.f32.mrf.mxu2 }
 0x2c5   : > { %v12281_v12 = vadd.f32 %v2679_v33, %v12089_v40  ;;  %v3361_v47 = vpop.permute.xlu0 %3360 }
 0x2c6   : > { %v2663_v60 = vpop.f32.mrf.mxu1  ;;  %v3383_v16 = vsel %vm3368_vm6, %v3359_v42, %v3361_v47 }
 0x2c7   : > { %v12285_v51 = vadd.f32 %v2663_v60, %v12066_v7  ;;  %v2849_v22 = vpop.f32.mrf.mxu0  ;;  %v3382_v60 = vsel %vm3368_vm6, %v3357_v3, %v3359_v42 }
 0x2c8   : > { %v12288_v49 = vadd.f32 %v2849_v22, %v12128_v9  ;;  %9464 = vmatmul.msk.bf16.vlgmr.msra.gmra.mxu3 %vm421_vm0, %v12157_v37  ;;  %v3381_v9 = vsel %vm3368_vm6, %v3355_v14, %v3357_v3  ;;  %3493 = vmatpush.bf16.msrb.mxu2 %v3382_v60  ;;  %v3365_v22 = vpop.permute.xlu1 %3364 }
 0x2c9   : > { %9461 = vmatmul.msk.bf16.gmra.mxu1 %vm421_vm0, %v12205_v34  ;;  %9463 = vmatmul.msk.bf16.gmra.mxu2 %vm421_vm0, %v12205_v34 }
 0x2ca   : > { %9466 = vmatmul.msk.bf16.vlgmr.msra.gmra.mxu0 %vm421_vm0, %v12157_v37  ;;  %3474 = vmatpush.bf16.msrb.mxu1 %v3381_v9  ;;  %v3373_v9 = vsel %vm3368_vm6, %v3337_v50, %v3339_v1 }
 0x2cb   : > { %v2696_v7 = vpop.f32.mrf.mxu3  ;;  %3512 = vmatpush.bf16.msra.mxu3 %v3383_v16  ;;  %4478 = vrot.lane.b32.xlu2 %v16440_v5, %s10319_s13 }
 0x2cc   : > { %v2682_v40 = vpop.f32.mrf.mxu2  ;;  %v12299_v44 = vadd.f32 %v2696_v7, %v12086_v23  ;;  %3494 = vmatpush.bf16.msrb.mxu2 %v3373_v9 }
 0x2cd   : > { %v12304_v45 = vadd.f32 %v2682_v40, %v12108_v15  ;;  %v3341_v7 = vpop.permute.xlu0 %3340  ;;  %v3372_v40 = vsel %vm3368_vm6, %v3335_v55, %v3337_v50 }
 0x2ce   : > { %v2665_v26 = vpop.f32.mrf.mxu1  ;;  %3475 = vmatpush.bf16.msrb.mxu1 %v3372_v40  ;;  %v3374_v60 = vsel %vm3368_vm6, %v3339_v1, %v3341_v7 }
 0x2cf   : > { %v12308_v33 = vadd.f32 %v2665_v26, %v12092_v62  ;;  %v2851_v41 = vpop.f32.mrf.mxu0  ;;  %v12324_v62 = vld [vmem:[%s16262_s3 + $0x50] sm:$0xff]  ;;  %3513 = vmatpush.bf16.msra.mxu3 %v3374_v60 }
 0x2d0   : > { %v12311_v23 = vadd.f32 %v2851_v41, %v12145_v35 }
 0x2d3   : > { %v2698_v14 = vpop.f32.mrf.mxu3  ;;  %4476 = vrot.lane.b32.xlu2 %v10516_v21, %s10319_s13 }
 0x2d4   : > { %v2684_v3 = vpop.f32.mrf.mxu2  ;;  %v12314_v15 = vadd.f32 %v2698_v14, %v12104_v38 }
 0x2d5   : > { %v12319_v42 = vadd.f32 %v2684_v3, %v12134_v36  ;;  %v3345_v36 = vpop.permute.xlu1 %3344  ;;  %v3363_v3 = vpop.permute.xlu0 %3362 }
 0x2d6   : > { %v2868_v35 = vpop.f32.mrf.mxu1  ;;  %v3384_v40 = vsel %vm3368_vm6, %v3361_v47, %v3363_v3 }
 0x2d7   : > { %v2854_v26 = vpop.f32.mrf.mxu0  ;;  %v12328_v38 = vadd.f32 %v2868_v35, %v12111_v2  ;;  %3531 = vmatpush.bf16.msra.mxu0 %v3384_v40 }
 0x2d8   : > { %v12331_v55 = vadd.f32 %v2854_v26, %v12176_v4  ;;  %9465 = vmatmul.msk.bf16.gmra.mxu3 %vm421_vm0, %v12205_v34 }
 0x2d9   : > { %9468 = vmatmul.msk.bf16.vlgmr.msra.gmra.mxu1 %vm421_vm0, %v12157_v37  ;;  %9482 = vmatmul.msk.bf16.vlgmr.msra.gmra.mxu2 %vm701_vm1, %v12324_v62 }
 0x2da   : > { %9467 = vmatmul.msk.bf16.gmra.mxu0 %vm421_vm0, %v12205_v34 }
 0x2db   : > { %v2701_v50 = vpop.f32.mrf.mxu3 }
 0x2dc   : > { %v12342_v2 = vadd.f32 %v2701_v50, %v12131_v52  ;;  %v2887_v1 = vpop.f32.mrf.mxu2 }
 0x2dd   : > { %v12345_v4 = vadd.f32 %v2887_v1, %v12160_v27  ;;  %v3343_v35 = vpop.permute.xlu1 %3342  ;;  %v3385_v1 = vsel %vm3368_vm6, %v3363_v3, %v3365_v22 }
 0x2de   : > { %v2870_v16 = vpop.f32.mrf.mxu1  ;;  %v3375_v26 = vsel %vm3368_vm6, %v3341_v7, %v3343_v35  ;;  %3550 = vmatpush.bf16.msra.mxu1 %v3385_v1  ;;  %v3376_v3 = vsel %vm3368_vm6, %v3343_v35, %v3345_v36 }
 0x2df   : > { %v2856_v41 = vpop.f32.mrf.mxu0  ;;  %v12348_v14 = vadd.f32 %v2870_v16, %v12137_v24  ;;  %v12363_v24 = vld [vmem:[%s16262_s3 + $0x58] sm:$0xff]  ;;  %3532 = vmatpush.bf16.msra.mxu0 %v3375_v26 }
 0x2e0   : > { %v12351_v37 = vadd.f32 %v2856_v41, %v12195_v53 }
 0x2e2   : > { %3551 = vmatpush.bf16.msra.mxu1 %v3376_v3  ;;  %v16460_v3 = vld [vmem:[#allocation20_spill] sm:$0xff] }
 0x2e3   : > { %v2703_v9 = vpop.f32.mrf.mxu3  ;;  %4508 = vrot.lane.b32.xlu2 %v16460_v3, %s10319_s13 }
 0x2e4   : > { %v12355_v52 = vadd.f32 %v2703_v9, %v12152_v30  ;;  %v2889_v60 = vpop.f32.mrf.mxu2 }
 0x2e5   : > { %v12358_v27 = vadd.f32 %v2889_v60, %v12186_v32  ;;  %v3367_v32 = vpop.permute.xlu2 %3366 }
 0x2e6   : > { %v2873_v53 = vpop.f32.mrf.mxu1  ;;  %v3386_v7 = vsel %vm3368_vm6, %v3365_v22, %v3367_v32 }
 0x2e7   : > { %v12367_v47 = vadd.f32 %v2873_v53, %v12163_v20  ;;  %v2925_v50 = vpop.f32.mrf.mxu0  ;;  %3569 = vmatpush.bf16.msra.mxu2 %v3386_v7 }
 0x2e8   : > { %v12370_v30 = vadd.f32 %v2925_v50, %v12223_v17  ;;  %9484 = vmatmul.msk.bf16.vlgmr.msrb.gmra.mxu3 %vm701_vm1, %v12324_v62 }
 0x2e9   : > { %9469 = vmatmul.msk.bf16.gmra.mxu1 %vm421_vm0, %v12205_v34  ;;  %9483 = vmatmul.msk.bf16.gmra.mxu2 %vm701_vm1, %v12363_v24 }
 0x2ea   : > { %9486 = vmatmul.msk.bf16.vlgmr.msrb.gmra.mxu0 %vm701_vm1, %v12324_v62 }
 0x2eb   : > { %v2906_v20 = vpop.f32.mrf.mxu3 }
 0x2ec   : > { %v2892_v17 = vpop.f32.mrf.mxu2  ;;  %v12386_v34 = vadd.f32 %v2906_v20, %v12183_v61 }
 0x2ed   : > { %v12392_v16 = vadd.f32 %v2892_v17, %v12209_v57  ;;  %v3347_v61 = vpop.permute.xlu2 %3346 }
 0x2ee   : > { %v2875_v41 = vpop.f32.mrf.mxu1 }
 0x2ef   : > { %v12395_v40 = vadd.f32 %v2875_v41, %v12189_v8  ;;  %v2927_v9 = vpop.f32.mrf.mxu0  ;;  %v3377_v8 = vsel %vm3368_vm6, %v3345_v36, %v3347_v61 }
 0x2f0   : > { %v12398_v60 = vadd.f32 %v2927_v9, %v12240_v31  ;;  %3570 = vmatpush.bf16.msra.mxu2 %v3377_v8 }
 0x2f3   : > { %v2908_v53 = vpop.f32.mrf.mxu3 }
 0x2f4   : > { %v2894_v22 = vpop.f32.mrf.mxu2  ;;  %v12405_v57 = vadd.f32 %v2908_v53, %v12200_v46 }
 0x2f5   : > { %v12412_v31 = vadd.f32 %v2894_v22, %v12232_v13  ;;  %v3636_v13 = vpop.permute.xlu0 %3635  ;;  %v3634_v9 = vpop.permute.xlu2 %3633 }
 0x2f6   : > { %v2944_v26 = vpop.f32.mrf.mxu1  ;;  %v3653_v61 = vsel %vm3368_vm6, %v3634_v9, %v3636_v13  ;;  %v16464_v9 = vld [vmem:[#allocation23_spill] sm:$0xff] }
 0x2f7   : > { %v2930_v50 = vpop.f32.mrf.mxu0  ;;  %v12415_v32 = vadd.f32 %v2944_v26, %v12212_v18  ;;  %v16458_v18 = vld [vmem:[#allocation29_spill] sm:$0xff]  ;;  %3684 = vmatpush.bf16.msrb.mxu3 %v3653_v61  ;;  %4488 = vrot.lane.b32.xlu2 %v16464_v9, %s10319_s13 }
 0x2f8   : > { %v12418_v46 = vadd.f32 %v2930_v50, %v12263_v59  ;;  %9485 = vmatmul.msk.bf16.gmra.mxu3 %vm701_vm1, %v12363_v24  ;;  %4222 = vrot.lane.b32.xlu0 %v16458_v18, %s10318_s21 }
 0x2f9   : > { %9488 = vmatmul.msk.bf16.vlgmr.msrb.gmra.mxu1 %vm701_vm1, %v12324_v62  ;;  %9490 = vmatmul.msk.bf16.vlgmr.msrb.gmra.mxu2 %vm701_vm1, %v12324_v62 }
 0x2fa   : > { %9487 = vmatmul.msk.bf16.gmra.mxu0 %vm701_vm1, %v12363_v24 }
 0x2fb   : > { %v2911_v36 = vpop.f32.mrf.mxu3 }
 0x2fc   : > { %v12433_v59 = vadd.f32 %v2911_v36, %v12228_v54  ;;  %v2963_v35 = vpop.f32.mrf.mxu2 }
 0x2fd   : > { %v12438_v20 = vadd.f32 %v2963_v35, %v12249_v39  ;;  %v3638_v53 = vpop.permute.xlu0 %3637  ;;  %v16459_v39 = vld [vmem:[#allocation7_spill] sm:$0xff] }
 0x2fe   : > { %v2946_v7 = vpop.f32.mrf.mxu1  ;;  %v3654_v26 = vsel %vm3368_vm6, %v3636_v13, %v3638_v53 }
 0x2ff   : > { %v2932_v17 = vpop.f32.mrf.mxu0  ;;  %v12441_v1 = vadd.f32 %v2946_v7, %v12235_v29  ;;  %3703 = vmatpush.bf16.msrb.mxu0 %v3654_v26  ;;  %v16463_v7 = vld [vmem:[#allocation31_spill] sm:$0xff] }
 0x300   : > { %v12444_v41 = vadd.f32 %v2932_v17, %v12278_v11  ;;  %4500 = vrot.lane.b32.xlu0 %v16459_v39, %s10319_s13 }
 0x303   : > { %v2913_v54 = vpop.f32.mrf.mxu3 }
 0x304   : > { %v12452_v22 = vadd.f32 %v2913_v54, %v12245_v58  ;;  %v2965_v29 = vpop.f32.mrf.mxu2  ;;  %v3640_v58 = vpop.permute.xlu1 %3639 }
 0x305   : > { %v12457_v11 = vadd.f32 %v2965_v29, %v12271_v63  ;;  %v16461_v63 = vld [vmem:[#allocation12_spill] sm:$0xff]  ;;  %v3655_v39 = vsel %vm3368_vm6, %v3638_v53, %v3640_v58  ;;  %v16467_v53 = vld [vmem:[#allocation25_spill] sm:$0xff] }
 0x306   : > { %v2949_v8 = vpop.f32.mrf.mxu1  ;;  %4496 = vrot.lane.b32.xlu1 %v16461_v63, %s10319_s13  ;;  %3722 = vmatpush.bf16.msrb.mxu1 %v3655_v39 }
 0x307   : > { %v12461_v50 = vadd.f32 %v2949_v8, %v12252_v25  ;;  %v3001_v36 = vpop.f32.mrf.mxu0  ;;  %4775 = vrot.lane.b32.xlu2 %v16467_v53, %s10319_s13 }
 0x308   : > { %v12464_v35 = vadd.f32 %v3001_v36, %v12299_v44  ;;  %9492 = vmatmul.msk.bf16.vlgmr.msra.gmra.mxu3 %vm701_vm1, %v12324_v62  ;;  %v16462_v44 = vld [vmem:[#allocation10_spill] sm:$0xff]  ;;  %v3642_v36 = vpop.permute.xlu2 %3641 }
 0x309   : > { %9489 = vmatmul.msk.bf16.gmra.mxu1 %vm701_vm1, %v12363_v24  ;;  %9491 = vmatmul.msk.bf16.gmra.mxu2 %vm701_vm1, %v12363_v24 }
 0x30a   : > { %9494 = vmatmul.msk.bf16.vlgmr.msra.gmra.mxu0 %vm701_vm1, %v12324_v62  ;;  %4480 = vrot.lane.b32.xlu0 %v16462_v44, %s10319_s13 }
 0x30b   : > { %v2982_v25 = vpop.f32.mrf.mxu3 }
 0x30c   : > { %v2968_v13 = vpop.f32.mrf.mxu2  ;;  %v12479_v17 = vadd.f32 %v2982_v25, %v16463_v7  ;;  %v3644_v3 = vpop.permute.xlu1 %3643  ;;  %v3656_v25 = vsel %vm3368_vm6, %v3640_v58, %v3642_v36 }
 0x30d   : > { %v12484_v61 = vadd.f32 %v2968_v13, %v12285_v51  ;;  %v3657_v7 = vsel %vm3368_vm6, %v3642_v36, %v3644_v3  ;;  %3741 = vmatpush.bf16.msrb.mxu2 %v3656_v25  ;;  %v16465_v13 = vld [vmem:[#allocation13_spill] sm:$0xff] }
 0x30e   : > { %v2951_v54 = vpop.f32.mrf.mxu1  ;;  %3760 = vmatpush.bf16.msra.mxu3 %v3657_v7 }
 0x30f   : > { %v12487_v29 = vadd.f32 %v2951_v54, %v12274_v28  ;;  %v3003_v8 = vpop.f32.mrf.mxu0  ;;  %v16466_v28 = vld [vmem:[#allocation14_spill] sm:$0xff] }
 0x310   : > { %v12490_v26 = vadd.f32 %v3003_v8, %v12314_v15  ;;  %4506 = vrot.lane.b32.xlu1 %v16466_v28, %s10319_s13  ;;  %v3648_v28 = vpop.permute.xlu2 %3647 }
 0x312   : > { %4502 = vrot.lane.b32.xlu0 %v16465_v13, %s10319_s13 }
 0x313   : > { %v2984_v51 = vpop.f32.mrf.mxu3 }
 0x314   : > { %v2970_v15 = vpop.f32.mrf.mxu2  ;;  %v12500_v54 = vadd.f32 %v2984_v51, %v12281_v12  ;;  %v16470_v51 = vld [vmem:[#allocation27_spill] sm:$0xff] }
 0x315   : > { %v12505_v39 = vadd.f32 %v2970_v15, %v12308_v33  ;;  %v16468_v33 = vld [vmem:[#allocation15_spill] sm:$0xff]  ;;  %4783 = vrot.lane.b32.xlu2 %v16470_v51, %s10319_s13 }
 0x316   : > { %v3115_v58 = vpop.f32.mrf.mxu1 }
 0x317   : > { %v3006_v8 = vpop.f32.mrf.mxu0  ;;  %v12508_v36 = vadd.f32 %v3115_v58, %v12288_v49  ;;  %v16469_v49 = vld [vmem:[#allocation16_spill] sm:$0xff] }
 0x318   : > { %v12511_v25 = vadd.f32 %v3006_v8, %v12342_v2  ;;  %9493 = vmatmul.msk.bf16.gmra.mxu3 %vm701_vm1, %v12363_v24  ;;  %4486 = vrot.lane.b32.xlu1 %v16469_v49, %s10319_s13  ;;  %v3646_v49 = vpop.permute.xlu1 %3645 }
 0x319   : > { %9496 = vmatmul.msk.bf16.vlgmr.msra.gmra.mxu1 %vm701_vm1, %v12324_v62  ;;  %9498 = vmatmul.msk.bf16.vlgmr.msra.gmra.mxu2 %vm701_vm1, %v12324_v62 }
 0x31a   : > { %9495 = vmatmul.msk.bf16.gmra.mxu0 %vm701_vm1, %v12363_v24  ;;  %4482 = vrot.lane.b32.xlu0 %v16468_v33, %s10319_s13  ;;  %v3924_v33 = vpop.permute.xlu2 %3923 }
 0x31b   : > { %v2987_v12 = vpop.f32.mrf.mxu3 }
 0x31c   : > { %v12526_v2 = vadd.f32 %v2987_v12, %v12304_v45  ;;  %v3134_v7 = vpop.f32.mrf.mxu2  ;;  %v16471_v45 = vld [vmem:[#allocation17_spill] sm:$0xff]  ;;  %v16472_v12 = vld [vmem:[#allocation18_spill] sm:$0xff] }
 0x31d   : > { %v12531_v15 = vadd.f32 %v3134_v7, %v12328_v38 }
 0x31e   : > { %v3117_v62 = vpop.f32.mrf.mxu1 }
 0x31f   : > { %v3008_v58 = vpop.f32.mrf.mxu0  ;;  %v12534_v8 = vadd.f32 %v3117_v62, %v12311_v23  ;;  %v12549_v23 = vld [vmem:[%s16263_s4 + $0x50] sm:$0xff] }
 0x320   : > { %v12537_v9 = vadd.f32 %v3008_v58, %v12355_v52  ;;  %4484 = vrot.lane.b32.xlu1 %v16472_v12, %s10319_s13  ;;  %v16473_v52 = vld [vmem:[#allocation30_spill] sm:$0xff]  ;;  %v3658_v58 = vsel %vm3368_vm6, %v3644_v3, %v3646_v49  ;;  %v16474_v3 = vld [vmem:[#allocation19_spill] sm:$0xff]  ;;  %v3659_v12 = vsel %vm3368_vm6, %v3646_v49, %v3648_v28 }
 0x321   : > { %4789 = vrot.lane.b32.xlu2 %v16473_v52, %s10319_s13  ;;  %3779 = vmatpush.bf16.msra.mxu0 %v3658_v58 }
 0x322   : > { %4504 = vrot.lane.b32.xlu0 %v16471_v45, %s10319_s13  ;;  %3798 = vmatpush.bf16.msra.mxu1 %v3659_v12 }
 0x323   : > { %v2989_v53 = vpop.f32.mrf.mxu3 }
 0x324   : > { %v12544_v51 = vadd.f32 %v2989_v53, %v12319_v42  ;;  %v3136_v38 = vpop.f32.mrf.mxu2 }
 0x325   : > { %v12554_v7 = vadd.f32 %v3136_v38, %v12348_v14 }
 0x326   : > { %v3120_v62 = vpop.f32.mrf.mxu1 }
 0x327   : > { %v12558_v44 = vadd.f32 %v3120_v62, %v12331_v55  ;;  %v3172_v42 = vpop.f32.mrf.mxu0  ;;  %v3650_v55 = vpop.permute.xlu0 %3649 }
 0x328   : > { %v12561_v53 = vadd.f32 %v3172_v42, %v12386_v34  ;;  %9512 = vmatmul.msk.bf16.vlgmr.msrb.gmra.mxu3 %vm421_vm0, %v12549_v23  ;;  %v16475_v34 = vld [vmem:[#allocation21_spill] sm:$0xff] }
 0x329   : > { %9497 = vmatmul.msk.bf16.gmra.mxu1 %vm701_vm1, %v12363_v24  ;;  %9499 = vmatmul.msk.bf16.gmra.mxu2 %vm701_vm1, %v12363_v24 }
 0x32a   : > { %9514 = vmatmul.msk.bf16.vlgmr.msrb.gmra.mxu0 %vm421_vm0, %v12549_v23  ;;  %4777 = vrot.lane.b32.xlu0 %v16474_v3, %s10319_s13  ;;  %v3652_v3 = vpop.permute.xlu1 %3651 }
 0x32b   : > { %v3153_v14 = vpop.f32.mrf.mxu3  ;;  %4781 = vrot.lane.b32.xlu1 %v16475_v34, %s10319_s13  ;;  %v3660_v34 = vsel %vm3368_vm6, %v3648_v28, %v3650_v55  ;;  %v12600_v28 = vld [vmem:[%s16263_s4 + $0x58] sm:$0xff]  ;;  %5065 = vrot.lane.b32.xlu2 %v16377_v0, %s10320_s26 }
 0x32c   : > { %v3139_v38 = vpop.f32.mrf.mxu2  ;;  %v12576_v62 = vadd.f32 %v3153_v14, %v12345_v4  ;;  %v3661_v4 = vsel %vm3368_vm6, %v3650_v55, %v3652_v3  ;;  %3817 = vmatpush.bf16.msra.mxu2 %v3660_v34 }
 0x32d   : > { %v12579_v58 = vadd.f32 %v3139_v38, %v12367_v47  ;;  %3836 = vmatpush.bf16.msrb.mxu3 %v3661_v4  ;;  %v16477_v38 = vld [vmem:[#allocation24_spill] sm:$0xff]  ;;  %v16478_v4 = vld [vmem:[#allocation26_spill] sm:$0xff] }
 0x32e   : > { %v3122_v42 = vpop.f32.mrf.mxu1 }
 0x32f   : > { %v12582_v24 = vadd.f32 %v3122_v42, %v12351_v37  ;;  %v3174_v52 = vpop.f32.mrf.mxu0  ;;  %v3926_v47 = vpop.permute.xlu0 %3925  ;;  %v16476_v37 = vld [vmem:[#allocation22_spill] sm:$0xff] }
 0x330   : > { %v12585_v5 = vadd.f32 %v3174_v52, %v12405_v57 }
 0x332   : > { %4779 = vrot.lane.b32.xlu0 %v16476_v37, %s10319_s13  ;;  %v3920_v42 = vpop.permute.xlu1 %3919 }
 0x333   : > { %v3155_v14 = vpop.f32.mrf.mxu3  ;;  %4785 = vrot.lane.b32.xlu1 %v16477_v38, %s10319_s13  ;;  %5045 = vrot.lane.b32.xlu2 %v16414_v19, %s10320_s26 }
 0x334   : > { %v3141_v57 = vpop.f32.mrf.mxu2  ;;  %v12595_v52 = vadd.f32 %v3155_v14, %v12358_v27  ;;  %v3904_v27 = vpop.permute.xlu2 %3903 }
 0x335   : > { %v12603_v49 = vadd.f32 %v3141_v57, %v12395_v40 }
 0x336   : > { %v3191_v12 = vpop.f32.mrf.mxu1 }
 0x337   : > { %v3177_v55 = vpop.f32.mrf.mxu0  ;;  %v12606_v3 = vadd.f32 %v3191_v12, %v12370_v30  ;;  %v3906_v40 = vpop.permute.xlu0 %3905 }
 0x338   : > { %v12609_v34 = vadd.f32 %v3177_v55, %v12433_v59  ;;  %9513 = vmatmul.msk.bf16.gmra.mxu3 %vm421_vm0, %v12600_v28  ;;  %v16479_v59 = vld [vmem:[#allocation28_spill] sm:$0xff] }
 0x339   : > { %9516 = vmatmul.msk.bf16.vlgmr.msrb.gmra.mxu1 %vm421_vm0, %v12549_v23  ;;  %9518 = vmatmul.msk.bf16.vlgmr.msrb.gmra.mxu2 %vm421_vm0, %v12549_v23 }
 0x33a   : > { %9515 = vmatmul.msk.bf16.gmra.mxu0 %vm421_vm0, %v12600_v28  ;;  %4791 = vrot.lane.b32.xlu0 %v16479_v59, %s10319_s13 }
 0x33b   : > { %v3158_v30 = vpop.f32.mrf.mxu3  ;;  %4787 = vrot.lane.b32.xlu1 %v16478_v4, %s10319_s13  ;;  %5063 = vrot.lane.b32.xlu2 %v16388_v10, %s10320_s26  ;;  %v16481_v10 = vld [vmem:[#allocation13_spill] sm:$0xff] }
 0x33c   : > { %v12624_v14 = vadd.f32 %v3158_v30, %v12392_v16  ;;  %v3210_v57 = vpop.f32.mrf.mxu2  ;;  %v3922_v13 = vpop.permute.xlu2 %3921 }
 0x33d   : > { %v12627_v12 = vadd.f32 %v3210_v57, %v12415_v32  ;;  %v3949_v4 = vsel %vm3939_vm7, %v3920_v42, %v3922_v13  ;;  %v3902_v30 = vpop.permute.xlu1 %3901 }
 0x33e   : > { %v3193_v55 = vpop.f32.mrf.mxu1  ;;  %3988 = vmatpush.bf16.msrb.mxu0 %v3949_v4 }
 0x33f   : > { %v3179_v38 = vpop.f32.mrf.mxu0  ;;  %v12630_v37 = vadd.f32 %v3193_v55, %v12398_v60  ;;  %v3900_v59 = vpop.permute.xlu0 %3899 }
 0x340   : > { %v12633_v48 = vadd.f32 %v3179_v38, %v12452_v22  ;;  %v3940_v38 = vsel %vm3939_vm7, %v3900_v59, %v3902_v30 }
 0x342   : > { %3989 = vmatpush.bf16.msrb.mxu0 %v3940_v38  ;;  %5067 = vrot.lane.b32.xlu0 %v16461_v63, %s10320_s26 }
 0x343   : > { %v3160_v16 = vpop.f32.mrf.mxu3  ;;  %4793 = vrot.lane.b32.xlu1 %v16458_v18, %s10319_s13 }
 0x344   : > { %v12639_v32 = vadd.f32 %v3160_v16, %v12412_v31  ;;  %v3212_v57 = vpop.f32.mrf.mxu2  ;;  %v3950_v31 = vsel %vm3939_vm7, %v3922_v13, %v3924_v33  ;;  %v3951_v16 = vsel %vm3939_vm7, %v3924_v33, %v3926_v47 }
 0x345   : > { %v12642_v60 = vadd.f32 %v3212_v57, %v12441_v1  ;;  %4007 = vmatpush.bf16.msrb.mxu1 %v3950_v31  ;;  %4026 = vmatpush.bf16.msrb.mxu2 %v3951_v16  ;;  %v3941_v31 = vsel %vm3939_vm7, %v3902_v30, %v3904_v27  ;;  %v3942_v16 = vsel %vm3939_vm7, %v3904_v27, %v3906_v40 }
 0x346   : > { %v3196_v22 = vpop.f32.mrf.mxu1 }
 0x347   : > { %v12646_v55 = vadd.f32 %v3196_v22, %v12418_v46  ;;  %v3248_v42 = vpop.f32.mrf.mxu0  ;;  %v3928_v46 = vpop.permute.xlu2 %3927 }
 0x348   : > { %v12649_v4 = vadd.f32 %v3248_v42, %v12479_v17  ;;  %9520 = vmatmul.msk.bf16.vlgmr.msra.gmra.mxu3 %vm421_vm0, %v12549_v23  ;;  %v3952_v57 = vsel %vm3939_vm7, %v3926_v47, %v3928_v46 }
 0x349   : > { %9517 = vmatmul.msk.bf16.gmra.mxu1 %vm421_vm0, %v12600_v28  ;;  %9519 = vmatmul.msk.bf16.gmra.mxu2 %vm421_vm0, %v12600_v28 }
 0x34a   : > { %9522 = vmatmul.msk.bf16.vlgmr.msra.gmra.mxu0 %vm421_vm0, %v12549_v23  ;;  %4045 = vmatpush.bf16.msra.mxu3 %v3952_v57 }
 0x34b   : > { %v3229_v1 = vpop.f32.mrf.mxu3  ;;  %4008 = vmatpush.bf16.msrb.mxu1 %v3941_v31  ;;  %4027 = vmatpush.bf16.msrb.mxu2 %v3942_v16 }
 0x34c   : > { %v3215_v17 = vpop.f32.mrf.mxu2  ;;  %v12662_v59 = vadd.f32 %v3229_v1, %v12438_v20  ;;  %v3932_v20 = vpop.permute.xlu0 %3931  ;;  %5061 = vrot.lane.b32.xlu1 %v10396_v6, %s10320_s26  ;;  %5047 = vrot.lane.b32.xlu0 %v10516_v21, %s10320_s26 }
 0x34d   : > { %v12665_v13 = vadd.f32 %v3215_v17, %v12461_v50 }
 0x34e   : > { %v3198_v33 = vpop.f32.mrf.mxu1 }
 0x34f   : > { %v12669_v22 = vadd.f32 %v3198_v33, %v12444_v41  ;;  %v3250_v38 = vpop.f32.mrf.mxu0  ;;  %v3908_v1 = vpop.permute.xlu2 %3907 }
 0x350   : > { %v12672_v42 = vadd.f32 %v3250_v38, %v12500_v54  ;;  %v3943_v54 = vsel %vm3939_vm7, %v3906_v40, %v3908_v1 }
 0x351   : > { %4046 = vmatpush.bf16.msra.mxu3 %v3943_v54 }
 0x353   : > { %v3231_v50 = vpop.f32.mrf.mxu3 }
 0x354   : > { %v3217_v17 = vpop.f32.mrf.mxu2  ;;  %v12677_v47 = vadd.f32 %v3231_v50, %v12457_v11  ;;  %v3912_v11 = vpop.permute.xlu0 %3911  ;;  %5043 = vrot.lane.b32.xlu1 %v16382_v56, %s10320_s26  ;;  %5041 = vrot.lane.b32.xlu0 %v16386_v43, %s10320_s26 }
 0x355   : > { %v12680_v41 = vadd.f32 %v3217_v17, %v12487_v29  ;;  %v3934_v29 = vpop.permute.xlu1 %3933 }
 0x356   : > { %v3267_v33 = vpop.f32.mrf.mxu1 }
 0x357   : > { %v3253_v57 = vpop.f32.mrf.mxu0  ;;  %v12684_v30 = vadd.f32 %v3267_v33, %v12464_v35  ;;  %v3930_v33 = vpop.permute.xlu2 %3929 }
 0x358   : > { %v12687_v27 = vadd.f32 %v3253_v57, %v12526_v2  ;;  %9521 = vmatmul.msk.bf16.gmra.mxu3 %vm421_vm0, %v12600_v28  ;;  %v3953_v54 = vsel %vm3939_vm7, %v3928_v46, %v3930_v33 }
 0x359   : > { %9524 = vmatmul.msk.bf16.vlgmr.msra.gmra.mxu1 %vm421_vm0, %v12549_v23  ;;  %9526 = vmatmul.msk.bf16.vlgmr.msra.gmra.mxu2 %vm421_vm0, %v12549_v23 }
 0x35a   : > { %9523 = vmatmul.msk.bf16.gmra.mxu0 %vm421_vm0, %v12600_v28 }
 0x35b   : > { %v3234_v35 = vpop.f32.mrf.mxu3  ;;  %4064 = vmatpush.bf16.msra.mxu0 %v3953_v54 }
 0x35c   : > { %v12698_v40 = vadd.f32 %v3234_v35, %v12484_v61  ;;  %v3420_v2 = vpop.f32.mrf.mxu2  ;;  %v3910_v61 = vpop.permute.xlu0 %3909  ;;  %5075 = vrot.lane.b32.xlu1 %v16471_v45, %s10320_s26  ;;  %5073 = vrot.lane.b32.xlu0 %v16481_v10, %s10320_s26 }
 0x35d   : > { %v12701_v38 = vadd.f32 %v3420_v2, %v12508_v36  ;;  %v3914_v57 = vpop.permute.xlu1 %3913 }
 0x35e   : > { %v3269_v31 = vpop.f32.mrf.mxu1 }
 0x35f   : > { %16480 = vst [vmem:[#allocation33_spill] sm:$0xff] %v12701_v38  ;;  %v3255_v16 = vpop.f32.mrf.mxu0  ;;  %v12704_v50 = vadd.f32 %v3269_v31, %v12490_v26  ;;  %v12719_v26 = vld [vmem:[%s16262_s3 + $0x60] sm:$0xff] }
 0x360   : > { %v12707_v17 = vadd.f32 %v3255_v16, %v12544_v51  ;;  %v3944_v51 = vsel %vm3939_vm7, %v3908_v1, %v3910_v61 }
 0x361   : > { %4065 = vmatpush.bf16.msra.mxu0 %v3944_v51 }
 0x363   : > { %v3236_v18 = vpop.f32.mrf.mxu3 }
 0x364   : > { %v12711_v35 = vadd.f32 %v3236_v18, %v12505_v39  ;;  %v3422_v36 = vpop.f32.mrf.mxu2 }
 0x365   : > { %v12714_v2 = vadd.f32 %v3422_v36, %v12534_v8 }
 0x366   : > { %v3272_v38 = vpop.f32.mrf.mxu1 }
 0x367   : > { %v12723_v46 = vadd.f32 %v3272_v38, %v12511_v25  ;;  %v3458_v31 = vpop.f32.mrf.mxu0  ;;  %v3936_v25 = vpop.permute.xlu1 %3935  ;;  %v3955_v38 = vsel %vm3939_vm7, %v3932_v20, %v3934_v29 }
 0x368   : > { %v12726_v18 = vadd.f32 %v3458_v31, %v12576_v62  ;;  %9528 = vmatmul.msk.bf16.vlgmr.msrb.gmra.mxu3 %vm421_vm0, %v12549_v23  ;;  %v3954_v62 = vsel %vm3939_vm7, %v3930_v33, %v3932_v20  ;;  %4102 = vmatpush.bf16.msra.mxu2 %v3955_v38  ;;  %v3956_v54 = vsel %vm3939_vm7, %v3934_v29, %v3936_v25  ;;  %v3916_v33 = vpop.permute.xlu2 %3915 }
 0x369   : > { %9525 = vmatmul.msk.bf16.gmra.mxu1 %vm421_vm0, %v12600_v28  ;;  %9527 = vmatmul.msk.bf16.gmra.mxu2 %vm421_vm0, %v12600_v28 }
 0x36a   : > { %9542 = vmatmul.msk.bf16.vlgmr.msrb.gmra.mxu0 %vm701_vm1, %v12719_v26  ;;  %4083 = vmatpush.bf16.msra.mxu1 %v3954_v62  ;;  %v3947_v62 = vsel %vm3939_vm7, %v3914_v57, %v3916_v33 }
 0x36b   : > { %v3439_v39 = vpop.f32.mrf.mxu3  ;;  %4121 = vmatpush.bf16.msrb.mxu3 %v3956_v54 }
 0x36c   : > { %v3425_v8 = vpop.f32.mrf.mxu2  ;;  %v12737_v1 = vadd.f32 %v3439_v39, %v12531_v15 }
 0x36d   : > { %v12742_v23 = vadd.f32 %v3425_v8, %v12558_v44  ;;  %v3945_v44 = vsel %vm3939_vm7, %v3910_v61, %v3912_v11  ;;  %v3946_v8 = vsel %vm3939_vm7, %v3912_v11, %v3914_v57 }
 0x36e   : > { %v3274_v16 = vpop.f32.mrf.mxu1  ;;  %4084 = vmatpush.bf16.msra.mxu1 %v3945_v44  ;;  %4103 = vmatpush.bf16.msra.mxu2 %v3946_v8 }
 0x36f   : > { %v12746_v36 = vadd.f32 %v3274_v16, %v12537_v9  ;;  %v3460_v51 = vpop.f32.mrf.mxu0  ;;  %4122 = vmatpush.bf16.msrb.mxu3 %v3947_v62  ;;  %v4209_v0 = vpop.permute.xlu1 %4208 }
 0x370   : > { %v12749_v15 = vadd.f32 %v3460_v51, %v12595_v52  ;;  %v12762_v52 = vld [vmem:[%s16262_s3 + $0x68] sm:$0xff] }
 0x373   : > { %v3441_v31 = vpop.f32.mrf.mxu3 }
 0x374   : > { %v3427_v39 = vpop.f32.mrf.mxu2  ;;  %v12752_v20 = vadd.f32 %v3441_v31, %v12554_v7  ;;  %v3938_v31 = vpop.permute.xlu2 %3937 }
 0x375   : > { %v12757_v29 = vadd.f32 %v3427_v39, %v12582_v24  ;;  %v4207_v24 = vpop.permute.xlu0 %4206  ;;  %v3957_v39 = vsel %vm3939_vm7, %v3936_v25, %v3938_v31 }
 0x376   : > { %v3477_v9 = vpop.f32.mrf.mxu1  ;;  %4140 = vmatpush.bf16.msrb.mxu0 %v3957_v39 }
 0x377   : > { %v3463_v38 = vpop.f32.mrf.mxu0  ;;  %v12766_v7 = vadd.f32 %v3477_v9, %v12561_v53  ;;  %v4205_v56 = vpop.permute.xlu1 %4204 }
 0x378   : > { %v12769_v11 = vadd.f32 %v3463_v38, %v12624_v14  ;;  %9529 = vmatmul.msk.bf16.gmra.mxu3 %vm421_vm0, %v12600_v28 }
 0x379   : > { %9544 = vmatmul.msk.bf16.vlgmr.msrb.gmra.mxu1 %vm701_vm1, %v12719_v26  ;;  %9546 = vmatmul.msk.bf16.vlgmr.msrb.gmra.mxu2 %vm701_vm1, %v12719_v26 }
 0x37a   : > { %9543 = vmatmul.msk.bf16.gmra.mxu0 %vm701_vm1, %v12762_v52 }
 0x37b   : > { %v3444_v57 = vpop.f32.mrf.mxu3 }
 0x37c   : > { %v12780_v53 = vadd.f32 %v3444_v57, %v12579_v58  ;;  %v3496_v61 = vpop.f32.mrf.mxu2 }
 0x37d   : > { %v12783_v14 = vadd.f32 %v3496_v61, %v12606_v3  ;;  %v4225_v61 = vsel %vm3939_vm7, %v4207_v24, %v4209_v0 }
 0x37e   : > { %v3479_v16 = vpop.f32.mrf.mxu1  ;;  %4274 = vmatpush.bf16.msrb.mxu2 %v4225_v61 }
 0x37f   : > { %v3465_v28 = vpop.f32.mrf.mxu0  ;;  %v12786_v54 = vadd.f32 %v3479_v16, %v12585_v5  ;;  %v3918_v5 = vpop.permute.xlu0 %3917 }
 0x380   : > { %v12789_v51 = vadd.f32 %v3465_v28, %v12639_v32  ;;  %v3948_v8 = vsel %vm3939_vm7, %v3916_v33, %v3918_v5  ;;  %v4211_v33 = vpop.permute.xlu2 %4210 }
 0x381   : > { %4141 = vmatpush.bf16.msrb.mxu0 %v3948_v8  ;;  %v4226_v19 = vsel %vm3939_vm7, %v4209_v0, %v4211_v33  ;;  %v16484_v8 = vld [vmem:[#allocation15_spill] sm:$0xff] }
 0x382   : > { %5053 = vrot.lane.b32.xlu0 %v16484_v8, %s10320_s26  ;;  %v16492_v8 = vld [vmem:[#allocation16_spill] sm:$0xff] }
 0x383   : > { %v3446_v58 = vpop.f32.mrf.mxu3 }
 0x384   : > { %v12799_v3 = vadd.f32 %v3446_v58, %v12603_v49  ;;  %v3498_v32 = vpop.f32.mrf.mxu2 }
 0x385   : > { %v12802_v44 = vadd.f32 %v3498_v32, %v12630_v37 }
 0x386   : > { %v3482_v25 = vpop.f32.mrf.mxu1 }
 0x387   : > { %v12806_v63 = vadd.f32 %v3482_v25, %v12609_v34  ;;  %v3534_v6 = vpop.f32.mrf.mxu0 }
 0x388   : > { %v12809_v9 = vadd.f32 %v3534_v6, %v12662_v59  ;;  %9548 = vmatmul.msk.bf16.vlgmr.msra.gmra.mxu3 %vm701_vm1, %v12719_v26  ;;  %v4213_v0 = vpop.permute.xlu2 %4212 }
 0x389   : > { %9545 = vmatmul.msk.bf16.gmra.mxu1 %vm701_vm1, %v12762_v52  ;;  %9547 = vmatmul.msk.bf16.gmra.mxu2 %vm701_vm1, %v12762_v52 }
 0x38a   : > { %9550 = vmatmul.msk.bf16.vlgmr.msra.gmra.mxu0 %vm701_vm1, %v12719_v26  ;;  %4293 = vmatpush.bf16.msra.mxu3 %v4226_v19  ;;  %v16490_v19 = vld [vmem:[#allocation33_spill] sm:$0xff] }
 0x38b   : > { %v3515_v37 = vpop.f32.mrf.mxu3 }
 0x38c   : > { %v3501_v49 = vpop.f32.mrf.mxu2  ;;  %v12826_v34 = vadd.f32 %v3515_v37, %v12627_v12  ;;  %v4224_v12 = vsel %vm3939_vm7, %v4205_v56, %v4207_v24  ;;  %v16486_v37 = vld [vmem:[#allocation14_spill] sm:$0xff] }
 0x38d   : > { %v12829_v59 = vadd.f32 %v3501_v49, %v12646_v55  ;;  %4255 = vmatpush.bf16.msrb.mxu1 %v4224_v12 }
 0x38e   : > { %v3484_v62 = vpop.f32.mrf.mxu1 }
 0x38f   : > { %v12832_v38 = vadd.f32 %v3484_v62, %v12633_v48  ;;  %v3536_v21 = vpop.f32.mrf.mxu0  ;;  %v4227_v62 = vsel %vm3939_vm7, %v4211_v33, %v4213_v0 }
 0x390   : > { %v12835_v57 = vadd.f32 %v3536_v21, %v12677_v47  ;;  %4312 = vmatpush.bf16.msra.mxu0 %v4227_v62  ;;  %v4219_v10 = vpop.permute.xlu2 %4218  ;;  %v16494_v62 = vld [vmem:[#allocation23_spill] sm:$0xff] }
 0x393   : > { %v3517_v55 = vpop.f32.mrf.mxu3 }
 0x394   : > { %v3503_v48 = vpop.f32.mrf.mxu2  ;;  %v12847_v47 = vadd.f32 %v3517_v55, %v12642_v60  ;;  %v16482_v60 = vld [vmem:[#allocation8_spill] sm:$0xff] }
 0x395   : > { %v12850_v16 = vadd.f32 %v3503_v48, %v12669_v22  ;;  %5069 = vrot.lane.b32.xlu2 %v16482_v60, %s10320_s26  ;;  %v4217_v60 = vpop.permute.xlu1 %4216 }
 0x396   : > { %v3553_v24 = vpop.f32.mrf.mxu1 }
 0x397   : > { %v3539_v28 = vpop.f32.mrf.mxu0  ;;  %v12853_v31 = vadd.f32 %v3553_v24, %v12649_v4  ;;  %v16483_v4 = vld [vmem:[#allocation18_spill] sm:$0xff] }
 0x398   : > { %v12856_v43 = vadd.f32 %v3539_v28, %v12698_v40  ;;  %9549 = vmatmul.msk.bf16.gmra.mxu3 %vm701_vm1, %v12762_v52  ;;  %5055 = vrot.lane.b32.xlu1 %v16483_v4, %s10320_s26 }
 0x399   : > { %9552 = vmatmul.msk.bf16.vlgmr.msra.gmra.mxu1 %vm701_vm1, %v12719_v26  ;;  %9554 = vmatmul.msk.bf16.vlgmr.msra.gmra.mxu2 %vm701_vm1, %v12719_v26 }
 0x39a   : > { %9551 = vmatmul.msk.bf16.gmra.mxu0 %vm701_vm1, %v12762_v52 }
 0x39b   : > { %v3520_v45 = vpop.f32.mrf.mxu3 }
 0x39c   : > { %v12873_v22 = vadd.f32 %v3520_v45, %v12665_v13  ;;  %v3572_v40 = vpop.f32.mrf.mxu2  ;;  %v16485_v13 = vld [vmem:[#allocation11_spill] sm:$0xff]  ;;  %v4215_v45 = vpop.permute.xlu0 %4214 }
 0x39d   : > { %v12876_v39 = vadd.f32 %v3572_v40, %v12684_v30  ;;  %5049 = vrot.lane.b32.xlu2 %v16485_v13, %s10320_s26  ;;  %v4228_v4 = vsel %vm3939_vm7, %v4213_v0, %v4215_v45  ;;  %v4229_v40 = vsel %vm3939_vm7, %v4215_v45, %v4217_v60  ;;  %v12947_v13 = vld [vmem:[%s16263_s4 + $0x60] sm:$0xff]  ;;  %v16497_v45 = vld [vmem:[#allocation24_spill] sm:$0xff] }
 0x39e   : > { %v3555_v58 = vpop.f32.mrf.mxu1  ;;  %4331 = vmatpush.bf16.msra.mxu1 %v4228_v4  ;;  %4350 = vmatpush.bf16.msra.mxu2 %v4229_v40 }
 0x39f   : > { %v3541_v5 = vpop.f32.mrf.mxu0  ;;  %v12879_v32 = vadd.f32 %v3555_v58, %v12672_v42  ;;  %v4230_v58 = vsel %vm3939_vm7, %v4217_v60, %v4219_v10 }
 0x3a0   : > { %v12882_v25 = vadd.f32 %v3541_v5, %v12711_v35  ;;  %5077 = vrot.lane.b32.xlu1 %v16486_v37, %s10320_s26 }
 0x3a3   : > { %v3522_v6 = vpop.f32.mrf.mxu3 }
 0x3a4   : > { %v12891_v30 = vadd.f32 %v3522_v6, %v12680_v41  ;;  %v3574_v49 = vpop.f32.mrf.mxu2  ;;  %v16487_v41 = vld [vmem:[#allocation10_spill] sm:$0xff]  ;;  %v16493_v6 = vld [vmem:[#allocation25_spill] sm:$0xff] }
 0x3a5   : > { %v12894_v42 = vadd.f32 %v3574_v49, %v12704_v50  ;;  %5051 = vrot.lane.b32.xlu0 %v16487_v41, %s10320_s26  ;;  %v16488_v50 = vld [vmem:[#allocation7_spill] sm:$0xff]  ;;  %v16495_v41 = vld [vmem:[#allocation20_spill] sm:$0xff] }
 0x3a6   : > { %v3558_v35 = vpop.f32.mrf.mxu1  ;;  %5071 = vrot.lane.b32.xlu2 %v16488_v50, %s10320_s26 }
 0x3a7   : > { %v12898_v21 = vadd.f32 %v3558_v35, %v12687_v27  ;;  %v3705_v56 = vpop.f32.mrf.mxu0 }
 0x3a8   : > { %v12901_v61 = vadd.f32 %v3705_v56, %v12737_v1  ;;  %9556 = vmatmul.msk.bf16.vlgmr.msrb.gmra.mxu3 %vm701_vm1, %v12719_v26  ;;  %v16489_v1 = vld [vmem:[#allocation22_spill] sm:$0xff] }
 0x3a9   : > { %9553 = vmatmul.msk.bf16.gmra.mxu1 %vm701_vm1, %v12762_v52  ;;  %9555 = vmatmul.msk.bf16.gmra.mxu2 %vm701_vm1, %v12762_v52 }
 0x3aa   : > { %9558 = vmatmul.msk.bf16.vlgmr.msrb.gmra.mxu0 %vm701_vm1, %v12719_v26  ;;  %5350 = vrot.lane.b32.xlu1 %v16489_v1, %s10320_s26 }
 0x3ab   : > { %v3686_v27 = vpop.f32.mrf.mxu3  ;;  %4369 = vmatpush.bf16.msrb.mxu3 %v4230_v58 }
 0x3ac   : > { %v3577_v33 = vpop.f32.mrf.mxu2  ;;  %v12918_v12 = vadd.f32 %v3686_v27, %v16490_v19  ;;  %v16496_v27 = vld [vmem:[#allocation26_spill] sm:$0xff] }
 0x3ad   : > { %v12921_v55 = vadd.f32 %v3577_v33, %v12723_v46  ;;  %v16491_v46 = vld [vmem:[#allocation19_spill] sm:$0xff] }
 0x3ae   : > { %v3560_v48 = vpop.f32.mrf.mxu1  ;;  %5348 = vrot.lane.b32.xlu0 %v16491_v46, %s10320_s26  ;;  %5057 = vrot.lane.b32.xlu2 %v16492_v8, %s10320_s26  ;;  %v12997_v46 = vld [vmem:[%s16263_s4 + $0x68] sm:$0xff] }
 0x3af   : > { %v12924_v26 = vadd.f32 %v3560_v48, %v12707_v17  ;;  %v3707_v24 = vpop.f32.mrf.mxu0 }
 0x3b0   : > { %v12927_v28 = vadd.f32 %v3707_v24, %v12752_v20 }
 0x3b2   : > { %5346 = vrot.lane.b32.xlu1 %v16493_v6, %s10320_s26 }
 0x3b3   : > { %v3688_v5 = vpop.f32.mrf.mxu3 }
 0x3b4   : > { %v3579_v17 = vpop.f32.mrf.mxu2  ;;  %v12935_v20 = vadd.f32 %v3688_v5, %v12714_v2 }
 0x3b5   : > { %v12942_v0 = vadd.f32 %v3579_v17, %v12746_v36  ;;  %v4493_v36 = vpop.permute.xlu1 %4492 }
 0x3b6   : > { %v3724_v37 = vpop.f32.mrf.mxu1  ;;  %5059 = vrot.lane.b32.xlu0 %v16494_v62, %s10320_s26  ;;  %5079 = vrot.lane.b32.xlu2 %v16495_v41, %s10320_s26  ;;  %v16501_v62 = vld [vmem:[#allocation27_spill] sm:$0xff] }
 0x3b7   : > { %v3710_v49 = vpop.f32.mrf.mxu0  ;;  %v12950_v35 = vadd.f32 %v3724_v37, %v12726_v18 }
 0x3b8   : > { %v12953_v2 = vadd.f32 %v3710_v49, %v12780_v53  ;;  %9557 = vmatmul.msk.bf16.gmra.mxu3 %vm701_vm1, %v12762_v52 }
 0x3b9   : > { %9572 = vmatmul.msk.bf16.vlgmr.msrb.gmra.mxu1 %vm421_vm0, %v12947_v13  ;;  %9574 = vmatmul.msk.bf16.vlgmr.msrb.gmra.mxu2 %vm421_vm0, %v12947_v13 }
 0x3ba   : > { %9559 = vmatmul.msk.bf16.gmra.mxu0 %vm701_vm1, %v12762_v52  ;;  %5358 = vrot.lane.b32.xlu1 %v16496_v27, %s10320_s26 }
 0x3bb   : > { %v3691_v18 = vpop.f32.mrf.mxu3 }
 0x3bc   : > { %v12966_v53 = vadd.f32 %v3691_v18, %v12742_v23  ;;  %v3743_v56 = vpop.f32.mrf.mxu2  ;;  %v4491_v23 = vpop.permute.xlu0 %4490 }
 0x3bd   : > { %v12973_v50 = vadd.f32 %v3743_v56, %v12766_v7  ;;  %v4520_v48 = vsel %vm4510_vm8, %v4491_v23, %v4493_v36  ;;  %v4473_v24 = vpop.permute.xlu1 %4472  ;;  %v4221_v7 = vpop.permute.xlu2 %4220 }
 0x3be   : > { %v3726_v1 = vpop.f32.mrf.mxu1  ;;  %4559 = vmatpush.bf16.msrb.mxu2 %v4520_v48  ;;  %5356 = vrot.lane.b32.xlu0 %v16497_v45, %s10320_s26  ;;  %v4231_v17 = vsel %vm3939_vm7, %v4219_v10, %v4221_v7  ;;  %v16500_v10 = vld [vmem:[#allocation30_spill] sm:$0xff] }
 0x3bf   : > { %v3712_v52 = vpop.f32.mrf.mxu0  ;;  %v12976_v33 = vadd.f32 %v3726_v1, %v12749_v15  ;;  %v16498_v15 = vld [vmem:[#allocation21_spill] sm:$0xff]  ;;  %4388 = vmatpush.bf16.msrb.mxu0 %v4231_v17 }
 0x3c0   : > { %v12979_v19 = vadd.f32 %v3712_v52, %v12799_v3  ;;  %5352 = vrot.lane.b32.xlu2 %v16498_v15, %s10320_s26  ;;  %v16499_v3 = vld [vmem:[#allocation28_spill] sm:$0xff] }
 0x3c2   : > { %5362 = vrot.lane.b32.xlu1 %v16499_v3, %s10320_s26 }
 0x3c3   : > { %v3693_v60 = vpop.f32.mrf.mxu3 }
 0x3c4   : > { %v12985_v4 = vadd.f32 %v3693_v60, %v12757_v29  ;;  %v3745_v40 = vpop.f32.mrf.mxu2 }
 0x3c5   : > { %v12992_v58 = vadd.f32 %v3745_v40, %v12786_v54  ;;  %v4471_v54 = vpop.permute.xlu0 %4470  ;;  %v4499_v23 = vpop.permute.xlu2 %4498 }
 0x3c6   : > { %v3729_v5 = vpop.f32.mrf.mxu1  ;;  %5360 = vrot.lane.b32.xlu0 %v16500_v10, %s10320_s26 }
 0x3c7   : > { %v13001_v29 = vadd.f32 %v3729_v5, %v12769_v11  ;;  %v3781_v8 = vpop.f32.mrf.mxu0  ;;  %v4495_v11 = vpop.permute.xlu1 %4494 }
 0x3c8   : > { %v13004_v6 = vadd.f32 %v3781_v8, %v12826_v34  ;;  %9576 = vmatmul.msk.bf16.vlgmr.msra.gmra.mxu3 %vm421_vm0, %v12947_v13  ;;  %5354 = vrot.lane.b32.xlu2 %v16501_v62, %s10320_s26  ;;  %v4521_v41 = vsel %vm4510_vm8, %v4493_v36, %v4495_v11 }
 0x3c9   : > { %9573 = vmatmul.msk.bf16.gmra.mxu1 %vm421_vm0, %v12997_v46  ;;  %9575 = vmatmul.msk.bf16.gmra.mxu2 %vm421_vm0, %v12997_v46 }
 0x3ca   : > { %9578 = vmatmul.msk.bf16.vlgmr.msra.gmra.mxu0 %vm421_vm0, %v12947_v13  ;;  %4578 = vmatpush.bf16.msra.mxu3 %v4521_v41 }
 0x3cb   : > { %v3762_v37 = vpop.f32.mrf.mxu3 }
 0x3cc   : > { %v3748_v34 = vpop.f32.mrf.mxu2  ;;  %v13017_v49 = vadd.f32 %v3762_v37, %v12783_v14  ;;  %v4511_v14 = vsel %vm4510_vm8, %v4471_v54, %v4473_v24 }
 0x3cd   : > { %v13022_v18 = vadd.f32 %v3748_v34, %v12806_v63  ;;  %4560 = vmatpush.bf16.msrb.mxu2 %v4511_v14  ;;  %v4223_v48 = vpop.permute.xlu0 %4222 }
 0x3ce   : > { %v3731_v56 = vpop.f32.mrf.mxu1  ;;  %v4232_v63 = vsel %vm3939_vm7, %v4221_v7, %v4223_v48 }
 0x3cf   : > { %v13026_v27 = vadd.f32 %v3731_v56, %v12789_v51  ;;  %v3783_v1 = vpop.f32.mrf.mxu0  ;;  %v4475_v60 = vpop.permute.xlu1 %4474  ;;  %4407 = vmatpush.bf16.msrb.mxu1 %v4232_v63  ;;  %v16502_v51 = vld [vmem:[#allocation29_spill] sm:$0xff] }
 0x3d0   : > { %v13029_v52 = vadd.f32 %v3783_v1, %v12847_v47  ;;  %5364 = vrot.lane.b32.xlu2 %v16502_v51, %s10320_s26  ;;  %v4512_v3 = vsel %vm4510_vm8, %v4473_v24, %v4475_v60 }
 0x3d1   : > { %4579 = vmatpush.bf16.msra.mxu3 %v4512_v3 }
 0x3d3   : > { %v3764_v45 = vpop.f32.mrf.mxu3 }
 0x3d4   : > { %v3750_v40 = vpop.f32.mrf.mxu2  ;;  %v13034_v36 = vadd.f32 %v3764_v45, %v12802_v44  ;;  %v4479_v44 = vpop.permute.xlu2 %4478 }
 0x3d5   : > { %v13039_v47 = vadd.f32 %v3750_v40, %v12832_v38  ;;  %v4501_v38 = vpop.permute.xlu0 %4500 }
 0x3d6   : > { %v3800_v15 = vpop.f32.mrf.mxu1  ;;  %v4524_v40 = vsel %vm4510_vm8, %v4499_v23, %v4501_v38 }
 0x3d7   : > { %v3786_v5 = vpop.f32.mrf.mxu0  ;;  %v13043_v17 = vadd.f32 %v3800_v15, %v12809_v9  ;;  %v4497_v62 = vpop.permute.xlu1 %4496 }
 0x3d8   : > { %v13046_v7 = vadd.f32 %v3786_v5, %v12873_v22  ;;  %9577 = vmatmul.msk.bf16.gmra.mxu3 %vm421_vm0, %v12997_v46  ;;  %v4522_v56 = vsel %vm4510_vm8, %v4495_v11, %v4497_v62 }
 0x3d9   : > { %9580 = vmatmul.msk.bf16.vlgmr.msra.gmra.mxu1 %vm421_vm0, %v12947_v13  ;;  %9582 = vmatmul.msk.bf16.vlgmr.msra.gmra.mxu2 %vm421_vm0, %v12947_v13 }
 0x3da   : > { %9579 = vmatmul.msk.bf16.gmra.mxu0 %vm421_vm0, %v12997_v46  ;;  %4635 = vmatpush.bf16.msra.mxu2 %v4524_v40 }
 0x3db   : > { %v3767_v9 = vpop.f32.mrf.mxu3  ;;  %4597 = vmatpush.bf16.msra.mxu0 %v4522_v56 }
 0x3dc   : > { %v13057_v24 = vadd.f32 %v3767_v9, %v12829_v59  ;;  %v3819_v22 = vpop.f32.mrf.mxu2  ;;  %v4477_v59 = vpop.permute.xlu2 %4476 }
 0x3dd   : > { %v13060_v8 = vadd.f32 %v3819_v22, %v12853_v31  ;;  %v4481_v41 = vpop.permute.xlu0 %4480 }
 0x3de   : > { %v3802_v54 = vpop.f32.mrf.mxu1  ;;  %v4515_v56 = vsel %vm4510_vm8, %v4479_v44, %v4481_v41 }
 0x3df   : > { %v3788_v10 = vpop.f32.mrf.mxu0  ;;  %v13063_v37 = vadd.f32 %v3802_v54, %v12835_v57  ;;  %v4513_v57 = vsel %vm4510_vm8, %v4475_v60, %v4477_v59  ;;  %v4507_v22 = vpop.permute.xlu1 %4506  ;;  %4636 = vmatpush.bf16.msra.mxu2 %v4515_v56 }
 0x3e0   : > { %v13066_v34 = vadd.f32 %v3788_v10, %v12891_v30  ;;  %4598 = vmatpush.bf16.msra.mxu0 %v4513_v57 }
 0x3e3   : > { %v3769_v1 = vpop.f32.mrf.mxu3 }
 0x3e4   : > { %v13070_v14 = vadd.f32 %v3769_v1, %v12850_v16  ;;  %v3821_v31 = vpop.f32.mrf.mxu2 }
 0x3e5   : > { %v13073_v48 = vadd.f32 %v3821_v31, %v12879_v32  ;;  %v4503_v16 = vpop.permute.xlu0 %4502 }
 0x3e6   : > { %v3805_v45 = vpop.f32.mrf.mxu1  ;;  %v4525_v3 = vsel %vm4510_vm8, %v4501_v38, %v4503_v16 }
 0x3e7   : > { %v13077_v30 = vadd.f32 %v3805_v45, %v12856_v43  ;;  %v3991_v63 = vpop.f32.mrf.mxu0 }
 0x3e8   : > { %v13080_v11 = vadd.f32 %v3991_v63, %v12918_v12  ;;  %9584 = vmatmul.msk.bf16.vlgmr.msrb.gmra.mxu3 %vm421_vm0, %v12947_v13  ;;  %v4523_v12 = vsel %vm4510_vm8, %v4497_v62, %v4499_v23  ;;  %v4514_v62 = vsel %vm4510_vm8, %v4477_v59, %v4479_v44 }
 0x3e9   : > { %9581 = vmatmul.msk.bf16.gmra.mxu1 %vm421_vm0, %v12997_v46  ;;  %9583 = vmatmul.msk.bf16.gmra.mxu2 %vm421_vm0, %v12997_v46 }
 0x3ea   : > { %9586 = vmatmul.msk.bf16.vlgmr.msrb.gmra.mxu0 %vm421_vm0, %v12947_v13  ;;  %4616 = vmatpush.bf16.msra.mxu1 %v4523_v12 }
 0x3eb   : > { %v3838_v43 = vpop.f32.mrf.mxu3  ;;  %4654 = vmatpush.bf16.msrb.mxu3 %v4525_v3 }
 0x3ec   : > { %v3824_v32 = vpop.f32.mrf.mxu2  ;;  %v13091_v60 = vadd.f32 %v3838_v43, %v12876_v39 }
 0x3ed   : > { %v13096_v51 = vadd.f32 %v3824_v32, %v12898_v21  ;;  %v4483_v10 = vpop.permute.xlu0 %4482 }
 0x3ee   : > { %v3807_v15 = vpop.f32.mrf.mxu1  ;;  %4617 = vmatpush.bf16.msra.mxu1 %v4514_v62  ;;  %v4516_v1 = vsel %vm4510_vm8, %v4481_v41, %v4483_v10 }
 0x3ef   : > { %v13100_v5 = vadd.f32 %v3807_v15, %v12882_v25  ;;  %v3993_v9 = vpop.f32.mrf.mxu0  ;;  %v13116_v25 = vld [vmem:[%s16262_s3 + $0x70] sm:$0xff]  ;;  %4655 = vmatpush.bf16.msrb.mxu3 %v4516_v1 }
 0x3f0   : > { %v13103_v39 = vadd.f32 %v3993_v9, %v12935_v20 }
 0x3f3   : > { %v3840_v54 = vpop.f32.mrf.mxu3 }
 0x3f4   : > { %v3826_v23 = vpop.f32.mrf.mxu2  ;;  %v13106_v21 = vadd.f32 %v3840_v54, %v12894_v42 }
 0x3f5   : > { %v13111_v38 = vadd.f32 %v3826_v23, %v12924_v26  ;;  %v4487_v26 = vpop.permute.xlu1 %4486  ;;  %v4505_v43 = vpop.permute.xlu0 %4504 }
 0x3f6   : > { %v4010_v20 = vpop.f32.mrf.mxu1  ;;  %v4526_v32 = vsel %vm4510_vm8, %v4503_v16, %v4505_v43  ;;  %v4527_v23 = vsel %vm4510_vm8, %v4505_v43, %v4507_v22 }
 0x3f7   : > { %v3996_v31 = vpop.f32.mrf.mxu0  ;;  %v13120_v42 = vadd.f32 %v4010_v20, %v12901_v61  ;;  %4673 = vmatpush.bf16.msrb.mxu0 %v4526_v32 }
 0x3f8   : > { %v13123_v44 = vadd.f32 %v3996_v31, %v12966_v53  ;;  %9585 = vmatmul.msk.bf16.gmra.mxu3 %vm421_vm0, %v12997_v46 }
 0x3f9   : > { %9588 = vmatmul.msk.bf16.vlgmr.msrb.gmra.mxu1 %vm421_vm0, %v12947_v13  ;;  %9602 = vmatmul.msk.bf16.vlgmr.msrb.gmra.mxu2 %vm701_vm1, %v13116_v25 }
 0x3fa   : > { %9587 = vmatmul.msk.bf16.gmra.mxu0 %vm421_vm0, %v12997_v46  ;;  %4692 = vmatpush.bf16.msrb.mxu1 %v4527_v23 }
 0x3fb   : > { %v3843_v41 = vpop.f32.mrf.mxu3 }
 0x3fc   : > { %v13134_v61 = vadd.f32 %v3843_v41, %v12921_v55  ;;  %v4029_v59 = vpop.f32.mrf.mxu2 }
 0x3fd   : > { %v13137_v53 = vadd.f32 %v4029_v59, %v12950_v35  ;;  %v4485_v40 = vpop.permute.xlu1 %4484 }
 0x3fe   : > { %v4012_v45 = vpop.f32.mrf.mxu1  ;;  %v4517_v3 = vsel %vm4510_vm8, %v4483_v10, %v4485_v40 }
 0x3ff   : > { %v3998_v57 = vpop.f32.mrf.mxu0  ;;  %v13140_v63 = vadd.f32 %v4012_v45, %v12927_v28  ;;  %v13155_v28 = vld [vmem:[%s16262_s3 + $0x78] sm:$0xff]  ;;  %4674 = vmatpush.bf16.msrb.mxu0 %v4517_v3 }
 0x400   : > { %v13143_v13 = vadd.f32 %v3998_v57, %v12985_v4 }
 0x403   : > { %v3845_v12 = vpop.f32.mrf.mxu3 }
 0x404   : > { %v13147_v55 = vadd.f32 %v3845_v12, %v12942_v0  ;;  %v4031_v15 = vpop.f32.mrf.mxu2 }
 0x405   : > { %v13150_v35 = vadd.f32 %v4031_v15, %v12976_v33  ;;  %v4509_v33 = vpop.permute.xlu2 %4508 }
 0x406   : > { %v4015_v4 = vpop.f32.mrf.mxu1  ;;  %v4528_v54 = vsel %vm4510_vm8, %v4507_v22, %v4509_v33  ;;  %v4518_v22 = vsel %vm4510_vm8, %v4485_v40, %v4487_v26 }
 0x407   : > { %v13159_v16 = vadd.f32 %v4015_v4, %v12953_v2  ;;  %v4067_v9 = vpop.f32.mrf.mxu0  ;;  %4711 = vmatpush.bf16.msrb.mxu2 %v4528_v54  ;;  %4693 = vmatpush.bf16.msrb.mxu1 %v4518_v22 }
 0x408   : > { %v13162_v0 = vadd.f32 %v4067_v9, %v13017_v49  ;;  %9604 = vmatmul.msk.bf16.vlgmr.msra.gmra.mxu3 %vm701_vm1, %v13116_v25 }
 0x409   : > { %9589 = vmatmul.msk.bf16.gmra.mxu1 %vm421_vm0, %v12997_v46  ;;  %9603 = vmatmul.msk.bf16.gmra.mxu2 %vm701_vm1, %v13155_v28 }
 0x40a   : > { %9606 = vmatmul.msk.bf16.vlgmr.msra.gmra.mxu0 %vm701_vm1, %v13116_v25 }
 0x40b   : > { %v4048_v2 = vpop.f32.mrf.mxu3 }
 0x40c   : > { %v4034_v10 = vpop.f32.mrf.mxu2  ;;  %v13174_v49 = vadd.f32 %v4048_v2, %v12973_v50 }
 0x40d   : > { %v13178_v62 = vadd.f32 %v4034_v10, %v13001_v29  ;;  %v4489_v31 = vpop.permute.xlu2 %4488 }
 0x40e   : > { %v4017_v46 = vpop.f32.mrf.mxu1  ;;  %v4519_v29 = vsel %vm4510_vm8, %v4487_v26, %v4489_v31 }
 0x40f   : > { %v13181_v56 = vadd.f32 %v4017_v46, %v12979_v19  ;;  %v4069_v20 = vpop.f32.mrf.mxu0  ;;  %4712 = vmatpush.bf16.msrb.mxu2 %v4519_v29 }
 0x410   : > { %v13184_v1 = vadd.f32 %v4069_v20, %v13034_v36 }
 0x413   : > { %v4050_v41 = vpop.f32.mrf.mxu3 }
 0x414   : > { %v4036_v59 = vpop.f32.mrf.mxu2  ;;  %v13187_v50 = vadd.f32 %v4050_v41, %v12992_v58  ;;  %v4778_v58 = vpop.permute.xlu0 %4777 }
 0x415   : > { %v13192_v45 = vadd.f32 %v4036_v59, %v13026_v27  ;;  %v4776_v4 = vpop.permute.xlu2 %4775 }
 0x416   : > { %v4086_v19 = vpop.f32.mrf.mxu1  ;;  %v4795_v3 = vsel %vm4510_vm8, %v4776_v4, %v4778_v58 }
 0x417   : > { %v4072_v57 = vpop.f32.mrf.mxu0  ;;  %v13195_v36 = vadd.f32 %v4086_v19, %v13004_v6  ;;  %4826 = vmatpush.bf16.msra.mxu3 %v4795_v3 }
 0x418   : > { %v13198_v43 = vadd.f32 %v4072_v57, %v13057_v24  ;;  %9605 = vmatmul.msk.bf16.gmra.mxu3 %vm701_vm1, %v13155_v28 }
 0x419   : > { %9608 = vmatmul.msk.bf16.vlgmr.msra.gmra.mxu1 %vm701_vm1, %v13116_v25  ;;  %9610 = vmatmul.msk.bf16.vlgmr.msra.gmra.mxu2 %vm701_vm1, %v13116_v25 }
 0x41a   : > { %9607 = vmatmul.msk.bf16.gmra.mxu0 %vm701_vm1, %v13155_v28 }
 0x41b   : > { %v4053_v27 = vpop.f32.mrf.mxu3 }
 0x41c   : > { %v13209_v6 = vadd.f32 %v4053_v27, %v13022_v18  ;;  %v4105_v26 = vpop.f32.mrf.mxu2  ;;  %v4780_v33 = vpop.permute.xlu0 %4779 }
 0x41d   : > { %v13212_v24 = vadd.f32 %v4105_v26, %v13043_v17  ;;  %v4784_v22 = vpop.permute.xlu2 %4783 }
 0x41e   : > { %v4088_v32 = vpop.f32.mrf.mxu1 }
 0x41f   : > { %v4074_v12 = vpop.f32.mrf.mxu0  ;;  %v13215_v40 = vadd.f32 %v4088_v32, %v13029_v52  ;;  %v4796_v52 = vsel %vm4510_vm8, %v4778_v58, %v4780_v33 }
 0x420   : > { %v13218_v15 = vadd.f32 %v4074_v12, %v13070_v14  ;;  %4845 = vmatpush.bf16.msra.mxu0 %v4796_v52 }
 0x423   : > { %v4055_v9 = vpop.f32.mrf.mxu3 }
 0x424   : > { %v13222_v18 = vadd.f32 %v4055_v9, %v13039_v47  ;;  %v4107_v2 = vpop.f32.mrf.mxu2  ;;  %v4782_v47 = vpop.permute.xlu1 %4781 }
 0x425   : > { %v13225_v17 = vadd.f32 %v4107_v2, %v13063_v37  ;;  %v4797_v19 = vsel %vm4510_vm8, %v4780_v33, %v4782_v47  ;;  %v4798_v57 = vsel %vm4510_vm8, %v4782_v47, %v4784_v22 }
 0x426   : > { %v4091_v54 = vpop.f32.mrf.mxu1  ;;  %4864 = vmatpush.bf16.msra.mxu1 %v4797_v19  ;;  %4883 = vmatpush.bf16.msra.mxu2 %v4798_v57 }
 0x427   : > { %v13229_v10 = vadd.f32 %v4091_v54, %v13046_v7  ;;  %v4143_v14 = vpop.f32.mrf.mxu0 }
 0x428   : > { %v13232_v23 = vadd.f32 %v4143_v14, %v13091_v60  ;;  %9612 = vmatmul.msk.bf16.vlgmr.msrb.gmra.mxu3 %vm701_vm1, %v13116_v25 }
 0x429   : > { %9609 = vmatmul.msk.bf16.gmra.mxu1 %vm701_vm1, %v13155_v28  ;;  %9611 = vmatmul.msk.bf16.gmra.mxu2 %vm701_vm1, %v13155_v28 }
 0x42a   : > { %9614 = vmatmul.msk.bf16.vlgmr.msrb.gmra.mxu0 %vm701_vm1, %v13116_v25 }
 0x42b   : > { %v4124_v7 = vpop.f32.mrf.mxu3 }
 0x42c   : > { %v4110_v37 = vpop.f32.mrf.mxu2  ;;  %v13243_v46 = vadd.f32 %v4124_v7, %v13060_v8  ;;  %v4786_v29 = vpop.permute.xlu1 %4785 }
 0x42d   : > { %v13246_v60 = vadd.f32 %v4110_v37, %v13077_v30  ;;  %v4799_v8 = vsel %vm4510_vm8, %v4784_v22, %v4786_v29  ;;  %v4790_v7 = vpop.permute.xlu2 %4789 }
 0x42e   : > { %v4093_v20 = vpop.f32.mrf.mxu1  ;;  %4902 = vmatpush.bf16.msrb.mxu3 %v4799_v8 }
 0x42f   : > { %v13249_v31 = vadd.f32 %v4093_v20, %v13066_v34  ;;  %v4145_v41 = vpop.f32.mrf.mxu0 }
 0x430   : > { %v13252_v59 = vadd.f32 %v4145_v41, %v13106_v21 }
 0x433   : > { %v4126_v30 = vpop.f32.mrf.mxu3 }
 0x434   : > { %v4112_v58 = vpop.f32.mrf.mxu2  ;;  %v13258_v34 = vadd.f32 %v4126_v30, %v13073_v48  ;;  %v4788_v2 = vpop.permute.xlu1 %4787 }
 0x435   : > { %v13261_v27 = vadd.f32 %v4112_v58, %v13100_v5  ;;  %v4801_v8 = vsel %vm4510_vm8, %v4788_v2, %v4790_v7 }
 0x436   : > { %v4257_v21 = vpop.f32.mrf.mxu1 }
 0x437   : > { %v4148_v26 = vpop.f32.mrf.mxu0  ;;  %v13264_v32 = vadd.f32 %v4257_v21, %v13080_v11 }
 0x438   : > { %v13267_v12 = vadd.f32 %v4148_v26, %v13134_v61  ;;  %9613 = vmatmul.msk.bf16.gmra.mxu3 %vm701_vm1, %v13155_v28 }
 0x439   : > { %9616 = vmatmul.msk.bf16.vlgmr.msrb.gmra.mxu1 %vm701_vm1, %v13116_v25  ;;  %9618 = vmatmul.msk.bf16.vlgmr.msrb.gmra.mxu2 %vm701_vm1, %v13116_v25 }
 0x43a   : > { %9615 = vmatmul.msk.bf16.gmra.mxu0 %vm701_vm1, %v13155_v28  ;;  %4940 = vmatpush.bf16.msrb.mxu1 %v4801_v8 }
 0x43b   : > { %v4129_v48 = vpop.f32.mrf.mxu3 }
 0x43c   : > { %v13278_v5 = vadd.f32 %v4129_v48, %v13096_v51  ;;  %v4276_v11 = vpop.f32.mrf.mxu2  ;;  %v13295_v51 = vld [vmem:[%s16263_s4 + $0x70] sm:$0xff]  ;;  %v4794_v57 = vpop.permute.xlu1 %4793 }
 0x43d   : > { %v13281_v61 = vadd.f32 %v4276_v11, %v13120_v42 }
 0x43e   : > { %v4259_v4 = vpop.f32.mrf.mxu1 }
 0x43f   : > { %v4150_v3 = vpop.f32.mrf.mxu0  ;;  %v13284_v9 = vadd.f32 %v4259_v4, %v13103_v39  ;;  %v4800_v39 = vsel %vm4510_vm8, %v4786_v29, %v4788_v2 }
 0x440   : > { %v13287_v33 = vadd.f32 %v4150_v3, %v13147_v55  ;;  %4921 = vmatpush.bf16.msrb.mxu0 %v4800_v39 }
 0x443   : > { %v4131_v25 = vpop.f32.mrf.mxu3 }
 0x444   : > { %v13290_v54 = vadd.f32 %v4131_v25, %v13111_v38  ;;  %v4278_v52 = vpop.f32.mrf.mxu2  ;;  %v5062_v25 = vpop.permute.xlu1 %5061 }
 0x445   : > { %v13298_v42 = vadd.f32 %v4278_v52, %v13140_v63 }
 0x446   : > { %v4262_v14 = vpop.f32.mrf.mxu1 }
 0x447   : > { %v13302_v55 = vadd.f32 %v4262_v14, %v13123_v44  ;;  %v4314_v47 = vpop.f32.mrf.mxu0  ;;  %v4792_v44 = vpop.permute.xlu0 %4791 }
 0x448   : > { %v13305_v38 = vadd.f32 %v4314_v47, %v13174_v49  ;;  %9632 = vmatmul.msk.bf16.vlgmr.msra.gmra.mxu3 %vm421_vm0, %v13295_v51  ;;  %v4802_v30 = vsel %vm4510_vm8, %v4790_v7, %v4792_v44 }
 0x449   : > { %9617 = vmatmul.msk.bf16.gmra.mxu1 %vm701_vm1, %v13155_v28  ;;  %9619 = vmatmul.msk.bf16.gmra.mxu2 %vm701_vm1, %v13155_v28  ;;  %v5066_v28 = vpop.permute.xlu2 %5065 }
 0x44a   : > { %9634 = vmatmul.msk.bf16.vlgmr.msra.gmra.mxu0 %vm421_vm0, %v13295_v51  ;;  %4959 = vmatpush.bf16.msrb.mxu2 %v4802_v30 }
 0x44b   : > { %v4295_v63 = vpop.f32.mrf.mxu3 }
 0x44c   : > { %v4281_v37 = vpop.f32.mrf.mxu2  ;;  %v13316_v20 = vadd.f32 %v4295_v63, %v13137_v53  ;;  %v4803_v53 = vsel %vm4510_vm8, %v4792_v44, %v4794_v57 }
 0x44d   : > { %v13319_v49 = vadd.f32 %v4281_v37, %v13159_v16  ;;  %4978 = vmatpush.bf16.msra.mxu3 %v4803_v53 }
 0x44e   : > { %v4264_v41 = vpop.f32.mrf.mxu1 }
 0x44f   : > { %v13322_v22 = vadd.f32 %v4264_v41, %v13143_v13  ;;  %v4316_v29 = vpop.f32.mrf.mxu0  ;;  %v5068_v16 = vpop.permute.xlu0 %5067 }
 0x450   : > { %v13325_v19 = vadd.f32 %v4316_v29, %v13187_v50  ;;  %v13336_v50 = vld [vmem:[%s16263_s4 + $0x78] sm:$0xff]  ;;  %v5044_v41 = vpop.permute.xlu1 %5043 }
 0x453   : > { %v4297_v58 = vpop.f32.mrf.mxu3 }
 0x454   : > { %v4283_v21 = vpop.f32.mrf.mxu2  ;;  %v13331_v13 = vadd.f32 %v4297_v58, %v13150_v35  ;;  %v5046_v35 = vpop.permute.xlu2 %5045  ;;  %v5093_v58 = vsel %vm5081_vm9, %v5066_v28, %v5068_v16 }
 0x455   : > { %v13339_v26 = vadd.f32 %v4283_v21, %v13181_v56 }
 0x456   : > { %v4333_v48 = vpop.f32.mrf.mxu1 }
 0x457   : > { %v4319_v11 = vpop.f32.mrf.mxu0  ;;  %v13342_v4 = vadd.f32 %v4333_v48, %v13162_v0  ;;  %v5048_v56 = vpop.permute.xlu0 %5047 }
 0x458   : > { %v13345_v3 = vadd.f32 %v4319_v11, %v13209_v6  ;;  %9633 = vmatmul.msk.bf16.gmra.mxu3 %vm421_vm0, %v13336_v50 }
 0x459   : > { %9636 = vmatmul.msk.bf16.vlgmr.msra.gmra.mxu1 %vm421_vm0, %v13295_v51  ;;  %9638 = vmatmul.msk.bf16.vlgmr.msra.gmra.mxu2 %vm421_vm0, %v13295_v51 }
 0x45a   : > { %9635 = vmatmul.msk.bf16.gmra.mxu0 %vm421_vm0, %v13336_v50  ;;  %5168 = vmatpush.bf16.msra.mxu2 %v5093_v58 }
 0x45b   : > { %v4300_v0 = vpop.f32.mrf.mxu3 }
 0x45c   : > { %v13356_v2 = vadd.f32 %v4300_v0, %v13178_v62  ;;  %v4352_v6 = vpop.f32.mrf.mxu2  ;;  %v5064_v44 = vpop.permute.xlu2 %5063 }
 0x45d   : > { %v13359_v52 = vadd.f32 %v4352_v6, %v13195_v36  ;;  %v5091_v63 = vsel %vm5081_vm9, %v5062_v25, %v5064_v44 }
 0x45e   : > { %v4335_v14 = vpop.f32.mrf.mxu1  ;;  %5130 = vmatpush.bf16.msra.mxu0 %v5091_v63 }
 0x45f   : > { %v4321_v39 = vpop.f32.mrf.mxu0  ;;  %v13362_v47 = vadd.f32 %v4335_v14, %v13184_v1  ;;  %v5042_v37 = vpop.permute.xlu0 %5041  ;;  %v5083_v14 = vsel %vm5081_vm9, %v5044_v41, %v5046_v35 }
 0x460   : > { %v13365_v7 = vadd.f32 %v4321_v39, %v13222_v18  ;;  %v5082_v8 = vsel %vm5081_vm9, %v5042_v37, %v5044_v41  ;;  %v5084_v39 = vsel %vm5081_vm9, %v5046_v35, %v5048_v56 }
 0x461   : > { %5169 = vmatpush.bf16.msra.mxu2 %v5084_v39 }
 0x462   : > { %5131 = vmatpush.bf16.msra.mxu0 %v5082_v8 }
 0x463   : > { %v4302_v62 = vpop.f32.mrf.mxu3 }
 0x464   : > { %v13369_v29 = vadd.f32 %v4302_v62, %v13192_v45  ;;  %v4354_v36 = vpop.f32.mrf.mxu2  ;;  %v5092_v45 = vsel %vm5081_vm9, %v5064_v44, %v5066_v28 }
 0x465   : > { %v13372_v57 = vadd.f32 %v4354_v36, %v13215_v40  ;;  %5149 = vmatpush.bf16.msra.mxu1 %v5092_v45 }
 0x466   : > { %v4338_v1 = vpop.f32.mrf.mxu1 }
 0x467   : > { %v13376_v18 = vadd.f32 %v4338_v1, %v13198_v43  ;;  %v4390_v30 = vpop.f32.mrf.mxu0  ;;  %v5070_v43 = vpop.permute.xlu2 %5069 }
 0x468   : > { %v13379_v53 = vadd.f32 %v4390_v30, %v13243_v46  ;;  %9640 = vmatmul.msk.bf16.vlgmr.msrb.gmra.mxu3 %vm421_vm0, %v13295_v51  ;;  %v5094_v11 = vsel %vm5081_vm9, %v5068_v16, %v5070_v43 }
 0x469   : > { %9637 = vmatmul.msk.bf16.gmra.mxu1 %vm421_vm0, %v13336_v50  ;;  %9639 = vmatmul.msk.bf16.gmra.mxu2 %vm421_vm0, %v13336_v50 }
 0x46a   : > { %9642 = vmatmul.msk.bf16.vlgmr.msrb.gmra.mxu0 %vm421_vm0, %v13295_v51  ;;  %5187 = vmatpush.bf16.msrb.mxu3 %v5094_v11 }
 0x46b   : > { %v4371_v40 = vpop.f32.mrf.mxu3  ;;  %5150 = vmatpush.bf16.msra.mxu1 %v5083_v14 }
 0x46c   : > { %v4357_v46 = vpop.f32.mrf.mxu2  ;;  %v13392_v21 = vadd.f32 %v4371_v40, %v13212_v24  ;;  %v5074_v24 = vpop.permute.xlu0 %5073 }
 0x46d   : > { %v13395_v48 = vadd.f32 %v4357_v46, %v13229_v10 }
 0x46e   : > { %v4340_v28 = vpop.f32.mrf.mxu1 }
 0x46f   : > { %v13399_v25 = vadd.f32 %v4340_v28, %v13218_v15  ;;  %v4392_v0 = vpop.f32.mrf.mxu0  ;;  %v5050_v44 = vpop.permute.xlu2 %5049 }
 0x470   : > { %v13402_v6 = vadd.f32 %v4392_v0, %v13258_v34  ;;  %v5085_v34 = vsel %vm5081_vm9, %v5048_v56, %v5050_v44 }
 0x471   : > { %5188 = vmatpush.bf16.msrb.mxu3 %v5085_v34 }
 0x473   : > { %v4373_v10 = vpop.f32.mrf.mxu3 }
 0x474   : > { %v4359_v63 = vpop.f32.mrf.mxu2  ;;  %v13407_v16 = vadd.f32 %v4373_v10, %v13225_v17  ;;  %v5054_v17 = vpop.permute.xlu0 %5053 }
 0x475   : > { %v13410_v15 = vadd.f32 %v4359_v63, %v13249_v31  ;;  %v5076_v31 = vpop.permute.xlu1 %5075 }
 0x476   : > { %v4409_v37 = vpop.f32.mrf.mxu1  ;;  %v5097_v63 = vsel %vm5081_vm9, %v5074_v24, %v5076_v31 }
 0x477   : > { %v4395_v62 = vpop.f32.mrf.mxu0  ;;  %v13414_v41 = vadd.f32 %v4409_v37, %v13232_v23  ;;  %v5072_v58 = vpop.permute.xlu2 %5071 }
 0x478   : > { %v13417_v35 = vadd.f32 %v4395_v62, %v13278_v5  ;;  %9641 = vmatmul.msk.bf16.gmra.mxu3 %vm421_vm0, %v13336_v50  ;;  %v5095_v40 = vsel %vm5081_vm9, %v5070_v43, %v5072_v58 }
 0x479   : > { %9644 = vmatmul.msk.bf16.vlgmr.msrb.gmra.mxu1 %vm421_vm0, %v13295_v51  ;;  %9646 = vmatmul.msk.bf16.vlgmr.msrb.gmra.mxu2 %vm421_vm0, %v13295_v51 }
 0x47a   : > { %9643 = vmatmul.msk.bf16.gmra.mxu0 %vm421_vm0, %v13336_v50  ;;  %5244 = vmatpush.bf16.msrb.mxu2 %v5097_v63 }
 0x47b   : > { %v4376_v23 = vpop.f32.mrf.mxu3  ;;  %5206 = vmatpush.bf16.msrb.mxu0 %v5095_v40 }
 0x47c   : > { %v13428_v56 = vadd.f32 %v4376_v23, %v13246_v60  ;;  %v4562_v5 = vpop.f32.mrf.mxu2  ;;  %v5052_v60 = vpop.permute.xlu0 %5051 }
 0x47d   : > { %v13431_v36 = vadd.f32 %v4562_v5, %v13264_v32  ;;  %v5056_v46 = vpop.permute.xlu1 %5055 }
 0x47e   : > { %v4411_v1 = vpop.f32.mrf.mxu1 }
 0x47f   : > { %v4397_v8 = vpop.f32.mrf.mxu0  ;;  %v13434_v30 = vadd.f32 %v4411_v1, %v13252_v59  ;;  %v13449_v59 = vld [vmem:[%s16262_s3 + $0x80] sm:$0xff]  ;;  %v5058_v1 = vpop.permute.xlu2 %5057 }
 0x480   : > { %v13437_v45 = vadd.f32 %v4397_v8, %v13290_v54  ;;  %v5086_v54 = vsel %vm5081_vm9, %v5050_v44, %v5052_v60  ;;  %v5089_v40 = vsel %vm5081_vm9, %v5056_v46, %v5058_v1 }
 0x481   : > { %5207 = vmatpush.bf16.msrb.mxu0 %v5086_v54 }
 0x483   : > { %v4378_v28 = vpop.f32.mrf.mxu3 }
 0x484   : > { %v13441_v11 = vadd.f32 %v4378_v28, %v13261_v27  ;;  %v4564_v32 = vpop.f32.mrf.mxu2 }
 0x485   : > { %v13444_v0 = vadd.f32 %v4564_v32, %v13284_v9 }
 0x486   : > { %v4414_v14 = vpop.f32.mrf.mxu1 }
 0x487   : > { %v13453_v43 = vadd.f32 %v4414_v14, %v13267_v12  ;;  %v4600_v39 = vpop.f32.mrf.mxu0  ;;  %v5078_v12 = vpop.permute.xlu1 %5077 }
 0x488   : > { %v13456_v27 = vadd.f32 %v4600_v39, %v13316_v20  ;;  %9648 = vmatmul.msk.bf16.vlgmr.msra.gmra.mxu3 %vm421_vm0, %v13295_v51  ;;  %v5096_v20 = vsel %vm5081_vm9, %v5072_v58, %v5074_v24  ;;  %v5098_v34 = vsel %vm5081_vm9, %v5076_v31, %v5078_v12  ;;  %v5088_v58 = vsel %vm5081_vm9, %v5054_v17, %v5056_v46  ;;  %v5080_v39 = vpop.permute.xlu2 %5079 }
 0x489   : > { %9645 = vmatmul.msk.bf16.gmra.mxu1 %vm421_vm0, %v13336_v50  ;;  %9647 = vmatmul.msk.bf16.gmra.mxu2 %vm421_vm0, %v13336_v50 }
 0x48a   : > { %9662 = vmatmul.msk.bf16.vlgmr.msra.gmra.mxu0 %vm701_vm1, %v13449_v59  ;;  %5225 = vmatpush.bf16.msrb.mxu1 %v5096_v20 }
 0x48b   : > { %v4581_v9 = vpop.f32.mrf.mxu3  ;;  %5263 = vmatpush.bf16.msra.mxu3 %v5098_v34  ;;  %5245 = vmatpush.bf16.msrb.mxu2 %v5088_v58 }
 0x48c   : > { %v4567_v10 = vpop.f32.mrf.mxu2  ;;  %v13467_v44 = vadd.f32 %v4581_v9, %v13281_v61  ;;  %v5099_v9 = vsel %vm5081_vm9, %v5078_v12, %v5080_v39 }
 0x48d   : > { %v13472_v51 = vadd.f32 %v4567_v10, %v13302_v55  ;;  %v5087_v55 = vsel %vm5081_vm9, %v5052_v60, %v5054_v17  ;;  %5282 = vmatpush.bf16.msra.mxu0 %v5099_v9 }
 0x48e   : > { %v4416_v37 = vpop.f32.mrf.mxu1  ;;  %5226 = vmatpush.bf16.msrb.mxu1 %v5087_v55 }
 0x48f   : > { %v13476_v62 = vadd.f32 %v4416_v37, %v13287_v33  ;;  %v4602_v23 = vpop.f32.mrf.mxu0  ;;  %5264 = vmatpush.bf16.msra.mxu3 %v5089_v40 }
 0x490   : > { %v13479_v61 = vadd.f32 %v4602_v23, %v13331_v13  ;;  %v13492_v13 = vld [vmem:[%s16262_s3 + $0x88] sm:$0xff] }
 0x493   : > { %v4583_v5 = vpop.f32.mrf.mxu3 }
 0x494   : > { %v4569_v8 = vpop.f32.mrf.mxu2  ;;  %v13482_v24 = vadd.f32 %v4583_v5, %v13298_v42  ;;  %v5353_v5 = vpop.permute.xlu2 %5352 }
 0x495   : > { %v13487_v31 = vadd.f32 %v4569_v8, %v13322_v22  ;;  %v5349_v22 = vpop.permute.xlu0 %5348 }
 0x496   : > { %v4619_v33 = vpop.f32.mrf.mxu1 }
 0x497   : > { %v4605_v28 = vpop.f32.mrf.mxu0  ;;  %v13496_v42 = vadd.f32 %v4619_v33, %v13305_v38 }
 0x498   : > { %v13499_v17 = vadd.f32 %v4605_v28, %v13356_v2  ;;  %9649 = vmatmul.msk.bf16.gmra.mxu3 %vm421_vm0, %v13336_v50 }
 0x499   : > { %9664 = vmatmul.msk.bf16.vlgmr.msra.gmra.mxu1 %vm701_vm1, %v13449_v59  ;;  %9666 = vmatmul.msk.bf16.vlgmr.msra.gmra.mxu2 %vm701_vm1, %v13449_v59 }
 0x49a   : > { %9663 = vmatmul.msk.bf16.gmra.mxu0 %vm701_vm1, %v13492_v13 }
 0x49b   : > { %v4586_v46 = vpop.f32.mrf.mxu3 }
 0x49c   : > { %v13510_v38 = vadd.f32 %v4586_v46, %v13319_v49  ;;  %v4638_v60 = vpop.f32.mrf.mxu2 }
 0x49d   : > { %v13513_v2 = vadd.f32 %v4638_v60, %v13342_v4  ;;  %v5060_v20 = vpop.permute.xlu0 %5059 }
 0x49e   : > { %v4621_v32 = vpop.f32.mrf.mxu1 }
 0x49f   : > { %v4607_v50 = vpop.f32.mrf.mxu0  ;;  %v13516_v14 = vadd.f32 %v4621_v32, %v13325_v19  ;;  %v5090_v19 = vsel %vm5081_vm9, %v5058_v1, %v5060_v20 }
 0x4a0   : > { %v13519_v54 = vadd.f32 %v4607_v50, %v13369_v29  ;;  %5283 = vmatpush.bf16.msra.mxu0 %v5090_v19 }
 0x4a3   : > { %v4588_v10 = vpop.f32.mrf.mxu3 }
 0x4a4   : > { %v13523_v49 = vadd.f32 %v4588_v10, %v13339_v26  ;;  %v4640_v63 = vpop.f32.mrf.mxu2  ;;  %v5351_v26 = vpop.permute.xlu1 %5350 }
 0x4a5   : > { %v13526_v4 = vadd.f32 %v4640_v63, %v13362_v47  ;;  %v5367_v40 = vsel %vm5081_vm9, %v5349_v22, %v5351_v26  ;;  %v5368_v28 = vsel %vm5081_vm9, %v5351_v26, %v5353_v5 }
 0x4a6   : > { %v4624_v37 = vpop.f32.mrf.mxu1  ;;  %5416 = vmatpush.bf16.msra.mxu2 %v5367_v40 }
 0x4a7   : > { %v13530_v34 = vadd.f32 %v4624_v37, %v13345_v3  ;;  %v4676_v29 = vpop.f32.mrf.mxu0  ;;  %v5355_v37 = vpop.permute.xlu2 %5354 }
 0x4a8   : > { %v13533_v12 = vadd.f32 %v4676_v29, %v13392_v21  ;;  %9668 = vmatmul.msk.bf16.vlgmr.msrb.gmra.mxu3 %vm701_vm1, %v13449_v59 }
 0x4a9   : > { %9665 = vmatmul.msk.bf16.gmra.mxu1 %vm701_vm1, %v13492_v13  ;;  %9667 = vmatmul.msk.bf16.gmra.mxu2 %vm701_vm1, %v13492_v13 }
 0x4aa   : > { %9670 = vmatmul.msk.bf16.vlgmr.msrb.gmra.mxu0 %vm701_vm1, %v13449_v59  ;;  %5435 = vmatpush.bf16.msrb.mxu3 %v5368_v28  ;;  %v5357_v28 = vpop.permute.xlu0 %5356 }
 0x4ab   : > { %v4657_v3 = vpop.f32.mrf.mxu3 }
 0x4ac   : > { %v4643_v47 = vpop.f32.mrf.mxu2  ;;  %v13544_v23 = vadd.f32 %v4657_v3, %v13359_v52  ;;  %v5347_v33 = vpop.permute.xlu1 %5346  ;;  %v16332_v3 = vmov 0  }
 0x4ad   : > { %v13547_v21 = vadd.f32 %v4643_v47, %v13376_v18  ;;  %v5366_v52 = vsel %vm5081_vm9, %v5347_v33, %v5349_v22  ;;  %10302 = vset.pattern.permute.xlu1 %v16332_v3  ;;  %10301 = vset.pattern.permute.xlu0 %v16332_v3 }
 0x4ae   : > { %v4626_v1 = vpop.f32.mrf.mxu1  ;;  %5397 = vmatpush.bf16.msra.mxu1 %v5366_v52  ;;  %10303 = vset.pattern.permute.xlu2 %v16332_v3 }
 0x4af   : > { %v13550_v8 = vadd.f32 %v4626_v1, %v13365_v7  ;;  %v4678_v55 = vpop.f32.mrf.mxu0  ;;  %v5598_v1 = vld [vmem:[%s16264_s5 + $0x8] sm:$0xff] }
 0x4b0   : > { %v13553_v58 = vadd.f32 %v4678_v55, %v13407_v16 }
 0x4b2   : > { %16503 = vst [vmem:[#allocation42_spill] sm:$0xff] %v13553_v58 }
 0x4b3   : > { %v4659_v18 = vpop.f32.mrf.mxu3 }
 0x4b4   : > { %v4645_v46 = vpop.f32.mrf.mxu2  ;;  %v13559_v60 = vadd.f32 %v4659_v18, %v13372_v57 }
 0x4b5   : > { %v13562_v7 = vadd.f32 %v4645_v46, %v13399_v25 }
 0x4b6   : > { %v4695_v16 = vpop.f32.mrf.mxu1 }
 0x4b7   : > { %v4681_v32 = vpop.f32.mrf.mxu0  ;;  %v13565_v50 = vadd.f32 %v4695_v16, %v13379_v53 }
 0x4b8   : > { %v13568_v39 = vadd.f32 %v4681_v32, %v13428_v56  ;;  %9669 = vmatmul.msk.bf16.gmra.mxu3 %vm701_vm1, %v13492_v13  ;;  %v5370_v32 = vsel %vm5081_vm9, %v5355_v37, %v5357_v28 }
 0x4b9   : > { %9672 = vmatmul.msk.bf16.vlgmr.msrb.gmra.mxu1 %vm701_vm1, %v13449_v59  ;;  %9674 = vmatmul.msk.bf16.vlgmr.msrb.gmra.mxu2 %vm701_vm1, %v13449_v59 }
 0x4ba   : > { %9671 = vmatmul.msk.bf16.gmra.mxu0 %vm701_vm1, %v13492_v13  ;;  %5473 = vmatpush.bf16.msrb.mxu1 %v5370_v32 }
 0x4bb   : > { %v4662_v57 = vpop.f32.mrf.mxu3 }
 0x4bc   : > { %v13579_v25 = vadd.f32 %v4662_v57, %v13395_v48  ;;  %v4714_v53 = vpop.f32.mrf.mxu2 }
 0x4bd   : > { %v13582_v56 = vadd.f32 %v4714_v53, %v13414_v41  ;;  %v5600_v41 = vld [vmem:[%s16264_s5 + $0x18] sm:$0xff] }
 0x4be   : > { %v4697_v22 = vpop.f32.mrf.mxu1  ;;  %5618 = vperm.xlu1 %10302, %v5600_v41  }
 0x4bf   : > { %v4683_v9 = vpop.f32.mrf.mxu0  ;;  %v13585_v10 = vadd.f32 %v4697_v22, %v13402_v6  ;;  %v5369_v6 = vsel %vm5081_vm9, %v5353_v5, %v5355_v37 }
 0x4c0   : > { %v13588_v20 = vadd.f32 %v4683_v9, %v13441_v11  ;;  %5454 = vmatpush.bf16.msrb.mxu0 %v5369_v6 }
 0x4c2   : > { %16504 = vst [vmem:[#allocation32_spill] sm:$0xff] %v13588_v20 }
 0x4c3   : > { %v4664_v63 = vpop.f32.mrf.mxu3 }
 0x4c4   : > { %v13591_v19 = vadd.f32 %v4664_v63, %v13410_v15  ;;  %v4716_v29 = vpop.f32.mrf.mxu2  ;;  %v5597_v63 = vld [vmem:[%s16264_s5] sm:$0xff] }
 0x4c5   : > { %v13594_v48 = vadd.f32 %v4716_v29, %v13434_v30  ;;  %5603 = vperm.xlu2 %10303, %v5597_v63  }
 0x4c6   : > { %16505 = vst [vmem:[#allocation5_spill] sm:$0xff] %v13591_v19  ;;  %v4700_v26 = vpop.f32.mrf.mxu1  ;;  %5608 = vperm.xlu1 %10302, %v5598_v1  }
 0x4c7   : > { %16506 = vst [vmem:[#allocation35_spill] sm:$0xff] %v13594_v48  ;;  %v13603_v11 = vadd.f32 %v4700_v26, %v13417_v35  ;;  %v4847_v15 = vpop.f32.mrf.mxu0  ;;  %v5361_v26 = vpop.permute.xlu0 %5360 }
 0x4c8   : > { %v13606_v30 = vadd.f32 %v4847_v15, %v13467_v44  ;;  %9676 = vmatmul.msk.bf16.vlgmr.msra.gmra.mxu3 %vm701_vm1, %v13449_v59 }
 0x4c9   : > { %9673 = vmatmul.msk.bf16.gmra.mxu1 %vm701_vm1, %v13492_v13  ;;  %9675 = vmatmul.msk.bf16.gmra.mxu2 %vm701_vm1, %v13492_v13 }
 0x4ca   : > { %9678 = vmatmul.msk.bf16.vlgmr.msra.gmra.mxu0 %vm701_vm1, %v13449_v59 }
 0x4cb   : > { %v4828_v35 = vpop.f32.mrf.mxu3 }
 0x4cc   : > { %v4719_v47 = vpop.f32.mrf.mxu2  ;;  %v13618_v5 = vadd.f32 %v4828_v35, %v13431_v36  ;;  %v5359_v36 = vpop.permute.xlu1 %5358  ;;  %v13685_v35 = vld [vmem:[%s16263_s4 + $0x88] sm:$0xff] }
 0x4cd   : > { %v13621_v44 = vadd.f32 %v4719_v47, %v13453_v43  ;;  %v5371_v57 = vsel %vm5081_vm9, %v5357_v28, %v5359_v36 }
 0x4ce   : > { %v4702_v55 = vpop.f32.mrf.mxu1  ;;  %5492 = vmatpush.bf16.msrb.mxu2 %v5371_v57 }
 0x4cf   : > { %v13627_v33 = vadd.f32 %v4702_v55, %v13437_v45  ;;  %v4849_v40 = vpop.f32.mrf.mxu0  ;;  %v13641_v45 = vld [vmem:[%s16263_s4 + $0x80] sm:$0xff] }
 0x4d0   : > { %v13630_v59 = vadd.f32 %v4849_v40, %v13482_v24  ;;  %v5599_v24 = vld [vmem:[%s16264_s5 + $0x10] sm:$0xff] }
 0x4d1   : > { %16507 = vst [vmem:[#allocation43_spill] sm:$0xff] %v13627_v33  ;;  %5613 = vperm.xlu0 %10301, %v5599_v24   ;;  %v5365_v24 = vpop.permute.xlu2 %5364 }
 0x4d3   : > { %v4830_v52 = vpop.f32.mrf.mxu3 }
 0x4d4   : > { %v4721_v18 = vpop.f32.mrf.mxu2  ;;  %v13633_v43 = vadd.f32 %v4830_v52, %v13444_v0  ;;  %v5363_v6 = vpop.permute.xlu1 %5362 }
 0x4d5   : > { %v13636_v46 = vadd.f32 %v4721_v18, %v13476_v62  ;;  %v5373_v1 = vsel %vm5081_vm9, %v5361_v26, %v5363_v6 }
 0x4d6   : > { %v4866_v16 = vpop.f32.mrf.mxu1  ;;  %5530 = vmatpush.bf16.msra.mxu0 %v5373_v1 }
 0x4d7   : > { %16508 = vst [vmem:[#allocation3_spill] sm:$0xff] %v13636_v46  ;;  %v4852_v0 = vpop.f32.mrf.mxu0  ;;  %v13649_v53 = vadd.f32 %v4866_v16, %v13456_v27  ;;  %v5374_v16 = vsel %vm5081_vm9, %v5363_v6, %v5365_v24 }
 0x4d8   : > { %v13652_v62 = vadd.f32 %v4852_v0, %v13510_v38  ;;  %9677 = vmatmul.msk.bf16.gmra.mxu3 %vm701_vm1, %v13492_v13 }
 0x4d9   : > { %9692 = vmatmul.msk.bf16.vlgmr.msra.gmra.mxu1 %vm421_vm0, %v13641_v45  ;;  %9694 = vmatmul.msk.bf16.vlgmr.msra.gmra.mxu2 %vm421_vm0, %v13641_v45 }
 0x4da   : > { %9679 = vmatmul.msk.bf16.gmra.mxu0 %vm701_vm1, %v13492_v13  ;;  %5549 = vmatpush.bf16.msra.mxu1 %v5374_v16 }
 0x4db   : > { %v4833_v22 = vpop.f32.mrf.mxu3 }
 0x4dc   : > { %v13663_v27 = vadd.f32 %v4833_v22, %v13472_v51  ;;  %v4885_v9 = vpop.f32.mrf.mxu2 }
 0x4dd   : > { %v13666_v38 = vadd.f32 %v4885_v9, %v13496_v42 }
 0x4de   : > { %v4868_v37 = vpop.f32.mrf.mxu1 }
 0x4df   : > { %v4854_v29 = vpop.f32.mrf.mxu0  ;;  %v13672_v41 = vadd.f32 %v4868_v37, %v13479_v61  ;;  %v5372_v61 = vsel %vm5081_vm9, %v5359_v36, %v5361_v26 }
 0x4e0   : > { %v13675_v13 = vadd.f32 %v4854_v29, %v13523_v49  ;;  %5511 = vmatpush.bf16.msra.mxu3 %v5372_v61 }
 0x4e3   : > { %v4835_v51 = vpop.f32.mrf.mxu3 }
 0x4e4   : > { %v13678_v15 = vadd.f32 %v4835_v51, %v13487_v31  ;;  %v13680_v42 = vpop.f32.mrf.mxu2 }
 0x4e6   : > { %v4871_v47 = vpop.f32.mrf.mxu1 }
 0x4e7   : > { %v13690_v49 = vadd.f32 %v4871_v47, %v13499_v17  ;;  %v4923_v55 = vpop.f32.mrf.mxu0 }
 0x4e8   : > { %v13693_v31 = vadd.f32 %v4923_v55, %v13544_v23  ;;  %9696 = vmatmul.msk.bf16.vlgmr.msrb.gmra.mxu3 %vm421_vm0, %v13641_v45 }
 0x4e9   : > { %9693 = vmatmul.msk.bf16.gmra.mxu1 %vm421_vm0, %v13685_v35  ;;  %9695 = vmatmul.msk.bf16.gmra.mxu2 %vm421_vm0, %v13685_v35 }
 0x4ea   : > { %9698 = vmatmul.msk.bf16.vlgmr.msrb.gmra.mxu0 %vm421_vm0, %v13641_v45 }
 0x4eb   : > { %v4904_v17 = vpop.f32.mrf.mxu3 }
 0x4ec   : > { %v4890_v40 = vpop.f32.mrf.mxu2  ;;  %v4994_v28 = vadd.f32 %v4904_v17, %v13513_v2 }
 0x4ed   : > { %v13705_v52 = vadd.f32 %v4890_v40, %v13530_v34 }
 0x4ee   : > { %v4873_v23 = vpop.f32.mrf.mxu1 }
 0x4ef   : > { %v13708_v36 = vadd.f32 %v4873_v23, %v13519_v54  ;;  %v13710_v18 = vpop.f32.mrf.mxu0 }
 0x4f3   : > { %v13713_v32 = vpop.f32.mrf.mxu3 }
 0x4f4   : > { %v13715_v57 = vpop.f32.mrf.mxu2 }
 0x4f6   : > { %v4942_v0 = vpop.f32.mrf.mxu1 }
 0x4f7   : > { %v4928_v22 = vpop.f32.mrf.mxu0  ;;  %v13718_v2 = vadd.f32 %v4942_v0, %v13533_v12 }
 0x4f8   : > { %v13721_v34 = vadd.f32 %v4928_v22, %v13579_v25  ;;  %9697 = vmatmul.msk.bf16.gmra.mxu3 %vm421_vm0, %v13685_v35 }
 0x4f9   : > { %9700 = vmatmul.msk.bf16.vlgmr.msrb.gmra.mxu1 %vm421_vm0, %v13641_v45  ;;  %9702 = vmatmul.msk.bf16.vlgmr.msrb.gmra.mxu2 %vm421_vm0, %v13641_v45 }
 0x4fa   : > { %9699 = vmatmul.msk.bf16.gmra.mxu0 %vm421_vm0, %v13685_v35 }
 0x4fb   : > { %v4909_v54 = vpop.f32.mrf.mxu3 }
 0x4fc   : > { %v5012_v9 = vadd.f32 %v4909_v54, %v13547_v21  ;;  %v4961_v12 = vpop.f32.mrf.mxu2 }
 0x4fd   : > { %v13733_v63 = vadd.f32 %v4961_v12, %v13565_v50 }
 0x4fe   : > { %v13735_v25 = vpop.f32.mrf.mxu1 }
 0x4ff   : > { %16509 = vst [vmem:[#allocation34_spill] sm:$0xff] %v13735_v25  ;;  %v13737_v37 = vpop.f32.mrf.mxu0 }
 0x500   : > { %16510 = vst [vmem:[#allocation4_spill] sm:$0xff] %v13737_v37 }
 0x503   : > { %v13739_v29 = vpop.f32.mrf.mxu3 }
 0x504   : > { %v13741_v26 = vpop.f32.mrf.mxu2 }
 0x506   : > { %v4947_v51 = vpop.f32.mrf.mxu1 }
 0x507   : > { %v5014_v6 = vadd.f32 %v4947_v51, %v13568_v39  ;;  %v5133_v47 = vpop.f32.mrf.mxu0 }
 0x508   : > { %v13745_v61 = vadd.f32 %v5133_v47, %v13618_v5  ;;  %9704 = vmatmul.msk.bf16.vlgmr.msra.gmra.mxu3 %vm421_vm0, %v13641_v45 }
 0x509   : > { %9701 = vmatmul.msk.bf16.gmra.mxu1 %vm421_vm0, %v13685_v35  ;;  %9703 = vmatmul.msk.bf16.gmra.mxu2 %vm421_vm0, %v13685_v35 }
 0x50a   : > { %9706 = vmatmul.msk.bf16.vlgmr.msra.gmra.mxu0 %vm421_vm0, %v13641_v45 }
 0x50b   : > { %v4980_v21 = vpop.f32.mrf.mxu3 }
 0x50c   : > { %v4966_v50 = vpop.f32.mrf.mxu2  ;;  %v4998_v39 = vadd.f32 %v4980_v21, %v13582_v56 }
 0x50d   : > { %v13757_v1 = vadd.f32 %v4966_v50, %v13603_v11 }
 0x50e   : > { %v13759_v5 = vpop.f32.mrf.mxu1 }
 0x50f   : > { %16511 = vst [vmem:[#allocation37_spill] sm:$0xff] %v13759_v5  ;;  %v13761_v55 = vpop.f32.mrf.mxu0 }
 0x513   : > { %v13763_v17 = vpop.f32.mrf.mxu3 }
 0x514   : > { %16512 = vst [vmem:[#allocation36_spill] sm:$0xff] %v13763_v17  ;;  %v13765_v40 = vpop.f32.mrf.mxu2 }
 0x515   : > { %16513 = vst [vmem:[#allocation39_spill] sm:$0xff] %v13765_v40 }
 0x516   : > { %v5152_v23 = vpop.f32.mrf.mxu1 }
 0x517   : > { %v5138_v24 = vpop.f32.mrf.mxu0  ;;  %v5296_v16 = vadd.f32 %v5152_v23, %v13606_v30 }
 0x518   : > { %v13769_v0 = vadd.f32 %v5138_v24, %v13663_v27  ;;  %9705 = vmatmul.msk.bf16.gmra.mxu3 %vm421_vm0, %v13685_v35 }
 0x519   : > { %9708 = vmatmul.msk.bf16.vlgmr.msra.gmra.mxu1 %vm421_vm0, %v13641_v45 }
 0x51a   : > { %9707 = vmatmul.msk.bf16.gmra.mxu0 %vm421_vm0, %v13685_v35 }
 0x51b   : > { %v4985_v56 = vpop.f32.mrf.mxu3 }
 0x51c   : > { %v5016_v11 = vadd.f32 %v4985_v56, %v13621_v44  ;;  %v5171_v22 = vpop.f32.mrf.mxu2 }
 0x51d   : > { %v13779_v54 = vadd.f32 %v5171_v22, %v13649_v53 }
 0x51e   : > { %v5154_v30 = vpop.f32.mrf.mxu1 }
 0x51f   : > { %v13781_v12 = vpop.f32.mrf.mxu0 }
 0x523   : > { %v13783_v27 = vpop.f32.mrf.mxu3 }
 0x524   : > { %16514 = vst [vmem:[#allocation38_spill] sm:$0xff] %v13783_v27  ;;  %v13785_v51 = vpop.f32.mrf.mxu2 }
 0x526   : > { %v5157_v47 = vpop.f32.mrf.mxu1 }
 0x527   : > { %v13788_v45 = vadd.f32 %v5157_v47, %v13652_v62  ;;  %v5209_v21 = vpop.f32.mrf.mxu0 }
 0x528   : > { %v13790_v50 = vadd.f32 %v5209_v21, %v4994_v28 }
 0x529   : > { %9709 = vmatmul.msk.bf16.gmra.mxu1 %vm421_vm0, %v13685_v35  ;;  %vm5926_vm0 = vcmask 302084  }
 0x52b   : > { %v5190_v44 = vpop.f32.mrf.mxu3 }
 0x52c   : > { %v5176_v53 = vpop.f32.mrf.mxu2  ;;  %v5298_v58 = vadd.f32 %v5190_v44, %v13666_v38 }
 0x52d   : > { %v13795_v23 = vadd.f32 %v5176_v53, %v13690_v49 }
 0x52e   : > { %v13797_v24 = vpop.f32.mrf.mxu1 }
 0x52f   : > { %v13799_v56 = vpop.f32.mrf.mxu0 }
 0x533   : > { %v13801_v22 = vpop.f32.mrf.mxu3 }
 0x534   : > { %v13803_v3 = vpop.f32.mrf.mxu2 }
 0x536   : > { %v5228_v62 = vpop.f32.mrf.mxu1 }
 0x537   : > { %v5214_v47 = vpop.f32.mrf.mxu0  ;;  %v13806_v28 = vadd.f32 %v5228_v62, %v13693_v31 }
 0x538   : > { %v13808_v21 = vadd.f32 %v5214_v47, %v5012_v9 }
 0x53b   : > { %v13810_v35 = vpop.f32.mrf.mxu3 }
 0x53c   : > { %v5247_v27 = vpop.f32.mrf.mxu2 }
 0x53d   : > { %v13813_v49 = vadd.f32 %v5247_v27, %v13718_v2 }
 0x53e   : > { %v13815_v53 = vpop.f32.mrf.mxu1 }
 0x53f   : > { %v13817_v46 = vpop.f32.mrf.mxu0 }
 0x543   : > { %v13819_v5 = vpop.f32.mrf.mxu3 }
 0x544   : > { %v13821_v20 = vpop.f32.mrf.mxu2 }
 0x545   : > { %16515 = vst [vmem:[#allocation40_spill] sm:$0xff] %v13821_v20 }
 0x546   : > { %v5233_v40 = vpop.f32.mrf.mxu1 }
 0x547   : > { %v13824_v31 = vadd.f32 %v5233_v40, %v13721_v34  ;;  %v5285_v9 = vpop.f32.mrf.mxu0  ;;  %v13841_v40 = vpop.permute.xlu1 %5618 }
 0x548   : > { %v13826_v62 = vadd.f32 %v5285_v9, %v4998_v39 }
 0x54a   : > { %16516 = vst [vmem:[#allocation41_spill] sm:$0xff] %v13826_v62 }
 0x54b   : > { %v5266_v47 = vpop.f32.mrf.mxu3 }
 0x54c   : > { %v5252_v33 = vpop.f32.mrf.mxu2  ;;  %v13829_v2 = vadd.f32 %v5266_v47, %v13733_v63  ;;  %v13846_v63 = vpop.permute.xlu2 %5603  ;;  %v13852_v47 = vld [vmem:[%s16261_s2] sm:$0xff] }
 0x54d   : > { %v13831_v27 = vadd.f32 %v5252_v33, %v5014_v6 }
 0x54e   : > { %v13833_v17 = vpop.f32.mrf.mxu1 }
 0x54f   : > { %16517 = vst [vmem:[#allocation9_spill] sm:$0xff] %v13831_v27  ;;  %v13835_v48 = vpop.f32.mrf.mxu0  ;;  %v5304_v27 = vadd.f32 %v13761_v55, %v13633_v43 }
 0x550   : > { %16518 = vst [vmem:[#allocation6_spill] sm:$0xff] %v13833_v17 }
 0x551   : > { %16519 = vst [vmem:[#allocation12_spill] sm:$0xff] %v13835_v48 }
 0x553   : > { %v13837_v37 = vpop.f32.mrf.mxu3 }
 0x554   : > { %v13839_v20 = vpop.f32.mrf.mxu2 }
 0x555   : > { %16520 = vst [vmem:[#allocation31_spill] sm:$0xff] %v13839_v20 }
 0x556   : > { %v5399_v34 = vpop.f32.mrf.mxu1 }
 0x557   : > { %v5290_v39 = vpop.f32.mrf.mxu0  ;;  %v5561_v9 = vadd.f32 %v5399_v34, %v13745_v61 }
 0x558   : > { %v13844_v62 = vadd.f32 %v5290_v39, %v5016_v11  ;;  %v13860_v11 = vperm.slane %v13852_v47, 0 }
 0x559   : > { %v5621_v6 = vadd.f32 %v13846_v63, %v5561_v9 }
 0x55a   : > { %16521 = vst [vmem:[#allocation17_spill] sm:$0xff] %v13844_v62  ;;  %v13864_v62 = vperm.slane %v13852_v47, 1 }
 0x55b   : > { %v5271_v33 = vpop.f32.mrf.mxu3  ;;  %v5657_v9 = vmax.f32 %v5621_v6, 0.0 }
 0x55c   : > { %v13855_v20 = vadd.f32 %v5271_v33, %v13757_v1  ;;  %v5418_v48 = vpop.f32.mrf.mxu2  ;;  %v13868_v1 = vpop.permute.xlu1 %5608 }
 0x55d   : > { %v5562_v61 = vadd.f32 %v5418_v48, %v5296_v16  ;;  %v5715_v48 = vmul.f32 %v13860_v11, %v5657_v9  ;;  %v13880_v9 = vpop.permute.xlu0 %5613 }
 0x55e   : > { %16522 = vst [vmem:[#allocation13_spill] sm:$0xff] %v13855_v20  ;;  %v5401_v34 = vpop.f32.mrf.mxu1  ;;  %v5305_v20 = vadd.f32 %v5154_v30, %v13630_v59 }
 0x55f   : > { %v5622_v39 = vadd.f32 %v13846_v63, %v5562_v61  ;;  %v13866_v17 = vpop.f32.mrf.mxu0  ;;  %v5570_v19 = vadd.f32 %v5401_v34, %v5304_v27 }
 0x560   : > { %16523 = vst [vmem:[#allocation8_spill] sm:$0xff] %v13866_v17 }
 0x561   : > { %v5658_v33 = vmax.f32 %v5622_v39, 0.0  ;;  %v5630_v16 = vadd.f32 %v13868_v1, %v5570_v19 }
 0x563   : > { %v5716_v43 = vmul.f32 %v13864_v62, %v5658_v33  ;;  %v13873_v55 = vpop.f32.mrf.mxu3  ;;  %v5666_v59 = vmax.f32 %v5630_v16, 0.0 }
 0x564   : > { %v5420_v6 = vpop.f32.mrf.mxu2 }
 0x565   : > { %v5761_v61 = vpack.c.bf16 %v5716_v43, %v5715_v48  ;;  %v5571_v25 = vadd.f32 %v5420_v6, %v5305_v20  ;;  %v5002_v20 = vadd.f32 %v13680_v42, %v13516_v14  ;;  %v5322_v48 = vadd.f32 %v13781_v12, %v13678_v15 }
 0x566   : > { %v5404_v17 = vpop.f32.mrf.mxu1  ;;  %v13900_v6 = vperm.slane %v13852_v47, 3 }
 0x567   : > { %v5631_v27 = vadd.f32 %v13868_v1, %v5571_v25  ;;  %v5579_v34 = vadd.f32 %v5404_v17, %v13769_v0  ;;  %v5456_v39 = vpop.f32.mrf.mxu0  ;;  %5801 = vrot.lane.b32.xlu1 %v5761_v61, %s10322_s17  ;;  %v13890_v0 = vmul.f32 %v13860_v11, %v5666_v59  ;;  %v5307_v43 = vadd.f32 %v13801_v22, %v5002_v20 }
 0x568   : > { %v5564_v30 = vadd.f32 %v5456_v39, %v5298_v58 }
 0x569   : > { %v5667_v33 = vmax.f32 %v5631_v27, 0.0  ;;  %v5639_v25 = vadd.f32 %v13880_v9, %v5579_v34  ;;  %v13904_v27 = vperm.slane %v13852_v47, 2 }
 0x56a   : > { %v5624_v19 = vadd.f32 %v13846_v63, %v5564_v30  ;;  %v5306_v30 = vadd.f32 %v13785_v51, %v13672_v41 }
 0x56b   : > { %v13886_v38 = vmul.f32 %v13864_v62, %v5667_v33  ;;  %v5437_v17 = vpop.f32.mrf.mxu3  ;;  %v5675_v15 = vmax.f32 %v5639_v25, 0.0 }
 0x56c   : > { %v5423_v44 = vpop.f32.mrf.mxu2  ;;  %v5563_v58 = vadd.f32 %v5437_v17, %v13779_v54  ;;  %v5660_v42 = vmax.f32 %v5624_v19, 0.0  ;;  %v5323_v17 = vadd.f32 %v13797_v24, %v13675_v13 }
 0x56d   : > { %v5580_v16 = vadd.f32 %v5423_v44, %v13788_v45  ;;  %v5766_v14 = vpack.c.bf16 %v13886_v38, %v13890_v0  ;;  %v5733_v44 = vmul.f32 %v13860_v11, %v5675_v15 }
 0x56e   : > { %v5623_v61 = vadd.f32 %v13846_v63, %v5563_v58  ;;  %v5406_v54 = vpop.f32.mrf.mxu1  ;;  %v5718_v33 = vmul.f32 %v13900_v6, %v5660_v42  ;;  %v5316_v42 = vadd.f32 %v13810_v35, %v13705_v52 }
 0x56f   : > { %v5640_v34 = vadd.f32 %v13880_v9, %v5580_v16  ;;  %v5588_v12 = vadd.f32 %v5406_v54, %v5322_v48  ;;  %v5458_v22 = vpop.f32.mrf.mxu0 }
 0x570   : > { %v5659_v39 = vmax.f32 %v5623_v61, 0.0  ;;  %v5573_v45 = vadd.f32 %v5458_v22, %v5307_v43 }
 0x571   : > { %v5676_v59 = vmax.f32 %v5640_v34, 0.0  ;;  %v5648_v58 = vadd.f32 %v13841_v40, %v5588_v12 }
 0x572   : > { %v5717_v19 = vmul.f32 %v13904_v27, %v5659_v39  ;;  %v5633_v20 = vadd.f32 %v13868_v1, %v5573_v45 }
 0x573   : > { %v5734_v25 = vmul.f32 %v13864_v62, %v5676_v59  ;;  %v5439_v48 = vpop.f32.mrf.mxu3  ;;  %v5684_v13 = vmax.f32 %v5648_v58, 0.0 }
 0x574   : > { %v5762_v43 = vpack.c.bf16 %v5718_v33, %v5717_v19  ;;  %v5425_v16 = vpop.f32.mrf.mxu2  ;;  %v5572_v61 = vadd.f32 %v5439_v48, %v5306_v30  ;;  %v5669_v54 = vmax.f32 %v5633_v20, 0.0  ;;  %v5003_v33 = vadd.f32 %v13713_v32, %v13526_v4 }
 0x575   : > { %v5771_v41 = vpack.c.bf16 %v5734_v25, %v5733_v44  ;;  %v5589_v51 = vadd.f32 %v5425_v16, %v5323_v17  ;;  %v5742_v19 = vmul.f32 %v13860_v11, %v5684_v13  ;;  %v5020_v44 = vadd.f32 %v13715_v57, %v13550_v8 }
 0x576   : > { %v5632_v34 = vadd.f32 %v13868_v1, %v5572_v61  ;;  %v5475_v22 = vpop.f32.mrf.mxu1  ;;  %5803 = vrot.lane.b32.xlu1 %v5762_v43, %s10322_s17  ;;  %v13925_v30 = vmul.f32 %v13900_v6, %v5669_v54  ;;  %v5308_v43 = vadd.f32 %v13799_v56, %v5003_v33  ;;  %v13945_v16 = vperm.slane %v13852_v47, 4 }
 0x577   : > { %v5649_v24 = vadd.f32 %v13841_v40, %v5589_v51  ;;  %v5461_v15 = vpop.f32.mrf.mxu0  ;;  %v5565_v12 = vadd.f32 %v5475_v22, %v13790_v50  ;;  %5821 = vrot.lane.b32.xlu2 %v5771_v41, %s10322_s17  ;;  %v5325_v11 = vadd.f32 %v13819_v5, %v5020_v44  ;;  %v13950_v41 = vperm.slane %v13852_v47, 5 }
 0x578   : > { %v5668_v39 = vmax.f32 %v5632_v34, 0.0  ;;  %v5582_v45 = vadd.f32 %v5461_v15, %v5316_v42  ;;  %v5004_v42 = vadd.f32 %v13710_v18, %v13559_v60  ;;  %v5324_v34 = vadd.f32 %v13803_v3, %v13708_v36 }
 0x579   : > { %v5685_v59 = vmax.f32 %v5649_v24, 0.0  ;;  %v5625_v20 = vadd.f32 %v13846_v63, %v5565_v12 }
 0x57a   : > { %v13928_v52 = vmul.f32 %v13904_v27, %v5668_v39  ;;  %v5642_v35 = vadd.f32 %v13880_v9, %v5582_v45  ;;  %v5309_v15 = vadd.f32 %v13815_v53, %v5004_v42  ;;  %v16524_v42 = vld [vmem:[#allocation42_spill] sm:$0xff] }
 0x57b   : > { %v5743_v50 = vmul.f32 %v13864_v62, %v5685_v59  ;;  %v5442_v17 = vpop.f32.mrf.mxu3  ;;  %v5661_v57 = vmax.f32 %v5625_v20, 0.0 }
 0x57c   : > { %v5581_v25 = vadd.f32 %v5442_v17, %v13795_v23  ;;  %v5494_v58 = vpop.f32.mrf.mxu2  ;;  %v5767_v48 = vpack.c.bf16 %v13925_v30, %v13928_v52  ;;  %v5678_v62 = vmax.f32 %v5642_v35, 0.0 }
 0x57d   : > { %v5566_v4 = vadd.f32 %v5494_v58, %v13806_v28  ;;  %v5776_v32 = vpack.c.bf16 %v5743_v50, %v5742_v19  ;;  %v13966_v38 = vmul.f32 %v13945_v16, %v5661_v57 }
 0x57e   : > { %v5641_v61 = vadd.f32 %v13880_v9, %v5581_v25  ;;  %v5477_v8 = vpop.f32.mrf.mxu1  ;;  %v5736_v22 = vmul.f32 %v13900_v6, %v5678_v62 }
 0x57f   : > { %v5626_v23 = vadd.f32 %v13846_v63, %v5566_v4  ;;  %v5463_v51 = vpop.f32.mrf.mxu0  ;;  %v5574_v56 = vadd.f32 %v5477_v8, %v5308_v43  ;;  %5831 = vrot.lane.b32.xlu0 %v5776_v32, %s10322_s17  ;;  %5811 = vrot.lane.b32.xlu2 %v5766_v14, %s10322_s17  ;;  %v13983_v4 = vperm.slane %v13852_v47, 7  ;;  %v5021_v32 = vadd.f32 %v13739_v29, %v13562_v7 }
 0x580   : > { %v5677_v5 = vmax.f32 %v5641_v61, 0.0  ;;  %v5591_v28 = vadd.f32 %v5463_v51, %v5325_v11 }
 0x581   : > { %v5662_v54 = vmax.f32 %v5626_v23, 0.0  ;;  %v5634_v60 = vadd.f32 %v13868_v1, %v5574_v56  ;;  %v5326_v23 = vadd.f32 %v13817_v46, %v5021_v32 }
 0x582   : > { %v5735_v13 = vmul.f32 %v13904_v27, %v5677_v5  ;;  %v5651_v24 = vadd.f32 %v13841_v40, %v5591_v28 }
 0x583   : > { %v13969_v0 = vmul.f32 %v13950_v41, %v5662_v54  ;;  %v5444_v18 = vpop.f32.mrf.mxu3  ;;  %v5670_v35 = vmax.f32 %v5634_v60, 0.0  ;;  %v16525_v54 = vld [vmem:[#allocation34_spill] sm:$0xff] }
 0x584   : > { %v5772_v14 = vpack.c.bf16 %v5736_v22, %v5735_v13  ;;  %v5590_v12 = vadd.f32 %v5444_v18, %v5324_v34  ;;  %v5496_v3 = vpop.f32.mrf.mxu2  ;;  %v5687_v45 = vmax.f32 %v5651_v24, 0.0  ;;  %v5005_v34 = vadd.f32 %v16525_v54, %v16524_v42  ;;  %v16526_v13 = vld [vmem:[#allocation5_spill] sm:$0xff]  ;;  %v16527_v24 = vld [vmem:[#allocation4_spill] sm:$0xff]  ;;  %v16535_v42 = vld [vmem:[#allocation43_spill] sm:$0xff] }
 0x585   : > { %v5763_v36 = vpack.c.bf16 %v13969_v0, %v13966_v38  ;;  %v5575_v39 = vadd.f32 %v5496_v3, %v5309_v15  ;;  %v5022_v15 = vadd.f32 %v16527_v24, %v16526_v13  ;;  %v16528_v0 = vld [vmem:[#allocation40_spill] sm:$0xff]  ;;  %v16536_v54 = vld [vmem:[#allocation39_spill] sm:$0xff] }
 0x586   : > { %v5650_v59 = vadd.f32 %v13841_v40, %v5590_v12  ;;  %v5480_v53 = vpop.f32.mrf.mxu1  ;;  %v5745_v25 = vmul.f32 %v13900_v6, %v5687_v45  ;;  %v5006_v6 = vadd.f32 %v13741_v26, %v13585_v10  ;;  %v14007_v10 = vperm.slane %v13852_v47, 6  ;;  %v16538_v24 = vld [vmem:[#allocation12_spill] sm:$0xff] }
 0x587   : > { %v5635_v33 = vadd.f32 %v13868_v1, %v5575_v39  ;;  %v5583_v19 = vadd.f32 %v5480_v53, %v13808_v21  ;;  %v5532_v50 = vpop.f32.mrf.mxu0  ;;  %5823 = vrot.lane.b32.xlu0 %v5772_v14, %s10322_s17  ;;  %v13988_v21 = vmul.f32 %v13945_v16, %v5670_v35  ;;  %v5310_v47 = vadd.f32 %v16528_v0, %v5005_v34  ;;  %v16529_v14 = vld [vmem:[#allocation6_spill] sm:$0xff] }
 0x588   : > { %v5686_v20 = vmax.f32 %v5650_v59, 0.0  ;;  %v5568_v17 = vadd.f32 %v5532_v50, %v13829_v2  ;;  %v5311_v51 = vadd.f32 %v13837_v37, %v5006_v6  ;;  %v5327_v12 = vadd.f32 %v16529_v14, %v5022_v15 }
 0x589   : > { %v5671_v44 = vmax.f32 %v5635_v33, 0.0  ;;  %v5643_v2 = vadd.f32 %v13880_v9, %v5583_v19  ;;  %v5024_v34 = vadd.f32 %v16536_v54, %v16535_v42 }
 0x58a   : > { %v5744_v58 = vmul.f32 %v13904_v27, %v5686_v20  ;;  %v5628_v43 = vadd.f32 %v13846_v63, %v5568_v17 }
 0x58b   : > { %v13991_v11 = vmul.f32 %v13950_v41, %v5671_v44  ;;  %v5513_v62 = vpop.f32.mrf.mxu3  ;;  %v5329_v0 = vadd.f32 %v13873_v55, %v5024_v34  ;;  %v16539_v55 = vld [vmem:[#allocation32_spill] sm:$0xff] }
 0x58c   : > { %v5664_v27 = vmax.f32 %v5628_v43, 0.0  ;;  %v5499_v61 = vpop.f32.mrf.mxu2  ;;  %v5567_v8 = vadd.f32 %v5513_v62, %v13813_v49  ;;  %v5777_v57 = vpack.c.bf16 %v5745_v25, %v5744_v58  ;;  %v5679_v49 = vmax.f32 %v5643_v2, 0.0  ;;  %v16530_v2 = vld [vmem:[#allocation41_spill] sm:$0xff] }
 0x58d   : > { %v5584_v7 = vadd.f32 %v5499_v61, %v13824_v31  ;;  %v5768_v29 = vpack.c.bf16 %v13991_v11, %v13988_v21 }
 0x58e   : > { %v14003_v56 = vmul.f32 %v13983_v4, %v5664_v27  ;;  %v5627_v5 = vadd.f32 %v13846_v63, %v5567_v8  ;;  %v5482_v26 = vpop.f32.mrf.mxu1  ;;  %5833 = vrot.lane.b32.xlu2 %v5777_v57, %s10322_s17  ;;  %v5737_v3 = vmul.f32 %v13945_v16, %v5679_v49  ;;  %v16531_v27 = vld [vmem:[#allocation13_spill] sm:$0xff]  ;;  %v16532_v8 = vmov 0  }
 0x58f   : > { %v5644_v46 = vadd.f32 %v13880_v9, %v5584_v7  ;;  %v5592_v31 = vadd.f32 %v5482_v26, %v5326_v23  ;;  %v5534_v28 = vpop.f32.mrf.mxu0  ;;  %5754 = vst.msk [vmem:[#allocation2 + $0x50] sm:$0xf] %vm5751_vm10, %v16532_v8  ;;  %v16533_v7 = vld [vmem:[#allocation35_spill] sm:$0xff] }
 0x590   : > { %v5663_v37 = vmax.f32 %v5627_v5, 0.0  ;;  %v5577_v22 = vadd.f32 %v5534_v28, %v5311_v51  ;;  %5752 = vst.msk [vmem:[#allocation2] sm:$0xf] %vm5751_vm10, %v16532_v8  ;;  %v16534_v51 = vld [vmem:[#allocation36_spill] sm:$0xff] }
 0x591   : > { %v5680_v38 = vmax.f32 %v5644_v46, 0.0  ;;  %v5652_v45 = vadd.f32 %v13841_v40, %v5592_v31  ;;  %v5007_v5 = vadd.f32 %v16534_v51, %v16533_v7  ;;  %5753 = vst.msk [vmem:[#allocation2 + $0x28] sm:$0xf] %vm5751_vm10, %v16532_v8 }
 0x592   : > { %v14017_v60 = vmul.f32 %v14007_v10, %v5663_v37  ;;  %v5637_v18 = vadd.f32 %v13868_v1, %v5577_v22  ;;  %5755 = vst.msk [vmem:[#allocation2 + $0x78] sm:$0xf] %vm5751_vm10, %v16532_v8  ;;  %v16537_v22 = vld [vmem:[#allocation9_spill] sm:$0xff]  ;;  %vm14219_vm10 = vmor %vm5926_vm0, %vm5863_vm15 }
 0x593   : > { %v5738_v39 = vmul.f32 %v13950_v41, %v5680_v38  ;;  %v5515_v59 = vpop.f32.mrf.mxu3  ;;  %v5688_v58 = vmax.f32 %v5652_v45, 0.0  ;;  %5757 = vst.msk [vmem:[#allocation2 + $0x24] sm:$0xf] %vm5756_vm11, %v16532_v8 }
 0x594   : > { %v5764_v53 = vpack.c.bf16 %v14003_v56, %v14017_v60  ;;  %v5673_v35 = vmax.f32 %v5637_v18, 0.0  ;;  %v5501_v33 = vpop.f32.mrf.mxu2  ;;  %v5576_v19 = vadd.f32 %v5515_v59, %v5310_v47  ;;  %5758 = vst.msk [vmem:[#allocation2 + $0x4c] sm:$0xf] %vm5756_vm11, %v16532_v8 }
 0x595   : > { %v5773_v50 = vpack.c.bf16 %v5738_v39, %v5737_v3  ;;  %v5593_v20 = vadd.f32 %v5501_v33, %v5327_v12  ;;  %5759 = vst.msk [vmem:[#allocation2 + $0x74] sm:$0xf] %vm5756_vm11, %v16532_v8  ;;  %v16540_v39 = vld [vmem:[#allocation37_spill] sm:$0xff] }
 0x596   : > { %v14027_v17 = vmul.f32 %v13983_v4, %v5673_v35  ;;  %v5636_v44 = vadd.f32 %v13868_v1, %v5576_v19  ;;  %v5551_v25 = vpop.f32.mrf.mxu1  ;;  %5805 = vrot.lane.b32.xlu2 %v5763_v36, %s10322_s17  ;;  %v14041_v36 = vld [vmem:[%s16261_s2 + $0x8] ss:$0 sm:$0xff]  ;;  %5760 = vst.msk [vmem:[#allocation2 + $0x9c] sm:$0xf] %vm5756_vm11, %v16532_v8  ;;  %v5023_v45 = vadd.f32 %v16540_v39, %v16539_v55  ;;  %v16541_v19 = vld [vmem:[#allocation31_spill] sm:$0xff] }
 0x597   : > { %v5653_v43 = vadd.f32 %v13841_v40, %v5593_v20  ;;  %v5537_v32 = vpop.f32.mrf.mxu0  ;;  %v5569_v62 = vadd.f32 %v5551_v25, %v16530_v2  ;;  %5825 = vrot.lane.b32.xlu1 %v5773_v50, %s10322_s17 }
 0x598   : > { %v5672_v6 = vmax.f32 %v5636_v44, 0.0  ;;  %v5586_v61 = vadd.f32 %v5537_v32, %v16531_v27  ;;  %v5328_v50 = vadd.f32 %v16541_v19, %v5023_v45 }
 0x599   : > { %v5689_v57 = vmax.f32 %v5653_v43, 0.0  ;;  %v5629_v23 = vadd.f32 %v13846_v63, %v5569_v62  ;;  %v5746_v63 = vmul.f32 %v13945_v16, %v5688_v58  ;;  %v16542_v62 = vld [vmem:[#allocation17_spill] sm:$0xff] }
 0x59a   : > { %v14048_v26 = vmul.f32 %v14007_v10, %v5672_v6  ;;  %v5646_v49 = vadd.f32 %v13880_v9, %v5586_v61 }
 0x59b   : > { %v5747_v46 = vmul.f32 %v13950_v41, %v5689_v57  ;;  %v5665_v31 = vmax.f32 %v5629_v23, 0.0  ;;  %v5518_v28 = vpop.f32.mrf.mxu3  ;;  %v5312_v41 = vadd.f32 %v16538_v24, %v5007_v5  ;;  %v16543_v57 = vld [vmem:[#allocation3_spill] sm:$0xff]  ;;  %v16544_v23 = vld [vmem:[#allocation38_spill] sm:$0xff]  ;;  %v16545_v5 = vld [vmem:[#allocation8_spill] sm:$0xff] }
 0x59c   : > { %v5682_v37 = vmax.f32 %v5646_v49, 0.0  ;;  %v5585_v13 = vadd.f32 %v5518_v28, %v16537_v22  ;;  %v5769_v16 = vpack.c.bf16 %v14027_v17, %v14048_v26 }
 0x59d   : > { %v14066_v15 = vmul.f32 %v14041_v36, %v5665_v31  ;;  %v5778_v38 = vpack.c.bf16 %v5747_v46, %v5746_v63 }
 0x59e   : > { %v5740_v47 = vmul.f32 %v13983_v4, %v5682_v37  ;;  %v5645_v18 = vadd.f32 %v13880_v9, %v5585_v13  ;;  %v5553_v14 = vpop.f32.mrf.mxu1 }
 0x59f   : > { %v5539_v12 = vpop.f32.mrf.mxu0  ;;  %v5578_v3 = vadd.f32 %v5553_v14, %v5312_v41  ;;  %5835 = vrot.lane.b32.xlu0 %v5778_v38, %s10322_s17  ;;  %5815 = vrot.lane.b32.xlu1 %v5768_v29, %s10322_s17 }
 0x5a0   : > { %v5681_v59 = vmax.f32 %v5645_v18, 0.0  ;;  %v5595_v35 = vadd.f32 %v5539_v12, %v5329_v0 }
 0x5a1   : > { %v5638_v33 = vadd.f32 %v13868_v1, %v5578_v3 }
 0x5a2   : > { %v5739_v20 = vmul.f32 %v14007_v10, %v5681_v59  ;;  %v5655_v44 = vadd.f32 %v13841_v40, %v5595_v35 }
 0x5a3   : > { %v5674_v25 = vmax.f32 %v5638_v33, 0.0  ;;  %v5520_v58 = vpop.f32.mrf.mxu3 }
 0x5a4   : > { %v5774_v21 = vpack.c.bf16 %v5740_v47, %v5739_v20  ;;  %v5691_v11 = vmax.f32 %v5655_v44, 0.0  ;;  %v5594_v29 = vadd.f32 %v5520_v58, %v5328_v50 }
 0x5a5   : > { %v14089_v43 = vmul.f32 %v14041_v36, %v5674_v25 }
 0x5a6   : > { %v14092_v32 = vmul.f32 %v13983_v4, %v5691_v11  ;;  %v5654_v2 = vadd.f32 %v13841_v40, %v5594_v29  ;;  %v5556_v1 = vpop.f32.mrf.mxu1  ;;  %v5025_v4 = vadd.f32 %v16544_v23, %v16543_v57 }
 0x5a7   : > { %v5587_v6 = vadd.f32 %v5556_v1, %v16542_v62  ;;  %5813 = vrot.lane.b32.xlu0 %v5767_v48, %s10322_s17  ;;  %v5770_v60 = vpack.c.bf16 %v14089_v43, %v14089_v43 }
 0x5a8   : > { %v5690_v27 = vmax.f32 %v5654_v2, 0.0  ;;  %v5330_v49 = vadd.f32 %v16545_v5, %v5025_v4  ;;  %v5765_v4 = vpack.c.bf16 %v14066_v15, %v14066_v15 }
 0x5a9   : > { %v5647_v61 = vadd.f32 %v13880_v9, %v5587_v6 }
 0x5aa   : > { %v14102_v8 = vmul.f32 %v14007_v10, %v5690_v27 }
 0x5ab   : > { %v5683_v7 = vmax.f32 %v5647_v61, 0.0 }
 0x5ac   : > { %v5779_v51 = vpack.c.bf16 %v14092_v32, %v14102_v8 }
 0x5ad   : > { %v5741_v63 = vmul.f32 %v14041_v36, %v5683_v7 }
 0x5ae   : > { %v5558_v46 = vpop.f32.mrf.mxu1 }
 0x5af   : > { %v5775_v30 = vpack.c.bf16 %v5741_v63, %v5741_v63  ;;  %v5596_v52 = vadd.f32 %v5558_v46, %v5330_v49  ;;  %5827 = vrot.lane.b32.xlu0 %v5774_v21, %s10322_s17 }
 0x5b1   : > { %v5656_v9 = vadd.f32 %v13841_v40, %v5596_v52  ;;  %5829 = vrot.lane.b32.xlu1 %v5775_v30, %s10322_s17 }
 0x5b3   : > { %v5692_v48 = vmax.f32 %v5656_v9, 0.0 }
 0x5b5   : > { %v5750_v10 = vmul.f32 %v14041_v36, %v5692_v48 }
 0x5b7   : > { %v5780_v43 = vpack.c.bf16 %v5750_v10, %v5750_v10 }
 0x5d1   : > { %v5822_v31 = vpop.permute.xlu2 %5821 }
 0x5d2   : > { %v5851_v42 = vrot.slane %v5822_v31, 4 }
 0x5d4   : > { %v5881_v54 = vsel %vm5861_vm13, %v5851_v42, %v5822_v31 }
 0x5d5   : > { %5934 = vst.msk [vmem:[#allocation2 + $0x50] sm:$0xff] %vm14115_vm14, %v5881_v54 }
 0x5d9   : > { %v14122_v40 = vpop.permute.xlu2 %5811  ;;  %v5802_v34 = vpop.permute.xlu1 %5801 }
 0x5da   : > { %v5846_v37 = vrot.slane %v14122_v40, 4  ;;  %v5841_v36 = vrot.slane %v5802_v34, 4 }
 0x5dc   : > { %v5872_v22 = vsel %vm5861_vm13, %v5846_v37, %v14122_v40  ;;  %v5862_v13 = vsel %vm5861_vm13, %v5841_v36, %v5802_v34  ;;  %v10255_v21 = vld [vmem:[#allocation2 + $0x54] sm:$0xf]  ;;  %v9764_v2 = vld [vmem:[#allocation2 + $0x50] sm:$0xf] }
 0x5dd   : > { %5929 = vst.msk [vmem:[#allocation2 + $0x28] sm:$0xff] %vm14115_vm14, %v5872_v22 }
 0x5de   : > { %5921 = vst.msk [vmem:[#allocation2] sm:$0xff] %vm14115_vm14, %v5862_v13 }
 0x5e4   : > { %v10250_v24 = vld [vmem:[#allocation2 + $0x24] sm:$0xf0]  ;;  %v9726_v41 = vld [vmem:[#allocation2 + $0x28] sm:$0xf0] }
 0x5e5   : > { %v9724_v38 = vld [vmem:[#allocation2] sm:$0xf]  ;;  %v10245_v0 = vld [vmem:[#allocation2 + $0x4] sm:$0xf] }
 0x5e6   : > { %v14134_v47 = vor.u32 %v10250_v24, %v9724_v38  ;;  %v14136_v18 = vor.u32 %v10245_v0, %v9726_v41 }
 0x5e8   : > { %6083 = vrot.lane.b32.xlu1 %v14134_v47, %s10313_s15  ;;  %6085 = vrot.lane.b32.xlu2 %v14136_v18, %s10313_s15  ;;  %v5834_v14 = vpop.permute.xlu2 %5833  ;;  %v5804_v12 = vpop.permute.xlu1 %5803 }
 0x5e9   : > { %v5842_v3 = vrot.slane %v5804_v12, 4  ;;  %v5857_v33 = vrot.slane %v5834_v14, 4 }
 0x5eb   : > { %v5864_v55 = vsel %vm5863_vm15, %v5841_v36, %v5842_v3 }
 0x5ec   : > { %v5865_v39 = vsel %vm5861_vm13, %v5864_v55, %v5804_v12 }
 0x5ed   : > { %5922 = vst [vmem:[#allocation2 + $0x8] sm:$0xff] %v5865_v39 }
 0x5f0   : > { %5807 = vrot.lane.b32.xlu1 %v5764_v53, %s10322_s17  ;;  %v14148_v45 = vpop.permute.xlu2 %5805 }
 0x5f1   : > { %v5832_v59 = vpop.permute.xlu0 %5831  ;;  %v5843_v35 = vrot.slane %v14148_v45, 4 }
 0x5f2   : > { %v5856_v19 = vrot.slane %v5832_v59, 4 }
 0x5f3   : > { %v5866_v50 = vsel %vm5863_vm15, %v5842_v3, %v5843_v35 }
 0x5f4   : > { %v5890_v20 = vsel %vm5861_vm13, %v5856_v19, %v5832_v59  ;;  %v5891_v44 = vsel %vm5863_vm15, %v5856_v19, %v5857_v33  ;;  %v5867_v25 = vsel %vm5861_vm13, %v5866_v50, %v14148_v45  ;;  %v9732_v36 = vld [vmem:[#allocation2 + $0x8] sm:$0xf] }
 0x5f5   : > { %v5892_v56 = vsel %vm5861_vm13, %v5891_v44, %v5834_v14  ;;  %5939 = vst.msk [vmem:[#allocation2 + $0x78] sm:$0xff] %vm14115_vm14, %v5890_v20  ;;  %v10246_v44 = vld [vmem:[#allocation2 + $0xc] sm:$0xf] }
 0x5f6   : > { %5940 = vst [vmem:[#allocation2 + $0x80] sm:$0xff] %v5892_v56 }
 0x5f7   : > { %5923 = vst [vmem:[#allocation2 + $0x10] sm:$0xff] %v5867_v25 }
 0x5f8   : > { %5819 = vrot.lane.b32.xlu1 %v5770_v60, %s10322_s17 }
 0x5f9   : > { %v5824_v53 = vpop.permute.xlu0 %5823 }
 0x5fa   : > { %v5852_v58 = vrot.slane %v5824_v53, 4 }
 0x5fc   : > { %v5882_v11 = vsel %vm5863_vm15, %v5851_v42, %v5852_v58  ;;  %v9766_v29 = vld [vmem:[#allocation2 + $0x78] sm:$0xf0]  ;;  %v10260_v1 = vld [vmem:[#allocation2 + $0x74] sm:$0xf0] }
 0x5fd   : > { %v5883_v62 = vsel %vm5861_vm13, %v5882_v11, %v5824_v53  ;;  %v14166_v6 = vor.u32 %v10255_v21, %v9766_v29  ;;  %v14168_v27 = vor.u32 %v10260_v1, %v9764_v2  ;;  %v10261_v50 = vld [vmem:[#allocation2 + $0x7c] sm:$0xf0]  ;;  %v9774_v60 = vld [vmem:[#allocation2 + $0x80] sm:$0xf0] }
 0x5fe   : > { %5935 = vst [vmem:[#allocation2 + $0x58] sm:$0xff] %v5883_v62  ;;  %v9740_v22 = vld [vmem:[#allocation2 + $0x10] sm:$0xf]  ;;  %v10247_v38 = vld [vmem:[#allocation2 + $0x14] sm:$0xf] }
 0x5ff   : > { %6105 = vrot.lane.b32.xlu0 %v14166_v6, %s10313_s15  ;;  %6103 = vrot.lane.b32.xlu2 %v14168_v27, %s10313_s15 }
 0x605   : > { %v10256_v56 = vld [vmem:[#allocation2 + $0x5c] sm:$0xf] }
 0x606   : > { %v14247_v53 = vor.u32 %v10256_v56, %v9774_v60 }
 0x607   : > { %5839 = vrot.lane.b32.xlu0 %v5780_v43, %s10322_s17  ;;  %5837 = vrot.lane.b32.xlu2 %v5779_v51, %s10322_s17 }
 0x609   : > { %v5826_v61 = vpop.permute.xlu1 %5825 }
 0x60a   : > { %v5853_v57 = vrot.slane %v5826_v61, 4 }
 0x60c   : > { %v5884_v23 = vsel %vm5863_vm15, %v5852_v58, %v5853_v57 }
 0x60d   : > { %v5885_v7 = vsel %vm5861_vm13, %v5884_v23, %v5826_v61 }
 0x60e   : > { %5936 = vst [vmem:[#allocation2 + $0x60] sm:$0xff] %v5885_v7 }
 0x60f   : > { %5817 = vrot.lane.b32.xlu0 %v5769_v16, %s10322_s17  ;;  %5809 = vrot.lane.b32.xlu2 %v5765_v4, %s10322_s17 }
 0x611   : > { %v14188_v5 = vpop.permute.xlu0 %5835  ;;  %v14196_v51 = vpop.permute.xlu1 %5815 }
 0x612   : > { %v5858_v32 = vrot.slane %v14188_v5, 4  ;;  %v5848_v17 = vrot.slane %v14196_v51, 4 }
 0x614   : > { %v5893_v8 = vsel %vm5863_vm15, %v5857_v33, %v5858_v32  ;;  %v9772_v33 = vld [vmem:[#allocation2 + $0x58] sm:$0xf] }
 0x615   : > { %v5894_v15 = vsel %vm5861_vm13, %v5893_v8, %v14188_v5  ;;  %v9780_v46 = vld [vmem:[#allocation2 + $0x60] sm:$0xf]  ;;  %v10257_v48 = vld [vmem:[#allocation2 + $0x64] sm:$0xf]  ;;  %v14239_v20 = vor.u32 %v10261_v50, %v9772_v33 }
 0x616   : > { %5941 = vst [vmem:[#allocation2 + $0x88] sm:$0xff] %v5894_v15 }
 0x619   : > { %v5814_v49 = vpop.permute.xlu0 %5813 }
 0x61a   : > { %v5847_v26 = vrot.slane %v5814_v49, 4 }
 0x61c   : > { %v5873_v16 = vsel %vm5863_vm15, %v5846_v37, %v5847_v26  ;;  %v5875_v63 = vsel %vm5863_vm15, %v5847_v26, %v5848_v17 }
 0x61d   : > { %v5874_v30 = vsel %vm5861_vm13, %v5873_v16, %v5814_v49  ;;  %v5876_v52 = vsel %vm5861_vm13, %v5875_v63, %v14196_v51  ;;  %v10262_v9 = vld [vmem:[#allocation2 + $0x84] sm:$0xf0]  ;;  %v9782_v10 = vld [vmem:[#allocation2 + $0x88] sm:$0xf0] }
 0x61e   : > { %5930 = vst [vmem:[#allocation2 + $0x30] sm:$0xff] %v5874_v30  ;;  %v14208_v31 = vor.u32 %v10262_v9, %v9780_v46  ;;  %v14210_v28 = vor.u32 %v10257_v48, %v9782_v10 }
 0x61f   : > { %5931 = vst [vmem:[#allocation2 + $0x38] sm:$0xff] %v5876_v52 }
 0x620   : > { %6111 = vrot.lane.b32.xlu0 %v14208_v31, %s10313_s15  ;;  %6113 = vrot.lane.b32.xlu1 %v14210_v28, %s10313_s15 }
 0x621   : > { %v5828_v42 = vpop.permute.xlu0 %5827 }
 0x622   : > { %v5854_v54 = vrot.slane %v5828_v42, 4 }
 0x623   : > { %v5830_v40 = vpop.permute.xlu1 %5829 }
 0x624   : > { %v5886_v34 = vsel %vm5863_vm15, %v5853_v57, %v5854_v54  ;;  %v5855_v37 = vrot.slane %v5830_v40, 4 }
 0x625   : > { %v5887_v13 = vsel %vm5861_vm13, %v5886_v34, %v5828_v42  ;;  %v10251_v41 = vld [vmem:[#allocation2 + $0x2c] sm:$0xf0]  ;;  %v9734_v19 = vld [vmem:[#allocation2 + $0x30] sm:$0xf0] }
 0x626   : > { %5937 = vst [vmem:[#allocation2 + $0x68] sm:$0xff] %v5887_v13  ;;  %v5888_v0 = vsel %vm5863_vm15, %v5854_v54, %v5855_v37  ;;  %v14224_v14 = vor.u32 %v10251_v41, %v9732_v36  ;;  %v10252_v12 = vld [vmem:[#allocation2 + $0x34] sm:$0xf0]  ;;  %v9742_v3 = vld [vmem:[#allocation2 + $0x38] sm:$0xf0]  ;;  %v14241_v25 = vor.u32 %v10246_v44, %v9734_v19 }
 0x627   : > { %v5889_v55 = vsel %vm5861_vm13, %v5888_v0, %v5830_v40  ;;  %v14227_v39 = vor.u32 %v10252_v12, %v9740_v22  ;;  %v14229_v59 = vor.u32 %v10247_v38, %v9742_v3 }
 0x628   : > { %5938 = vst.msk [vmem:[#allocation2 + $0x70] sm:$0xff] %vm14219_vm10, %v5889_v55  ;;  %6087 = vrot.lane.b32.xlu2 %v14224_v14, %s10313_s15 }
 0x629   : > { %6091 = vrot.lane.b32.xlu0 %v14227_v39, %s10313_s15  ;;  %6093 = vrot.lane.b32.xlu1 %v14229_v59, %s10313_s15 }
 0x62f   : > { %v9796_v42 = vld [vmem:[#allocation2 + $0x70] sm:$0xf]  ;;  %v10259_v37 = vld [vmem:[#allocation2 + $0x74] sm:$0xf] }
 0x630   : > { %6107 = vrot.lane.b32.xlu2 %v14239_v20, %s10313_s15 }
 0x631   : > { %6089 = vrot.lane.b32.xlu0 %v14241_v25, %s10313_s15 }
 0x638   : > { %6109 = vrot.lane.b32.xlu2 %v14247_v53, %s10313_s15 }
 0x642   : > { %v6086_v58 = vpop.permute.xlu2 %6085 }
 0x659   : > { %v6104_v21 = vpop.permute.xlu2 %6103 }
 0x65a   : > { %v6084_v11 = vpop.permute.xlu1 %6083 }
 0x65b   : > { %v6123_v45 = vsel %vm1034_vm2, %v6084_v11, %v6086_v58 }
 0x661   : > { %v5838_v29 = vpop.permute.xlu2 %5837 }
 0x662   : > { %v5859_v2 = vrot.slane %v5838_v29, 4  ;;  %v5808_v1 = vpop.permute.xlu1 %5807 }
 0x663   : > { %v5844_v62 = vrot.slane %v5808_v1, 4 }
 0x664   : > { %v5895_v43 = vsel %vm5863_vm15, %v5858_v32, %v5859_v2 }
 0x665   : > { %v5896_v61 = vsel %vm5861_vm13, %v5895_v43, %v5838_v29  ;;  %v5868_v57 = vsel %vm5863_vm15, %v5843_v35, %v5844_v62 }
 0x666   : > { %5942 = vst [vmem:[#allocation2 + $0x90] sm:$0xff] %v5896_v61  ;;  %v5869_v23 = vsel %vm5861_vm13, %v5868_v57, %v5808_v1  ;;  %v9788_v1 = vld [vmem:[#allocation2 + $0x68] sm:$0xf] }
 0x667   : > { %5924 = vst [vmem:[#allocation2 + $0x18] sm:$0xff] %v5869_v23 }
 0x669   : > { %v5810_v4 = vpop.permute.xlu2 %5809 }
 0x66a   : > { %v5845_v7 = vrot.slane %v5810_v4, 4  ;;  %v5820_v63 = vpop.permute.xlu1 %5819 }
 0x66b   : > { %v5850_v30 = vrot.slane %v5820_v63, 4 }
 0x66c   : > { %v5870_v8 = vsel %vm5863_vm15, %v5844_v62, %v5845_v7 }
 0x66d   : > { %v5871_v15 = vsel %vm5861_vm13, %v5870_v8, %v5810_v4  ;;  %v10263_v11 = vld [vmem:[#allocation2 + $0x8c] sm:$0xf0]  ;;  %v9790_v4 = vld [vmem:[#allocation2 + $0x90] sm:$0xf0]  ;;  %v10258_v8 = vld [vmem:[#allocation2 + $0x6c] sm:$0xf] }
 0x66e   : > { %5928 = vst.msk [vmem:[#allocation2 + $0x20] sm:$0xff] %vm14219_vm10, %v5871_v15  ;;  %v9748_v41 = vld [vmem:[#allocation2 + $0x18] sm:$0xf]  ;;  %v14308_v62 = vor.u32 %v10263_v11, %v9788_v1  ;;  %v10248_v43 = vld [vmem:[#allocation2 + $0x1c] sm:$0xf]  ;;  %v14322_v15 = vor.u32 %v10258_v8, %v9790_v4 }
 0x66f   : > { %v9882_v1 = vld [vmem:[#allocation2 + $0x60] sm:$0xf]  ;;  %v9874_v4 = vld [vmem:[#allocation2 + $0x58] sm:$0xf] }
 0x670   : > { %16551 = vst [vmem:[#allocation15_spill] sm:$0xff] %v14322_v15  ;;  %v10231_v8 = vld [vmem:[#allocation2 + $0x34] sm:$0xf0] }
 0x671   : > { %v6106_v5 = vpop.permute.xlu0 %6105 }
 0x672   : > { %v6132_v32 = vsel %vm1034_vm2, %v6104_v21, %v6106_v5 }
 0x673   : > { %6171 = vmatpush.bf16.msra.mxu2 %v6132_v32 }
 0x675   : > { %v9756_v0 = vld [vmem:[#allocation2 + $0x20] sm:$0xf]  ;;  %v10249_v55 = vld [vmem:[#allocation2 + $0x24] sm:$0xf] }
 0x677   : > { %6172 = vmatpush.bf16.msra.mxu2 %v6123_v45 }
 0x679   : > { %v5840_v35 = vpop.permute.xlu0 %5839 }
 0x67a   : > { %v5860_v49 = vrot.slane %v5840_v35, 4 }
 0x67c   : > { %v5897_v26 = vsel %vm5863_vm15, %v5859_v2, %v5860_v49  ;;  %v14361_v49 = vld [vmem:[%s16265_s6 + $0x18] sm:$0xff] }
 0x67d   : > { %v5898_v16 = vsel %vm5861_vm13, %v5897_v26, %v5840_v35 }
 0x67e   : > { %5943 = vst.msk [vmem:[#allocation2 + $0x98] sm:$0xff] %vm14219_vm10, %v5898_v16 }
 0x681   : > { %v5818_v46 = vpop.permute.xlu0 %5817 }
 0x682   : > { %v5849_v52 = vrot.slane %v5818_v46, 4  ;;  %v14269_v9 = vpop.permute.xlu2 %6087 }
 0x683   : > { %v6124_v24 = vsel %vm1034_vm2, %v6086_v58, %v14269_v9 }
 0x684   : > { %v5877_v48 = vsel %vm5863_vm15, %v5848_v17, %v5849_v52  ;;  %v5879_v10 = vsel %vm5863_vm15, %v5849_v52, %v5850_v30 }
 0x685   : > { %v5878_v54 = vsel %vm5861_vm13, %v5877_v48, %v5818_v46  ;;  %v5880_v40 = vsel %vm5861_vm13, %v5879_v10, %v5820_v63  ;;  %v10264_v34 = vld [vmem:[#allocation2 + $0x94] sm:$0xf0]  ;;  %v9798_v36 = vld [vmem:[#allocation2 + $0x98] sm:$0xf0]  ;;  %v9876_v48 = vld [vmem:[#allocation2 + $0x80] sm:$0xf0] }
 0x686   : > { %5932 = vst [vmem:[#allocation2 + $0x40] sm:$0xff] %v5878_v54  ;;  %v14277_v22 = vor.u32 %v10264_v34, %v9796_v42  ;;  %v14279_v13 = vor.u32 %v10259_v37, %v9798_v36  ;;  %v10235_v46 = vld [vmem:[#allocation2 + $0x5c] sm:$0xf]  ;;  %v9840_v54 = vld [vmem:[#allocation2 + $0x30] sm:$0xf0] }
 0x687   : > { %5933 = vst.msk [vmem:[#allocation2 + $0x48] sm:$0xff] %vm14219_vm10, %v5880_v40  ;;  %v9879_v42 = vor.u32 %v10235_v46, %v9876_v48  ;;  %v9892_v40 = vld [vmem:[#allocation2 + $0x90] sm:$0xf0]  ;;  %v10226_v34 = vld [vmem:[#allocation2 + $0xc] sm:$0xf] }
 0x688   : > { %6119 = vrot.lane.b32.xlu2 %v14277_v22, %s10313_s15  ;;  %6121 = vrot.lane.b32.xlu0 %v14279_v13, %s10313_s15  ;;  %v9843_v37 = vor.u32 %v10226_v34, %v9840_v54  ;;  %v10237_v36 = vld [vmem:[#allocation2 + $0x6c] sm:$0xf]  ;;  %v10241_v54 = vld [vmem:[#allocation2 + $0x8c] sm:$0xf0]  ;;  %v10236_v34 = vld [vmem:[#allocation2 + $0x64] sm:$0xf] }
 0x689   : > { %v9832_v48 = vld [vmem:[#allocation2 + $0x28] sm:$0xf0] }
 0x68a   : > { %v6108_v51 = vpop.permute.xlu2 %6107 }
 0x68b   : > { %v6133_v17 = vsel %vm1034_vm2, %v6106_v5, %v6108_v51  ;;  %v14333_v5 = vld [vmem:[%s16265_s6 + $0x10] sm:$0xff] }
 0x68c   : > { %6190 = vmatpush.bf16.msrb.mxu3 %v6133_v17  ;;  %9802 = vmatmul.msk.bf16.vlgmr.msra.gmra.mxu2 %vm701_vm1, %v14333_v5 }
 0x68d   : > { %v10253_v38 = vld [vmem:[#allocation2 + $0x3c] sm:$0xf0]  ;;  %v9750_v2 = vld [vmem:[#allocation2 + $0x40] sm:$0xf0] }
 0x68e   : > { %v14288_v12 = vor.u32 %v10253_v38, %v9748_v41  ;;  %v10254_v3 = vld [vmem:[#allocation2 + $0x44] sm:$0xf0]  ;;  %v9758_v33 = vld [vmem:[#allocation2 + $0x48] sm:$0xf0]  ;;  %v14310_v61 = vor.u32 %v10248_v43, %v9750_v2  ;;  %v9856_v41 = vld [vmem:[#allocation2 + $0x40] sm:$0xf0] }
 0x68f   : > { %v14292_v19 = vor.u32 %v10254_v3, %v9756_v0  ;;  %v14294_v50 = vor.u32 %v10249_v55, %v9758_v33  ;;  %v10228_v0 = vld [vmem:[#allocation2 + $0x1c] sm:$0xf]  ;;  %v10238_v55 = vld [vmem:[#allocation2 + $0x74] sm:$0xf0] }
 0x690   : > { %6191 = vmatpush.bf16.msrb.mxu3 %v6124_v24  ;;  %6095 = vrot.lane.b32.xlu1 %v14288_v12, %s10313_s15  ;;  %16550 = vst [vmem:[#allocation18_spill] sm:$0xff] %v14310_v61  ;;  %v9859_v3 = vor.u32 %v10228_v0, %v9856_v41  ;;  %v9866_v24 = vld [vmem:[#allocation2 + $0x50] sm:$0xf]  ;;  %v10232_v41 = vld [vmem:[#allocation2 + $0x3c] sm:$0xf0] }
 0x691   : > { %6099 = vrot.lane.b32.xlu2 %v14292_v19, %s10313_s15  ;;  %6101 = vrot.lane.b32.xlu0 %v14294_v50, %s10313_s15  ;;  %v9854_v0 = vld [vmem:[#allocation2 + $0x18] sm:$0xf] }
 0x692   : > { %v6110_v44 = vpop.permute.xlu2 %6109  ;;  %v6112_v56 = vpop.permute.xlu0 %6111 }
 0x693   : > { %v14302_v60 = vpop.permute.xlu1 %6113  ;;  %v6134_v58 = vsel %vm1034_vm2, %v6108_v51, %v6110_v44  ;;  %v6135_v21 = vsel %vm1034_vm2, %v6110_v44, %v6112_v56  ;;  %9804 = vmatmul.msk.bf16.vlgmr.msrb.gmra.mxu3 %vm701_vm1, %v14333_v5  ;;  %v9895_v51 = vor.u32 %v10237_v36, %v9892_v40  ;;  %v9867_v44 = vor.u32 %v10238_v55, %v9866_v24  ;;  %v9838_v40 = vld [vmem:[#allocation2 + $0x8] sm:$0xf]  ;;  %v14486_v24 = vld [vmem:[%s16265_s6] sm:$0xff] }
 0x694   : > { %6209 = vmatpush.bf16.msrb.mxu0 %v6134_v58  ;;  %6228 = vmatpush.bf16.msrb.mxu1 %v6135_v21  ;;  %v6136_v29 = vsel %vm1034_vm2, %v6112_v56, %v14302_v60  ;;  %v9830_v56 = vld [vmem:[#allocation2] sm:$0xf]  ;;  %v10240_v21 = vld [vmem:[#allocation2 + $0x84] sm:$0xf0] }
 0x695   : > { %6247 = vmatpush.bf16.msrb.mxu2 %v6136_v29  ;;  %v9883_v43 = vor.u32 %v10240_v21, %v9882_v1  ;;  %v14517_v1 = vld [vmem:[%s16265_s6 + $0x8] sm:$0xff] }
 0x698   : > { %6115 = vrot.lane.b32.xlu1 %v14308_v62, %s10313_s15 }
 0x699   : > { %6097 = vrot.lane.b32.xlu2 %v14310_v61, %s10313_s15  ;;  %6654 = vrot.lane.b32.xlu0 %v14239_v20, %s10314_s24 }
 0x69b   : > { %v6092_v57 = vpop.permute.xlu0 %6091  ;;  %v14318_v23 = vpop.permute.xlu1 %6093 }
 0x69c   : > { %v6127_v7 = vsel %vm1034_vm2, %v6092_v57, %v14318_v23  ;;  %9803 = vmatmul.msk.bf16.gmra.mxu2 %vm701_vm1, %v14361_v49 }
 0x69d   : > { %6248 = vmatpush.bf16.msrb.mxu2 %v6127_v7  ;;  %v10234_v7 = vld [vmem:[#allocation2 + $0x54] sm:$0xf] }
 0x6a0   : > { %6117 = vrot.lane.b32.xlu1 %v14322_v15, %s10313_s15 }
 0x6a1   : > { %6634 = vrot.lane.b32.xlu2 %v14224_v14, %s10314_s24  ;;  %6636 = vrot.lane.b32.xlu0 %v14241_v25, %s10314_s24 }
 0x6a3   : > { %v6090_v32 = vpop.permute.xlu0 %6089  ;;  %9805 = vmatmul.msk.bf16.gmra.mxu3 %vm701_vm1, %v14361_v49 }
 0x6a4   : > { %v6125_v45 = vsel %vm1034_vm2, %v14269_v9, %v6090_v32  ;;  %v6126_v35 = vsel %vm1034_vm2, %v6090_v32, %v6092_v57  ;;  %v9868_v57 = vld [vmem:[#allocation2 + $0x78] sm:$0xf0] }
 0x6a5   : > { %6210 = vmatpush.bf16.msrb.mxu0 %v6125_v45  ;;  %6229 = vmatpush.bf16.msrb.mxu1 %v6126_v35  ;;  %v9871_v32 = vor.u32 %v10234_v7, %v9868_v57  ;;  %v10239_v45 = vld [vmem:[#allocation2 + $0x7c] sm:$0xf0] }
 0x6a8   : > { %6656 = vrot.lane.b32.xlu1 %v14247_v53, %s10314_s24  ;;  %9806 = vmatmul.msk.bf16.vlgmr.msrb.gmra.mxu0 %vm701_vm1, %v14333_v5 }
 0x6a9   : > { %6652 = vrot.lane.b32.xlu2 %v14166_v6, %s10314_s24  ;;  %6630 = vrot.lane.b32.xlu0 %v14134_v47, %s10314_s24 }
 0x6aa   : > { %9808 = vmatmul.msk.bf16.vlgmr.msrb.gmra.mxu1 %vm701_vm1, %v14333_v5 }
 0x6ac   : > { %9810 = vmatmul.msk.bf16.vlgmr.msrb.gmra.mxu2 %vm701_vm1, %v14333_v5 }
 0x6b0   : > { %6650 = vrot.lane.b32.xlu1 %v14168_v27, %s10314_s24 }
 0x6b1   : > { %6658 = vrot.lane.b32.xlu2 %v14208_v31, %s10314_s24  ;;  %6662 = vrot.lane.b32.xlu0 %v14308_v62, %s10314_s24 }
 0x6b8   : > { %6632 = vrot.lane.b32.xlu1 %v14136_v18, %s10314_s24  ;;  %9807 = vmatmul.msk.bf16.gmra.mxu0 %vm701_vm1, %v14361_v49 }
 0x6b9   : > { %6638 = vrot.lane.b32.xlu2 %v14227_v39, %s10314_s24  ;;  %6642 = vrot.lane.b32.xlu0 %v14288_v12, %s10314_s24 }
 0x6ba   : > { %9809 = vmatmul.msk.bf16.gmra.mxu1 %vm701_vm1, %v14361_v49 }
 0x6bc   : > { %9811 = vmatmul.msk.bf16.gmra.mxu2 %vm701_vm1, %v14361_v49 }
 0x6c0   : > { %6664 = vrot.lane.b32.xlu1 %v14322_v15, %s10314_s24 }
 0x6c1   : > { %6660 = vrot.lane.b32.xlu2 %v14210_v28, %s10314_s24  ;;  %6640 = vrot.lane.b32.xlu0 %v14229_v59, %s10314_s24 }
 0x6c8   : > { %6644 = vrot.lane.b32.xlu1 %v14310_v61, %s10314_s24 }
 0x6c9   : > { %6956 = vrot.lane.b32.xlu2 %v14166_v6, %s10315_s9  ;;  %6958 = vrot.lane.b32.xlu0 %v14239_v20, %s10315_s9 }
 0x6d0   : > { %6646 = vrot.lane.b32.xlu1 %v14292_v19, %s10314_s24 }
 0x6d1   : > { %6936 = vrot.lane.b32.xlu2 %v14136_v18, %s10315_s9  ;;  %6938 = vrot.lane.b32.xlu0 %v14224_v14, %s10315_s9 }
 0x6d8   : > { %6666 = vrot.lane.b32.xlu1 %v14277_v22, %s10314_s24 }
 0x6d9   : > { %6954 = vrot.lane.b32.xlu2 %v14168_v27, %s10315_s9  ;;  %6648 = vrot.lane.b32.xlu0 %v14294_v50, %s10314_s24 }
 0x6e0   : > { %6668 = vrot.lane.b32.xlu1 %v14279_v13, %s10314_s24 }
 0x6e1   : > { %6960 = vrot.lane.b32.xlu2 %v14247_v53, %s10315_s9  ;;  %6964 = vrot.lane.b32.xlu0 %v14210_v28, %s10315_s9 }
 0x6e2   : > { %v6120_v26 = vpop.permute.xlu2 %6119 }
 0x6e8   : > { %6934 = vrot.lane.b32.xlu1 %v14134_v47, %s10315_s9 }
 0x6e9   : > { %6940 = vrot.lane.b32.xlu2 %v14241_v25, %s10315_s9  ;;  %6944 = vrot.lane.b32.xlu0 %v14229_v59, %s10315_s9 }
 0x6eb   : > { %v6100_v52 = vpop.permute.xlu2 %6099 }
 0x6f0   : > { %6966 = vrot.lane.b32.xlu1 %v14308_v62, %s10315_s9 }
 0x6f1   : > { %6962 = vrot.lane.b32.xlu2 %v14208_v31, %s10315_s9  ;;  %6942 = vrot.lane.b32.xlu0 %v14227_v39, %s10315_s9 }
 0x6f8   : > { %6946 = vrot.lane.b32.xlu1 %v14288_v12, %s10315_s9 }
 0x6f9   : > { %7258 = vrot.lane.b32.xlu2 %v14168_v27, %s10316_s19  ;;  %7260 = vrot.lane.b32.xlu0 %v14166_v6, %s10316_s19 }
 0x6fa   : > { %v6122_v16 = vpop.permute.xlu0 %6121 }
 0x6fb   : > { %v6140_v63 = vsel %vm1034_vm2, %v6120_v26, %v6122_v16  ;;  %v9875_v16 = vor.u32 %v10239_v45, %v9874_v4 }
 0x6fc   : > { %6323 = vmatpush.bf16.msra.mxu2 %v6140_v63  ;;  %v9846_v63 = vld [vmem:[#allocation2 + $0x10] sm:$0xf] }
 0x6fd   : > { %v9847_v46 = vor.u32 %v10231_v8, %v9846_v63 }
 0x700   : > { %6968 = vrot.lane.b32.xlu1 %v14322_v15, %s10315_s9 }
 0x701   : > { %7238 = vrot.lane.b32.xlu2 %v14134_v47, %s10316_s19  ;;  %7240 = vrot.lane.b32.xlu0 %v14136_v18, %s10316_s19 }
 0x702   : > { %v6096_v30 = vpop.permute.xlu1 %6095 }
 0x703   : > { %v6102_v9 = vpop.permute.xlu0 %6101  ;;  %v6128_v33 = vsel %vm1034_vm2, %v14318_v23, %v6096_v30  ;;  %v6098_v23 = vpop.permute.xlu2 %6097 }
 0x704   : > { %v6131_v10 = vsel %vm1034_vm2, %v6100_v52, %v6102_v9  ;;  %v6129_v35 = vsel %vm1034_vm2, %v6096_v30, %v6098_v23  ;;  %v10225_v9 = vld [vmem:[#allocation2 + $0x4] sm:$0xf] }
 0x705   : > { %6324 = vmatpush.bf16.msra.mxu2 %v6131_v10  ;;  %v10230_v10 = vld [vmem:[#allocation2 + $0x2c] sm:$0xf0]  ;;  %v9835_v30 = vor.u32 %v10225_v9, %v9832_v48 }
 0x708   : > { %9818 = vmatmul.msk.bf16.vlgmr.msra.gmra.mxu2 %vm701_vm1, %v14333_v5  ;;  %6948 = vrot.lane.b32.xlu1 %v14310_v61, %s10315_s9 }
 0x709   : > { %6507 = vmatpush.bf16.msrb.mxu2 %v9879_v42  ;;  %6972 = vrot.lane.b32.xlu2 %v14279_v13, %s10315_s9  ;;  %v9884_v42 = vld [vmem:[#allocation2 + $0x88] sm:$0xf0] }
 0x70a   : > { %6950 = vrot.lane.b32.xlu0 %v14292_v19, %s10315_s9  ;;  %v6116_v17 = vpop.permute.xlu1 %6115  ;;  %v9887_v36 = vor.u32 %v10236_v34, %v9884_v42 }
 0x70b   : > { %v6137_v38 = vsel %vm1034_vm2, %v14302_v60, %v6116_v17  ;;  %v10229_v60 = vld [vmem:[#allocation2 + $0x24] sm:$0xf0] }
 0x70c   : > { %6266 = vmatpush.bf16.msra.mxu3 %v6137_v38  ;;  %v9831_v2 = vor.u32 %v10229_v60, %v9830_v56  ;;  %v6655_v38 = vpop.permute.xlu0 %6654  ;;  %v6635_v60 = vpop.permute.xlu2 %6634 }
 0x70d   : > { %6508 = vmatpush.bf16.msrb.mxu2 %v9843_v37  ;;  %v9890_v37 = vld [vmem:[#allocation2 + $0x68] sm:$0xf] }
 0x70f   : > { %v14527_v8 = vpop.f32.mrf.mxu2 }
 0x710   : > { %6970 = vrot.lane.b32.xlu1 %v14277_v22, %s10315_s9  ;;  %6267 = vmatpush.bf16.msra.mxu3 %v6128_v33  ;;  %v9855_v33 = vor.u32 %v10232_v41, %v9854_v0 }
 0x711   : > { %6583 = vmatpush.bf16.msra.mxu2 %v9895_v51  ;;  %7262 = vrot.lane.b32.xlu2 %v14239_v20, %s10316_s19  ;;  %v9891_v51 = vor.u32 %v10241_v54, %v9890_v37 }
 0x712   : > { %7266 = vrot.lane.b32.xlu0 %v14208_v31, %s10316_s19  ;;  %v6118_v58 = vpop.permute.xlu1 %6117 }
 0x713   : > { %v6138_v11 = vsel %vm1034_vm2, %v6116_v17, %v6118_v58  ;;  %v6139_v29 = vsel %vm1034_vm2, %v6118_v58, %v6120_v26  ;;  %9812 = vmatmul.msk.bf16.vlgmr.msra.gmra.mxu3 %vm701_vm1, %v14333_v5  ;;  %v6130_v26 = vsel %vm1034_vm2, %v6098_v23, %v6100_v52  ;;  %v9839_v52 = vor.u32 %v10230_v10, %v9838_v40  ;;  %v9848_v17 = vld [vmem:[#allocation2 + $0x38] sm:$0xf0] }
 0x714   : > { %6450 = vmatpush.bf16.msrb.mxu3 %v9867_v44  ;;  %6285 = vmatpush.bf16.msra.mxu0 %v6138_v11  ;;  %v14494_v56 = vpop.permute.xlu0 %6636  ;;  %v10242_v11 = vld [vmem:[#allocation2 + $0x94] sm:$0xf0]  ;;  %v6653_v7 = vpop.permute.xlu2 %6652 }
 0x715   : > { %6584 = vmatpush.bf16.msra.mxu2 %v9859_v3  ;;  %6304 = vmatpush.bf16.msra.mxu1 %v6139_v29  ;;  %v6672_v21 = vsel %vm1655_vm3, %v6635_v60, %v14494_v56  ;;  %v9898_v29 = vld [vmem:[#allocation2 + $0x70] sm:$0xf] }
 0x717   : > { %v14547_v9 = vpop.f32.mrf.mxu2 }
 0x718   : > { %6451 = vmatpush.bf16.msrb.mxu3 %v9831_v2  ;;  %9819 = vmatmul.msk.bf16.gmra.mxu2 %vm701_vm1, %v14361_v49  ;;  %v9899_v2 = vor.u32 %v10242_v11, %v9898_v29 }
 0x719   : > { %6952 = vrot.lane.b32.xlu1 %v14294_v50, %s10315_s9  ;;  %7242 = vrot.lane.b32.xlu2 %v14224_v14, %s10316_s19  ;;  %s10282_s9 = smul.u32 288, %s16599_s28 }
 0x71a   : > { %7246 = vrot.lane.b32.xlu0 %v14227_v39, %s10316_s19  ;;  %6286 = vmatpush.bf16.msra.mxu0 %v6129_v35  ;;  %v14477_v3 = vpop.permute.xlu1 %6656 }
 0x71b   : > { %6305 = vmatpush.bf16.msra.mxu1 %v6130_v26  ;;  %v6681_v44 = vsel %vm1655_vm3, %v6655_v38, %v14477_v3  ;;  %s16093_s30 = scalar_lea.vmem %s16267_s8, %s10282_s9 }
 0x71c   : > { %6526 = vmatpush.bf16.msra.mxu3 %v9883_v43  ;;  %v9862_v43 = vld [vmem:[#allocation2 + $0x20] sm:$0xf]  ;;  %v6631_v4 = vpop.permute.xlu0 %6630 }
 0x71d   : > { %9814 = vmatmul.msk.bf16.vlgmr.msra.gmra.mxu0 %vm701_vm1, %v14333_v5 }
 0x71e   : > { %6469 = vmatpush.bf16.msrb.mxu0 %v9871_v32  ;;  %9816 = vmatmul.msk.bf16.vlgmr.msra.gmra.mxu1 %vm701_vm1, %v14333_v5  ;;  %v10227_v5 = vld [vmem:[#allocation2 + $0x14] sm:$0xf]  ;;  %v6680_v32 = vsel %vm1655_vm3, %v6653_v7, %v6655_v38 }
 0x71f   : > { %6488 = vmatpush.bf16.msrb.mxu1 %v9875_v16  ;;  %v9851_v55 = vor.u32 %v10227_v5, %v9848_v17 }
 0x720   : > { %6527 = vmatpush.bf16.msra.mxu3 %v9847_v46  ;;  %v6659_v46 = vpop.permute.xlu2 %6658 }
 0x721   : > { %7264 = vrot.lane.b32.xlu2 %v14247_v53, %s10316_s19  ;;  %7268 = vrot.lane.b32.xlu1 %v14210_v28, %s10316_s19 }
 0x722   : > { %6470 = vmatpush.bf16.msrb.mxu0 %v9835_v30  ;;  %7244 = vrot.lane.b32.xlu0 %v14241_v25, %s10316_s19  ;;  %v6651_v58 = vpop.permute.xlu1 %6650  ;;  %v14567_v30 = vpop.f32.mrf.mxu2 }
 0x723   : > { %6489 = vmatpush.bf16.msrb.mxu1 %v9839_v52  ;;  %9813 = vmatmul.msk.bf16.gmra.mxu3 %vm701_vm1, %v14361_v49  ;;  %v6679_v45 = vsel %vm1655_vm3, %v6651_v58, %v6653_v7  ;;  %16552 = vst [vmem:[#allocation11_spill] sm:$0xff] %v14567_v30  ;;  %v6682_v52 = vsel %vm1655_vm3, %v14477_v3, %v6659_v46 }
 0x724   : > { %v6663_v63 = vpop.permute.xlu0 %6662 }
 0x726   : > { %6545 = vmatpush.bf16.msra.mxu0 %v9887_v36 }
 0x727   : > { %6564 = vmatpush.bf16.msra.mxu1 %v9891_v51 }
 0x728   : > { %9906 = vmatmul.msk.bf16.vlgmr.msrb.gmra.mxu2 %vm701_vm1, %v14486_v24  ;;  %v6639_v40 = vpop.permute.xlu2 %6638 }
 0x729   : > { %6756 = vmatpush.bf16.msrb.mxu2 %v6681_v44  ;;  %7274 = vrot.lane.b32.xlu2 %v14277_v22, %s10316_s19  ;;  %v6673_v51 = vsel %vm1655_vm3, %v14494_v56, %v6639_v40  ;;  %v14614_v44 = vld [vmem:[%s16265_s6 + $0x20] sm:$0xff] }
 0x72a   : > { %6546 = vmatpush.bf16.msra.mxu0 %v9851_v55  ;;  %7248 = vrot.lane.b32.xlu1 %v14229_v59, %s10316_s19  ;;  %v6633_v57 = vpop.permute.xlu1 %6632  ;;  %v14587_v17 = vpop.f32.mrf.mxu2 }
 0x72b   : > { %6565 = vmatpush.bf16.msra.mxu1 %v9855_v33  ;;  %7276 = vrot.lane.b32.xlu0 %v14279_v13, %s10316_s19  ;;  %v6670_v26 = vsel %vm1655_vm3, %v6631_v4, %v6633_v57  ;;  %v6671_v16 = vsel %vm1655_vm3, %v6633_v57, %v6635_v60  ;;  %16553 = vst [vmem:[#allocation14_spill] sm:$0xff] %v14587_v17  ;;  %v14653_v57 = vld [vmem:[%s16265_s6 + $0x28] sm:$0xff]  ;;  %v14657_v4 = vpop.f32.mrf.mxu1 }
 0x72c   : > { %v6643_v42 = vpop.permute.xlu0 %6642  ;;  %16556 = vst [vmem:[#allocation22_spill] sm:$0xff] %v14657_v4 }
 0x72d   : > { %9815 = vmatmul.msk.bf16.gmra.mxu0 %vm701_vm1, %v14361_v49  ;;  %6757 = vmatpush.bf16.msrb.mxu2 %v6672_v21 }
 0x72e   : > { %9817 = vmatmul.msk.bf16.gmra.mxu1 %vm701_vm1, %v14361_v49  ;;  %v10233_v49 = vld [vmem:[#allocation2 + $0x44] sm:$0xf0] }
 0x72f   : > { %v9863_v23 = vor.u32 %v10233_v49, %v9862_v43  ;;  %v14638_v49 = vpop.f32.mrf.mxu3 }
 0x730   : > { %v6661_v37 = vpop.permute.xlu2 %6660 }
 0x731   : > { %7254 = vrot.lane.b32.xlu2 %v14292_v19, %s10316_s19  ;;  %v6683_v41 = vsel %vm1655_vm3, %v6659_v46, %v6661_v37  ;;  %v6684_v38 = vsel %vm1655_vm3, %v6661_v37, %v6663_v63 }
 0x732   : > { %7270 = vrot.lane.b32.xlu1 %v14308_v62, %s10316_s19  ;;  %v14535_v35 = vpop.permute.xlu1 %6664  ;;  %v14616_v56 = vpop.f32.mrf.mxu2 }
 0x733   : > { %7256 = vrot.lane.b32.xlu0 %v14294_v50, %s10316_s19  ;;  %9900 = vmatmul.msk.bf16.vlgmr.msrb.gmra.mxu3 %vm701_vm1, %v14486_v24  ;;  %v6685_v48 = vsel %vm1655_vm3, %v6663_v63, %v14535_v35  ;;  %16554 = vst [vmem:[#allocation10_spill] sm:$0xff] %v14616_v56 }
 0x734   : > { %6602 = vmatpush.bf16.msrb.mxu3 %v9899_v2  ;;  %v6641_v34 = vpop.permute.xlu0 %6640 }
 0x735   : > { %v6674_v0 = vsel %vm1655_vm3, %v6639_v40, %v6641_v34  ;;  %v6675_v3 = vsel %vm1655_vm3, %v6641_v34, %v6643_v42 }
 0x738   : > { %9907 = vmatmul.msk.bf16.gmra.mxu2 %vm701_vm1, %v14517_v1  ;;  %6603 = vmatpush.bf16.msrb.mxu3 %v9863_v23  ;;  %v6957_v55 = vpop.permute.xlu2 %6956  ;;  %v14655_v23 = vpop.f32.mrf.mxu0 }
 0x739   : > { %7252 = vrot.lane.b32.xlu2 %v14310_v61, %s10316_s19 }
 0x73a   : > { %7250 = vrot.lane.b32.xlu1 %v14288_v12, %s10316_s19  ;;  %v14555_v10 = vpop.permute.xlu1 %6644  ;;  %v14636_v2 = vpop.f32.mrf.mxu2 }
 0x73b   : > { %7562 = vrot.lane.b32.xlu0 %v14168_v27, %s10317_s10  ;;  %v6676_v54 = vsel %vm1655_vm3, %v6643_v42, %v14555_v10  ;;  %16555 = vst [vmem:[#allocation7_spill] sm:$0xff] %v14636_v2 }
 0x73c   : > { %v14599_v5 = vpop.permute.xlu0 %6958 }
 0x73d   : > { %9902 = vmatmul.msk.bf16.vlgmr.msrb.gmra.mxu0 %vm701_vm1, %v14486_v24  ;;  %v6984_v60 = vsel %vm2226_vm4, %v6957_v55, %v14599_v5 }
 0x73e   : > { %9904 = vmatmul.msk.bf16.vlgmr.msrb.gmra.mxu1 %vm701_vm1, %v14486_v24  ;;  %6718 = vmatpush.bf16.msrb.mxu0 %v6679_v45 }
 0x73f   : > { %6737 = vmatpush.bf16.msrb.mxu1 %v6680_v32 }
 0x740   : > { %v6937_v21 = vpop.permute.xlu2 %6936  ;;  %v14680_v46 = vpop.f32.mrf.mxu0 }
 0x741   : > { %7568 = vrot.lane.b32.xlu2 %v14247_v53, %s10317_s10 }
 0x742   : > { %6719 = vmatpush.bf16.msrb.mxu0 %v6670_v26  ;;  %7272 = vrot.lane.b32.xlu1 %v14322_v15, %s10316_s19  ;;  %v14579_v36 = vpop.permute.xlu1 %6646  ;;  %v14668_v26 = vpop.f32.mrf.mxu3 }
 0x743   : > { %6738 = vmatpush.bf16.msrb.mxu1 %v6671_v16  ;;  %7570 = vrot.lane.b32.xlu0 %v14208_v31, %s10317_s10  ;;  %v6677_v45 = vsel %vm1655_vm3, %v14555_v10, %v14579_v36 }
 0x744   : > { %9901 = vmatmul.msk.bf16.gmra.mxu3 %vm701_vm1, %v14517_v1  ;;  %v14624_v58 = vpop.permute.xlu0 %6938 }
 0x745   : > { %v6975_v29 = vsel %vm2226_vm4, %v6937_v21, %v14624_v58 }
 0x748   : > { %9914 = vmatmul.msk.bf16.vlgmr.msra.gmra.mxu2 %vm701_vm1, %v14486_v24 }
 0x749   : > { %6832 = vmatpush.bf16.msra.mxu2 %v6685_v48  ;;  %7544 = vrot.lane.b32.xlu2 %v14136_v18, %s10317_s10  ;;  %v14682_v48 = vpop.f32.mrf.mxu1 }
 0x74a   : > { %7564 = vrot.lane.b32.xlu1 %v14166_v6, %s10317_s10  ;;  %v6667_v33 = vpop.permute.xlu1 %6666  ;;  %16558 = vst [vmem:[#allocation19_spill] sm:$0xff] %v14682_v48  ;;  %v14699_v37 = vpop.f32.mrf.mxu3 }
 0x74b   : > { %7548 = vrot.lane.b32.xlu0 %v14241_v25, %s10317_s10  ;;  %v6686_v43 = vsel %vm1655_vm3, %v14535_v35, %v6667_v33  ;;  %v6955_v35 = vpop.permute.xlu2 %6954  ;;  %16560 = vst [vmem:[#allocation25_spill] sm:$0xff] %v14699_v37 }
 0x74c   : > { %v6649_v32 = vpop.permute.xlu0 %6648  ;;  %v6983_v16 = vsel %vm2226_vm4, %v6955_v35, %v6957_v55 }
 0x74d   : > { %9903 = vmatmul.msk.bf16.gmra.mxu0 %vm701_vm1, %v14517_v1  ;;  %6833 = vmatpush.bf16.msra.mxu2 %v6676_v54  ;;  %v6678_v54 = vsel %vm1655_vm3, %v14579_v36, %v6649_v32 }
 0x74e   : > { %9905 = vmatmul.msk.bf16.gmra.mxu1 %vm701_vm1, %v14517_v1 }
 0x751   : > { %7566 = vrot.lane.b32.xlu2 %v14239_v20, %s10317_s10 }
 0x752   : > { %7542 = vrot.lane.b32.xlu1 %v14134_v47, %s10317_s10  ;;  %v6669_v11 = vpop.permute.xlu1 %6668 }
 0x753   : > { %7546 = vrot.lane.b32.xlu0 %v14224_v14, %s10317_s10  ;;  %v6687_v63 = vsel %vm1655_vm3, %v6667_v33, %v6669_v11  ;;  %v6961_v34 = vpop.permute.xlu2 %6960  ;;  %v14725_v33 = vpop.f32.mrf.mxu3 }
 0x754   : > { %9908 = vmatmul.msk.bf16.vlgmr.msra.gmra.mxu3 %vm701_vm1, %v14486_v24  ;;  %v6965_v42 = vpop.permute.xlu0 %6964  ;;  %v6985_v11 = vsel %vm2226_vm4, %v14599_v5, %v6961_v34 }
 0x755   : > { %6775 = vmatpush.bf16.msra.mxu3 %v6682_v52 }
 0x758   : > { %9915 = vmatmul.msk.bf16.gmra.mxu2 %vm701_vm1, %v14517_v1 }
 0x759   : > { %6776 = vmatpush.bf16.msra.mxu3 %v6673_v51  ;;  %7576 = vrot.lane.b32.xlu2 %v14322_v15, %s10317_s10  ;;  %v14705_v51 = vpop.f32.mrf.mxu0 }
 0x75a   : > { %7550 = vrot.lane.b32.xlu1 %v14227_v39, %s10317_s10  ;;  %v6935_v7 = vpop.permute.xlu1 %6934 }
 0x75b   : > { %7578 = vrot.lane.b32.xlu0 %v14277_v22, %s10317_s10  ;;  %v6974_v40 = vsel %vm2226_vm4, %v6935_v7, %v6937_v21 }
 0x75d   : > { %9910 = vmatmul.msk.bf16.vlgmr.msra.gmra.mxu0 %vm701_vm1, %v14486_v24 }
 0x75e   : > { %9912 = vmatmul.msk.bf16.vlgmr.msra.gmra.mxu1 %vm701_vm1, %v14486_v24  ;;  %6794 = vmatpush.bf16.msra.mxu0 %v6683_v41  ;;  %v14707_v41 = vpop.f32.mrf.mxu1 }
 0x75f   : > { %6813 = vmatpush.bf16.msra.mxu1 %v6684_v38  ;;  %16561 = vst [vmem:[#allocation23_spill] sm:$0xff] %v14707_v41 }
 0x761   : > { %7556 = vrot.lane.b32.xlu2 %v14310_v61, %s10317_s10 }
 0x762   : > { %6795 = vmatpush.bf16.msra.mxu0 %v6674_v0  ;;  %7572 = vrot.lane.b32.xlu1 %v14210_v28, %s10317_s10  ;;  %v14684_v10 = vpop.permute.xlu1 %6966  ;;  %v6945_v0 = vpop.permute.xlu0 %6944 }
 0x763   : > { %6814 = vmatpush.bf16.msra.mxu1 %v6675_v3  ;;  %7558 = vrot.lane.b32.xlu0 %v14292_v19, %s10317_s10  ;;  %v6988_v36 = vsel %vm2226_vm4, %v6965_v42, %v14684_v10  ;;  %v6941_v3 = vpop.permute.xlu2 %6940 }
 0x764   : > { %9909 = vmatmul.msk.bf16.gmra.mxu3 %vm701_vm1, %v14517_v1  ;;  %v6976_v35 = vsel %vm2226_vm4, %v14624_v58, %v6941_v3 }
 0x766   : > { %v14731_v21 = vpop.f32.mrf.mxu1 }
 0x768   : > { %9934 = vmatmul.msk.bf16.vlgmr.msrb.gmra.mxu2 %vm701_vm1, %v14614_v44 }
 0x769   : > { %7041 = vmatpush.bf16.msrb.mxu2 %v6984_v60  ;;  %7554 = vrot.lane.b32.xlu2 %v14288_v12, %s10317_s10  ;;  %v14729_v60 = vpop.f32.mrf.mxu0 }
 0x76a   : > { %7552 = vrot.lane.b32.xlu1 %v14229_v59, %s10317_s10  ;;  %v14711_v38 = vpop.permute.xlu1 %6946 }
 0x76b   : > { %7560 = vrot.lane.b32.xlu0 %v14294_v50, %s10317_s10  ;;  %v6979_v55 = vsel %vm2226_vm4, %v6945_v0, %v14711_v38  ;;  %v6963_v32 = vpop.permute.xlu2 %6962 }
 0x76c   : > { %v6987_v58 = vsel %vm2226_vm4, %v6963_v32, %v6965_v42 }
 0x76d   : > { %9911 = vmatmul.msk.bf16.gmra.mxu0 %vm701_vm1, %v14517_v1  ;;  %7042 = vmatpush.bf16.msrb.mxu2 %v6975_v29 }
 0x76e   : > { %9913 = vmatmul.msk.bf16.gmra.mxu1 %vm701_vm1, %v14517_v1 }
 0x771   : > { %7872 = vrot.lane.b32.xlu2 %v14247_v53, %s10318_s21 }
 0x772   : > { %7574 = vrot.lane.b32.xlu1 %v14308_v62, %s10317_s10 }
 0x773   : > { %7580 = vrot.lane.b32.xlu0 %v14279_v13, %s10317_s10 }
 0x774   : > { %9916 = vmatmul.msk.bf16.vlgmr.msrb.gmra.mxu3 %vm701_vm1, %v14486_v24  ;;  %v14664_v24 = vpop.f32.mrf.mxu2 }
 0x775   : > { %6851 = vmatpush.bf16.msrb.mxu3 %v6686_v43  ;;  %16557 = vst [vmem:[#allocation33_spill] sm:$0xff] %v14664_v24  ;;  %v6943_v43 = vpop.permute.xlu0 %6942  ;;  %v14844_v24 = vld [vmem:[%s16265_s6 + $0x38] sm:$0xff] }
 0x778   : > { %9935 = vmatmul.msk.bf16.gmra.mxu2 %vm701_vm1, %v14653_v57 }
 0x779   : > { %6852 = vmatpush.bf16.msrb.mxu3 %v6677_v45  ;;  %7852 = vrot.lane.b32.xlu2 %v14241_v25, %s10318_s21  ;;  %v14745_v45 = vpop.permute.xlu1 %6968 }
 0x77a   : > { %7870 = vrot.lane.b32.xlu1 %v14239_v20, %s10318_s21 }
 0x77b   : > { %7866 = vrot.lane.b32.xlu0 %v14168_v27, %s10318_s21 }
 0x77c   : > { %v14691_v52 = vpop.f32.mrf.mxu2 }
 0x77d   : > { %9930 = vmatmul.msk.bf16.vlgmr.msrb.gmra.mxu0 %vm701_vm1, %v14614_v44  ;;  %16559 = vst [vmem:[#allocation16_spill] sm:$0xff] %v14691_v52 }
 0x77e   : > { %9932 = vmatmul.msk.bf16.vlgmr.msrb.gmra.mxu1 %vm701_vm1, %v14614_v44  ;;  %6870 = vmatpush.bf16.msrb.mxu0 %v6687_v63 }
 0x77f   : > { %7022 = vmatpush.bf16.msrb.mxu1 %v6983_v16 }
 0x781   : > { %7846 = vrot.lane.b32.xlu2 %v14134_v47, %s10318_s21 }
 0x782   : > { %6871 = vmatpush.bf16.msrb.mxu0 %v6678_v54  ;;  %7850 = vrot.lane.b32.xlu1 %v14224_v14, %s10318_s21  ;;  %v6986_v54 = vsel %vm2226_vm4, %v6961_v34, %v6963_v32  ;;  %v6978_v34 = vsel %vm2226_vm4, %v6943_v43, %v6945_v0  ;;  %v14794_v0 = vld [vmem:[%s16265_s6 + $0x30] sm:$0xff] }
 0x783   : > { %7023 = vmatpush.bf16.msrb.mxu1 %v6974_v40  ;;  %7848 = vrot.lane.b32.xlu0 %v14136_v18, %s10318_s21 }
 0x784   : > { %9917 = vmatmul.msk.bf16.gmra.mxu3 %vm701_vm1, %v14517_v1 }
 0x788   : > { %9942 = vmatmul.msk.bf16.vlgmr.msra.gmra.mxu2 %vm701_vm1, %v14614_v44 }
 0x789   : > { %7117 = vmatpush.bf16.msra.mxu2 %v6988_v36  ;;  %7878 = vrot.lane.b32.xlu2 %v14308_v62, %s10318_s21  ;;  %v14771_v36 = vpop.permute.xlu0 %7260 }
 0x78a   : > { %7868 = vrot.lane.b32.xlu1 %v14166_v6, %s10318_s21 }
 0x78b   : > { %7880 = vrot.lane.b32.xlu0 %v14322_v15, %s10318_s21  ;;  %v14717_v1 = vpop.f32.mrf.mxu2 }
 0x78c   : > { %16562 = vst [vmem:[#allocation20_spill] sm:$0xff] %v14717_v1 }
 0x78d   : > { %9931 = vmatmul.msk.bf16.gmra.mxu0 %vm701_vm1, %v14653_v57  ;;  %7118 = vmatpush.bf16.msra.mxu2 %v6979_v55  ;;  %v7259_v55 = vpop.permute.xlu2 %7258 }
 0x78e   : > { %9933 = vmatmul.msk.bf16.gmra.mxu1 %vm701_vm1, %v14653_v57 }
 0x791   : > { %7858 = vrot.lane.b32.xlu2 %v14288_v12, %s10318_s21 }
 0x792   : > { %7874 = vrot.lane.b32.xlu1 %v14208_v31, %s10318_s21 }
 0x793   : > { %7860 = vrot.lane.b32.xlu0 %v14310_v61, %s10318_s21  ;;  %v14739_v29 = vpop.f32.mrf.mxu2 }
 0x794   : > { %16563 = vst [vmem:[#allocation26_spill] sm:$0xff] %v14739_v29  ;;  %9936 = vmatmul.msk.bf16.vlgmr.msra.gmra.mxu3 %vm701_vm1, %v14614_v44 }
 0x795   : > { %7060 = vmatpush.bf16.msra.mxu3 %v6985_v11  ;;  %v14773_v11 = vpop.permute.xlu1 %6948 }
 0x796   : > { %v14743_v7 = vpop.f32.mrf.mxu3 }
 0x798   : > { %9943 = vmatmul.msk.bf16.gmra.mxu2 %vm701_vm1, %v14653_v57 }
 0x799   : > { %7061 = vmatpush.bf16.msra.mxu3 %v6976_v35  ;;  %7856 = vrot.lane.b32.xlu2 %v14229_v59, %s10318_s21  ;;  %v6977_v35 = vsel %vm2226_vm4, %v6941_v3, %v6943_v43  ;;  %v7287_v43 = vsel %vm2797_vm5, %v7259_v55, %v14771_v36  ;;  %v7239_v55 = vpop.permute.xlu2 %7238 }
 0x79a   : > { %v14753_v5 = vpop.f32.mrf.mxu0  ;;  %7854 = vrot.lane.b32.xlu1 %v14227_v39, %s10318_s21 }
 0x79b   : > { %v14755_v16 = vpop.f32.mrf.mxu1  ;;  %7862 = vrot.lane.b32.xlu0 %v14292_v19, %s10318_s21  ;;  %v14761_v63 = vpop.f32.mrf.mxu2 }
 0x79c   : > { %16564 = vst [vmem:[#allocation24_spill] sm:$0xff] %v14761_v63 }
 0x79d   : > { %9938 = vmatmul.msk.bf16.vlgmr.msra.gmra.mxu0 %vm701_vm1, %v14614_v44 }
 0x79e   : > { %9940 = vmatmul.msk.bf16.vlgmr.msra.gmra.mxu1 %vm701_vm1, %v14614_v44  ;;  %7079 = vmatpush.bf16.msra.mxu0 %v6986_v54  ;;  %v14769_v40 = vpop.f32.mrf.mxu3 }
 0x79f   : > { %7098 = vmatpush.bf16.msra.mxu1 %v6987_v58  ;;  %v14802_v58 = vpop.permute.xlu0 %7240 }
 0x7a1   : > { %8174 = vrot.lane.b32.xlu2 %v14239_v20, %s10319_s13  ;;  %v6973_v48 = vpop.permute.xlu2 %6972 }
 0x7a2   : > { %7080 = vmatpush.bf16.msra.mxu0 %v6977_v35  ;;  %v14779_v42 = vpop.f32.mrf.mxu0  ;;  %7876 = vrot.lane.b32.xlu1 %v14210_v28, %s10318_s21 }
 0x7a3   : > { %7099 = vmatpush.bf16.msra.mxu1 %v6978_v34  ;;  %v14781_v32 = vpop.f32.mrf.mxu1  ;;  %7882 = vrot.lane.b32.xlu0 %v14277_v22, %s10318_s21  ;;  %v14787_v54 = vpop.f32.mrf.mxu2 }
 0x7a4   : > { %16565 = vst [vmem:[#allocation21_spill] sm:$0xff] %v14787_v54  ;;  %9937 = vmatmul.msk.bf16.gmra.mxu3 %vm701_vm1, %v14653_v57  ;;  %v6971_v54 = vpop.permute.xlu1 %6970 }
 0x7a5   : > { %v6990_v4 = vsel %vm2226_vm4, %v14745_v45, %v6971_v54 }
 0x7a6   : > { %v14796_v3 = vpop.f32.mrf.mxu3 }
 0x7a7   : > { %v6951_v56 = vpop.permute.xlu0 %6950 }
 0x7a8   : > { %9962 = vmatmul.msk.bf16.vlgmr.msrb.gmra.mxu2 %vm701_vm1, %v14794_v0 }
 0x7a9   : > { %7326 = vmatpush.bf16.msrb.mxu2 %v7287_v43  ;;  %8154 = vrot.lane.b32.xlu2 %v14224_v14, %s10319_s13  ;;  %v7278_v43 = vsel %vm2797_vm5, %v7239_v55, %v14802_v58  ;;  %v6989_v55 = vsel %vm2226_vm4, %v14684_v10, %v14745_v45  ;;  %v6980_v10 = vsel %vm2226_vm4, %v14711_v38, %v14773_v11  ;;  %v7263_v37 = vpop.permute.xlu2 %7262 }
 0x7aa   : > { %v14806_v35 = vpop.f32.mrf.mxu0  ;;  %8172 = vrot.lane.b32.xlu1 %v14166_v6, %s10319_s13  ;;  %v6991_v38 = vsel %vm2226_vm4, %v6971_v54, %v6973_v48 }
 0x7ab   : > { %v14808_v34 = vpop.f32.mrf.mxu1  ;;  %7884 = vrot.lane.b32.xlu0 %v14279_v13, %s10318_s21  ;;  %v14814_v63 = vpop.f32.mrf.mxu2 }
 0x7ac   : > { %16566 = vst [vmem:[#allocation28_spill] sm:$0xff] %v14814_v63  ;;  %v6953_v41 = vpop.permute.xlu1 %6952 }
 0x7ad   : > { %9939 = vmatmul.msk.bf16.gmra.mxu0 %vm701_vm1, %v14653_v57  ;;  %7327 = vmatpush.bf16.msrb.mxu2 %v7278_v43  ;;  %v6982_v45 = vsel %vm2226_vm4, %v6951_v56, %v6953_v41 }
 0x7ae   : > { %9941 = vmatmul.msk.bf16.gmra.mxu1 %vm701_vm1, %v14653_v57  ;;  %v14822_v29 = vpop.f32.mrf.mxu3 }
 0x7af   : > { %v7267_v30 = vpop.permute.xlu0 %7266 }
 0x7b1   : > { %7864 = vrot.lane.b32.xlu2 %v14294_v50, %s10318_s21 }
 0x7b2   : > { %v14826_v1 = vpop.f32.mrf.mxu0  ;;  %8152 = vrot.lane.b32.xlu1 %v14136_v18, %s10319_s13 }
 0x7b3   : > { %v14828_v52 = vpop.f32.mrf.mxu1  ;;  %8150 = vrot.lane.b32.xlu0 %v14134_v47, %s10319_s13  ;;  %v14837_v43 = vpop.f32.mrf.mxu2 }
 0x7b4   : > { %16567 = vst [vmem:[#allocation30_spill] sm:$0xff] %v14837_v43  ;;  %9944 = vmatmul.msk.bf16.vlgmr.msrb.gmra.mxu3 %vm701_vm1, %v14614_v44  ;;  %v14874_v17 = vpop.permute.xlu1 %7268 }
 0x7b5   : > { %7136 = vmatpush.bf16.msrb.mxu3 %v6989_v55 }
 0x7b6   : > { %v14846_v2 = vpop.f32.mrf.mxu3 }
 0x7b8   : > { %9963 = vmatmul.msk.bf16.gmra.mxu2 %vm701_vm1, %v14844_v24 }
 0x7b9   : > { %7137 = vmatpush.bf16.msrb.mxu3 %v6980_v10  ;;  %8180 = vrot.lane.b32.xlu2 %v14210_v28, %s10319_s13 }
 0x7ba   : > { %v14855_v43 = vpop.f32.mrf.mxu0  ;;  %8170 = vrot.lane.b32.xlu1 %v14168_v27, %s10319_s13 }
 0x7bb   : > { %v14857_v63 = vpop.f32.mrf.mxu1  ;;  %8182 = vrot.lane.b32.xlu0 %v14308_v62, %s10319_s13  ;;  %v14863_v55 = vpop.f32.mrf.mxu2 }
 0x7bc   : > { %16568 = vst [vmem:[#allocation27_spill] sm:$0xff] %v14863_v55  ;;  %v6981_v55 = vsel %vm2226_vm4, %v14773_v11, %v6951_v56  ;;  %v7291_v11 = vsel %vm2797_vm5, %v7267_v30, %v14874_v17  ;;  %v14900_v54 = vpop.permute.xlu1 %7248 }
 0x7bd   : > { %9946 = vmatmul.msk.bf16.vlgmr.msrb.gmra.mxu0 %vm701_vm1, %v14614_v44 }
 0x7be   : > { %9960 = vmatmul.msk.bf16.vlgmr.msrb.gmra.mxu1 %vm701_vm1, %v14794_v0  ;;  %7155 = vmatpush.bf16.msrb.mxu0 %v6990_v4  ;;  %v14872_v10 = vpop.f32.mrf.mxu3 }
 0x7bf   : > { %7174 = vmatpush.bf16.msrb.mxu1 %v6991_v38 }
 0x7c1   : > { %8160 = vrot.lane.b32.xlu2 %v14229_v59, %s10319_s13 }
 0x7c2   : > { %7156 = vmatpush.bf16.msrb.mxu0 %v6981_v55  ;;  %v14881_v44 = vpop.f32.mrf.mxu0  ;;  %8176 = vrot.lane.b32.xlu1 %v14247_v53, %s10319_s13 }
 0x7c3   : > { %7175 = vmatpush.bf16.msrb.mxu1 %v6982_v45  ;;  %v14883_v4 = vpop.f32.mrf.mxu1  ;;  %8162 = vrot.lane.b32.xlu0 %v14288_v12, %s10319_s13  ;;  %v6517_v48 = vpop.f32.mrf.mxu2 }
 0x7c4   : > { %9945 = vmatmul.msk.bf16.gmra.mxu3 %vm701_vm1, %v14653_v57  ;;  %v14892_v56 = vadd.f32 %v6517_v48, %v14731_v21  ;;  %v7247_v21 = vpop.permute.xlu0 %7246  ;;  %v7243_v45 = vpop.permute.xlu2 %7242 }
 0x7c6   : > { %16569 = vst [vmem:[#allocation29_spill] sm:$0xff] %v14892_v56 }
 0x7c7   : > { %v14894_v41 = vpop.f32.mrf.mxu3 }
 0x7c8   : > { %16570 = vst [vmem:[#allocation42_spill] sm:$0xff] %v14894_v41  ;;  %9970 = vmatmul.msk.bf16.vlgmr.msra.gmra.mxu2 %vm701_vm1, %v14794_v0 }
 0x7c9   : > { %7402 = vmatpush.bf16.msra.mxu2 %v7291_v11  ;;  %8158 = vrot.lane.b32.xlu2 %v14227_v39, %s10319_s13  ;;  %v7282_v11 = vsel %vm2797_vm5, %v7247_v21, %v14900_v54 }
 0x7ca   : > { %v14904_v55 = vpop.f32.mrf.mxu0  ;;  %8156 = vrot.lane.b32.xlu1 %v14241_v25, %s10319_s13 }
 0x7cb   : > { %16571 = vst [vmem:[#allocation34_spill] sm:$0xff] %v14904_v55  ;;  %v14906_v38 = vpop.f32.mrf.mxu1  ;;  %8184 = vrot.lane.b32.xlu0 %v14322_v15, %s10319_s13  ;;  %v6586_v48 = vpop.f32.mrf.mxu2 }
 0x7cc   : > { %v14913_v56 = vadd.f32 %v6586_v48, %v14755_v16  ;;  %v7288_v48 = vsel %vm2797_vm5, %v14771_v36, %v7263_v37 }
 0x7cd   : > { %9947 = vmatmul.msk.bf16.gmra.mxu0 %vm701_vm1, %v14653_v57  ;;  %7403 = vmatpush.bf16.msra.mxu2 %v7282_v11 }
 0x7ce   : > { %16572 = vst [vmem:[#allocation5_spill] sm:$0xff] %v14913_v56  ;;  %9961 = vmatmul.msk.bf16.gmra.mxu1 %vm701_vm1, %v14844_v24 }
 0x7cf   : > { %v14921_v55 = vpop.f32.mrf.mxu3 }
 0x7d0   : > { %16573 = vst [vmem:[#allocation4_spill] sm:$0xff] %v14921_v55  ;;  %v7265_v55 = vpop.permute.xlu2 %7264 }
 0x7d1   : > { %8476 = vrot.lane.b32.xlu2 %v14166_v6, %s10320_s26  ;;  %v7245_v6 = vpop.permute.xlu0 %7244 }
 0x7d2   : > { %v6479_v15 = vpop.f32.mrf.mxu0  ;;  %8178 = vrot.lane.b32.xlu1 %v14208_v31, %s10319_s13 }
 0x7d3   : > { %v6498_v41 = vpop.f32.mrf.mxu1  ;;  %8164 = vrot.lane.b32.xlu0 %v14310_v61, %s10319_s13  ;;  %v14930_v57 = vadd.f32 %v6479_v15, %v14725_v33  ;;  %v6588_v11 = vpop.f32.mrf.mxu2  ;;  %v7279_v33 = vsel %vm2797_vm5, %v14802_v58, %v7243_v45  ;;  %v7289_v58 = vsel %vm2797_vm5, %v7263_v37, %v7265_v55  ;;  %v7281_v37 = vsel %vm2797_vm5, %v7245_v6, %v7247_v21 }
 0x7d4   : > { %v14933_v16 = vadd.f32 %v6498_v41, %v14729_v60  ;;  %9964 = vmatmul.msk.bf16.vlgmr.msra.gmra.mxu3 %vm701_vm1, %v14794_v0  ;;  %v14940_v56 = vadd.f32 %v6588_v11, %v14781_v32  ;;  %v14942_v61 = vpop.permute.xlu1 %7270  ;;  %v7290_v11 = vsel %vm2797_vm5, %v7265_v55, %v7267_v30  ;;  %v7280_v30 = vsel %vm2797_vm5, %v7243_v45, %v7245_v6  ;;  %v14996_v6 = vld [vmem:[%s16265_s6 + $0x40] sm:$0xff] }
 0x7d5   : > { %7345 = vmatpush.bf16.msra.mxu3 %v7288_v48 }
 0x7d7   : > { %v14944_v15 = vpop.f32.mrf.mxu3 }
 0x7d8   : > { %9971 = vmatmul.msk.bf16.gmra.mxu2 %vm701_vm1, %v14844_v24 }
 0x7d9   : > { %7346 = vmatpush.bf16.msra.mxu3 %v7279_v33  ;;  %8456 = vrot.lane.b32.xlu2 %v14136_v18, %s10320_s26 }
 0x7da   : > { %v6548_v60 = vpop.f32.mrf.mxu0  ;;  %8474 = vrot.lane.b32.xlu1 %v14168_v27, %s10320_s26  ;;  %v7277_v27 = vpop.permute.xlu0 %7276 }
 0x7db   : > { %v6567_v36 = vpop.f32.mrf.mxu1  ;;  %8186 = vrot.lane.b32.xlu0 %v14277_v22, %s10319_s13  ;;  %v14957_v32 = vadd.f32 %v6548_v60, %v14743_v7  ;;  %v6591_v48 = vpop.f32.mrf.mxu2 }
 0x7dc   : > { %v14960_v41 = vadd.f32 %v6567_v36, %v14753_v5  ;;  %v14965_v18 = vadd.f32 %v6591_v48, %v14808_v34  ;;  %v14973_v5 = vpop.permute.xlu2 %7274  ;;  %v14975_v33 = vpop.permute.xlu1 %7250 }
 0x7dd   : > { %9966 = vmatmul.msk.bf16.vlgmr.msra.gmra.mxu0 %vm701_vm1, %v14794_v0 }
 0x7de   : > { %9968 = vmatmul.msk.bf16.vlgmr.msra.gmra.mxu1 %vm701_vm1, %v14794_v0  ;;  %7364 = vmatpush.bf16.msra.mxu0 %v7289_v58 }
 0x7df   : > { %7383 = vmatpush.bf16.msra.mxu1 %v7290_v11  ;;  %v14971_v7 = vpop.f32.mrf.mxu3 }
 0x7e1   : > { %8166 = vrot.lane.b32.xlu2 %v14292_v19, %s10319_s13 }
 0x7e2   : > { %7365 = vmatpush.bf16.msra.mxu0 %v7280_v30  ;;  %v6550_v34 = vpop.f32.mrf.mxu0  ;;  %8454 = vrot.lane.b32.xlu1 %v14134_v47, %s10320_s26 }
 0x7e3   : > { %7384 = vmatpush.bf16.msra.mxu1 %v7281_v37  ;;  %v6569_v55 = vpop.f32.mrf.mxu1  ;;  %8168 = vrot.lane.b32.xlu0 %v14294_v50, %s10319_s13  ;;  %v14986_v60 = vadd.f32 %v6550_v34, %v14769_v40  ;;  %v6593_v21 = vpop.f32.mrf.mxu2  ;;  %v7295_v40 = vsel %vm2797_vm5, %v14973_v5, %v7277_v27 }
 0x7e4   : > { %v14989_v45 = vadd.f32 %v6569_v55, %v14779_v42  ;;  %9965 = vmatmul.msk.bf16.gmra.mxu3 %vm701_vm1, %v14844_v24  ;;  %v14999_v47 = vadd.f32 %v6593_v21, %v14828_v52  ;;  %v7257_v42 = vpop.permute.xlu0 %7256  ;;  %v7273_v11 = vpop.permute.xlu1 %7272  ;;  %v6492_v52 = vadd.f32 %v14857_v63, %v14655_v23 }
 0x7e5   : > { %v7255_v37 = vpop.permute.xlu2 %7254 }
 0x7e6   : > { %v7286_v23 = vsel %vm2797_vm5, %v7255_v37, %v7257_v42  ;;  %v6454_v42 = vadd.f32 %v14846_v2, %v14527_v8 }
 0x7e7   : > { %v15001_v36 = vpop.f32.mrf.mxu3 }
 0x7e8   : > { %9990 = vmatmul.msk.bf16.vlgmr.msrb.gmra.mxu2 %vm701_vm1, %v14996_v6 }
 0x7e9   : > { %7478 = vmatpush.bf16.msrb.mxu2 %v7295_v40  ;;  %8482 = vrot.lane.b32.xlu2 %v14208_v31, %s10320_s26 }
 0x7ea   : > { %v6553_v48 = vpop.f32.mrf.mxu0  ;;  %8188 = vrot.lane.b32.xlu1 %v14279_v13, %s10319_s13 }
 0x7eb   : > { %v6572_v58 = vpop.f32.mrf.mxu1  ;;  %8484 = vrot.lane.b32.xlu0 %v14210_v28, %s10320_s26  ;;  %v15016_v27 = vadd.f32 %v6553_v48, %v14796_v3  ;;  %v6759_v31 = vpop.f32.mrf.mxu2  ;;  %v6473_v48 = vadd.f32 %v14855_v43, %v14638_v49  ;;  %v7293_v49 = vsel %vm2797_vm5, %v14942_v61, %v7273_v11 }
 0x7ec   : > { %v15019_v30 = vadd.f32 %v6572_v58, %v14806_v35  ;;  %v15021_v34 = vadd.f32 %v6759_v31, %v6492_v52  ;;  %v6494_v35 = vadd.f32 %v14883_v4, %v14680_v46  ;;  %v6497_v31 = vadd.f32 %v14906_v38, %v14705_v51 }
 0x7ed   : > { %9967 = vmatmul.msk.bf16.gmra.mxu0 %vm701_vm1, %v14844_v24  ;;  %7479 = vmatpush.bf16.msrb.mxu2 %v7286_v23  ;;  %v7253_v4 = vpop.permute.xlu2 %7252  ;;  %v6475_v38 = vadd.f32 %v14881_v44, %v14668_v26 }
 0x7ee   : > { %9969 = vmatmul.msk.bf16.gmra.mxu1 %vm701_vm1, %v14844_v24 }
 0x7ef   : > { %v15028_v28 = vpop.f32.mrf.mxu3 }
 0x7f1   : > { %8462 = vrot.lane.b32.xlu2 %v14227_v39, %s10320_s26  ;;  %v7292_v39 = vsel %vm2797_vm5, %v14874_v17, %v14942_v61  ;;  %v7283_v17 = vsel %vm2797_vm5, %v14900_v54, %v14975_v33  ;;  %v6456_v61 = vadd.f32 %v14872_v10, %v14547_v9 }
 0x7f2   : > { %v6555_v63 = vpop.f32.mrf.mxu0  ;;  %8478 = vrot.lane.b32.xlu1 %v14239_v20, %s10320_s26  ;;  %v15052_v20 = vld [vmem:[%s16265_s6 + $0x48] sm:$0xff] }
 0x7f3   : > { %v6574_v3 = vpop.f32.mrf.mxu1  ;;  %8464 = vrot.lane.b32.xlu0 %v14229_v59, %s10320_s26  ;;  %v15039_v55 = vadd.f32 %v6555_v63, %v14822_v29  ;;  %v6761_v40 = vpop.f32.mrf.mxu2 }
 0x7f4   : > { %v15042_v21 = vadd.f32 %v6574_v3, %v14826_v1  ;;  %9972 = vmatmul.msk.bf16.vlgmr.msrb.gmra.mxu3 %vm701_vm1, %v14794_v0  ;;  %v15054_v59 = vpop.permute.xlu1 %7564  ;;  %v15056_v46 = vadd.f32 %v6761_v40, %v6494_v35  ;;  %v15058_v1 = vpop.permute.xlu0 %7562  ;;  %v16576_v3 = vld [vmem:[#allocation25_spill] sm:$0xff]  ;;  %v16577_v35 = vld [vmem:[#allocation34_spill] sm:$0xff] }
 0x7f5   : > { %7421 = vmatpush.bf16.msrb.mxu3 %v7292_v39  ;;  %v15108_v63 = vpop.permute.xlu2 %7568  ;;  %v6478_v39 = vadd.f32 %v16577_v35, %v16576_v3 }
 0x7f7   : > { %v15060_v29 = vpop.f32.mrf.mxu3 }
 0x7f8   : > { %9991 = vmatmul.msk.bf16.gmra.mxu2 %vm701_vm1, %v15052_v20 }
 0x7f9   : > { %7422 = vmatpush.bf16.msrb.mxu3 %v7283_v17  ;;  %8460 = vrot.lane.b32.xlu2 %v14241_v25, %s10320_s26  ;;  %v7294_v25 = vsel %vm2797_vm5, %v7273_v11, %v14973_v5  ;;  %v7284_v5 = vsel %vm2797_vm5, %v14975_v33, %v7253_v4  ;;  %v7285_v11 = vsel %vm2797_vm5, %v7253_v4, %v7255_v37  ;;  %v16575_v33 = vld [vmem:[#allocation42_spill] sm:$0xff] }
 0x7fa   : > { %v6721_v58 = vpop.f32.mrf.mxu0  ;;  %8458 = vrot.lane.b32.xlu1 %v14224_v14, %s10320_s26 }
 0x7fb   : > { %v6740_v52 = vpop.f32.mrf.mxu1  ;;  %8486 = vrot.lane.b32.xlu0 %v14308_v62, %s10320_s26  ;;  %v15079_v54 = vadd.f32 %v6721_v58, %v6454_v42  ;;  %v6764_v2 = vpop.f32.mrf.mxu2  ;;  %v16578_v42 = vld [vmem:[#allocation15_spill] sm:$0xff] }
 0x7fc   : > { %v15081_v8 = vadd.f32 %v6740_v52, %v6473_v48  ;;  %v15087_v43 = vadd.f32 %v6764_v2, %v6497_v31  ;;  %v15093_v14 = vpop.permute.xlu1 %7542  ;;  %v15097_v51 = vpop.permute.xlu0 %7570 }
 0x7fd   : > { %9974 = vmatmul.msk.bf16.vlgmr.msrb.gmra.mxu0 %vm701_vm1, %v14794_v0  ;;  %v7545_v31 = vpop.permute.xlu2 %7544 }
 0x7fe   : > { %9976 = vmatmul.msk.bf16.vlgmr.msrb.gmra.mxu1 %vm701_vm1, %v14794_v0  ;;  %7440 = vmatpush.bf16.msrb.mxu0 %v7293_v49 }
 0x7ff   : > { %7459 = vmatpush.bf16.msrb.mxu1 %v7294_v25  ;;  %v15095_v62 = vpop.f32.mrf.mxu3  ;;  %v16579_v25 = vld [vmem:[#allocation14_spill] sm:$0xff] }
 0x801   : > { %8492 = vrot.lane.b32.xlu2 %v14279_v13, %s10320_s26 }
 0x802   : > { %7441 = vmatpush.bf16.msrb.mxu0 %v7284_v5  ;;  %v6723_v0 = vpop.f32.mrf.mxu0  ;;  %8480 = vrot.lane.b32.xlu1 %v14247_v53, %s10320_s26  ;;  %v7594_v53 = vsel %vm3368_vm6, %v15108_v63, %v15097_v51 }
 0x803   : > { %7460 = vmatpush.bf16.msrb.mxu1 %v7285_v11  ;;  %v6742_v23 = vpop.f32.mrf.mxu1  ;;  %8466 = vrot.lane.b32.xlu0 %v14288_v12, %s10320_s26  ;;  %v15114_v9 = vadd.f32 %v6723_v0, %v6456_v61  ;;  %v6766_v10 = vpop.f32.mrf.mxu2  ;;  %v16574_v12 = vld [vmem:[#allocation11_spill] sm:$0xff]  ;;  %v16580_v61 = vld [vmem:[#allocation4_spill] sm:$0xff] }
 0x804   : > { %v15116_v26 = vadd.f32 %v6742_v23, %v6475_v38  ;;  %9973 = vmatmul.msk.bf16.gmra.mxu3 %vm701_vm1, %v14844_v24  ;;  %v15121_v13 = vadd.f32 %v6766_v10, %v14933_v16  ;;  %v6459_v37 = vadd.f32 %v16575_v33, %v16574_v12  ;;  %v15134_v40 = vpop.permute.xlu1 %7550  ;;  %v7549_v4 = vpop.permute.xlu0 %7548  ;;  %v6461_v38 = vadd.f32 %v16580_v61, %v16579_v25  ;;  %v16581_v33 = vld [vmem:[#allocation22_spill] sm:$0xff]  ;;  %v16585_v61 = vld [vmem:[#allocation19_spill] sm:$0xff] }
 0x805   : > { %v7591_v23 = vsel %vm3368_vm6, %v15058_v1, %v15054_v59  ;;  %v7567_v3 = vpop.permute.xlu2 %7566  ;;  %v7582_v1 = vsel %vm3368_vm6, %v15093_v14, %v7545_v31 }
 0x806   : > { %v7593_v25 = vsel %vm3368_vm6, %v7567_v3, %v15108_v63  ;;  %v7592_v14 = vsel %vm3368_vm6, %v15054_v59, %v7567_v3 }
 0x807   : > { %v15123_v44 = vpop.f32.mrf.mxu3 }
 0x808   : > { %9998 = vmatmul.msk.bf16.vlgmr.msra.gmra.mxu2 %vm701_vm1, %v14996_v6 }
 0x809   : > { %7687 = vmatpush.bf16.msra.mxu2 %v7594_v53  ;;  %8472 = vrot.lane.b32.xlu2 %v14294_v50, %s10320_s26  ;;  %v7585_v50 = vsel %vm3368_vm6, %v7549_v4, %v15134_v40 }
 0x80a   : > { %v6726_v16 = vpop.f32.mrf.mxu0  ;;  %8490 = vrot.lane.b32.xlu1 %v14277_v22, %s10320_s26  ;;  %v8743_v22 = vld [vmem:[%s16266_s7] sm:$0xff] }
 0x80b   : > { %v6745_v17 = vpop.f32.mrf.mxu1  ;;  %8488 = vrot.lane.b32.xlu0 %v16578_v42, %s10320_s26  ;;  %v15142_v48 = vadd.f32 %v6726_v16, %v6459_v37  ;;  %v6835_v52 = vpop.f32.mrf.mxu2 }
 0x80c   : > { %v15144_v58 = vadd.f32 %v6745_v17, %v6478_v39  ;;  %v15147_v2 = vadd.f32 %v6835_v52, %v14960_v41  ;;  %v8744_v41 = vld [vmem:[%s16266_s7 + $0x8] sm:$0xff]  ;;  %v7547_v53 = vpop.permute.xlu0 %7546  ;;  %v16584_v52 = vld [vmem:[#allocation18_spill] sm:$0xff] }
 0x80d   : > { %9975 = vmatmul.msk.bf16.gmra.mxu0 %vm701_vm1, %v14844_v24  ;;  %7688 = vmatpush.bf16.msra.mxu2 %v7585_v50  ;;  %v15220_v59 = vpop.permute.xlu2 %7576 }
 0x80e   : > { %9977 = vmatmul.msk.bf16.gmra.mxu1 %vm701_vm1, %v14844_v24 }
 0x80f   : > { %v15158_v49 = vpop.f32.mrf.mxu3 }
 0x811   : > { %8749 = vperm.xlu2 %10303, %v8743_v22  }
 0x812   : > { %v6728_v5 = vpop.f32.mrf.mxu0  ;;  %8470 = vrot.lane.b32.xlu1 %v14292_v19, %s10320_s26  ;;  %v16582_v19 = vld [vmem:[#allocation28_spill] sm:$0xff] }
 0x813   : > { %v6747_v24 = vpop.f32.mrf.mxu1  ;;  %8754 = vperm.xlu0 %10301, %v8744_v41   ;;  %v15167_v11 = vadd.f32 %v6728_v5, %v6461_v38  ;;  %v6837_v10 = vpop.f32.mrf.mxu2  ;;  %v6511_v37 = vadd.f32 %v16582_v19, %v16581_v33  ;;  %v16586_v38 = vld [vmem:[#allocation30_spill] sm:$0xff]  ;;  %v7583_v19 = vsel %vm3368_vm6, %v7545_v31, %v7547_v53  ;;  %v16588_v31 = vld [vmem:[#allocation23_spill] sm:$0xff] }
 0x814   : > { %v15170_v0 = vadd.f32 %v6747_v24, %v14930_v57  ;;  %9992 = vmatmul.msk.bf16.vlgmr.msra.gmra.mxu3 %vm701_vm1, %v14996_v6  ;;  %v15178_v12 = vadd.f32 %v6837_v10, %v14989_v45  ;;  %v8746_v57 = vld [vmem:[%s16266_s7 + $0x18] sm:$0xff]  ;;  %v15213_v5 = vpop.permute.xlu0 %7578  ;;  %v16587_v10 = vld [vmem:[#allocation7_spill] sm:$0xff] }
 0x815   : > { %7630 = vmatpush.bf16.msra.mxu3 %v7591_v23  ;;  %v16583_v45 = vld [vmem:[#allocation10_spill] sm:$0xff]  ;;  %v7573_v23 = vpop.permute.xlu1 %7572  ;;  %v6532_v33 = vadd.f32 %v14971_v7, %v16587_v10 }
 0x816   : > { %v6530_v16 = vadd.f32 %v14944_v15, %v16583_v45 }
 0x817   : > { %v6778_v35 = vpop.f32.mrf.mxu3 }
 0x818   : > { %v15185_v39 = vadd.f32 %v6778_v35, %v6511_v37  ;;  %9999 = vmatmul.msk.bf16.gmra.mxu2 %vm701_vm1, %v15052_v20  ;;  %v7584_v37 = vsel %vm3368_vm6, %v7547_v53, %v7549_v4 }
 0x819   : > { %7631 = vmatpush.bf16.msra.mxu3 %v7582_v1  ;;  %8764 = vperm.xlu2 %10303, %v8746_v57  }
 0x81a   : > { %v6797_v17 = vpop.f32.mrf.mxu0  ;;  %8468 = vrot.lane.b32.xlu1 %v16584_v52, %s10320_s26  ;;  %v16590_v52 = vld [vmem:[#allocation33_spill] sm:$0xff] }
 0x81b   : > { %v6816_v42 = vpop.f32.mrf.mxu1  ;;  %v15195_v50 = vadd.f32 %v6797_v17, %v6530_v16  ;;  %v6840_v41 = vpop.f32.mrf.mxu2  ;;  %v16589_v16 = vld [vmem:[#allocation27_spill] sm:$0xff]  ;;  %v7598_v17 = vsel %vm3368_vm6, %v15220_v59, %v15213_v5 }
 0x81c   : > { %v15198_v22 = vadd.f32 %v6816_v42, %v14957_v32  ;;  %v15205_v15 = vadd.f32 %v6840_v41, %v15019_v30  ;;  %v6513_v32 = vadd.f32 %v16586_v38, %v16585_v61  ;;  %v8745_v30 = vld [vmem:[%s16266_s7 + $0x10] sm:$0xff]  ;;  %v6516_v4 = vadd.f32 %v16589_v16, %v16588_v31 }
 0x81d   : > { %9994 = vmatmul.msk.bf16.vlgmr.msra.gmra.mxu0 %vm701_vm1, %v14996_v6  ;;  %v6535_v41 = vadd.f32 %v15001_v36, %v16590_v52  ;;  %v7595_v31 = vsel %vm3368_vm6, %v15097_v51, %v7573_v23  ;;  %v16594_v51 = vld [vmem:[#allocation20_spill] sm:$0xff] }
 0x81e   : > { %9996 = vmatmul.msk.bf16.vlgmr.msra.gmra.mxu1 %vm701_vm1, %v14996_v6  ;;  %7649 = vmatpush.bf16.msra.mxu0 %v7592_v14  ;;  %v7553_v14 = vpop.permute.xlu1 %7552 }
 0x81f   : > { %7668 = vmatpush.bf16.msra.mxu1 %v7593_v25  ;;  %v6780_v63 = vpop.f32.mrf.mxu3 }
 0x820   : > { %v15215_v24 = vadd.f32 %v6780_v63, %v6513_v32  ;;  %v7557_v32 = vpop.permute.xlu2 %7556 }
 0x822   : > { %7650 = vmatpush.bf16.msra.mxu0 %v7583_v19  ;;  %v6799_v57 = vpop.f32.mrf.mxu0  ;;  %8759 = vperm.xlu1 %10302, %v8745_v30  }
 0x823   : > { %7669 = vmatpush.bf16.msra.mxu1 %v7584_v37  ;;  %v6818_v3 = vpop.f32.mrf.mxu1  ;;  %v15226_v35 = vadd.f32 %v6799_v57, %v6532_v33  ;;  %v6842_v45 = vpop.f32.mrf.mxu2  ;;  %v16591_v33 = vld [vmem:[#allocation29_spill] sm:$0xff] }
 0x824   : > { %v15229_v1 = vadd.f32 %v6818_v3, %v14986_v60  ;;  %9993 = vmatmul.msk.bf16.gmra.mxu3 %vm701_vm1, %v15052_v20  ;;  %v15234_v7 = vadd.f32 %v6842_v45, %v15042_v21  ;;  %v15245_v60 = vpop.permute.xlu0 %7558 }
 0x825   : > { %v7589_v36 = vsel %vm3368_vm6, %v7557_v32, %v15245_v60 }
 0x827   : > { %v6783_v53 = vpop.f32.mrf.mxu3 }
 0x828   : > { %v15241_v42 = vadd.f32 %v6783_v53, %v6516_v4  ;;  %10006 = vmatmul.msk.bf16.vlgmr.msrb.gmra.mxu2 %vm701_vm1, %v14996_v6  ;;  %v7575_v4 = vpop.permute.xlu1 %7574 }
 0x829   : > { %7763 = vmatpush.bf16.msrb.mxu2 %v7598_v17 }
 0x82a   : > { %v6802_v21 = vpop.f32.mrf.mxu0 }
 0x82b   : > { %v6821_v25 = vpop.f32.mrf.mxu1  ;;  %v15249_v61 = vadd.f32 %v6802_v21, %v6535_v41  ;;  %v7044_v63 = vpop.f32.mrf.mxu2  ;;  %v16593_v41 = vld [vmem:[#allocation5_spill] sm:$0xff] }
 0x82c   : > { %v15252_v38 = vadd.f32 %v6821_v25, %v15016_v27  ;;  %v15255_v30 = vadd.f32 %v7044_v63, %v15081_v8  ;;  %v16592_v27 = vld [vmem:[#allocation16_spill] sm:$0xff]  ;;  %v15280_v17 = vpop.permute.xlu0 %7560  ;;  %v6606_v25 = vadd.f32 %v15060_v29, %v16594_v51 }
 0x82d   : > { %9995 = vmatmul.msk.bf16.gmra.mxu0 %vm701_vm1, %v15052_v20  ;;  %7764 = vmatpush.bf16.msrb.mxu2 %v7589_v36  ;;  %v6537_v37 = vadd.f32 %v15028_v28, %v16592_v27  ;;  %v7555_v28 = vpop.permute.xlu2 %7554  ;;  %v7596_v27 = vsel %vm3368_vm6, %v7573_v23, %v7575_v4  ;;  %v16596_v51 = vld [vmem:[#allocation24_spill] sm:$0xff] }
 0x82e   : > { %9997 = vmatmul.msk.bf16.gmra.mxu1 %vm701_vm1, %v15052_v20 }
 0x82f   : > { %v6785_v10 = vpop.f32.mrf.mxu3 }
 0x830   : > { %v15264_v19 = vadd.f32 %v6785_v10, %v16591_v33  ;;  %v15306_v29 = vpop.permute.xlu1 %7870 }
 0x832   : > { %v6804_v57 = vpop.f32.mrf.mxu0 }
 0x833   : > { %v6823_v8 = vpop.f32.mrf.mxu1  ;;  %v15268_v3 = vadd.f32 %v6804_v57, %v6537_v37  ;;  %v7046_v16 = vpop.f32.mrf.mxu2  ;;  %v7597_v37 = vsel %vm3368_vm6, %v7575_v4, %v15220_v59 }
 0x834   : > { %v15271_v45 = vadd.f32 %v6823_v8, %v15039_v55  ;;  %10000 = vmatmul.msk.bf16.vlgmr.msrb.gmra.mxu3 %vm701_vm1, %v14996_v6  ;;  %v15278_v53 = vadd.f32 %v7046_v16, %v15116_v26  ;;  %v7586_v55 = vsel %vm3368_vm6, %v15134_v40, %v7553_v14  ;;  %v7581_v59 = vpop.permute.xlu0 %7580  ;;  %v16595_v8 = vld [vmem:[#allocation26_spill] sm:$0xff]  ;;  %v7588_v16 = vsel %vm3368_vm6, %v7555_v28, %v7557_v32 }
 0x835   : > { %7706 = vmatpush.bf16.msrb.mxu3 %v7595_v31  ;;  %v15311_v23 = vpop.permute.xlu2 %7872  ;;  %v7587_v31 = vsel %vm3368_vm6, %v7553_v14, %v7555_v28 }
 0x836   : > { %v7897_v28 = vsel %vm3939_vm7, %v15306_v29, %v15311_v23 }
 0x837   : > { %v6854_v52 = vpop.f32.mrf.mxu3 }
 0x838   : > { %v15283_v21 = vadd.f32 %v6854_v52, %v16593_v41  ;;  %10007 = vmatmul.msk.bf16.gmra.mxu2 %vm701_vm1, %v15052_v20 }
 0x839   : > { %7707 = vmatpush.bf16.msrb.mxu3 %v7586_v55  ;;  %v7851_v55 = vpop.permute.xlu1 %7850 }
 0x83a   : > { %v6873_v26 = vpop.f32.mrf.mxu0 }
 0x83b   : > { %v7025_v63 = vpop.f32.mrf.mxu1  ;;  %v15291_v36 = vadd.f32 %v6873_v26, %v6606_v25  ;;  %v7049_v33 = vpop.f32.mrf.mxu2  ;;  %v6611_v25 = vadd.f32 %v15123_v44, %v16596_v51 }
 0x83c   : > { %v15294_v10 = vadd.f32 %v7025_v63, %v15079_v54  ;;  %v15300_v57 = vadd.f32 %v7049_v33, %v15144_v58  ;;  %v6608_v58 = vadd.f32 %v15095_v62, %v16595_v8  ;;  %v15327_v62 = vld [vmem:[%s16265_s6 + $0x50] sm:$0xff] }
 0x83d   : > { %10002 = vmatmul.msk.bf16.vlgmr.msrb.gmra.mxu0 %vm701_vm1, %v14996_v6 }
 0x83e   : > { %10004 = vmatmul.msk.bf16.vlgmr.msrb.gmra.mxu1 %vm701_vm1, %v14996_v6  ;;  %7725 = vmatpush.bf16.msrb.mxu0 %v7596_v27 }
 0x83f   : > { %7744 = vmatpush.bf16.msrb.mxu1 %v7597_v37  ;;  %v6856_v54 = vpop.f32.mrf.mxu3  ;;  %v15347_v37 = vpop.permute.xlu2 %7852 }
 0x840   : > { %v15309_v40 = vadd.f32 %v6856_v54, %v14940_v56  ;;  %v7888_v44 = vsel %vm3939_vm7, %v7851_v55, %v15347_v37 }
 0x842   : > { %7726 = vmatpush.bf16.msrb.mxu0 %v7587_v31  ;;  %v6875_v6 = vpop.f32.mrf.mxu0 }
 0x843   : > { %7745 = vmatpush.bf16.msrb.mxu1 %v7588_v16  ;;  %v7027_v4 = vpop.f32.mrf.mxu1  ;;  %v15317_v52 = vadd.f32 %v6875_v6, %v6608_v58  ;;  %v7051_v56 = vpop.f32.mrf.mxu2  ;;  %v16597_v58 = vld [vmem:[#allocation21_spill] sm:$0xff] }
 0x844   : > { %v15320_v41 = vadd.f32 %v7027_v4, %v15114_v9  ;;  %10001 = vmatmul.msk.bf16.gmra.mxu3 %vm701_vm1, %v15052_v20  ;;  %v15330_v14 = vadd.f32 %v7051_v56, %v15170_v0  ;;  %v7867_v0 = vpop.permute.xlu0 %7866  ;;  %v6613_v31 = vadd.f32 %v15158_v49, %v16597_v58 }
 0x847   : > { %v6859_v32 = vpop.f32.mrf.mxu3 }
 0x848   : > { %v15336_v9 = vadd.f32 %v6859_v32, %v14965_v18  ;;  %10026 = vmatmul.msk.bf16.vlgmr.msra.gmra.mxu2 %vm701_vm1, %v15327_v62 }
 0x849   : > { %7972 = vmatpush.bf16.msra.mxu2 %v7897_v28  ;;  %v7847_v28 = vpop.permute.xlu2 %7846 }
 0x84a   : > { %v6878_v26 = vpop.f32.mrf.mxu0 }
 0x84b   : > { %v7030_v63 = vpop.f32.mrf.mxu1  ;;  %v15342_v33 = vadd.f32 %v6878_v26, %v6611_v25  ;;  %v7120_v18 = vpop.f32.mrf.mxu2 }
 0x84c   : > { %v15345_v27 = vadd.f32 %v7030_v63, %v15142_v48  ;;  %v15350_v54 = vadd.f32 %v7120_v18, %v15198_v22  ;;  %v7849_v49 = vpop.permute.xlu0 %7848 }
 0x84d   : > { %10003 = vmatmul.msk.bf16.gmra.mxu0 %vm701_vm1, %v15052_v20  ;;  %7973 = vmatpush.bf16.msra.mxu2 %v7888_v44 }
 0x84e   : > { %10005 = vmatmul.msk.bf16.gmra.mxu1 %vm701_vm1, %v15052_v20  ;;  %v7599_v20 = vsel %vm3368_vm6, %v15213_v5, %v7581_v59  ;;  %v7590_v5 = vsel %vm3368_vm6, %v15245_v60, %v15280_v17 }
 0x84f   : > { %v6861_v8 = vpop.f32.mrf.mxu3 }
 0x850   : > { %v15359_v48 = vadd.f32 %v6861_v8, %v14999_v47  ;;  %v15375_v47 = vld [vmem:[%s16265_s6 + $0x58] sm:$0xff] }
 0x851   : > { %v7879_v17 = vpop.permute.xlu2 %7878 }
 0x852   : > { %v6880_v16 = vpop.f32.mrf.mxu0 }
 0x853   : > { %v7032_v22 = vpop.f32.mrf.mxu1  ;;  %v15363_v6 = vadd.f32 %v6880_v16, %v6613_v31  ;;  %v7122_v56 = vpop.f32.mrf.mxu2 }
 0x854   : > { %v15366_v4 = vadd.f32 %v7032_v22, %v15167_v11  ;;  %10020 = vmatmul.msk.bf16.vlgmr.msra.gmra.mxu3 %vm701_vm1, %v15327_v62  ;;  %v15378_v32 = vadd.f32 %v7122_v56, %v15229_v1  ;;  %v7869_v11 = vpop.permute.xlu1 %7868 }
 0x855   : > { %7782 = vmatpush.bf16.msra.mxu3 %v7599_v20  ;;  %v7896_v44 = vsel %vm3939_vm7, %v7869_v11, %v15306_v29  ;;  %v7886_v29 = vsel %vm3939_vm7, %v7847_v28, %v7849_v49 }
 0x857   : > { %v7063_v51 = vpop.f32.mrf.mxu3 }
 0x858   : > { %v15381_v25 = vadd.f32 %v7063_v51, %v15021_v34  ;;  %10027 = vmatmul.msk.bf16.gmra.mxu2 %vm701_vm1, %v15375_v47  ;;  %v7895_v34 = vsel %vm3939_vm7, %v7867_v0, %v7869_v11 }
 0x859   : > { %7783 = vmatpush.bf16.msra.mxu3 %v7590_v5  ;;  %v7859_v5 = vpop.permute.xlu2 %7858 }
 0x85a   : > { %v7082_v59 = vpop.f32.mrf.mxu0 }
 0x85b   : > { %v7101_v26 = vpop.f32.mrf.mxu1  ;;  %v15389_v1 = vadd.f32 %v7082_v59, %v15185_v39  ;;  %v7125_v18 = vpop.f32.mrf.mxu2 }
 0x85c   : > { %v15392_v63 = vadd.f32 %v7101_v26, %v15195_v50  ;;  %v15398_v8 = vadd.f32 %v7125_v18, %v15252_v38  ;;  %v15404_v39 = vpop.permute.xlu0 %7880  ;;  %v7875_v0 = vpop.permute.xlu1 %7874  ;;  %v7887_v38 = vsel %vm3939_vm7, %v7849_v49, %v7851_v55 }
 0x85d   : > { %10022 = vmatmul.msk.bf16.vlgmr.msra.gmra.mxu0 %vm701_vm1, %v15327_v62  ;;  %v7901_v55 = vsel %vm3939_vm7, %v7879_v17, %v15404_v39 }
 0x85e   : > { %10024 = vmatmul.msk.bf16.vlgmr.msra.gmra.mxu1 %vm701_vm1, %v15327_v62  ;;  %7934 = vmatpush.bf16.msra.mxu0 %v7895_v34 }
 0x85f   : > { %7953 = vmatpush.bf16.msra.mxu1 %v7896_v44  ;;  %v7065_v50 = vpop.f32.mrf.mxu3 }
 0x860   : > { %v15407_v60 = vadd.f32 %v7065_v50, %v15056_v46  ;;  %v7898_v50 = vsel %vm3939_vm7, %v15311_v23, %v7875_v0 }
 0x862   : > { %7935 = vmatpush.bf16.msra.mxu0 %v7886_v29  ;;  %v7084_v58 = vpop.f32.mrf.mxu0 }
 0x863   : > { %7954 = vmatpush.bf16.msra.mxu1 %v7887_v38  ;;  %v7103_v31 = vpop.f32.mrf.mxu1  ;;  %v15412_v16 = vadd.f32 %v7084_v58, %v15215_v24  ;;  %v7127_v20 = vpop.f32.mrf.mxu2 }
 0x864   : > { %v15415_v22 = vadd.f32 %v7103_v31, %v15226_v35  ;;  %10021 = vmatmul.msk.bf16.gmra.mxu3 %vm701_vm1, %v15375_v47  ;;  %v15420_v46 = vadd.f32 %v7127_v20, %v15271_v45  ;;  %v15429_v24 = vpop.permute.xlu0 %7860  ;;  %v7855_v11 = vpop.permute.xlu1 %7854 }
 0x865   : > { %v7892_v26 = vsel %vm3939_vm7, %v7859_v5, %v15429_v24 }
 0x867   : > { %v7068_v56 = vpop.f32.mrf.mxu3 }
 0x868   : > { %v15425_v49 = vadd.f32 %v7068_v56, %v15087_v43  ;;  %10034 = vmatmul.msk.bf16.vlgmr.msrb.gmra.mxu2 %vm701_vm1, %v15327_v62 }
 0x869   : > { %8048 = vmatpush.bf16.msrb.mxu2 %v7901_v55 }
 0x86a   : > { %v7087_v35 = vpop.f32.mrf.mxu0 }
 0x86b   : > { %v7106_v28 = vpop.f32.mrf.mxu1  ;;  %v15432_v51 = vadd.f32 %v7087_v35, %v15241_v42  ;;  %v7329_v59 = vpop.f32.mrf.mxu2 }
 0x86c   : > { %v15435_v45 = vadd.f32 %v7106_v28, %v15249_v61  ;;  %v15438_v43 = vadd.f32 %v7329_v59, %v15294_v10  ;;  %v7877_v38 = vpop.permute.xlu1 %7876  ;;  %v15462_v31 = vpop.permute.xlu0 %7862 }
 0x86d   : > { %10023 = vmatmul.msk.bf16.gmra.mxu0 %vm701_vm1, %v15375_v47  ;;  %8049 = vmatpush.bf16.msrb.mxu2 %v7892_v26  ;;  %v7899_v28 = vsel %vm3939_vm7, %v7875_v0, %v7877_v38 }
 0x86e   : > { %10025 = vmatmul.msk.bf16.gmra.mxu1 %vm701_vm1, %v15375_v47 }
 0x86f   : > { %v7070_v42 = vpop.f32.mrf.mxu3 }
 0x870   : > { %v15447_v18 = vadd.f32 %v7070_v42, %v15121_v13  ;;  %v7857_v13 = vpop.permute.xlu2 %7856 }
 0x872   : > { %v7089_v61 = vpop.f32.mrf.mxu0 }
 0x873   : > { %v7108_v34 = vpop.f32.mrf.mxu1  ;;  %v15450_v44 = vadd.f32 %v7089_v61, %v15264_v19  ;;  %v7331_v29 = vpop.f32.mrf.mxu2 }
 0x874   : > { %v15453_v10 = vadd.f32 %v7108_v34, %v15268_v3  ;;  %10028 = vmatmul.msk.bf16.vlgmr.msrb.gmra.mxu3 %vm701_vm1, %v15327_v62  ;;  %v15460_v58 = vadd.f32 %v7331_v29, %v15320_v41  ;;  %v7889_v3 = vsel %vm3939_vm7, %v15347_v37, %v7855_v11  ;;  %v7883_v0 = vpop.permute.xlu0 %7882 }
 0x875   : > { %7991 = vmatpush.bf16.msrb.mxu3 %v7898_v50 }
 0x877   : > { %v7139_v19 = vpop.f32.mrf.mxu3 }
 0x878   : > { %v15465_v20 = vadd.f32 %v7139_v19, %v15147_v2  ;;  %10035 = vmatmul.msk.bf16.gmra.mxu2 %vm701_vm1, %v15375_v47  ;;  %v7900_v2 = vsel %vm3939_vm7, %v7877_v38, %v7879_v17  ;;  %v15489_v26 = vpop.permute.xlu2 %8174  ;;  %v7890_v17 = vsel %vm3939_vm7, %v7855_v11, %v7857_v13 }
 0x879   : > { %7992 = vmatpush.bf16.msrb.mxu3 %v7889_v3 }
 0x87a   : > { %v7158_v23 = vpop.f32.mrf.mxu0 }
 0x87b   : > { %v7177_v56 = vpop.f32.mrf.mxu1  ;;  %v15472_v41 = vadd.f32 %v7158_v23, %v15283_v21  ;;  %v7334_v35 = vpop.f32.mrf.mxu2 }
 0x87c   : > { %v15475_v55 = vadd.f32 %v7177_v56, %v15291_v36  ;;  %v15480_v59 = vadd.f32 %v7334_v35, %v15345_v27  ;;  %v8173_v21 = vpop.permute.xlu1 %8172  ;;  %v7891_v27 = vsel %vm3939_vm7, %v7857_v13, %v7859_v5  ;;  %v7885_v3 = vpop.permute.xlu0 %7884 }
 0x87d   : > { %10030 = vmatmul.msk.bf16.vlgmr.msrb.gmra.mxu0 %vm701_vm1, %v15327_v62 }
 0x87e   : > { %10032 = vmatmul.msk.bf16.vlgmr.msrb.gmra.mxu1 %vm701_vm1, %v15327_v62  ;;  %8010 = vmatpush.bf16.msrb.mxu0 %v7899_v28 }
 0x87f   : > { %8029 = vmatpush.bf16.msrb.mxu1 %v7900_v2  ;;  %v7141_v37 = vpop.f32.mrf.mxu3 }
 0x880   : > { %v15487_v36 = vadd.f32 %v7141_v37, %v15178_v12  ;;  %v15504_v12 = vld [vmem:[%s16265_s6 + $0x60] sm:$0xff]  ;;  %v15522_v56 = vpop.permute.xlu2 %8154 }
 0x882   : > { %8011 = vmatpush.bf16.msrb.mxu0 %v7890_v17  ;;  %v7160_v42 = vpop.f32.mrf.mxu0 }
 0x883   : > { %8030 = vmatpush.bf16.msrb.mxu1 %v7891_v27  ;;  %v7179_v61 = vpop.f32.mrf.mxu1  ;;  %v15494_v34 = vadd.f32 %v7160_v42, %v15309_v40  ;;  %v7336_v29 = vpop.f32.mrf.mxu2  ;;  %v8200_v40 = vsel %vm4510_vm8, %v8173_v21, %v15489_v26  ;;  %v7902_v27 = vsel %vm3939_vm7, %v15404_v39, %v7883_v0 }
 0x884   : > { %v15497_v50 = vadd.f32 %v7179_v61, %v15317_v52  ;;  %10029 = vmatmul.msk.bf16.gmra.mxu3 %vm701_vm1, %v15375_v47  ;;  %v15507_v11 = vadd.f32 %v7336_v29, %v15366_v4  ;;  %v8153_v52 = vpop.permute.xlu1 %8152  ;;  %v8151_v61 = vpop.permute.xlu0 %8150 }
 0x885   : > { %v8191_v28 = vsel %vm4510_vm8, %v8153_v52, %v15522_v56 }
 0x887   : > { %v7144_v5 = vpop.f32.mrf.mxu3 }
 0x888   : > { %v15512_v38 = vadd.f32 %v7144_v5, %v15205_v15  ;;  %10054 = vmatmul.msk.bf16.vlgmr.msra.gmra.mxu2 %vm701_vm1, %v15504_v12 }
 0x889   : > { %8257 = vmatpush.bf16.msra.mxu2 %v8200_v40 }
 0x88a   : > { %v7163_v13 = vpop.f32.mrf.mxu0 }
 0x88b   : > { %v7182_v19 = vpop.f32.mrf.mxu1  ;;  %v15517_v23 = vadd.f32 %v7163_v13, %v15336_v9  ;;  %v7405_v35 = vpop.f32.mrf.mxu2 }
 0x88c   : > { %v15520_v4 = vadd.f32 %v7182_v19, %v15342_v33  ;;  %v15525_v15 = vadd.f32 %v7405_v35, %v15392_v63 }
 0x88d   : > { %10031 = vmatmul.msk.bf16.gmra.mxu0 %vm701_vm1, %v15375_v47  ;;  %8258 = vmatpush.bf16.msra.mxu2 %v8191_v28 }
 0x88e   : > { %10033 = vmatmul.msk.bf16.gmra.mxu1 %vm701_vm1, %v15375_v47 }
 0x88f   : > { %v7146_v9 = vpop.f32.mrf.mxu3 }
 0x890   : > { %v15534_v33 = vadd.f32 %v7146_v9, %v15234_v7  ;;  %v15549_v7 = vld [vmem:[%s16265_s6 + $0x68] sm:$0xff] }
 0x892   : > { %v7165_v2 = vpop.f32.mrf.mxu0 }
 0x893   : > { %v7184_v37 = vpop.f32.mrf.mxu1  ;;  %v15537_v17 = vadd.f32 %v7165_v2, %v15359_v48  ;;  %v7407_v42 = vpop.f32.mrf.mxu2 }
 0x894   : > { %v15540_v63 = vadd.f32 %v7184_v37, %v15363_v6  ;;  %10036 = vmatmul.msk.bf16.vlgmr.msra.gmra.mxu3 %vm701_vm1, %v15327_v62  ;;  %v15552_v29 = vadd.f32 %v7407_v42, %v15415_v22  ;;  %v7865_v48 = vpop.permute.xlu2 %7864  ;;  %v8171_v6 = vpop.permute.xlu1 %8170  ;;  %v7893_v62 = vsel %vm3939_vm7, %v15429_v24, %v15462_v31 }
 0x895   : > { %8067 = vmatpush.bf16.msra.mxu3 %v7902_v27  ;;  %v8199_v28 = vsel %vm4510_vm8, %v8171_v6, %v8173_v21  ;;  %v8190_v21 = vsel %vm4510_vm8, %v8151_v61, %v8153_v52 }
 0x897   : > { %v7348_v5 = vpop.f32.mrf.mxu3 }
 0x898   : > { %v15555_v40 = vadd.f32 %v7348_v5, %v15255_v30  ;;  %10055 = vmatmul.msk.bf16.gmra.mxu2 %vm701_vm1, %v15549_v7  ;;  %v7903_v30 = vsel %vm3939_vm7, %v7883_v0, %v7885_v3 }
 0x899   : > { %8068 = vmatpush.bf16.msra.mxu3 %v7893_v62 }
 0x89a   : > { %v7367_v39 = vpop.f32.mrf.mxu0 }
 0x89b   : > { %v7386_v13 = vpop.f32.mrf.mxu1  ;;  %v15563_v22 = vadd.f32 %v7367_v39, %v15381_v25  ;;  %v7410_v35 = vpop.f32.mrf.mxu2 }
 0x89c   : > { %v15566_v19 = vadd.f32 %v7386_v13, %v15389_v1  ;;  %v15571_v9 = vadd.f32 %v7410_v35, %v15435_v45  ;;  %v15577_v25 = vpop.permute.xlu0 %8182  ;;  %v8181_v0 = vpop.permute.xlu2 %8180  ;;  %v7894_v45 = vsel %vm3939_vm7, %v15462_v31, %v7865_v48 }
 0x89d   : > { %10050 = vmatmul.msk.bf16.vlgmr.msra.gmra.mxu0 %vm701_vm1, %v15504_v12  ;;  %v8177_v3 = vpop.permute.xlu1 %8176  ;;  %v8204_v52 = vsel %vm4510_vm8, %v8181_v0, %v15577_v25 }
 0x89e   : > { %10052 = vmatmul.msk.bf16.vlgmr.msra.gmra.mxu1 %vm701_vm1, %v15504_v12  ;;  %8086 = vmatpush.bf16.msra.mxu0 %v7903_v30 }
 0x89f   : > { %8238 = vmatpush.bf16.msra.mxu1 %v8199_v28  ;;  %v7350_v1 = vpop.f32.mrf.mxu3 }
 0x8a0   : > { %v15580_v24 = vadd.f32 %v7350_v1, %v15278_v53  ;;  %v8201_v1 = vsel %vm4510_vm8, %v15489_v26, %v8177_v3 }
 0x8a2   : > { %8087 = vmatpush.bf16.msra.mxu0 %v7894_v45  ;;  %v7369_v2 = vpop.f32.mrf.mxu0 }
 0x8a3   : > { %8239 = vmatpush.bf16.msra.mxu1 %v8190_v21  ;;  %v7388_v37 = vpop.f32.mrf.mxu1  ;;  %v15586_v27 = vadd.f32 %v7369_v2, %v15407_v60  ;;  %v7412_v6 = vpop.f32.mrf.mxu2 }
 0x8a4   : > { %v15589_v42 = vadd.f32 %v7388_v37, %v15412_v16  ;;  %10037 = vmatmul.msk.bf16.gmra.mxu3 %vm701_vm1, %v15375_v47  ;;  %v15594_v53 = vadd.f32 %v7412_v6, %v15453_v10  ;;  %v15603_v60 = vpop.permute.xlu0 %8162  ;;  %v8161_v62 = vpop.permute.xlu2 %8160 }
 0x8a5   : > { %v8157_v5 = vpop.permute.xlu1 %8156  ;;  %v8195_v13 = vsel %vm4510_vm8, %v8161_v62, %v15603_v60 }
 0x8a7   : > { %v7353_v31 = vpop.f32.mrf.mxu3 }
 0x8a8   : > { %v15599_v61 = vadd.f32 %v7353_v31, %v15300_v57  ;;  %10062 = vmatmul.msk.bf16.vlgmr.msrb.gmra.mxu2 %vm701_vm1, %v15504_v12 }
 0x8a9   : > { %8333 = vmatpush.bf16.msrb.mxu2 %v8204_v52 }
 0x8aa   : > { %v7372_v16 = vpop.f32.mrf.mxu0 }
 0x8ab   : > { %v7391_v48 = vpop.f32.mrf.mxu1  ;;  %v15606_v47 = vadd.f32 %v7372_v16, %v15425_v49  ;;  %v7481_v39 = vpop.f32.mrf.mxu2 }
 0x8ac   : > { %v15609_v10 = vadd.f32 %v7391_v48, %v15432_v51  ;;  %v15612_v57 = vadd.f32 %v7481_v39, %v15475_v55  ;;  %v15636_v37 = vpop.permute.xlu0 %8184 }
 0x8ad   : > { %10051 = vmatmul.msk.bf16.gmra.mxu0 %vm701_vm1, %v15549_v7  ;;  %8334 = vmatpush.bf16.msrb.mxu2 %v8195_v13  ;;  %v8179_v21 = vpop.permute.xlu1 %8178 }
 0x8ae   : > { %10053 = vmatmul.msk.bf16.gmra.mxu1 %vm701_vm1, %v15549_v7  ;;  %v8202_v48 = vsel %vm4510_vm8, %v8177_v3, %v8179_v21 }
 0x8af   : > { %v7355_v49 = vpop.f32.mrf.mxu3 }
 0x8b0   : > { %v15621_v35 = vadd.f32 %v7355_v49, %v15330_v14  ;;  %v8159_v14 = vpop.permute.xlu2 %8158 }
 0x8b2   : > { %v7374_v51 = vpop.f32.mrf.mxu0 }
 0x8b3   : > { %v7393_v30 = vpop.f32.mrf.mxu1  ;;  %v15624_v28 = vadd.f32 %v7374_v51, %v15447_v18  ;;  %v7483_v45 = vpop.f32.mrf.mxu2 }
 0x8b4   : > { %v15627_v55 = vadd.f32 %v7393_v30, %v15450_v44  ;;  %10056 = vmatmul.msk.bf16.vlgmr.msrb.gmra.mxu3 %vm701_vm1, %v15504_v12  ;;  %v15634_v2 = vadd.f32 %v7483_v45, %v15497_v50  ;;  %v8192_v44 = vsel %vm4510_vm8, %v15522_v56, %v8157_v5  ;;  %v15665_v3 = vpop.permute.xlu0 %8164 }
 0x8b5   : > { %8276 = vmatpush.bf16.msrb.mxu3 %v8201_v1 }
 0x8b7   : > { %v7424_v18 = vpop.f32.mrf.mxu3 }
 0x8b8   : > { %v15639_v6 = vadd.f32 %v7424_v18, %v15350_v54  ;;  %10063 = vmatmul.msk.bf16.gmra.mxu2 %vm701_vm1, %v15549_v7  ;;  %v8203_v54 = vsel %vm4510_vm8, %v8179_v21, %v8181_v0  ;;  %v15663_v13 = vpop.permute.xlu2 %8476  ;;  %v8194_v0 = vsel %vm4510_vm8, %v8159_v14, %v8161_v62 }
 0x8b9   : > { %8277 = vmatpush.bf16.msrb.mxu3 %v8192_v44 }
 0x8ba   : > { %v7443_v26 = vpop.f32.mrf.mxu0 }
 0x8bb   : > { %v7462_v31 = vpop.f32.mrf.mxu1  ;;  %v15646_v50 = vadd.f32 %v7443_v26, %v15465_v20  ;;  %v7486_v16 = vpop.f32.mrf.mxu2 }
 0x8bc   : > { %v15649_v52 = vadd.f32 %v7462_v31, %v15472_v41  ;;  %v15654_v39 = vadd.f32 %v7486_v16, %v15520_v4  ;;  %v8475_v20 = vpop.permute.xlu1 %8474  ;;  %v8193_v4 = vsel %vm4510_vm8, %v8157_v5, %v8159_v14  ;;  %v15680_v5 = vld [vmem:[%s16265_s6 + $0x70] sm:$0xff]  ;;  %v8187_v44 = vpop.permute.xlu0 %8186 }
 0x8bd   : > { %10058 = vmatmul.msk.bf16.vlgmr.msrb.gmra.mxu0 %vm701_vm1, %v15504_v12 }
 0x8be   : > { %10060 = vmatmul.msk.bf16.vlgmr.msrb.gmra.mxu1 %vm701_vm1, %v15504_v12  ;;  %8295 = vmatpush.bf16.msrb.mxu0 %v8202_v48 }
 0x8bf   : > { %8314 = vmatpush.bf16.msrb.mxu1 %v8203_v54  ;;  %v7426_v56 = vpop.f32.mrf.mxu3 }
 0x8c0   : > { %v15661_v41 = vadd.f32 %v7426_v56, %v15378_v32  ;;  %v15698_v31 = vpop.permute.xlu2 %8456 }
 0x8c2   : > { %8296 = vmatpush.bf16.msrb.mxu0 %v8193_v4  ;;  %v7445_v49 = vpop.f32.mrf.mxu0  ;;  %v8205_v4 = vsel %vm4510_vm8, %v15577_v25, %v15636_v37  ;;  %v8196_v25 = vsel %vm4510_vm8, %v15603_v60, %v15665_v3 }
 0x8c3   : > { %8315 = vmatpush.bf16.msrb.mxu1 %v8194_v0  ;;  %v7464_v51 = vpop.f32.mrf.mxu1  ;;  %v15670_v30 = vadd.f32 %v7445_v49, %v15487_v36  ;;  %v7488_v32 = vpop.f32.mrf.mxu2  ;;  %v8503_v36 = vsel %vm5081_vm9, %v8475_v20, %v15663_v13 }
 0x8c4   : > { %v15673_v1 = vadd.f32 %v7464_v51, %v15494_v34  ;;  %10057 = vmatmul.msk.bf16.gmra.mxu3 %vm701_vm1, %v15549_v7  ;;  %v15683_v62 = vadd.f32 %v7488_v32, %v15540_v63  ;;  %v8455_v34 = vpop.permute.xlu1 %8454  ;;  %v8169_v49 = vpop.permute.xlu0 %8168 }
 0x8c5   : > { %v8494_v48 = vsel %vm5081_vm9, %v8455_v34, %v15698_v31 }
 0x8c7   : > { %v7429_v45 = vpop.f32.mrf.mxu3 }
 0x8c8   : > { %v15688_v21 = vadd.f32 %v7429_v45, %v15398_v8  ;;  %10082 = vmatmul.msk.bf16.vlgmr.msra.gmra.mxu2 %vm701_vm1, %v15680_v5 }
 0x8c9   : > { %8542 = vmatpush.bf16.msra.mxu2 %v8503_v36 }
 0x8ca   : > { %v7448_v14 = vpop.f32.mrf.mxu0 }
 0x8cb   : > { %v7467_v18 = vpop.f32.mrf.mxu1  ;;  %v15693_v26 = vadd.f32 %v7448_v14, %v15512_v38  ;;  %v7690_v16 = vpop.f32.mrf.mxu2 }
 0x8cc   : > { %v15696_v63 = vadd.f32 %v7467_v18, %v15517_v23  ;;  %v15701_v8 = vadd.f32 %v7690_v16, %v15566_v19  ;;  %v8189_v51 = vpop.permute.xlu1 %8188 }
 0x8cd   : > { %10059 = vmatmul.msk.bf16.gmra.mxu0 %vm701_vm1, %v15549_v7  ;;  %8543 = vmatpush.bf16.msra.mxu2 %v8494_v48  ;;  %v8207_v16 = vsel %vm4510_vm8, %v8187_v44, %v8189_v51 }
 0x8ce   : > { %10061 = vmatmul.msk.bf16.gmra.mxu1 %vm701_vm1, %v15549_v7 }
 0x8cf   : > { %v7431_v38 = vpop.f32.mrf.mxu3 }
 0x8d0   : > { %v15710_v23 = vadd.f32 %v7431_v38, %v15420_v46  ;;  %v15726_v46 = vld [vmem:[%s16265_s6 + $0x78] sm:$0xff] }
 0x8d2   : > { %v7450_v54 = vpop.f32.mrf.mxu0 }
 0x8d3   : > { %v7469_v20 = vpop.f32.mrf.mxu1  ;;  %v15713_v56 = vadd.f32 %v7450_v54, %v15534_v33  ;;  %v7692_v0 = vpop.f32.mrf.mxu2 }
 0x8d4   : > { %v15716_v19 = vadd.f32 %v7469_v20, %v15537_v17  ;;  %10064 = vmatmul.msk.bf16.vlgmr.msra.gmra.mxu3 %vm701_vm1, %v15504_v12  ;;  %v15729_v33 = vadd.f32 %v7692_v0, %v15589_v42  ;;  %v8167_v17 = vpop.permute.xlu2 %8166  ;;  %v8479_v38 = vpop.permute.xlu1 %8478 }
 0x8d5   : > { %8352 = vmatpush.bf16.msra.mxu3 %v8205_v4 }
 0x8d7   : > { %v7633_v32 = vpop.f32.mrf.mxu3 }
 0x8d8   : > { %v15732_v45 = vadd.f32 %v7633_v32, %v15438_v43  ;;  %10083 = vmatmul.msk.bf16.gmra.mxu2 %vm701_vm1, %v15726_v46  ;;  %v8206_v43 = vsel %vm4510_vm8, %v15636_v37, %v8187_v44  ;;  %v8198_v44 = vsel %vm4510_vm8, %v8167_v17, %v8169_v49 }
 0x8d9   : > { %8353 = vmatpush.bf16.msra.mxu3 %v8196_v25 }
 0x8da   : > { %v7652_v36 = vpop.f32.mrf.mxu0 }
 0x8db   : > { %v7671_v34 = vpop.f32.mrf.mxu1  ;;  %v15740_v42 = vadd.f32 %v7652_v36, %v15555_v40  ;;  %v7695_v18 = vpop.f32.mrf.mxu2 }
 0x8dc   : > { %v15743_v14 = vadd.f32 %v7671_v34, %v15563_v22  ;;  %v15749_v48 = vadd.f32 %v7695_v18, %v15609_v10  ;;  %v15755_v40 = vpop.permute.xlu0 %8484  ;;  %v8483_v37 = vpop.permute.xlu2 %8482  ;;  %v8197_v10 = vsel %vm4510_vm8, %v15665_v3, %v8167_v17 }
 0x8dd   : > { %10066 = vmatmul.msk.bf16.vlgmr.msra.gmra.mxu0 %vm701_vm1, %v15504_v12  ;;  %v8507_v49 = vsel %vm5081_vm9, %v8483_v37, %v15755_v40  ;;  %v8459_v32 = vpop.permute.xlu1 %8458 }
 0x8de   : > { %10080 = vmatmul.msk.bf16.vlgmr.msra.gmra.mxu1 %vm701_vm1, %v15680_v5  ;;  %8371 = vmatpush.bf16.msra.mxu0 %v8206_v43 }
 0x8df   : > { %8390 = vmatpush.bf16.msra.mxu1 %v8207_v16  ;;  %v7635_v22 = vpop.f32.mrf.mxu3 }
 0x8e0   : > { %v15758_v60 = vadd.f32 %v7635_v22, %v15460_v58 }
 0x8e2   : > { %8372 = vmatpush.bf16.msra.mxu0 %v8197_v10  ;;  %v7654_v12 = vpop.f32.mrf.mxu0 }
 0x8e3   : > { %8391 = vmatpush.bf16.msra.mxu1 %v8198_v44  ;;  %v7673_v54 = vpop.f32.mrf.mxu1  ;;  %v15764_v20 = vadd.f32 %v7654_v12, %v15580_v24  ;;  %v7697_v0 = vpop.f32.mrf.mxu2 }
 0x8e4   : > { %v15767_v4 = vadd.f32 %v7673_v54, %v15586_v27  ;;  %10065 = vmatmul.msk.bf16.gmra.mxu3 %vm701_vm1, %v15549_v7  ;;  %v15772_v58 = vadd.f32 %v7697_v0, %v15627_v55  ;;  %v15781_v24 = vpop.permute.xlu0 %8464  ;;  %v8463_v36 = vpop.permute.xlu2 %8462 }
 0x8e5   : > { %v8498_v18 = vsel %vm5081_vm9, %v8463_v36, %v15781_v24  ;;  %v8481_v44 = vpop.permute.xlu1 %8480 }
 0x8e7   : > { %v7638_v3 = vpop.f32.mrf.mxu3 }
 0x8e8   : > { %v15777_v17 = vadd.f32 %v7638_v3, %v15480_v59  ;;  %10090 = vmatmul.msk.bf16.vlgmr.msrb.gmra.mxu2 %vm701_vm1, %v15680_v5 }
 0x8e9   : > { %8618 = vmatpush.bf16.msrb.mxu2 %v8507_v49 }
 0x8ea   : > { %v7657_v27 = vpop.f32.mrf.mxu0 }
 0x8eb   : > { %v7676_v51 = vpop.f32.mrf.mxu1  ;;  %v15784_v25 = vadd.f32 %v7657_v27, %v15599_v61  ;;  %v7766_v34 = vpop.f32.mrf.mxu2  ;;  %v8505_v27 = vsel %vm5081_vm9, %v8479_v38, %v8481_v44 }
 0x8ec   : > { %v15787_v55 = vadd.f32 %v7676_v51, %v15606_v47  ;;  %v15790_v59 = vadd.f32 %v7766_v34, %v15649_v52 }
 0x8ed   : > { %10067 = vmatmul.msk.bf16.gmra.mxu0 %vm701_vm1, %v15549_v7  ;;  %8619 = vmatpush.bf16.msrb.mxu2 %v8498_v18  ;;  %v8504_v7 = vsel %vm5081_vm9, %v15663_v13, %v8479_v38 }
 0x8ee   : > { %10081 = vmatmul.msk.bf16.gmra.mxu1 %vm701_vm1, %v15726_v46 }
 0x8ef   : > { %v7640_v61 = vpop.f32.mrf.mxu3 }
 0x8f0   : > { %v15799_v43 = vadd.f32 %v7640_v61, %v15507_v11  ;;  %v8461_v11 = vpop.permute.xlu2 %8460 }
 0x8f1   : > { %v8496_v38 = vsel %vm5081_vm9, %v8459_v32, %v8461_v11 }
 0x8f2   : > { %v7659_v47 = vpop.f32.mrf.mxu0 }
 0x8f3   : > { %v7678_v16 = vpop.f32.mrf.mxu1  ;;  %v15802_v22 = vadd.f32 %v7659_v47, %v15621_v35  ;;  %v7768_v10 = vpop.f32.mrf.mxu2 }
 0x8f4   : > { %v15805_v52 = vadd.f32 %v7678_v16, %v15624_v28  ;;  %10084 = vmatmul.msk.bf16.vlgmr.msrb.gmra.mxu3 %vm701_vm1, %v15680_v5  ;;  %v15812_v12 = vadd.f32 %v7768_v10, %v15673_v1  ;;  %v8495_v28 = vsel %vm5081_vm9, %v15698_v31, %v8459_v32  ;;  %v8487_v32 = vpop.permute.xlu0 %8486 }
 0x8f5   : > { %8561 = vmatpush.bf16.msrb.mxu3 %v8504_v7 }
 0x8f7   : > { %v7709_v54 = vpop.f32.mrf.mxu3 }
 0x8f8   : > { %v15815_v35 = vadd.f32 %v7709_v54, %v15525_v15  ;;  %10091 = vmatmul.msk.bf16.gmra.mxu2 %vm701_vm1, %v15726_v46  ;;  %v8506_v15 = vsel %vm5081_vm9, %v8481_v44, %v8483_v37  ;;  %v8493_v34 = vpop.permute.xlu2 %8492  ;;  %v8497_v37 = vsel %vm5081_vm9, %v8461_v11, %v8463_v36 }
 0x8f9   : > { %8562 = vmatpush.bf16.msrb.mxu3 %v8495_v28 }
 0x8fa   : > { %v7728_v13 = vpop.f32.mrf.mxu0 }
 0x8fb   : > { %v7747_v0 = vpop.f32.mrf.mxu1  ;;  %v15822_v3 = vadd.f32 %v7728_v13, %v15639_v6  ;;  %v7771_v49 = vpop.f32.mrf.mxu2 }
 0x8fc   : > { %v15825_v1 = vadd.f32 %v7747_v0, %v15646_v50  ;;  %v15830_v51 = vadd.f32 %v7771_v49, %v15696_v63  ;;  %v8491_v6 = vpop.permute.xlu1 %8490  ;;  %v8467_v49 = vpop.permute.xlu0 %8466 }
 0x8fd   : > { %10086 = vmatmul.msk.bf16.vlgmr.msrb.gmra.mxu0 %vm701_vm1, %v15680_v5 }
 0x8fe   : > { %10088 = vmatmul.msk.bf16.vlgmr.msrb.gmra.mxu1 %vm701_vm1, %v15680_v5  ;;  %8580 = vmatpush.bf16.msrb.mxu0 %v8505_v27 }
 0x8ff   : > { %8599 = vmatpush.bf16.msrb.mxu1 %v8506_v15  ;;  %v7711_v31 = vpop.f32.mrf.mxu3 }
 0x900   : > { %v15837_v50 = vadd.f32 %v7711_v31, %v15552_v29  ;;  %v15852_v29 = vld [vmem:[%s16265_s6 + $0x80] sm:$0xff] }
 0x902   : > { %8581 = vmatpush.bf16.msrb.mxu0 %v8496_v38  ;;  %v7730_v63 = vpop.f32.mrf.mxu0 }
 0x903   : > { %8600 = vmatpush.bf16.msrb.mxu1 %v8497_v37  ;;  %v7749_v18 = vpop.f32.mrf.mxu1  ;;  %v15842_v61 = vadd.f32 %v7730_v63, %v15661_v41  ;;  %v7773_v16 = vpop.f32.mrf.mxu2  ;;  %v8511_v41 = vsel %vm5081_vm9, %v8491_v6, %v8493_v34  ;;  %v8508_v34 = vsel %vm5081_vm9, %v15755_v40, %v8487_v32  ;;  %v8499_v40 = vsel %vm5081_vm9, %v15781_v24, %v8467_v49 }
 0x904   : > { %v15845_v47 = vadd.f32 %v7749_v18, %v15670_v30  ;;  %10085 = vmatmul.msk.bf16.gmra.mxu3 %vm701_vm1, %v15726_v46  ;;  %v15855_v36 = vadd.f32 %v7773_v16, %v15716_v19  ;;  %v8471_v30 = vpop.permute.xlu1 %8470  ;;  %v8473_v19 = vpop.permute.xlu2 %8472 }
 0x905   : > { %v8489_v63 = vpop.permute.xlu0 %8488 }
 0x907   : > { %v7714_v7 = vpop.f32.mrf.mxu3 }
 0x908   : > { %v15859_v10 = vadd.f32 %v7714_v7, %v15571_v9  ;;  %10110 = vmatmul.msk.bf16.vlgmr.msra.gmra.mxu2 %vm701_vm1, %v15852_v29  ;;  %v8502_v9 = vsel %vm5081_vm9, %v8471_v30, %v8473_v19 }
 0x909   : > { %8694 = vmatpush.bf16.msra.mxu2 %v8511_v41 }
 0x90a   : > { %v7733_v44 = vpop.f32.mrf.mxu0 }
 0x90b   : > { %v7752_v11 = vpop.f32.mrf.mxu1  ;;  %v15864_v54 = vadd.f32 %v7733_v44, %v15688_v21  ;;  %v7975_v13 = vpop.f32.mrf.mxu2  ;;  %v8510_v44 = vsel %vm5081_vm9, %v8489_v63, %v8491_v6 }
 0x90c   : > { %v15867_v28 = vadd.f32 %v7752_v11, %v15693_v26  ;;  %v15870_v0 = vadd.f32 %v7975_v13, %v15743_v14  ;;  %v8469_v24 = vpop.permute.xlu1 %8468 }
 0x90d   : > { %10087 = vmatmul.msk.bf16.gmra.mxu0 %vm701_vm1, %v15726_v46  ;;  %8695 = vmatpush.bf16.msra.mxu2 %v8502_v9  ;;  %v8501_v6 = vsel %vm5081_vm9, %v8469_v24, %v8471_v30 }
 0x90e   : > { %10089 = vmatmul.msk.bf16.gmra.mxu1 %vm701_vm1, %v15726_v46 }
 0x90f   : > { %v7716_v21 = vpop.f32.mrf.mxu3 }
 0x910   : > { %v15878_v27 = vadd.f32 %v7716_v21, %v15594_v53  ;;  %v15893_v53 = vld [vmem:[%s16265_s6 + $0x88] sm:$0xff] }
 0x912   : > { %v7735_v26 = vpop.f32.mrf.mxu0 }
 0x913   : > { %v7754_v15 = vpop.f32.mrf.mxu1  ;;  %v15881_v31 = vadd.f32 %v7735_v26, %v15710_v23  ;;  %v7977_v38 = vpop.f32.mrf.mxu2 }
 0x914   : > { %v15884_v14 = vadd.f32 %v7754_v15, %v15713_v56  ;;  %10092 = vmatmul.msk.bf16.vlgmr.msra.gmra.mxu3 %vm701_vm1, %v15680_v5  ;;  %v15896_v37 = vadd.f32 %v7977_v38, %v15767_v4 }
 0x915   : > { %8637 = vmatpush.bf16.msra.mxu3 %v8508_v34 }
 0x917   : > { %v7785_v23 = vpop.f32.mrf.mxu3 }
 0x918   : > { %v15899_v56 = vadd.f32 %v7785_v23, %v15612_v57  ;;  %10111 = vmatmul.msk.bf16.gmra.mxu2 %vm701_vm1, %v15893_v53  ;;  %v8509_v57 = vsel %vm5081_vm9, %v8487_v32, %v8489_v63  ;;  %v8500_v32 = vsel %vm5081_vm9, %v8467_v49, %v8469_v24 }
 0x919   : > { %8638 = vmatpush.bf16.msra.mxu3 %v8499_v40 }
 0x91a   : > { %v7937_v18 = vpop.f32.mrf.mxu0 }
 0x91b   : > { %v7956_v16 = vpop.f32.mrf.mxu1  ;;  %v15906_v7 = vadd.f32 %v7937_v18, %v15732_v45  ;;  %v7980_v41 = vpop.f32.mrf.mxu2 }
 0x91c   : > { %v15909_v4 = vadd.f32 %v7956_v16, %v15740_v42  ;;  %v15914_v11 = vadd.f32 %v7980_v41, %v15787_v55 }
 0x91d   : > { %10094 = vmatmul.msk.bf16.vlgmr.msra.gmra.mxu0 %vm701_vm1, %v15680_v5 }
 0x91e   : > { %10096 = vmatmul.msk.bf16.vlgmr.msra.gmra.mxu1 %vm701_vm1, %v15680_v5  ;;  %8656 = vmatpush.bf16.msra.mxu0 %v8509_v57 }
 0x91f   : > { %8675 = vmatpush.bf16.msra.mxu1 %v8510_v44  ;;  %v7787_v45 = vpop.f32.mrf.mxu3 }
 0x920   : > { %v15921_v42 = vadd.f32 %v7787_v45, %v15634_v2 }
 0x922   : > { %8657 = vmatpush.bf16.msra.mxu0 %v8500_v32  ;;  %v7939_v55 = vpop.f32.mrf.mxu0 }
 0x923   : > { %8676 = vmatpush.bf16.msra.mxu1 %v8501_v6  ;;  %v7958_v19 = vpop.f32.mrf.mxu1  ;;  %v15926_v13 = vadd.f32 %v7939_v55, %v15758_v60  ;;  %v7982_v9 = vpop.f32.mrf.mxu2 }
 0x924   : > { %v15929_v5 = vadd.f32 %v7958_v19, %v15764_v20  ;;  %10093 = vmatmul.msk.bf16.gmra.mxu3 %vm701_vm1, %v15726_v46  ;;  %v15934_v2 = vadd.f32 %v7982_v9, %v15805_v52 }
 0x927   : > { %v7790_v49 = vpop.f32.mrf.mxu3 }
 0x928   : > { %v15937_v30 = vadd.f32 %v7790_v49, %v15654_v39  ;;  %10118 = vmatmul.msk.bf16.vlgmr.msrb.gmra.mxu2 %vm701_vm1, %v15852_v29 }
 0x92a   : > { %v7942_v21 = vpop.f32.mrf.mxu0 }
 0x92b   : > { %v7961_v60 = vpop.f32.mrf.mxu1  ;;  %v15942_v26 = vadd.f32 %v7942_v21, %v15777_v17  ;;  %v8051_v15 = vpop.f32.mrf.mxu2 }
 0x92c   : > { %v8118_v20 = vadd.f32 %v7961_v60, %v15784_v25  ;;  %v15946_v34 = vadd.f32 %v8051_v15, %v15825_v1 }
 0x92d   : > { %10095 = vmatmul.msk.bf16.gmra.mxu0 %vm701_vm1, %v15726_v46 }
 0x92e   : > { %10097 = vmatmul.msk.bf16.gmra.mxu1 %vm701_vm1, %v15726_v46 }
 0x92f   : > { %v7792_v39 = vpop.f32.mrf.mxu3 }
 0x930   : > { %v15953_v52 = vadd.f32 %v7792_v39, %v15683_v62 }
 0x932   : > { %v7944_v38 = vpop.f32.mrf.mxu0 }
 0x933   : > { %v7963_v23 = vpop.f32.mrf.mxu1  ;;  %v15956_v17 = vadd.f32 %v7944_v38, %v15799_v43  ;;  %v8053_v40 = vpop.f32.mrf.mxu2 }
 0x934   : > { %v8127_v25 = vadd.f32 %v7963_v23, %v15802_v22  ;;  %10112 = vmatmul.msk.bf16.vlgmr.msrb.gmra.mxu3 %vm701_vm1, %v15852_v29  ;;  %v15962_v1 = vadd.f32 %v8053_v40, %v15845_v47 }
 0x937   : > { %v7994_v63 = vpop.f32.mrf.mxu3 }
 0x938   : > { %v15965_v46 = vadd.f32 %v7994_v63, %v15701_v8  ;;  %10119 = vmatmul.msk.bf16.gmra.mxu2 %vm701_vm1, %v15893_v53 }
 0x93a   : > { %v8013_v62 = vpop.f32.mrf.mxu0 }
 0x93b   : > { %v8032_v18 = vpop.f32.mrf.mxu1  ;;  %v15970_v43 = vadd.f32 %v8013_v62, %v15815_v35  ;;  %v8056_v16 = vpop.f32.mrf.mxu2 }
 0x93c   : > { %v8104_v22 = vadd.f32 %v8032_v18, %v15822_v3  ;;  %v15974_v41 = vadd.f32 %v8056_v16, %v15867_v28 }
 0x93d   : > { %10114 = vmatmul.msk.bf16.vlgmr.msrb.gmra.mxu0 %vm701_vm1, %v15852_v29 }
 0x93e   : > { %10116 = vmatmul.msk.bf16.vlgmr.msrb.gmra.mxu1 %vm701_vm1, %v15852_v29 }
 0x93f   : > { %v7996_v8 = vpop.f32.mrf.mxu3 }
 0x940   : > { %v15981_v47 = vadd.f32 %v7996_v8, %v15729_v33 }
 0x942   : > { %v8015_v57 = vpop.f32.mrf.mxu0 }
 0x943   : > { %v8034_v44 = vpop.f32.mrf.mxu1  ;;  %v15984_v35 = vadd.f32 %v8015_v57, %v15837_v50  ;;  %v8058_v24 = vpop.f32.mrf.mxu2 }
 0x944   : > { %v8113_v3 = vadd.f32 %v8034_v44, %v15842_v61  ;;  %10113 = vmatmul.msk.bf16.gmra.mxu3 %vm701_vm1, %v15893_v53  ;;  %v15990_v28 = vadd.f32 %v8058_v24, %v15884_v14 }
 0x947   : > { %v7999_v45 = vpop.f32.mrf.mxu3 }
 0x948   : > { %v15993_v32 = vadd.f32 %v7999_v45, %v15749_v48  ;;  %10126 = vmatmul.msk.bf16.vlgmr.msra.gmra.mxu2 %vm701_vm1, %v15852_v29 }
 0x94a   : > { %v8018_v33 = vpop.f32.mrf.mxu0 }
 0x94b   : > { %v8037_v6 = vpop.f32.mrf.mxu1  ;;  %v15998_v50 = vadd.f32 %v8018_v33, %v15859_v10  ;;  %v8260_v55 = vpop.f32.mrf.mxu2 }
 0x94c   : > { %v8122_v61 = vadd.f32 %v8037_v6, %v15864_v54  ;;  %v16002_v19 = vadd.f32 %v8260_v55, %v15909_v4 }
 0x94d   : > { %10115 = vmatmul.msk.bf16.gmra.mxu0 %vm701_vm1, %v15893_v53 }
 0x94e   : > { %10117 = vmatmul.msk.bf16.gmra.mxu1 %vm701_vm1, %v15893_v53 }
 0x94f   : > { %v8001_v48 = vpop.f32.mrf.mxu3 }
 0x950   : > { %v16009_v14 = vadd.f32 %v8001_v48, %v15772_v58 }
 0x952   : > { %v8020_v9 = vpop.f32.mrf.mxu0 }
 0x953   : > { %v8039_v49 = vpop.f32.mrf.mxu1  ;;  %v16012_v10 = vadd.f32 %v8020_v9, %v15878_v27  ;;  %v8262_v21 = vpop.f32.mrf.mxu2 }
 0x954   : > { %v8131_v54 = vadd.f32 %v8039_v49, %v15881_v31  ;;  %10120 = vmatmul.msk.bf16.vlgmr.msra.gmra.mxu3 %vm701_vm1, %v15852_v29  ;;  %v16018_v4 = vadd.f32 %v8262_v21, %v15929_v5 }
 0x957   : > { %v8070_v60 = vpop.f32.mrf.mxu3 }
 0x958   : > { %v16021_v15 = vadd.f32 %v8070_v60, %v15790_v59  ;;  %10127 = vmatmul.msk.bf16.gmra.mxu2 %vm701_vm1, %v15893_v53 }
 0x95a   : > { %v8089_v58 = vpop.f32.mrf.mxu0 }
 0x95b   : > { %v8241_v39 = vpop.f32.mrf.mxu1  ;;  %v16026_v27 = vadd.f32 %v8089_v58, %v15899_v56  ;;  %v8265_v31 = vpop.f32.mrf.mxu2 }
 0x95c   : > { %v16028_v38 = vadd.f32 %v8265_v31, %v8118_v20 }
 0x95d   : > { %10122 = vmatmul.msk.bf16.vlgmr.msra.gmra.mxu0 %vm701_vm1, %v15852_v29 }
 0x95e   : > { %10124 = vmatmul.msk.bf16.vlgmr.msra.gmra.mxu1 %vm701_vm1, %v15852_v29 }
 0x95f   : > { %v8072_v5 = vpop.f32.mrf.mxu3 }
 0x960   : > { %v16035_v59 = vadd.f32 %v8072_v5, %v15812_v12 }
 0x962   : > { %v8091_v23 = vpop.f32.mrf.mxu0 }
 0x963   : > { %v8243_v40 = vpop.f32.mrf.mxu1  ;;  %v16038_v63 = vadd.f32 %v8091_v23, %v15921_v42  ;;  %v8267_v56 = vpop.f32.mrf.mxu2 }
 0x964   : > { %10121 = vmatmul.msk.bf16.gmra.mxu3 %vm701_vm1, %v15893_v53  ;;  %v16042_v20 = vadd.f32 %v8267_v56, %v8127_v25  ;;  %v16087_v23 = vpop.permute.xlu2 %8749 }
 0x967   : > { %v8075_v62 = vpop.f32.mrf.mxu3 }
 0x968   : > { %v16045_v18 = vadd.f32 %v8075_v62, %v15830_v51 }
 0x96a   : > { %v8094_v29 = vpop.f32.mrf.mxu0 }
 0x96b   : > { %v8246_v16 = vpop.f32.mrf.mxu1  ;;  %v16048_v12 = vadd.f32 %v8094_v29, %v15937_v30  ;;  %v8336_v8 = vpop.f32.mrf.mxu2  ;;  %v8412_v29 = vadd.f32 %v8243_v40, %v15926_v13 }
 0x96c   : > { %v16050_v57 = vadd.f32 %v8336_v8, %v8104_v22 }
 0x96d   : > { %10123 = vmatmul.msk.bf16.gmra.mxu0 %vm701_vm1, %v15893_v53 }
 0x96e   : > { %10125 = vmatmul.msk.bf16.gmra.mxu1 %vm701_vm1, %v15893_v53 }
 0x96f   : > { %v8077_v42 = vpop.f32.mrf.mxu3 }
 0x970   : > { %v16057_v25 = vadd.f32 %v8077_v42, %v15855_v36 }
 0x972   : > { %v8096_v51 = vpop.f32.mrf.mxu0 }
 0x973   : > { %v8248_v44 = vpop.f32.mrf.mxu1  ;;  %v16060_v24 = vadd.f32 %v8096_v51, %v15953_v52  ;;  %v8338_v30 = vpop.f32.mrf.mxu2 }
 0x974   : > { %v16062_v45 = vadd.f32 %v8338_v30, %v8113_v3  ;;  %v16104_v51 = vpop.permute.xlu0 %8754 }
 0x977   : > { %v8279_v22 = vpop.f32.mrf.mxu3 }
 0x978   : > { %v16065_v33 = vadd.f32 %v8279_v22, %v15870_v0 }
 0x97a   : > { %v16067_v6 = vpop.f32.mrf.mxu0 }
 0x97b   : > { %v8317_v53 = vpop.f32.mrf.mxu1  ;;  %v8341_v55 = vpop.f32.mrf.mxu2 }
 0x97c   : > { %v16069_v48 = vadd.f32 %v8341_v55, %v8122_v61  ;;  %v8403_v61 = vadd.f32 %v8241_v39, %v15906_v7 }
 0x97f   : > { %v8281_v36 = vpop.f32.mrf.mxu3 }
 0x980   : > { %v16072_v9 = vadd.f32 %v8281_v36, %v15896_v37 }
 0x982   : > { %v16074_v52 = vpop.f32.mrf.mxu0 }
 0x983   : > { %v8319_v49 = vpop.f32.mrf.mxu1  ;;  %v8343_v3 = vpop.f32.mrf.mxu2 }
 0x984   : > { %v16076_v21 = vadd.f32 %v8343_v3, %v8131_v54 }
 0x987   : > { %v8284_v60 = vpop.f32.mrf.mxu3 }
 0x988   : > { %v16079_v0 = vadd.f32 %v8284_v60, %v15914_v11  ;;  %v8421_v60 = vadd.f32 %v8246_v16, %v15942_v26 }
 0x98a   : > { %v16081_v58 = vpop.f32.mrf.mxu0 }
 0x98b   : > { %v16083_v31 = vpop.f32.mrf.mxu1  ;;  %v8545_v5 = vpop.f32.mrf.mxu2 }
 0x98c   : > { %v8707_v37 = vadd.f32 %v8545_v5, %v8403_v61  ;;  %v16116_v61 = vpop.permute.xlu1 %8759 }
 0x98e   : > { %v8767_v56 = vadd.f32 %v16087_v23, %v8707_v37 }
 0x98f   : > { %v8286_v62 = vpop.f32.mrf.mxu3 }
 0x990   : > { %v16096_v11 = vadd.f32 %v8286_v62, %v15934_v2  ;;  %v8803_v54 = vmax.f32 %v8767_v56, 0.0 }
 0x992   : > { %v16098_v7 = vpop.f32.mrf.mxu0  ;;  %8839 = vst [vmem:[%s16093_s30] sm:$0xff] %v8803_v54 }
 0x993   : > { %v16100_v39 = vpop.f32.mrf.mxu1  ;;  %v8547_v8 = vpop.f32.mrf.mxu2 }
 0x994   : > { %v8716_v42 = vadd.f32 %v8547_v8, %v8412_v29  ;;  %v8430_v29 = vadd.f32 %v8248_v44, %v15956_v17  ;;  %v16128_v8 = vpop.permute.xlu2 %8764 }
 0x996   : > { %v8776_v30 = vadd.f32 %v16104_v51, %v8716_v42 }
 0x997   : > { %v8355_v22 = vpop.f32.mrf.mxu3 }
 0x998   : > { %v16108_v55 = vadd.f32 %v8355_v22, %v15946_v34  ;;  %v8812_v2 = vmax.f32 %v8776_v30, 0.0 }
 0x99a   : > { %v16110_v36 = vpop.f32.mrf.mxu0  ;;  %8848 = vst [vmem:[%s16093_s30 + $0x48] sm:$0xff] %v8812_v2 }
 0x99b   : > { %v16112_v3 = vpop.f32.mrf.mxu1  ;;  %v8550_v13 = vpop.f32.mrf.mxu2 }
 0x99c   : > { %v8725_v40 = vadd.f32 %v8550_v13, %v8421_v60  ;;  %v8407_v13 = vadd.f32 %v8317_v53, %v15970_v43 }
 0x99e   : > { %v8785_v5 = vadd.f32 %v16116_v61, %v8725_v40 }
 0x99f   : > { %v8357_v37 = vpop.f32.mrf.mxu3 }
 0x9a0   : > { %v16120_v56 = vadd.f32 %v8357_v37, %v15962_v1  ;;  %v8821_v34 = vmax.f32 %v8785_v5, 0.0 }
 0x9a2   : > { %v16122_v62 = vpop.f32.mrf.mxu0  ;;  %8857 = vst [vmem:[%s16093_s30 + $0x90] sm:$0xff] %v8821_v34 }
 0x9a3   : > { %v16124_v54 = vpop.f32.mrf.mxu1  ;;  %v8552_v26 = vpop.f32.mrf.mxu2 }
 0x9a4   : > { %v8734_v16 = vadd.f32 %v8552_v26, %v8430_v29  ;;  %v8416_v26 = vadd.f32 %v8319_v49, %v15984_v35  ;;  %v8425_v35 = vadd.f32 %v16083_v31, %v15998_v50 }
 0x9a6   : > { %v8794_v42 = vadd.f32 %v16128_v8, %v8734_v16 }
 0x9a7   : > { %v8360_v30 = vpop.f32.mrf.mxu3 }
 0x9a8   : > { %v16132_v1 = vadd.f32 %v8360_v30, %v15974_v41  ;;  %v8830_v22 = vmax.f32 %v8794_v42, 0.0 }
 0x9aa   : > { %v16134_v2 = vpop.f32.mrf.mxu0  ;;  %8866 = vst [vmem:[%s16093_s30 + $0xd8] sm:$0xff] %v8830_v22 }
 0x9ab   : > { %v16136_v60 = vpop.f32.mrf.mxu1  ;;  %v8621_v17 = vpop.f32.mrf.mxu2 }
 0x9ac   : > { %v8711_v44 = vadd.f32 %v8621_v17, %v8407_v13 }
 0x9ae   : > { %v8771_v40 = vadd.f32 %v16087_v23, %v8711_v44 }
 0x9af   : > { %v8362_v5 = vpop.f32.mrf.mxu3 }
 0x9b0   : > { %v16142_v37 = vadd.f32 %v8362_v5, %v15990_v28  ;;  %v8807_v34 = vmax.f32 %v8771_v40, 0.0  ;;  %v8406_v28 = vadd.f32 %v16067_v6, %v15965_v46 }
 0x9b2   : > { %v16144_v41 = vpop.f32.mrf.mxu0  ;;  %8843 = vst [vmem:[%s16093_s30 + $0x20] sm:$0xff] %v8807_v34 }
 0x9b3   : > { %v16146_v29 = vpop.f32.mrf.mxu1  ;;  %v8623_v16 = vpop.f32.mrf.mxu2 }
 0x9b4   : > { %v8720_v43 = vadd.f32 %v8623_v16, %v8416_v26 }
 0x9b6   : > { %v8780_v53 = vadd.f32 %v16104_v51, %v8720_v43 }
 0x9b7   : > { %v8564_v42 = vpop.f32.mrf.mxu3 }
 0x9b8   : > { %v8708_v30 = vadd.f32 %v8564_v42, %v16002_v19  ;;  %v8816_v22 = vmax.f32 %v8780_v53, 0.0 }
 0x9ba   : > { %v8768_v13 = vadd.f32 %v16087_v23, %v8708_v30  ;;  %v8583_v17 = vpop.f32.mrf.mxu0  ;;  %8852 = vst [vmem:[%s16093_s30 + $0x68] sm:$0xff] %v8816_v22  ;;  %v8434_v22 = vadd.f32 %v16100_v39, %v16012_v10 }
 0x9bb   : > { %v8602_v44 = vpop.f32.mrf.mxu1  ;;  %v8709_v49 = vadd.f32 %v8583_v17, %v16065_v33  ;;  %v8626_v34 = vpop.f32.mrf.mxu2  ;;  %v8415_v33 = vadd.f32 %v16074_v52, %v15981_v47 }
 0x9bc   : > { %v8710_v40 = vadd.f32 %v8602_v44, %v8406_v28  ;;  %v8804_v5 = vmax.f32 %v8768_v13, 0.0  ;;  %v8729_v6 = vadd.f32 %v8626_v34, %v8425_v35 }
 0x9bd   : > { %v8769_v19 = vadd.f32 %v16087_v23, %v8709_v49 }
 0x9be   : > { %v8770_v46 = vadd.f32 %v16087_v23, %v8710_v40  ;;  %8840 = vst [vmem:[%s16093_s30 + $0x8] sm:$0xff] %v8804_v5  ;;  %v8789_v43 = vadd.f32 %v16116_v61, %v8729_v6 }
 0x9bf   : > { %v8805_v26 = vmax.f32 %v8769_v19, 0.0  ;;  %v8566_v50 = vpop.f32.mrf.mxu3 }
 0x9c0   : > { %v8806_v16 = vmax.f32 %v8770_v46, 0.0  ;;  %v8717_v31 = vadd.f32 %v8566_v50, %v16018_v4  ;;  %v8825_v53 = vmax.f32 %v8789_v43, 0.0 }
 0x9c1   : > { %8841 = vst [vmem:[%s16093_s30 + $0x10] sm:$0xff] %v8805_v26  ;;  %v8411_v26 = vadd.f32 %v16112_v3, %v16026_v27 }
 0x9c2   : > { %8842 = vst [vmem:[%s16093_s30 + $0x18] sm:$0xff] %v8806_v16  ;;  %v8777_v42 = vadd.f32 %v16104_v51, %v8717_v31  ;;  %v8585_v30 = vpop.f32.mrf.mxu0 }
 0x9c3   : > { %v8604_v28 = vpop.f32.mrf.mxu1  ;;  %8861 = vst [vmem:[%s16093_s30 + $0xb0] sm:$0xff] %v8825_v53  ;;  %v8718_v13 = vadd.f32 %v8585_v30, %v16072_v9  ;;  %v8628_v44 = vpop.f32.mrf.mxu2  ;;  %v8424_v9 = vadd.f32 %v16081_v58, %v15993_v32 }
 0x9c4   : > { %v8719_v4 = vadd.f32 %v8604_v28, %v8415_v33  ;;  %v8813_v17 = vmax.f32 %v8777_v42, 0.0  ;;  %v8738_v35 = vadd.f32 %v8628_v44, %v8434_v22 }
 0x9c5   : > { %v8778_v47 = vadd.f32 %v16104_v51, %v8718_v13 }
 0x9c6   : > { %v8779_v52 = vadd.f32 %v16104_v51, %v8719_v4  ;;  %8849 = vst [vmem:[%s16093_s30 + $0x50] sm:$0xff] %v8813_v17  ;;  %v8798_v5 = vadd.f32 %v16128_v8, %v8738_v35  ;;  %v8420_v4 = vadd.f32 %v16124_v54, %v16038_v63 }
 0x9c7   : > { %v8814_v49 = vmax.f32 %v8778_v47, 0.0  ;;  %v8569_v10 = vpop.f32.mrf.mxu3 }
 0x9c8   : > { %v8815_v40 = vmax.f32 %v8779_v52, 0.0  ;;  %v8726_v39 = vadd.f32 %v8569_v10, %v16028_v38  ;;  %v8834_v34 = vmax.f32 %v8798_v5, 0.0 }
 0x9c9   : > { %8850 = vst [vmem:[%s16093_s30 + $0x58] sm:$0xff] %v8814_v49 }
 0x9ca   : > { %8851 = vst [vmem:[%s16093_s30 + $0x60] sm:$0xff] %v8815_v40  ;;  %v8786_v19 = vadd.f32 %v16116_v61, %v8726_v39  ;;  %v8588_v46 = vpop.f32.mrf.mxu0 }
 0x9cb   : > { %v8607_v6 = vpop.f32.mrf.mxu1  ;;  %8870 = vst [vmem:[%s16093_s30 + $0xf8] sm:$0xff] %v8834_v34  ;;  %v8727_v16 = vadd.f32 %v8588_v46, %v16079_v0  ;;  %v8697_v50 = vpop.f32.mrf.mxu2  ;;  %v8433_v0 = vadd.f32 %v16098_v7, %v16009_v14  ;;  %v8429_v34 = vadd.f32 %v16136_v60, %v16048_v12 }
 0x9cc   : > { %v8728_v38 = vadd.f32 %v8607_v6, %v8424_v9  ;;  %v8822_v43 = vmax.f32 %v8786_v19, 0.0  ;;  %v8715_v31 = vadd.f32 %v8697_v50, %v8411_v26 }
 0x9cd   : > { %v8787_v32 = vadd.f32 %v16116_v61, %v8727_v16 }
 0x9ce   : > { %v8788_v58 = vadd.f32 %v16116_v61, %v8728_v38  ;;  %8858 = vst [vmem:[%s16093_s30 + $0x98] sm:$0xff] %v8822_v43  ;;  %v8775_v42 = vadd.f32 %v16087_v23, %v8715_v31  ;;  %v8438_v31 = vadd.f32 %v16146_v29, %v16060_v24 }
 0x9cf   : > { %v8823_v33 = vmax.f32 %v8787_v32, 0.0  ;;  %v8571_v27 = vpop.f32.mrf.mxu3 }
 0x9d0   : > { %v8824_v53 = vmax.f32 %v8788_v58, 0.0  ;;  %v8735_v3 = vadd.f32 %v8571_v27, %v16042_v20  ;;  %v8811_v30 = vmax.f32 %v8775_v42, 0.0 }
 0x9d1   : > { %8859 = vst [vmem:[%s16093_s30 + $0xa0] sm:$0xff] %v8823_v33 }
 0x9d2   : > { %8860 = vst [vmem:[%s16093_s30 + $0xa8] sm:$0xff] %v8824_v53  ;;  %v8795_v28 = vadd.f32 %v16128_v8, %v8735_v3  ;;  %v8590_v22 = vpop.f32.mrf.mxu0 }
 0x9d3   : > { %v8609_v13 = vpop.f32.mrf.mxu1  ;;  %8847 = vst [vmem:[%s16093_s30 + $0x40] sm:$0xff] %v8811_v30  ;;  %v8736_v17 = vadd.f32 %v8590_v22, %v16096_v11  ;;  %v8699_v47 = vpop.f32.mrf.mxu2  ;;  %v8410_v11 = vadd.f32 %v16110_v36, %v16021_v15 }
 0x9d4   : > { %v8737_v20 = vadd.f32 %v8609_v13, %v8433_v0  ;;  %v8831_v44 = vmax.f32 %v8795_v28, 0.0  ;;  %v8724_v52 = vadd.f32 %v8699_v47, %v8420_v4 }
 0x9d5   : > { %v8796_v14 = vadd.f32 %v16128_v8, %v8736_v17 }
 0x9d6   : > { %v8797_v7 = vadd.f32 %v16128_v8, %v8737_v20  ;;  %8867 = vst [vmem:[%s16093_s30 + $0xe0] sm:$0xff] %v8831_v44  ;;  %v8784_v40 = vadd.f32 %v16104_v51, %v8724_v52 }
 0x9d7   : > { %v8832_v35 = vmax.f32 %v8796_v14, 0.0  ;;  %v8640_v63 = vpop.f32.mrf.mxu3 }
 0x9d8   : > { %v8833_v49 = vmax.f32 %v8797_v7, 0.0  ;;  %v8712_v54 = vadd.f32 %v8640_v63, %v16050_v57  ;;  %v8820_v5 = vmax.f32 %v8784_v40, 0.0  ;;  %v8437_v7 = vadd.f32 %v16144_v41, %v16057_v25 }
 0x9d9   : > { %8868 = vst [vmem:[%s16093_s30 + $0xe8] sm:$0xff] %v8832_v35 }
 0x9da   : > { %8869 = vst [vmem:[%s16093_s30 + $0xf0] sm:$0xff] %v8833_v49  ;;  %v8772_v10 = vadd.f32 %v16087_v23, %v8712_v54  ;;  %v8659_v39 = vpop.f32.mrf.mxu0 }
 0x9db   : > { %v8678_v9 = vpop.f32.mrf.mxu1  ;;  %8856 = vst [vmem:[%s16093_s30 + $0x88] sm:$0xff] %v8820_v5  ;;  %v8713_v19 = vadd.f32 %v8659_v39, %v16108_v55  ;;  %v8702_v6 = vpop.f32.mrf.mxu2  ;;  %v8419_v55 = vadd.f32 %v16122_v62, %v16035_v59 }
 0x9dc   : > { %v8714_v57 = vadd.f32 %v8678_v9, %v8410_v11  ;;  %v8808_v46 = vmax.f32 %v8772_v10, 0.0  ;;  %v8733_v26 = vadd.f32 %v8702_v6, %v8429_v34 }
 0x9dd   : > { %v8773_v15 = vadd.f32 %v16087_v23, %v8713_v19 }
 0x9de   : > { %v8774_v36 = vadd.f32 %v16087_v23, %v8714_v57  ;;  %8844 = vst [vmem:[%s16093_s30 + $0x28] sm:$0xff] %v8808_v46  ;;  %v8793_v43 = vadd.f32 %v16116_v61, %v8733_v26 }
 0x9df   : > { %v8809_v16 = vmax.f32 %v8773_v15, 0.0  ;;  %v8642_v12 = vpop.f32.mrf.mxu3 }
 0x9e0   : > { %v8810_v38 = vmax.f32 %v8774_v36, 0.0  ;;  %v8721_v60 = vadd.f32 %v8642_v12, %v16062_v45  ;;  %v8829_v50 = vmax.f32 %v8793_v43, 0.0 }
 0x9e1   : > { %8845 = vst [vmem:[%s16093_s30 + $0x30] sm:$0xff] %v8809_v16 }
 0x9e2   : > { %8846 = vst [vmem:[%s16093_s30 + $0x38] sm:$0xff] %v8810_v38  ;;  %v8781_v32 = vadd.f32 %v16104_v51, %v8721_v60  ;;  %v8661_v23 = vpop.f32.mrf.mxu0 }
 0x9e3   : > { %v8680_v58 = vpop.f32.mrf.mxu1  ;;  %8865 = vst [vmem:[%s16093_s30 + $0xd0] sm:$0xff] %v8829_v50  ;;  %v8722_v33 = vadd.f32 %v8661_v23, %v16120_v56  ;;  %v8704_v42 = vpop.f32.mrf.mxu2  ;;  %v8428_v56 = vadd.f32 %v16134_v2, %v16045_v18 }
 0x9e4   : > { %v8723_v45 = vadd.f32 %v8680_v58, %v8419_v55  ;;  %v8817_v53 = vmax.f32 %v8781_v32, 0.0  ;;  %v8742_v27 = vadd.f32 %v8704_v42, %v8438_v31 }
 0x9e5   : > { %v8782_v59 = vadd.f32 %v16104_v51, %v8722_v33 }
 0x9e6   : > { %v8783_v62 = vadd.f32 %v16104_v51, %v8723_v45  ;;  %8853 = vst [vmem:[%s16093_s30 + $0x70] sm:$0xff] %v8817_v53  ;;  %v8802_v30 = vadd.f32 %v16128_v8, %v8742_v27 }
 0x9e7   : > { %v8818_v3 = vmax.f32 %v8782_v59, 0.0  ;;  %v8645_v24 = vpop.f32.mrf.mxu3 }
 0x9e8   : > { %v8819_v0 = vmax.f32 %v8783_v62, 0.0  ;;  %v8730_v29 = vadd.f32 %v8645_v24, %v16069_v48  ;;  %v8838_v28 = vmax.f32 %v8802_v30, 0.0 }
 0x9e9   : > { %8854 = vst [vmem:[%s16093_s30 + $0x78] sm:$0xff] %v8818_v3 }
 0x9ea   : > { %8855 = vst [vmem:[%s16093_s30 + $0x80] sm:$0xff] %v8819_v0  ;;  %v8790_v22 = vadd.f32 %v16116_v61, %v8730_v29  ;;  %v8664_v51 = vpop.f32.mrf.mxu0 }
 0x9eb   : > { %v8683_v13 = vpop.f32.mrf.mxu1  ;;  %8874 = vst [vmem:[%s16093_s30 + $0x118] sm:$0xff] %v8838_v28  ;;  %v8731_v4 = vadd.f32 %v8664_v51, %v16132_v1 }
 0x9ec   : > { %v8732_v17 = vadd.f32 %v8683_v13, %v8428_v56  ;;  %v8826_v20 = vmax.f32 %v8790_v22, 0.0 }
 0x9ed   : > { %v8791_v44 = vadd.f32 %v16116_v61, %v8731_v4 }
 0x9ee   : > { %v8792_v48 = vadd.f32 %v16116_v61, %v8732_v17  ;;  %8862 = vst [vmem:[%s16093_s30 + $0xb8] sm:$0xff] %v8826_v20 }
 0x9ef   : > { %v8827_v18 = vmax.f32 %v8791_v44, 0.0  ;;  %v8647_v47 = vpop.f32.mrf.mxu3 }
 0x9f0   : > { %v8828_v2 = vmax.f32 %v8792_v48, 0.0  ;;  %v8739_v14 = vadd.f32 %v8647_v47, %v16076_v21 }
 0x9f1   : > { %8863 = vst [vmem:[%s16093_s30 + $0xc0] sm:$0xff] %v8827_v18 }
 0x9f2   : > { %8864 = vst [vmem:[%s16093_s30 + $0xc8] sm:$0xff] %v8828_v2  ;;  %v8799_v1 = vadd.f32 %v16128_v8, %v8739_v14  ;;  %v8666_v52 = vpop.f32.mrf.mxu0 }
 0x9f3   : > { %v8685_v35 = vpop.f32.mrf.mxu1  ;;  %v8740_v61 = vadd.f32 %v8666_v52, %v16142_v37 }
 0x9f4   : > { %v8741_v49 = vadd.f32 %v8685_v35, %v8437_v7  ;;  %v8835_v40 = vmax.f32 %v8799_v1, 0.0 }
 0x9f5   : > { %v8800_v63 = vadd.f32 %v16128_v8, %v8740_v61 }
 0x9f6   : > { %v8801_v54 = vadd.f32 %v16128_v8, %v8741_v49  ;;  %8871 = vst [vmem:[%s16093_s30 + $0x100] sm:$0xff] %v8835_v40 }
 0x9f7   : > { %v8836_v21 = vmax.f32 %v8800_v63, 0.0 }
 0x9f8   : > { %v8837_v11 = vmax.f32 %v8801_v54, 0.0 }
 0x9f9   : > { %8872 = vst [vmem:[%s16093_s30 + $0x108] sm:$0xff] %v8836_v21 }
 0x9fa   : > { %8873 = vst [vmem:[%s16093_s30 + $0x110] sm:$0xff] %v8837_v11 }
 0x9fb PF: > { %s18_s27 = sadd.s32 1, %s10311_s27  }
 0x9fc   : > { %p15_p4 = scmp.ge.s32.totalorder %s18_s27, 4  }
 0x9fe   :  { %17 = sbr.rel (!%p15_p4) target bundleno = 1 (0x1), region = 109 }

</bundles_post_ra>
